<compile_context>
chip_gen: v7x
topology: tpu7x:2x2x1
jax: 0.10.0
libtpu: 0.0.40
codegen_flags: <defaults>
</compile_context>

<pallas_src>
import functools

import jax
import jax.numpy as jnp
import numpy as np
from jax import lax
from jax.experimental import pallas as pl
from jax.experimental.pallas import tpu as pltpu


def _round_up(x, m):
    return (x + m - 1) // m * m


def _cdiv(a, b):
    return (a + b - 1) // b


def _pick_tile(dim, pref, min_blocks=1):
    """Tile size: multiple of 128, <= pref, >= min_blocks blocks, low padding."""
    dim128 = _round_up(dim, 128)
    t = min(pref, dim128)
    nblk = max(min_blocks, _cdiv(dim128, t))
    return _round_up(_cdiv(dim128, nblk), 128)


# ----------------------------------------------------------------------------
# Pallas kernel: interval bound propagation through a dense linear operator
# ----------------------------------------------------------------------------
def _bounds_kernel(cr_ref, wt_ref, lo_ref, up_ref, *, tks):
    # grid = (M_blocks [parallel], N_blocks [arbitrary/reduction])
    k = pl.program_id(1)

    @pl.when(k == 0)
    def _():
        lo_ref[...] = jnp.zeros_like(lo_ref)
        up_ref[...] = jnp.zeros_like(up_ref)

    tk = wt_ref.shape[0]
    n_sub = tk // tks
    # Sub-chunk the reduction so |W| is at most a (tks, tm) temp (not the full
    # (tk, tm) tile); accumulation goes straight into the resident output rows.
    for s in range(n_sub):
        s0 = s * tks
        s1 = s0 + tks
        w = wt_ref[s0:s1, :]                # (tks, tm)  static slice of W^T tile
        cr = cr_ref[:, s0:s1]               # (8, tks)   row0 = c, row1 = r
        dc = jnp.dot(cr, w, preferred_element_type=jnp.float32)            # (8, tm)
        dr = jnp.dot(cr, jnp.abs(w), preferred_element_type=jnp.float32)   # (8, tm)
        lo_ref[...] += dc[0:1, :] - dr[1:2, :]   # c@W - r@|W|
        up_ref[...] += dc[0:1, :] + dr[1:2, :]   # c@W + r@|W|


def compute_bounds_pallas(weights_t, bias, lower_prev, upper_prev, *,
                          tm=1024, tk=2048):
    """Interval bound propagation through a dense linear operator.

    weights_t : (N, M)  transposed operator (W^T), i.e. W[m, n] = weights_t[n, m]
    bias      : (M,) or (M, 1)
    lower_prev, upper_prev : length-N vectors (any shape, flattened)

    Returns (lower, upper), each of shape (M, 1), float32.
    """
    N, M = weights_t.shape

    # Tile selection: (8,128)-aligned; >=2 j-blocks when possible so both v7x
    # TensorCores get work under dimension_semantics=("parallel", ...).
    tm = _pick_tile(M, tm, min_blocks=2)
    tk = _pick_tile(N, tk, min_blocks=1)
    Mp = _round_up(M, tm)
    Np = _round_up(N, tk)
    tks = 256 if tk % 256 == 0 else 128

    # Avoid extra full-size HBM copies when the operator is already aligned/f32.
    wt = weights_t if weights_t.dtype == jnp.float32 else weights_t.astype(jnp.float32)
    if (N, M) != (Np, Mp):
        wt = jnp.pad(wt, ((0, Np - N), (0, Mp - M)))
    # TODO(synk): streaming W^T in bf16 halves HBM traffic (~2x wall-clock on
    # v5e) but the bounds are then only sound for the rounded operator; keep
    # f32 for verifier soundness.

    l = lower_prev.reshape(-1).astype(jnp.float32)
    u = upper_prev.reshape(-1).astype(jnp.float32)
    c = (l + u) * 0.5
    r = (u - l) * 0.5
    cr = (jnp.zeros((8, Np), jnp.float32)
          .at[0, :N].set(c)
          .at[1, :N].set(r))

    grid = (Mp // tm, Np // tk)

    grid_spec = pltpu.PrefetchScalarGridSpec(
        num_scalar_prefetch=0,
        grid=grid,
        in_specs=[
            # c/r slab blocked along the reduction axis: VMEM per buffer is
            # 8*tk*4 bytes regardless of N (full-slab residency scaled with N).
            pl.BlockSpec((8, tk), lambda j, k: (0, k)),
            # W^T tile — the only large HBM stream.
            pl.BlockSpec((tk, tm), lambda j, k: (k, j)),
        ],
        out_specs=[
            pl.BlockSpec((1, tm), lambda j, k: (0, j)),   # lower (lane-dense)
            pl.BlockSpec((1, tm), lambda j, k: (0, j)),   # upper (lane-dense)
        ],
    )

    vmem_bytes = (2 * tk * tm * 4          # double-buffered W^T tiles
                  + 2 * 8 * tk * 4         # double-buffered c/r blocks
                  + 4 * tm * 4             # output blocks
                  + tks * tm * 4           # |W| sub-chunk temp
                  + 8 * 1024 * 1024)       # headroom
    vmem_bytes = int(min(max(vmem_bytes, 32 * 1024 * 1024), 64 * 1024 * 1024))

    cost = pl.CostEstimate(
        flops=32 * Mp * Np,                # two (8,tk)x(tk,tm) dots per tile
        transcendentals=0,
        bytes_accessed=Mp * Np * 4 + 8 * Np * 4 + 2 * Mp * 4,
    )

    lower, upper = pl.pallas_call(
        functools.partial(_bounds_kernel, tks=tks),
        out_shape=(
            jax.ShapeDtypeStruct((1, Mp), jnp.float32),
            jax.ShapeDtypeStruct((1, Mp), jnp.float32),
        ),
        grid_spec=grid_spec,
        compiler_params=pltpu.CompilerParams(
            dimension_semantics=("parallel", "arbitrary"),
            vmem_limit_bytes=vmem_bytes,
        ),
        cost_estimate=cost,
    )(cr, wt)

    # Bias added outside the kernel: trivially cheap on a (M,) vector, removes
    # one double-buffered input and the branchy k==last epilogue from the pipeline.
    b = bias.reshape(-1).astype(jnp.float32)
    lower = lower[0, :M] + b
    upper = upper[0, :M] + b
    return lower.reshape(M, 1), upper.reshape(M, 1)


# ----------------------------------------------------------------------------
# ConvTransformer forward (JAX glue around the Pallas kernel)
# ----------------------------------------------------------------------------
class ConvTransformerJAX:
    def __init__(self, conv_weight, conv_bias, stride, padding, shape_in):
        # conv_weight: (out_c, in_c, kh, kw)  (PyTorch OIHW)
        self.kernel = conv_weight
        self.bias = conv_bias
        self.stride = stride
        self.padding = padding
        self.shape_in = shape_in          # (1, in_c, Hi, Wi)

    def forward(self, lower_bound_prev, upper_bound_prev):
        in_c, Hi, Wi = self.shape_in[1], self.shape_in[2], self.shape_in[3]
        out_c, _, kh, kw = self.kernel.shape
        sh, sw = self.stride
        ph, pw = self.padding
        Ho = (Hi - kh + 2 * ph) // sh + 1
        Wo = (Wi - kw + 2 * pw) // sw + 1
        N = in_c * Hi * Wi
        M = out_c * Ho * Wo

        # Build the explicit linear operator of the conv by pushing the identity
        # basis through conv2d (vectorized version of the PyTorch unit-vector loop).
        # TODO(synk): for realistic layer sizes, skip the dense (M,N) operator and
        # do IBP directly with two convolutions (conv(c,W) ± conv(r,|W|) + b);
        # kept because the module's semantics store the explicit operator.
        eye_imgs = jnp.eye(N, dtype=jnp.float32).reshape(N, in_c, Hi, Wi)
        conv_out = lax.conv_general_dilated(
            eye_imgs, self.kernel.astype(jnp.float32),
            window_strides=(sh, sw),
            padding=[(ph, ph), (pw, pw)],
            dimension_numbers=("NCHW", "OIHW", "NCHW"),
            precision=lax.Precision.HIGHEST,
        )                                              # (N, out_c, Ho, Wo)
        weights_t = conv_out.reshape(N, M)             # W^T : weights_t[n, m] = W[m, n]

        # bias repeated across output spatial positions -> (M, 1)
        bias_col = jnp.repeat(self.bias.astype(jnp.float32), Ho * Wo).reshape(M, 1)

        # Hot path: interval bound propagation in Pallas (MXU matvecs on W^T).
        lower, upper = compute_bounds_pallas(
            weights_t, bias_col,
            lower_bound_prev.reshape(-1), upper_bound_prev.reshape(-1),
        )

        # Stored dense operator (module semantics); transpose only happens here.
        weights = weights_t.T                          # (M, N)
        self.weights_lower = weights.reshape(1, M, N)
        self.weights_upper = self.weights_lower
        self.bias_lower = bias_col.reshape(1, M, 1)
        self.bias_upper = self.bias_lower
        self.lower_bound = lower.reshape(1, M, 1)
        self.upper_bound = upper.reshape(1, M, 1)
        self.shape_out = (1, out_c, Ho, Wo)
        return self.lower_bound, self.upper_bound


# ----------------------------------------------------------------------------
# Demo / self-check
# ----------------------------------------------------------------------------
if __name__ == "__main__":
    key = jax.random.PRNGKey(0)
    k_w, k_b, k_l, k_u = jax.random.split(key, 4)

    # Small shapes: in_c=4, Hi=Wi=16, out_c=8, 3x3 conv, stride 1, pad 1
    in_c, Hi, Wi = 4, 16, 16
    out_c, kh, kw = 8, 3, 3
    stride, padding = (1, 1), (1, 1)

    conv_weight = (jax.random.normal(k_w, (out_c, in_c, kh, kw), jnp.float32)
                   * (1.0 / np.sqrt(in_c * kh * kw)))
    conv_bias = jax.random.normal(k_b, (out_c,), jnp.float32) * 0.1

    N = in_c * Hi * Wi
    a = jax.random.normal(k_l, (1, N, 1), jnp.float32)
    b = jax.random.normal(k_u, (1, N, 1), jnp.float32)
    lower_prev = jnp.minimum(a, b)
    upper_prev = jnp.maximum(a, b)

    ct = ConvTransformerJAX(conv_weight, conv_bias, stride, padding,
                            shape_in=(1, in_c, Hi, Wi))
    lower, upper = ct.forward(lower_prev, upper_prev)
    lower = jax.block_until_ready(lower)
    upper = jax.block_until_ready(upper)

    # Pure-JAX reference for the same interval propagation (W+/W- form).
    W = ct.weights_lower[0]
    bcol = ct.bias_lower[0]
    Wp, Wm = jnp.maximum(W, 0.0), jnp.minimum(W, 0.0)
    l0, u0 = lower_prev[0], upper_prev[0]
    hp = lax.Precision.HIGHEST
    lower_ref = jnp.dot(Wp, l0, precision=hp) + jnp.dot(Wm, u0, precision=hp) + bcol
    upper_ref = jnp.dot(Wp, u0, precision=hp) + jnp.dot(Wm, l0, precision=hp) + bcol

    assert lower.shape == (1, W.shape[0], 1) and upper.shape == (1, W.shape[0], 1)
    np.testing.assert_allclose(np.asarray(lower[0]), np.asarray(lower_ref),
                               rtol=1e-4, atol=1e-4)
    np.testing.assert_allclose(np.asarray(upper[0]), np.asarray(upper_ref),
                               rtol=1e-4, atol=1e-4)
    assert bool(jnp.all(lower <= upper + 1e-5))
    print("KERNEL_OK")
</pallas_src>

<mosaic_0001>
module attributes {stable_mosaic.version = 11 : i64} {
  func.func @_bounds_kernel(%arg0: i32, %arg1: i32, %arg2: memref<8x1024xf32, #tpu.memory_space<vmem>>, %arg3: memref<1024x1024xf32, #tpu.memory_space<vmem>>, %arg4: memref<1x1024xf32, #tpu.memory_space<vmem>>, %arg5: memref<1x1024xf32, #tpu.memory_space<vmem>>) attributes {dimension_semantics = [#tpu.dimension_semantics<parallel>, #tpu.dimension_semantics<arbitrary>], iteration_bounds = array<i64: 2, 1>, scalar_prefetch = 0 : i64, scratch_operands = 0 : i64, tpu.core_type = #tpu.core_type<tc>, window_params = [{transform_indices = @transform_0, window_bounds = array<i64: 8, 1024>}, {transform_indices = @transform_1, window_bounds = array<i64: 1024, 1024>}, {transform_indices = @transform_2, window_bounds = array<i64: 1, 1024>}, {transform_indices = @transform_3, window_bounds = array<i64: 1, 1024>}]} {
    %c0_i32 = arith.constant 0 : i32
    %0 = arith.cmpi eq, %arg1, %c0_i32 : i32
    %1 = arith.extui %0 : i1 to i32
    %c0_i32_0 = arith.constant 0 : i32
    %2 = arith.cmpi ne, %1, %c0_i32_0 : i32
    scf.if %2 {
      %cst_52 = arith.constant 0.000000e+00 : f32
      %71 = vector.broadcast %cst_52 : f32 to vector<1x1024xf32>
      %c0_53 = arith.constant 0 : index
      %c0_54 = arith.constant 0 : index
      %72 = vector.load %arg4[%c0_53, %c0_54] : memref<1x1024xf32, #tpu.memory_space<vmem>>, vector<1x1024xf32>
      tpu.vector_store %arg4[%c0_53, %c0_54], %71 {strides = array<i32>} : memref<1x1024xf32, #tpu.memory_space<vmem>>, vector<1x1024xf32>,
      %cst_55 = arith.constant 0.000000e+00 : f32
      %73 = vector.broadcast %cst_55 : f32 to vector<1x1024xf32>
      %c0_56 = arith.constant 0 : index
      %c0_57 = arith.constant 0 : index
      %74 = vector.load %arg5[%c0_56, %c0_57] : memref<1x1024xf32, #tpu.memory_space<vmem>>, vector<1x1024xf32>
      tpu.vector_store %arg5[%c0_56, %c0_57], %73 {strides = array<i32>} : memref<1x1024xf32, #tpu.memory_space<vmem>>, vector<1x1024xf32>,
    } else {
    }
    %c0 = arith.constant 0 : index
    %c0_1 = arith.constant 0 : index
    %3 = vector.load %arg3[%c0, %c0_1] : memref<1024x1024xf32, #tpu.memory_space<vmem>>, vector<256x1024xf32>
    %c0_2 = arith.constant 0 : index
    %c0_3 = arith.constant 0 : index
    %4 = vector.load %arg2[%c0_2, %c0_3] : memref<8x1024xf32, #tpu.memory_space<vmem>>, vector<8x256xf32>
    %cst = arith.constant dense<0.000000e+00> : vector<8x1024xf32>
    %5 = tpu.matmul %4, %3, %cst {dimension_numbers = #tpu.dot_dimension_numbers<[1], [0], [0], [1], [0, 0, 1, 1], [], []>} : vector<8x256xf32>, vector<256x1024xf32>, vector<8x1024xf32> -> vector<8x1024xf32>
    %6 = math.absf %3 : vector<256x1024xf32>
    %cst_4 = arith.constant dense<0.000000e+00> : vector<8x1024xf32>
    %7 = tpu.matmul %4, %6, %cst_4 {dimension_numbers = #tpu.dot_dimension_numbers<[1], [0], [0], [1], [0, 0, 1, 1], [], []>} : vector<8x256xf32>, vector<256x1024xf32>, vector<8x1024xf32> -> vector<8x1024xf32>
    %c0_5 = arith.constant 0 : index
    %c0_6 = arith.constant 0 : index
    %8 = vector.load %arg4[%c0_5, %c0_6] : memref<1x1024xf32, #tpu.memory_space<vmem>>, vector<1x1024xf32>
    %9 = vector.extract_strided_slice %5 {offsets = [0, 0], sizes = [1, 1024], strides = [1, 1]} : vector<8x1024xf32> to vector<1x1024xf32>
    %10 = vector.extract_strided_slice %7 {offsets = [1, 0], sizes = [1, 1024], strides = [1, 1]} : vector<8x1024xf32> to vector<1x1024xf32>
    %11 = arith.subf %9, %10 : vector<1x1024xf32>
    %12 = arith.addf %8, %11 : vector<1x1024xf32>
    %c0_7 = arith.constant 0 : index
    %c0_8 = arith.constant 0 : index
    %13 = vector.load %arg4[%c0_7, %c0_8] : memref<1x1024xf32, #tpu.memory_space<vmem>>, vector<1x1024xf32>
    tpu.vector_store %arg4[%c0_7, %c0_8], %12 {strides = array<i32>} : memref<1x1024xf32, #tpu.memory_space<vmem>>, vector<1x1024xf32>,
    %c0_9 = arith.constant 0 : index
    %c0_10 = arith.constant 0 : index
    %14 = vector.load %arg5[%c0_9, %c0_10] : memref<1x1024xf32, #tpu.memory_space<vmem>>, vector<1x1024xf32>
    %15 = vector.extract_strided_slice %5 {offsets = [0, 0], sizes = [1, 1024], strides = [1, 1]} : vector<8x1024xf32> to vector<1x1024xf32>
    %16 = vector.extract_strided_slice %7 {offsets = [1, 0], sizes = [1, 1024], strides = [1, 1]} : vector<8x1024xf32> to vector<1x1024xf32>
    %17 = arith.addf %15, %16 : vector<1x1024xf32>
    %18 = arith.addf %14, %17 : vector<1x1024xf32>
    %c0_11 = arith.constant 0 : index
    %c0_12 = arith.constant 0 : index
    %19 = vector.load %arg5[%c0_11, %c0_12] : memref<1x1024xf32, #tpu.memory_space<vmem>>, vector<1x1024xf32>
    tpu.vector_store %arg5[%c0_11, %c0_12], %18 {strides = array<i32>} : memref<1x1024xf32, #tpu.memory_space<vmem>>, vector<1x1024xf32>,
    %c256 = arith.constant 256 : index
    %c0_13 = arith.constant 0 : index
    %20 = vector.load %arg3[%c256, %c0_13] : memref<1024x1024xf32, #tpu.memory_space<vmem>>, vector<256x1024xf32>
    %c0_14 = arith.constant 0 : index
    %c256_15 = arith.constant 256 : index
    %21 = vector.load %arg2[%c0_14, %c256_15] : memref<8x1024xf32, #tpu.memory_space<vmem>>, vector<8x256xf32>
    %cst_16 = arith.constant dense<0.000000e+00> : vector<8x1024xf32>
    %22 = tpu.matmul %21, %20, %cst_16 {dimension_numbers = #tpu.dot_dimension_numbers<[1], [0], [0], [1], [0, 0, 1, 1], [], []>} : vector<8x256xf32>, vector<256x1024xf32>, vector<8x1024xf32> -> vector<8x1024xf32>
    %23 = math.absf %20 : vector<256x1024xf32>
    %cst_17 = arith.constant dense<0.000000e+00> : vector<8x1024xf32>
    %24 = tpu.matmul %21, %23, %cst_17 {dimension_numbers = #tpu.dot_dimension_numbers<[1], [0], [0], [1], [0, 0, 1, 1], [], []>} : vector<8x256xf32>, vector<256x1024xf32>, vector<8x1024xf32> -> vector<8x1024xf32>
    %c0_18 = arith.constant 0 : index
    %c0_19 = arith.constant 0 : index
    %25 = vector.load %arg4[%c0_18, %c0_19] : memref<1x1024xf32, #tpu.memory_space<vmem>>, vector<1x1024xf32>
    %26 = vector.extract_strided_slice %22 {offsets = [0, 0], sizes = [1, 1024], strides = [1, 1]} : vector<8x1024xf32> to vector<1x1024xf32>
    %27 = vector.extract_strided_slice %24 {offsets = [1, 0], sizes = [1, 1024], strides = [1, 1]} : vector<8x1024xf32> to vector<1x1024xf32>
    %28 = arith.subf %26, %27 : vector<1x1024xf32>
    %29 = arith.addf %25, %28 : vector<1x1024xf32>
    %c0_20 = arith.constant 0 : index
    %c0_21 = arith.constant 0 : index
    %30 = vector.load %arg4[%c0_20, %c0_21] : memref<1x1024xf32, #tpu.memory_space<vmem>>, vector<1x1024xf32>
    tpu.vector_store %arg4[%c0_20, %c0_21], %29 {strides = array<i32>} : memref<1x1024xf32, #tpu.memory_space<vmem>>, vector<1x1024xf32>,
    %c0_22 = arith.constant 0 : index
    %c0_23 = arith.constant 0 : index
    %31 = vector.load %arg5[%c0_22, %c0_23] : memref<1x1024xf32, #tpu.memory_space<vmem>>, vector<1x1024xf32>
    %32 = vector.extract_strided_slice %22 {offsets = [0, 0], sizes = [1, 1024], strides = [1, 1]} : vector<8x1024xf32> to vector<1x1024xf32>
    %33 = vector.extract_strided_slice %24 {offsets = [1, 0], sizes = [1, 1024], strides = [1, 1]} : vector<8x1024xf32> to vector<1x1024xf32>
    %34 = arith.addf %32, %33 : vector<1x1024xf32>
    %35 = arith.addf %31, %34 : vector<1x1024xf32>
    %c0_24 = arith.constant 0 : index
    %c0_25 = arith.constant 0 : index
    %36 = vector.load %arg5[%c0_24, %c0_25] : memref<1x1024xf32, #tpu.memory_space<vmem>>, vector<1x1024xf32>
    tpu.vector_store %arg5[%c0_24, %c0_25], %35 {strides = array<i32>} : memref<1x1024xf32, #tpu.memory_space<vmem>>, vector<1x1024xf32>,
    %c512 = arith.constant 512 : index
    %c0_26 = arith.constant 0 : index
    %37 = vector.load %arg3[%c512, %c0_26] : memref<1024x1024xf32, #tpu.memory_space<vmem>>, vector<256x1024xf32>
    %c0_27 = arith.constant 0 : index
    %c512_28 = arith.constant 512 : index
    %38 = vector.load %arg2[%c0_27, %c512_28] : memref<8x1024xf32, #tpu.memory_space<vmem>>, vector<8x256xf32>
    %cst_29 = arith.constant dense<0.000000e+00> : vector<8x1024xf32>
    %39 = tpu.matmul %38, %37, %cst_29 {dimension_numbers = #tpu.dot_dimension_numbers<[1], [0], [0], [1], [0, 0, 1, 1], [], []>} : vector<8x256xf32>, vector<256x1024xf32>, vector<8x1024xf32> -> vector<8x1024xf32>
    %40 = math.absf %37 : vector<256x1024xf32>
    %cst_30 = arith.constant dense<0.000000e+00> : vector<8x1024xf32>
    %41 = tpu.matmul %38, %40, %cst_30 {dimension_numbers = #tpu.dot_dimension_numbers<[1], [0], [0], [1], [0, 0, 1, 1], [], []>} : vector<8x256xf32>, vector<256x1024xf32>, vector<8x1024xf32> -> vector<8x1024xf32>
    %c0_31 = arith.constant 0 : index
    %c0_32 = arith.constant 0 : index
    %42 = vector.load %arg4[%c0_31, %c0_32] : memref<1x1024xf32, #tpu.memory_space<vmem>>, vector<1x1024xf32>
    %43 = vector.extract_strided_slice %39 {offsets = [0, 0], sizes = [1, 1024], strides = [1, 1]} : vector<8x1024xf32> to vector<1x1024xf32>
    %44 = vector.extract_strided_slice %41 {offsets = [1, 0], sizes = [1, 1024], strides = [1, 1]} : vector<8x1024xf32> to vector<1x1024xf32>
    %45 = arith.subf %43, %44 : vector<1x1024xf32>
    %46 = arith.addf %42, %45 : vector<1x1024xf32>
    %c0_33 = arith.constant 0 : index
    %c0_34 = arith.constant 0 : index
    %47 = vector.load %arg4[%c0_33, %c0_34] : memref<1x1024xf32, #tpu.memory_space<vmem>>, vector<1x1024xf32>
    tpu.vector_store %arg4[%c0_33, %c0_34], %46 {strides = array<i32>} : memref<1x1024xf32, #tpu.memory_space<vmem>>, vector<1x1024xf32>,
    %c0_35 = arith.constant 0 : index
    %c0_36 = arith.constant 0 : index
    %48 = vector.load %arg5[%c0_35, %c0_36] : memref<1x1024xf32, #tpu.memory_space<vmem>>, vector<1x1024xf32>
    %49 = vector.extract_strided_slice %39 {offsets = [0, 0], sizes = [1, 1024], strides = [1, 1]} : vector<8x1024xf32> to vector<1x1024xf32>
    %50 = vector.extract_strided_slice %41 {offsets = [1, 0], sizes = [1, 1024], strides = [1, 1]} : vector<8x1024xf32> to vector<1x1024xf32>
    %51 = arith.addf %49, %50 : vector<1x1024xf32>
    %52 = arith.addf %48, %51 : vector<1x1024xf32>
    %c0_37 = arith.constant 0 : index
    %c0_38 = arith.constant 0 : index
    %53 = vector.load %arg5[%c0_37, %c0_38] : memref<1x1024xf32, #tpu.memory_space<vmem>>, vector<1x1024xf32>
    tpu.vector_store %arg5[%c0_37, %c0_38], %52 {strides = array<i32>} : memref<1x1024xf32, #tpu.memory_space<vmem>>, vector<1x1024xf32>,
    %c768 = arith.constant 768 : index
    %c0_39 = arith.constant 0 : index
    %54 = vector.load %arg3[%c768, %c0_39] : memref<1024x1024xf32, #tpu.memory_space<vmem>>, vector<256x1024xf32>
    %c0_40 = arith.constant 0 : index
    %c768_41 = arith.constant 768 : index
    %55 = vector.load %arg2[%c0_40, %c768_41] : memref<8x1024xf32, #tpu.memory_space<vmem>>, vector<8x256xf32>
    %cst_42 = arith.constant dense<0.000000e+00> : vector<8x1024xf32>
    %56 = tpu.matmul %55, %54, %cst_42 {dimension_numbers = #tpu.dot_dimension_numbers<[1], [0], [0], [1], [0, 0, 1, 1], [], []>} : vector<8x256xf32>, vector<256x1024xf32>, vector<8x1024xf32> -> vector<8x1024xf32>
    %57 = math.absf %54 : vector<256x1024xf32>
    %cst_43 = arith.constant dense<0.000000e+00> : vector<8x1024xf32>
    %58 = tpu.matmul %55, %57, %cst_43 {dimension_numbers = #tpu.dot_dimension_numbers<[1], [0], [0], [1], [0, 0, 1, 1], [], []>} : vector<8x256xf32>, vector<256x1024xf32>, vector<8x1024xf32> -> vector<8x1024xf32>
    %c0_44 = arith.constant 0 : index
    %c0_45 = arith.constant 0 : index
    %59 = vector.load %arg4[%c0_44, %c0_45] : memref<1x1024xf32, #tpu.memory_space<vmem>>, vector<1x1024xf32>
    %60 = vector.extract_strided_slice %56 {offsets = [0, 0], sizes = [1, 1024], strides = [1, 1]} : vector<8x1024xf32> to vector<1x1024xf32>
    %61 = vector.extract_strided_slice %58 {offsets = [1, 0], sizes = [1, 1024], strides = [1, 1]} : vector<8x1024xf32> to vector<1x1024xf32>
    %62 = arith.subf %60, %61 : vector<1x1024xf32>
    %63 = arith.addf %59, %62 : vector<1x1024xf32>
    %c0_46 = arith.constant 0 : index
    %c0_47 = arith.constant 0 : index
    %64 = vector.load %arg4[%c0_46, %c0_47] : memref<1x1024xf32, #tpu.memory_space<vmem>>, vector<1x1024xf32>
    tpu.vector_store %arg4[%c0_46, %c0_47], %63 {strides = array<i32>} : memref<1x1024xf32, #tpu.memory_space<vmem>>, vector<1x1024xf32>,
    %c0_48 = arith.constant 0 : index
    %c0_49 = arith.constant 0 : index
    %65 = vector.load %arg5[%c0_48, %c0_49] : memref<1x1024xf32, #tpu.memory_space<vmem>>, vector<1x1024xf32>
    %66 = vector.extract_strided_slice %56 {offsets = [0, 0], sizes = [1, 1024], strides = [1, 1]} : vector<8x1024xf32> to vector<1x1024xf32>
    %67 = vector.extract_strided_slice %58 {offsets = [1, 0], sizes = [1, 1024], strides = [1, 1]} : vector<8x1024xf32> to vector<1x1024xf32>
    %68 = arith.addf %66, %67 : vector<1x1024xf32>
    %69 = arith.addf %65, %68 : vector<1x1024xf32>
    %c0_50 = arith.constant 0 : index
    %c0_51 = arith.constant 0 : index
    %70 = vector.load %arg5[%c0_50, %c0_51] : memref<1x1024xf32, #tpu.memory_space<vmem>>, vector<1x1024xf32>
    tpu.vector_store %arg5[%c0_50, %c0_51], %69 {strides = array<i32>} : memref<1x1024xf32, #tpu.memory_space<vmem>>, vector<1x1024xf32>,
    return
  }
  func.func @transform_0(%arg0: i32, %arg1: i32) -> (i32, i32) {
    %c0_i32 = arith.constant 0 : i32
    %c0_i32_0 = arith.constant 0 : i32
    return %c0_i32, %arg1 : i32, i32
  }
  func.func @transform_1(%arg0: i32, %arg1: i32) -> (i32, i32) {
    %c0_i32 = arith.constant 0 : i32
    return %arg1, %arg0 : i32, i32
  }
  func.func @transform_2(%arg0: i32, %arg1: i32) -> (i32, i32) {
    %c0_i32 = arith.constant 0 : i32
    %c0_i32_0 = arith.constant 0 : i32
    return %c0_i32, %arg0 : i32, i32
  }
  func.func @transform_3(%arg0: i32, %arg1: i32) -> (i32, i32) {
    %c0_i32 = arith.constant 0 : i32
    %c0_i32_0 = arith.constant 0 : i32
    return %c0_i32, %arg0 : i32, i32
  }
}

</mosaic_0001>

<bundles_post_ra>
// kernel: tpu_custom_call.1
= control target key start
LH: loop header
LB: loop body
LE: loop exit
PB: predicated region body
PF: predicated region fallthrough
CT: control target
= control target key end

     0   :  { %9 = vsyncpa [#allocation3], 0  ;;  %s12186_s0 = inlined_call_operand.hbm [shape: f32[8,1024], index: 0, kind: input, shape index: {}]   ;;  %s12187_s1 = inlined_call_operand.hbm [shape: f32[1024,2048], index: 1, kind: input, shape index: {}]   ;;  %s12188_s2 = inlined_call_operand.hbm [shape: f32[1,2048], index: 2, kind: output, shape index: {0}]   ;;  %s12189_s3 = inlined_call_operand.hbm [shape: f32[1,2048], index: 3, kind: output, shape index: {1}]  }
   0x1   :  { %10 = vsyncpa [#allocation6], 0 }
   0x2   :  { %12 = vsyncpa [#allocation6 + $0x1], 0 }
   0x3   :  { %13 = vsyncpa [#allocation4], 0 }
   0x4   :  { %15 = vsyncpa [#allocation4 + $0x1], 0 }
   0x5   :  { %16 = vsyncpa [#allocation9], 0 }
   0x6   :  { %18 = vsyncpa [#allocation9 + $0x1], 0  ;;  %s8519_s12 = smov 0   ;;  %s8521_s13 = smov 0  }
   0x7   :  { %s8523_s14 = smov 0   ;;  %s8525_s15 = smov 0  }
   0x8   :  { %s8527_s16 = smov 0   ;;  %s8529_s17 = smov 0  }
   0x9 LB: > { %s5386_s18 = sadd.s32 4294967295, %s8489_s17   ;;  %s5387_s19 = sadd.s32 4294967294, %s8489_s17   ;;  %s8489_s17 = sphi %s8529_s17, %s24_s17   ;;  %s8485_s16 = sphi %s8527_s16, %s12860_s16   ;;  %s8481_s15 = sphi %s8525_s15, %s12859_s15   ;;  %s8477_s14 = sphi %s8523_s14, %s12858_s14   ;;  %s8473_s13 = sphi %s8521_s13, %s12857_s13   ;;  %s8469_s12 = sphi %s8519_s12, %s12856_s12  }
   0xa   : > { %s71_s20 = sadd.s32 1, %s8477_s14  ;;  %p78_p0 = scmp.ne.s32.totalorder %s8477_s14, %s8473_s13 }
   0xb   : > { %p79_p1 = scmp.eq.s32.totalorder %s8489_s17, 0  ;;  %p84_p2 = scmp.ne.s32.totalorder %s8473_s13, %s8469_s12 }
   0xc   : > { %p8557_p3 = scmp.eq.s32.totalorder %s5386_s18, 0  ;;  %p108_p4 = scmp.eq.s32.totalorder %s5386_s18, 1 }
   0xd   : > { %p8561_p5 = por %p79_p1, %p78_p0  ;;  %p114_p6 = scmp.eq.s32.totalorder %s5387_s19, 1 }
   0xe   : > { %s12355_s21 = scalar_select %p8557_p3, 1, 0 }
   0xf   : > { %p8567_p7 = por %p8557_p3, %p84_p2  ;;  %p8571_p8 = por %p108_p4, %p78_p0 }
  0x10   : > { %p8575_p9 = por %p114_p6, %p84_p2  ;;  %p5388_p10 = scmp.ge.s32.totalorder %s8489_s17, 1 }
  0x11   : > { %s12357_s23 = scalar_select %p8567_p7, 1, 0 }
  0x12   : > { %s12358_s24 = scalar_select %p8571_p8, 1, 0 }
  0x13   : > { %s12359_s25 = scalar_select %p8575_p9, 1, 0 }
  0x14   : > { %p147_p11 = scmp.lt.s32.totalorder %s8489_s17, 3  ;;  %s8491_s27 = smov [#allocation2]  }
  0x15   : > { %s163_s28 = sshll.u32 %s8491_s27, 4  ;;  %p7484_p1 = scmp.lt.s32.totalorder %s8489_s17, 2  ;;  %s164_s28 = int_to_ptr.vmem [resolvable:$true] %s163_s28 }
  0x16   : > { %p8582_p13 = pnand %p5388_p10, %p147_p11  ;;  %s36_s4 = sadd.s32 1, %s8485_s16 }
  0x17   : > { %p8591_p4 = pnand %p7484_p1, %p8561_p5  ;;  %p8602_p6 = scmp.ge.s32.totalorder %s36_s4, 2 }
  0x18   : > { %s12360_s26 = scalar_select %p8582_p13, 1, 0 }
  0x19   : > { %p7468_p0 = pneg %p8582_p13  ;;  %s174_s6 = sand.u32 1, %s8477_s14  }
  0x1a   : > { %s12361_s29 = scalar_select %p8591_p4, 1, 0 }
  0x1b   : > { %p8597_p2 = pnand %p7468_p0, %p8557_p3  ;;  %s8313_s9 = scalar_lea.hbm %s12186_s0, 1024 }
  0x1c   : > { %s12363_s5 = scalar_select %p8602_p6, 1, 0 }
  0x1d   : > { %p8314_p5 = scmp.ne.s32.totalorder %s12186_s0, %s8313_s9  ;;  %p8315_p10 = pneg %p8597_p2 }
  0x1e   : > { %p8320_p0 = scmp.lt.u32.totalorder %s8313_s9, %s12186_s0 }
  0x1f   : > { %p8316_p11 = pnand %p8315_p10, %p8314_p5 }
  0x21   : > { %p8317_p1 = pneg %p8316_p11 }
  0x23   : > { %p8322_p12 = pnand %p8320_p0, %p8317_p1 }
  0x25   : > { %8325 = shalt.err (!%p8322_p12)
}
  0x26   : > { %s8326_s22 = scalar_lea.vmem %s164_s28, 1024  ;;  %p8334_p3 = scmp.lt.s32.totalorder %s164_s28, %s164_s28 }
  0x27   : > { %p8327_p9 = scmp.ne.s32.totalorder %s164_s28, %s8326_s22  ;;  %p8335_p13 = scmp.lt.s32.totalorder %s8326_s22, %s8326_s22 }
  0x29   : > { %p8329_p8 = pnand %p8327_p9, %p8315_p10  ;;  %p8336_p4 = por %p8335_p13, %p8334_p3 }
  0x2b   : > { %p8330_p7 = pneg %p8329_p8 }
  0x2d   : > { %p8337_p6 = pnand %p8336_p4, %p8330_p7 }
  0x2f   : > { %8340 = shalt.err (!%p8337_p6)
}
  0x30   : > { %7471 = dma.hbm_to_vmem [thread:$0]  (!%p8597_p2), %s12186_s0, 1024, %s164_s28, [#allocation3]  }
  0x31   : > { %p12364_p9 = scmp.ne.s32.totalorder %s12363_s5, 0  ;;  %s5391_s8 = sshll.u32 %s174_s6, 13 }
  0x32   : > { %s5407_s10 = sshll.u32 %s8485_s16, 10  ;;  %s178_s19 = scalar_lea.vmem [#allocation5], %s5391_s8 }
  0x33   : > { %s12862_s4 = smov (%p12364_p9, %s36_s4), 0  ;;  %s8633_s18 = scalar_lea.hbm %s12187_s1, %s5407_s10 }
  0x34   : > { %s67_s9 = ssub.s32 %s8485_s16, %s12862_s4  ;;  %s188_s22 = sshll.u32 %s178_s19, 4  ;;  %s8640_s22 = int_to_ptr.vmem [resolvable:$true] %s188_s22 }
  0x35   : > { %p69_p3 = scmp.eq.s32.totalorder %s67_s9, 0  ;;  %s8642_s5 = scalar_lea.sflag [#allocation6], %s174_s6 }
  0x36   : > { %s8341_s27 = scalar_lea.hbm %s8633_s18, 131072  ;;  %p12365_p8 = scmp.ne.s32.totalorder %s12361_s29, 0 }
  0x37   : > { %s8638_s28 = scalar_select %p69_p3, %s8477_s14, %s71_s20  }
  0x38   : > { %p8342_p7 = scmp.ne.s32.totalorder %s8633_s18, %s8341_s27  ;;  %p8343_p12 = pneg %p12365_p8 }
  0x39   : > { %s8346_s8 = scalar_lea.hbm %s12187_s1, 262144  ;;  %p8347_p2 = scmp.lt.u32.totalorder %s8633_s18, %s12187_s1 }
  0x3a   : > { %p8344_p13 = pnand %p8343_p12, %p8342_p7  ;;  %p8348_p6 = scmp.lt.u32.totalorder %s8346_s8, %s8341_s27 }
  0x3b   : > { %p8350_p10 = scmp.lt.u32.totalorder %s8341_s27, %s8633_s18 }
  0x3c   : > { %p8345_p4 = pneg %p8344_p13  ;;  %p8349_p5 = por %p8348_p6, %p8347_p2 }
  0x3e   : > { %p8351_p11 = por %p8350_p10, %p8349_p5 }
  0x40   : > { %p8352_p1 = pnand %p8351_p11, %p8345_p4 }
  0x42   : > { %8355 = shalt.err (!%p8352_p1)
}
  0x43   : > { %s8356_s20 = scalar_lea.vmem %s8640_s22, 131072  ;;  %s8492_s6 = smov [#allocation5]  }
  0x44   : > { %p8357_p0 = scmp.ne.s32.totalorder %s8640_s22, %s8356_s20  ;;  %s8361_s11 = sshll.u32 %s8492_s6, 4  ;;  %s8362_s11 = int_to_ptr.vmem [resolvable:$false] %s8361_s11 }
  0x45   : > { %s8363_s19 = scalar_lea.vmem %s8362_s11, 262144  ;;  %p8364_p7 = scmp.lt.s32.totalorder %s8640_s22, %s8362_s11 }
  0x46   : > { %p8359_p9 = pnand %p8357_p0, %p8343_p12  ;;  %p8365_p13 = scmp.lt.s32.totalorder %s8363_s19, %s8356_s20 }
  0x48   : > { %p8360_p3 = pneg %p8359_p9  ;;  %p8366_p2 = por %p8365_p13, %p8364_p7 }
  0x4a   : > { %p8367_p6 = pnand %p8366_p2, %p8360_p3 }
  0x4c   : > { %8370 = shalt.err (!%p8367_p6)
}
  0x4d   : > { %s8493_s27 = smov 2048   ;;  %s8494_s7 = smov 1024  }
  0x4e   : > { %s8495_s9 = smov 64   ;;  %p12366_p12 = scmp.ne.s32.totalorder %s12360_s26, 0 }
  0x4f   : > { %7475 = dma.hbm_to_vmem [thread:$0]  (!%p12365_p8), %s8633_s18, 131072, %s8640_s22, %s8642_s5, %s8493_s27, %s8494_s7, %s8495_s9  }
  0x50   : > { %200 = sbr.rel (%p12366_p12) target bundleno = 1448 (0x5a8), region = 28 }
  0x57   : > { %p12367_p4 = scmp.ne.s32.totalorder %s12355_s21, 0 }
  0x59   : > { %8452 = dma.done.wait (%p12367_p4), [#allocation3], 1024  }
  0x5a   : > { %8454 = vsyncadd (%p12367_p4), [#allocation3], 4294966272  ;;  %s8677_s8 = sand.u32 1, %s8473_s13   ;;  %p12368_p8 = scmp.ne.s32.totalorder %s12357_s23, 0 }
  0x5b   : > { %s5396_s10 = sshll.u32 %s8677_s8, 13  ;;  %s207_s30 = scalar_lea.sflag [#allocation6], %s8677_s8 }
  0x5c   : > { %s8681_s20 = scalar_lea.vmem [#allocation5], %s5396_s10 }
  0x5d   : > { %8456 = dma.done.wait (%p12368_p8), %s207_s30, 131072  }
  0x5e   : > { %8458 = vsyncadd (%p12368_p8), %s207_s30, 4294836224  ;;  %v250_v0 = vld [vmem:[%s8681_s20 + $0x8] sm:$0xff]  ;;  %v252_v2 = vld [vmem:[%s8681_s20 + $0x18] sm:$0xff]  ;;  %s5397_s21 = sshll.u32 %s8677_s8, 3  ;;  %s5408_s29 = sshll.u32 %s8481_s15, 7 }
  0x5f   : > { %v258_v1 = vld [vmem:[%s8681_s20 + $0x48] sm:$0xff]  ;;  %v792_v4 = vand.u32 2147483647, %v250_v0  ;;  %v260_v6 = vld [vmem:[%s8681_s20 + $0x58] sm:$0xff]  ;;  %v249_v7 = vld [vmem:[%s8681_s20] sm:$0xff]  ;;  %s10814_s23 = scalar_lea.vmem [#allocation7], %s5397_s21  ;;  %s12106_s15 = scalar_lea.hbm %s12188_s2, %s5408_s29 }
  0x60   : > { %v5410_v3 = vpack.c.bf16 %v258_v1, %v250_v0  ;;  %v800_v5 = vand.u32 2147483647, %v258_v1  ;;  %v5474_v8 = vpack.c.bf16 %v260_v6, %v252_v2  ;;  %v794_v9 = vand.u32 2147483647, %v252_v2  ;;  %v257_v11 = vld [vmem:[%s8681_s20 + $0x40] sm:$0xff]  ;;  %v251_v12 = vld [vmem:[%s8681_s20 + $0x10] sm:$0xff]  ;;  %s12113_s27 = scalar_lea.hbm %s12189_s3, %s5408_s29 }
  0x61   : > { %v802_v10 = vand.u32 2147483647, %v260_v6  ;;  %v5412_v13 = vpack.c.bf16 %v257_v11, %v249_v7  ;;  %v791_v14 = vand.u32 2147483647, %v249_v7  ;;  %v799_v15 = vand.u32 2147483647, %v257_v11 }
  0x62   : > { %5411 = vmatprep.subr.bf16.mxu0 %v5410_v3  ;;  %v259_v16 = vld [vmem:[%s8681_s20 + $0x50] sm:$0xff]  ;;  %v266_v17 = vld [vmem:[%s8681_s20 + $0x88] sm:$0xff]  ;;  %v8696_v18 = vpack.c.bf16 %v800_v5, %v792_v4  ;;  %5475 = vmatprep.subr.bf16.mxu1 %v5474_v8  ;;  %v793_v20 = vand.u32 2147483647, %v251_v12  ;;  %v8700_v23 = vld [vmem:[%s8681_s20 + $0x98] sm:$0xff]  ;;  %s10819_s26 = scalar_lea.vmem [#allocation8], %s5397_s21 }
  0x63   : > { %v5476_v19 = vpack.c.bf16 %v259_v16, %v251_v12  ;;  %v801_v21 = vand.u32 2147483647, %v259_v16  ;;  %v274_v22 = vld [vmem:[%s8681_s20 + $0xc8] sm:$0xff]  ;;  %v8702_v24 = vpack.c.bf16 %v802_v10, %v794_v9  ;;  %5413 = vmatpush1.bf16.msra.mxu0 %v5412_v13  ;;  %v8704_v25 = vpack.c.bf16 %v799_v15, %v791_v14  ;;  %v8707_v27 = vld [vmem:[%s8681_s20 + $0xd8] sm:$0xff]  ;;  %v265_v28 = vld [vmem:[%s8681_s20 + $0x80] sm:$0xff]  ;;  %s5245_s18 = sshll.u32 %s10814_s23, 4  ;;  %s12108_s18 = int_to_ptr.vmem [resolvable:$true] %s5245_s18 }
  0x64   : > { %12369 = vst [vmem:[#allocation14_spill] sm:$0xff] %v8696_v18  ;;  %v5414_v26 = vpack.c.bf16 %v274_v22, %v266_v17  ;;  %v273_v29 = vld [vmem:[%s8681_s20 + $0xc0] sm:$0xff]  ;;  %v808_v30 = vand.u32 2147483647, %v266_v17  ;;  %v5478_v32 = vpack.c.bf16 %v8707_v27, %v8700_v23  ;;  %v807_v34 = vand.u32 2147483647, %v265_v28 }
  0x65   : > { %12370 = vst [vmem:[#allocation15_spill] sm:$0xff] %v8702_v24  ;;  %12371 = vst [vmem:[#allocation16_spill] sm:$0xff] %v8704_v25  ;;  %5477 = vmatpush1.bf16.msra.mxu1 %v5476_v19  ;;  %v8711_v31 = vpack.c.bf16 %v801_v21, %v793_v20  ;;  %v5416_v33 = vpack.c.bf16 %v273_v29, %v265_v28  ;;  %v267_v35 = vld [vmem:[%s8681_s20 + $0x90] sm:$0xff]  ;;  %v8718_v37 = vld [vmem:[%s8681_s20 + $0x108] sm:$0xff]  ;;  %v815_v38 = vand.u32 2147483647, %v273_v29 }
  0x66   : > { %v275_v36 = vld [vmem:[%s8681_s20 + $0xd0] sm:$0xff]  ;;  %5415 = vmatprep.subr.bf16.mxu0 %v5414_v26  ;;  %v809_v40 = vand.u32 2147483647, %v267_v35  ;;  %5479 = vmatprep.subr.bf16.mxu1 %v5478_v32  ;;  %v8721_v42 = vld [vmem:[%s8681_s20 + $0x148] sm:$0xff]  ;;  %v8724_v43 = vld [vmem:[%s8681_s20 + $0x118] sm:$0xff]  ;;  %s5259_s22 = sshll.u32 %s10819_s26, 4  ;;  %s12115_s22 = int_to_ptr.vmem [resolvable:$true] %s5259_s22 }
  0x67   : > { %12372 = vst [vmem:[#allocation17_spill] sm:$0xff] %v8711_v31  ;;  %v5480_v39 = vpack.c.bf16 %v275_v36, %v267_v35  ;;  %v817_v41 = vand.u32 2147483647, %v275_v36  ;;  %v8727_v44 = vld [vmem:[%s8681_s20 + $0x158] sm:$0xff]  ;;  %v816_v45 = vand.u32 2147483647, %v274_v22  ;;  %5417 = vmatpush1.bf16.msra.mxu0 %v5416_v33  ;;  %v5418_v46 = vpack.c.bf16 %v8721_v42, %v8718_v37 }
  0x68   : > { %v5482_v47 = vpack.c.bf16 %v8727_v44, %v8724_v43  ;;  %v281_v48 = vld [vmem:[%s8681_s20 + $0x100] sm:$0xff]  ;;  %v283_v50 = vld [vmem:[%s8681_s20 + $0x110] sm:$0xff]  ;;  %v810_v51 = vand.u32 2147483647, %v8700_v23  ;;  %v8737_v52 = vpack.c.bf16 %v815_v38, %v807_v34  ;;  %v8741_v57 = vld [vmem:[%s8681_s20 + $0x188] sm:$0xff]  ;;  %s5226_s7 = scalar_lea.sflag [#allocation4], %s8677_s8 }
  0x69   : > { %v289_v49 = vld [vmem:[%s8681_s20 + $0x140] sm:$0xff]  ;;  %5481 = vmatpush1.bf16.msra.mxu1 %v5480_v39  ;;  %v823_v54 = vand.u32 2147483647, %v281_v48  ;;  %v291_v56 = vld [vmem:[%s8681_s20 + $0x150] sm:$0xff]  ;;  %v8743_v58 = vpack.c.bf16 %v816_v45, %v808_v30  ;;  %5419 = vmatprep.subr.bf16.mxu0 %v5418_v46  ;;  %v825_v60 = vand.u32 2147483647, %v283_v50  ;;  %v8751_v0 = vpack.c.bf16 %v817_v41, %v809_v40 }
  0x6a   : > { %12373 = vst [vmem:[#allocation18_spill] sm:$0xff] %v8737_v52  ;;  %v5420_v53 = vpack.c.bf16 %v289_v49, %v281_v48  ;;  %v831_v55 = vand.u32 2147483647, %v289_v49  ;;  %5483 = vmatprep.subr.bf16.mxu1 %v5482_v47  ;;  %v5484_v59 = vpack.c.bf16 %v291_v56, %v283_v50  ;;  %v833_v61 = vand.u32 2147483647, %v291_v56  ;;  %v8746_v62 = vld [vmem:[%s8681_s20 + $0x1c8] sm:$0xff] }
  0x6b   : > { %12374 = vst [vmem:[#allocation19_spill] sm:$0xff] %v8743_v58  ;;  %v8749_v63 = vld [vmem:[%s8681_s20 + $0x198] sm:$0xff]  ;;  %12375 = vst [vmem:[#allocation20_spill] sm:$0xff] %v8751_v0  ;;  %v5422_v1 = vpack.c.bf16 %v8746_v62, %v8741_v57  ;;  %v297_v3 = vld [vmem:[%s8681_s20 + $0x180] sm:$0xff]  ;;  %v818_v5 = vand.u32 2147483647, %v8707_v27 }
  0x6c   : > { %v8756_v2 = vld [vmem:[%s8681_s20 + $0x1d8] sm:$0xff]  ;;  %v305_v4 = vld [vmem:[%s8681_s20 + $0x1c0] sm:$0xff]  ;;  %v8761_v6 = vpack.c.bf16 %v831_v55, %v823_v54  ;;  %5421 = vmatpush1.bf16.msra.mxu0 %v5420_v53  ;;  %v839_v9 = vand.u32 2147483647, %v297_v3  ;;  %v299_v11 = vld [vmem:[%s8681_s20 + $0x190] sm:$0xff]  ;;  %v8784_v26 = vpack.c.bf16 %v833_v61, %v825_v60  ;;  %s8371_s9 = scalar_lea.vmem %s12108_s18, 128 }
  0x6d   : > { %v5486_v7 = vpack.c.bf16 %v8756_v2, %v8749_v63  ;;  %v5424_v8 = vpack.c.bf16 %v305_v4, %v297_v3  ;;  %v847_v10 = vand.u32 2147483647, %v305_v4  ;;  %v307_v12 = vld [vmem:[%s8681_s20 + $0x1d0] sm:$0xff]  ;;  %5485 = vmatpush1.bf16.msra.mxu1 %v5484_v59  ;;  %5423 = vmatprep.subr.bf16.mxu0 %v5422_v1  ;;  %v841_v14 = vand.u32 2147483647, %v299_v11  ;;  %v8768_v16 = vld [vmem:[%s8681_s20 + $0x208] sm:$0xff]  ;;  %p8372_p5 = scmp.ne.s32.totalorder %s12108_s18, %s8371_s9 }
  0x6e   : > { %12376 = vst [vmem:[#allocation21_spill] sm:$0xff] %v8761_v6  ;;  %v5488_v13 = vpack.c.bf16 %v307_v12, %v299_v11  ;;  %v849_v15 = vand.u32 2147483647, %v307_v12  ;;  %v8771_v17 = vld [vmem:[%s8681_s20 + $0x248] sm:$0xff]  ;;  %v8773_v19 = vpack.c.bf16 %v818_v5, %v810_v51  ;;  %v8778_v21 = vld [vmem:[%s8681_s20 + $0x218] sm:$0xff]  ;;  %v313_v23 = vld [vmem:[%s8681_s20 + $0x200] sm:$0xff] }
  0x6f   : > { %5487 = vmatprep.subr.bf16.mxu1 %v5486_v7  ;;  %v5426_v20 = vpack.c.bf16 %v8771_v17, %v8768_v16  ;;  %v8781_v22 = vld [vmem:[%s8681_s20 + $0x258] sm:$0xff]  ;;  %12378 = vst [vmem:[#allocation23_spill] sm:$0xff] %v8784_v26  ;;  %v8786_v27 = vpack.c.bf16 %v847_v10, %v839_v9  ;;  %v321_v29 = vld [vmem:[%s8681_s20 + $0x240] sm:$0xff]  ;;  %v855_v30 = vand.u32 2147483647, %v313_v23  ;;  %v315_v32 = vld [vmem:[%s8681_s20 + $0x210] sm:$0xff] }
  0x70   : > { %12377 = vst [vmem:[#allocation22_spill] sm:$0xff] %v8773_v19  ;;  %v5490_v28 = vpack.c.bf16 %v8781_v22, %v8778_v21  ;;  %v323_v33 = vld [vmem:[%s8681_s20 + $0x250] sm:$0xff]  ;;  %v8793_v34 = vpack.c.bf16 %v849_v15, %v841_v14  ;;  %5425 = vmatpush1.bf16.msra.mxu0 %v5424_v8  ;;  %v5428_v35 = vpack.c.bf16 %v321_v29, %v313_v23  ;;  %v863_v36 = vand.u32 2147483647, %v321_v29  ;;  %v8796_v39 = vld [vmem:[%s8681_s20 + $0x288] sm:$0xff]  ;;  %v8804_v47 = vld [vmem:[%s8681_s20 + $0x298] sm:$0xff] }
  0x71   : > { %12379 = vst [vmem:[#allocation24_spill] sm:$0xff] %v8786_v27  ;;  %v857_v38 = vand.u32 2147483647, %v315_v32  ;;  %v8799_v40 = vld [vmem:[%s8681_s20 + $0x2c8] sm:$0xff]  ;;  %5489 = vmatpush1.bf16.msra.mxu1 %v5488_v13  ;;  %5427 = vmatprep.subr.bf16.mxu0 %v5426_v20  ;;  %v5492_v41 = vpack.c.bf16 %v323_v33, %v315_v32  ;;  %v865_v45 = vand.u32 2147483647, %v323_v33 }
  0x72   : > { %12380 = vst [vmem:[#allocation25_spill] sm:$0xff] %v8793_v34  ;;  %v5430_v46 = vpack.c.bf16 %v8799_v40, %v8796_v39  ;;  %v8807_v48 = vld [vmem:[%s8681_s20 + $0x2d8] sm:$0xff]  ;;  %v329_v49 = vld [vmem:[%s8681_s20 + $0x280] sm:$0xff]  ;;  %5491 = vmatprep.subr.bf16.mxu1 %v5490_v28  ;;  %v331_v54 = vld [vmem:[%s8681_s20 + $0x290] sm:$0xff]  ;;  %v8815_v56 = vpack.c.bf16 %v863_v36, %v855_v30  ;;  %v824_v18 = vand.u32 2147483647, %v8718_v37 }
  0x73   : > { %v5494_v50 = vpack.c.bf16 %v8807_v48, %v8804_v47  ;;  %v337_v51 = vld [vmem:[%s8681_s20 + $0x2c0] sm:$0xff]  ;;  %v871_v53 = vand.u32 2147483647, %v329_v49  ;;  %v339_v55 = vld [vmem:[%s8681_s20 + $0x2d0] sm:$0xff]  ;;  %v873_v60 = vand.u32 2147483647, %v331_v54  ;;  %v8830_v9 = vpack.c.bf16 %v865_v45, %v857_v38 }
  0x74   : > { %12381 = vst [vmem:[#allocation26_spill] sm:$0xff] %v8815_v56  ;;  %v879_v59 = vand.u32 2147483647, %v337_v51  ;;  %v8818_v61 = vld [vmem:[%s8681_s20 + $0x308] sm:$0xff]  ;;  %5429 = vmatpush1.bf16.msra.mxu0 %v5428_v35  ;;  %v5432_v3 = vpack.c.bf16 %v337_v51, %v329_v49  ;;  %v881_v4 = vand.u32 2147483647, %v339_v55  ;;  %v5496_v10 = vpack.c.bf16 %v339_v55, %v331_v54 }
  0x75   : > { %v8821_v1 = vld [vmem:[%s8681_s20 + $0x348] sm:$0xff]  ;;  %v8824_v5 = vld [vmem:[%s8681_s20 + $0x318] sm:$0xff]  ;;  %v345_v8 = vld [vmem:[%s8681_s20 + $0x300] sm:$0xff]  ;;  %12382 = vst [vmem:[#allocation27_spill] sm:$0xff] %v8830_v9  ;;  %5493 = vmatpush1.bf16.msra.mxu1 %v5492_v41  ;;  %5431 = vmatprep.subr.bf16.mxu0 %v5430_v46  ;;  %p12853_p10 = scmp.ne.s32.totalorder %s12358_s24, 0  ;;  %s8497_s10 = smov [#allocation7]  }
  0x76   : > { %v8827_v7 = vld [vmem:[%s8681_s20 + $0x358] sm:$0xff]  ;;  %v5434_v11 = vpack.c.bf16 %v8821_v1, %v8818_v61  ;;  %v353_v12 = vld [vmem:[%s8681_s20 + $0x340] sm:$0xff]  ;;  %v887_v13 = vand.u32 2147483647, %v345_v8  ;;  %v347_v14 = vld [vmem:[%s8681_s20 + $0x310] sm:$0xff]  ;;  %5495 = vmatprep.subr.bf16.mxu1 %v5494_v50  ;;  %v8851_v36 = vpack.c.bf16 %v879_v59, %v871_v53  ;;  %v8853_v38 = vpack.c.bf16 %v881_v4, %v873_v60  ;;  %s8375_s30 = sshll.u32 %s8497_s10, 4  ;;  %s8376_s30 = int_to_ptr.vmem [resolvable:$false] %s8375_s30 }
  0x77   : > { %v5498_v15 = vpack.c.bf16 %v8827_v7, %v8824_v5  ;;  %v895_v20 = vand.u32 2147483647, %v353_v12  ;;  %v355_v23 = vld [vmem:[%s8681_s20 + $0x350] sm:$0xff]  ;;  %v8840_v28 = vld [vmem:[%s8681_s20 + $0x388] sm:$0xff]  ;;  %v889_v30 = vand.u32 2147483647, %v347_v14  ;;  %v5436_v41 = vpack.c.bf16 %v353_v12, %v345_v8  ;;  %p8373_p11 = pnand %p8372_p5, %p12853_p10  ;;  %p8378_p0 = scmp.lt.s32.totalorder %s12108_s18, %s8376_s30 }
  0x78   : > { %v8843_v29 = vld [vmem:[%s8681_s20 + $0x3c8] sm:$0xff]  ;;  %v897_v32 = vand.u32 2147483647, %v355_v23  ;;  %v8846_v33 = vld [vmem:[%s8681_s20 + $0x398] sm:$0xff]  ;;  %12383 = vst [vmem:[#allocation28_spill] sm:$0xff] %v8851_v36  ;;  %12384 = vst [vmem:[#allocation29_spill] sm:$0xff] %v8853_v38  ;;  %5433 = vmatpush1.bf16.msra.mxu0 %v5432_v3  ;;  %v5500_v46 = vpack.c.bf16 %v355_v23, %v347_v14 }
  0x79   : > { %v8849_v35 = vld [vmem:[%s8681_s20 + $0x3d8] sm:$0xff]  ;;  %v361_v45 = vld [vmem:[%s8681_s20 + $0x380] sm:$0xff]  ;;  %5497 = vmatpush1.bf16.msra.mxu1 %v5496_v10  ;;  %5435 = vmatprep.subr.bf16.mxu0 %v5434_v11  ;;  %v5438_v49 = vpack.c.bf16 %v8843_v29, %v8840_v28  ;;  %v363_v53 = vld [vmem:[%s8681_s20 + $0x390] sm:$0xff]  ;;  %v8869_v4 = vpack.c.bf16 %v895_v20, %v887_v13  ;;  %p8374_p1 = pneg %p8373_p11 }
  0x7a   : > { %v369_v50 = vld [vmem:[%s8681_s20 + $0x3c0] sm:$0xff]  ;;  %v903_v51 = vand.u32 2147483647, %v361_v45  ;;  %5499 = vmatprep.subr.bf16.mxu1 %v5498_v15  ;;  %v5502_v54 = vpack.c.bf16 %v8849_v35, %v8846_v33  ;;  %v371_v59 = vld [vmem:[%s8681_s20 + $0x3d0] sm:$0xff]  ;;  %v8864_v60 = vld [vmem:[%s8681_s20 + $0x408] sm:$0xff]  ;;  %v8877_v11 = vpack.c.bf16 %v897_v32, %v889_v30 }
  0x7b   : > { %v911_v55 = vand.u32 2147483647, %v369_v50  ;;  %v8867_v3 = vld [vmem:[%s8681_s20 + $0x448] sm:$0xff]  ;;  %12385 = vst [vmem:[#allocation30_spill] sm:$0xff] %v8869_v4  ;;  %v8872_v8 = vld [vmem:[%s8681_s20 + $0x418] sm:$0xff]  ;;  %v5440_v12 = vpack.c.bf16 %v369_v50, %v361_v45  ;;  %v377_v23 = vld [vmem:[%s8681_s20 + $0x400] sm:$0xff]  ;;  %v5504_v13 = vpack.c.bf16 %v371_v59, %v363_v53 }
  0x7c   : > { %v8875_v10 = vld [vmem:[%s8681_s20 + $0x458] sm:$0xff]  ;;  %12386 = vst [vmem:[#allocation31_spill] sm:$0xff] %v8877_v11  ;;  %5437 = vmatpush1.bf16.msra.mxu0 %v5436_v41  ;;  %v905_v14 = vand.u32 2147483647, %v363_v53  ;;  %v913_v15 = vand.u32 2147483647, %v371_v59  ;;  %v5442_v20 = vpack.c.bf16 %v8867_v3, %v8864_v60 }
  0x7d   : > { %5501 = vmatpush1.bf16.msra.mxu1 %v5500_v46  ;;  %5439 = vmatprep.subr.bf16.mxu0 %v5438_v49  ;;  %v385_v4 = vld [vmem:[%s8681_s20 + $0x440] sm:$0xff]  ;;  %v919_v30 = vand.u32 2147483647, %v377_v23  ;;  %v379_v32 = vld [vmem:[%s8681_s20 + $0x410] sm:$0xff]  ;;  %v5506_v41 = vpack.c.bf16 %v8875_v10, %v8872_v8  ;;  %v8888_v11 = vld [vmem:[%s8681_s20 + $0x488] sm:$0xff]  ;;  %v8893_v49 = vpack.c.bf16 %v911_v55, %v903_v51 }
  0x7e   : > { %5503 = vmatprep.subr.bf16.mxu1 %v5502_v54  ;;  %v927_v45 = vand.u32 2147483647, %v385_v4  ;;  %v387_v50 = vld [vmem:[%s8681_s20 + $0x450] sm:$0xff]  ;;  %v8891_v46 = vld [vmem:[%s8681_s20 + $0x4c8] sm:$0xff]  ;;  %v921_v53 = vand.u32 2147483647, %v379_v32  ;;  %v5444_v54 = vpack.c.bf16 %v385_v4, %v377_v23  ;;  %v8902_v56 = vpack.c.bf16 %v913_v15, %v905_v14 }
  0x7f   : > { %12387 = vst [vmem:[#allocation32_spill] sm:$0xff] %v8893_v49  ;;  %v929_v59 = vand.u32 2147483647, %v387_v50  ;;  %v8896_v38 = vld [vmem:[%s8681_s20 + $0x498] sm:$0xff]  ;;  %v393_v9 = vld [vmem:[%s8681_s20 + $0x480] sm:$0xff]  ;;  %v5508_v51 = vpack.c.bf16 %v387_v50, %v379_v32  ;;  %v5446_v55 = vpack.c.bf16 %v8891_v46, %v8888_v11  ;;  %v395_v27 = vld [vmem:[%s8681_s20 + $0x490] sm:$0xff] }
  0x80   : > { %v8899_v36 = vld [vmem:[%s8681_s20 + $0x4d8] sm:$0xff]  ;;  %5441 = vmatpush1.bf16.msra.mxu0 %v5440_v12  ;;  %12388 = vst [vmem:[#allocation33_spill] sm:$0xff] %v8902_v56  ;;  %v401_v49 = vld [vmem:[%s8681_s20 + $0x4c0] sm:$0xff]  ;;  %v935_v34 = vand.u32 2147483647, %v393_v9  ;;  %v403_v23 = vld [vmem:[%s8681_s20 + $0x4d0] sm:$0xff]  ;;  %v8923_v56 = vpack.c.bf16 %v927_v45, %v919_v30 }
  0x81   : > { %5505 = vmatpush1.bf16.msra.mxu1 %v5504_v13  ;;  %5443 = vmatprep.subr.bf16.mxu0 %v5442_v20  ;;  %v5510_v12 = vpack.c.bf16 %v8899_v36, %v8896_v38  ;;  %v943_v4 = vand.u32 2147483647, %v401_v49  ;;  %v8912_v14 = vld [vmem:[%s8681_s20 + $0x508] sm:$0xff]  ;;  %v937_v13 = vand.u32 2147483647, %v395_v27  ;;  %v8918_v32 = vld [vmem:[%s8681_s20 + $0x518] sm:$0xff]  ;;  %v5448_v26 = vpack.c.bf16 %v401_v49, %v393_v9 }
  0x82   : > { %5507 = vmatprep.subr.bf16.mxu1 %v5506_v41  ;;  %v8915_v15 = vld [vmem:[%s8681_s20 + $0x548] sm:$0xff]  ;;  %v945_v20 = vand.u32 2147483647, %v403_v23  ;;  %12389 = vst [vmem:[#allocation34_spill] sm:$0xff] %v8918_v32  ;;  %v8921_v50 = vld [vmem:[%s8681_s20 + $0x558] sm:$0xff]  ;;  %12391 = vst [vmem:[#allocation36_spill] sm:$0xff] %v8923_v56  ;;  %v8925_v41 = vpack.c.bf16 %v929_v59, %v921_v53  ;;  %v5512_v0 = vpack.c.bf16 %v403_v23, %v395_v27 }
  0x83   : > { %12390 = vst [vmem:[#allocation35_spill] sm:$0xff] %v8921_v50  ;;  %v409_v6 = vld [vmem:[%s8681_s20 + $0x500] sm:$0xff]  ;;  %v5450_v52 = vpack.c.bf16 %v8915_v15, %v8912_v14  ;;  %v411_v30 = vld [vmem:[%s8681_s20 + $0x510] sm:$0xff]  ;;  %v5514_v45 = vpack.c.bf16 %v8921_v50, %v8918_v32  ;;  %v8936_v9 = vld [vmem:[%s8681_s20 + $0x588] sm:$0xff]  ;;  %v8941_v27 = vpack.c.bf16 %v943_v4, %v935_v34 }
  0x84   : > { %12392 = vst [vmem:[#allocation37_spill] sm:$0xff] %v8925_v41  ;;  %5445 = vmatpush1.bf16.msra.mxu0 %v5444_v54  ;;  %v417_v19 = vld [vmem:[%s8681_s20 + $0x540] sm:$0xff]  ;;  %v951_v58 = vand.u32 2147483647, %v409_v6  ;;  %v419_v59 = vld [vmem:[%s8681_s20 + $0x550] sm:$0xff]  ;;  %12393 = vst [vmem:[#allocation38_spill] sm:$0xff] %v8936_v9 }
  0x85   : > { %5509 = vmatpush1.bf16.msra.mxu1 %v5508_v51  ;;  %5447 = vmatprep.subr.bf16.mxu0 %v5446_v55  ;;  %v959_v53 = vand.u32 2147483647, %v417_v19  ;;  %v8939_v49 = vld [vmem:[%s8681_s20 + $0x5c8] sm:$0xff]  ;;  %12395 = vst [vmem:[#allocation40_spill] sm:$0xff] %v8941_v27  ;;  %v8944_v54 = vld [vmem:[%s8681_s20 + $0x598] sm:$0xff]  ;;  %v8949_v55 = vpack.c.bf16 %v945_v20, %v937_v13  ;;  %v425_v56 = vld [vmem:[%s8681_s20 + $0x580] sm:$0xff]  ;;  %v5516_v34 = vpack.c.bf16 %v419_v59, %v411_v30 }
  0x86   : > { %5511 = vmatprep.subr.bf16.mxu1 %v5510_v12  ;;  %12394 = vst [vmem:[#allocation39_spill] sm:$0xff] %v8939_v49  ;;  %12396 = vst [vmem:[#allocation41_spill] sm:$0xff] %v8944_v54  ;;  %v8947_v51 = vld [vmem:[%s8681_s20 + $0x5d8] sm:$0xff]  ;;  %v5452_v12 = vpack.c.bf16 %v417_v19, %v409_v6  ;;  %v953_v23 = vand.u32 2147483647, %v411_v30  ;;  %v5454_v4 = vpack.c.bf16 %v8939_v49, %v8936_v9  ;;  %v433_v27 = vld [vmem:[%s8681_s20 + $0x5c0] sm:$0xff] }
  0x87   : > { %12397 = vst [vmem:[#allocation42_spill] sm:$0xff] %v8947_v51  ;;  %12398 = vst [vmem:[#allocation43_spill] sm:$0xff] %v8949_v55  ;;  %v961_v41 = vand.u32 2147483647, %v419_v59  ;;  %v967_v13 = vand.u32 2147483647, %v425_v56  ;;  %v5518_v6 = vpack.c.bf16 %v8947_v51, %v8944_v54 }
  0x88   : > { %5449 = vmatpush1.bf16.msra.mxu0 %v5448_v26  ;;  %v427_v20 = vld [vmem:[%s8681_s20 + $0x590] sm:$0xff]  ;;  %v975_v19 = vand.u32 2147483647, %v433_v27  ;;  %v8960_v55 = vld [vmem:[%s8681_s20 + $0x608] sm:$0xff]  ;;  %v8968_v31 = vld [vmem:[%s8681_s20 + $0x618] sm:$0xff] }
  0x89   : > { %5513 = vmatpush1.bf16.msra.mxu1 %v5512_v0  ;;  %5451 = vmatprep.subr.bf16.mxu0 %v5450_v52  ;;  %v435_v26 = vld [vmem:[%s8681_s20 + $0x5d0] sm:$0xff]  ;;  %12399 = vst [vmem:[#allocation44_spill] sm:$0xff] %v8960_v55  ;;  %v8963_v0 = vld [vmem:[%s8681_s20 + $0x648] sm:$0xff]  ;;  %v8965_v52 = vpack.c.bf16 %v959_v53, %v951_v58  ;;  %v969_v30 = vand.u32 2147483647, %v427_v20  ;;  %12402 = vst [vmem:[#allocation47_spill] sm:$0xff] %v8968_v31  ;;  %v8975_v51 = vpack.c.bf16 %v961_v41, %v953_v23 }
  0x8a   : > { %5515 = vmatprep.subr.bf16.mxu1 %v5514_v45  ;;  %12400 = vst [vmem:[#allocation45_spill] sm:$0xff] %v8963_v0  ;;  %v977_v59 = vand.u32 2147483647, %v435_v26  ;;  %v8971_v25 = vld [vmem:[%s8681_s20 + $0x658] sm:$0xff]  ;;  %v5456_v45 = vpack.c.bf16 %v433_v27, %v425_v56  ;;  %v441_v24 = vld [vmem:[%s8681_s20 + $0x600] sm:$0xff]  ;;  %v5520_v58 = vpack.c.bf16 %v435_v26, %v427_v20  ;;  %v5458_v53 = vpack.c.bf16 %v8963_v0, %v8960_v55  ;;  %v451_v56 = vld [vmem:[%s8681_s20 + $0x650] sm:$0xff] }
  0x8b   : > { %12401 = vst [vmem:[#allocation46_spill] sm:$0xff] %v8965_v52  ;;  %12403 = vst [vmem:[#allocation48_spill] sm:$0xff] %v8971_v25  ;;  %v449_v52 = vld [vmem:[%s8681_s20 + $0x640] sm:$0xff]  ;;  %v983_v54 = vand.u32 2147483647, %v441_v24  ;;  %v5522_v37 = vpack.c.bf16 %v8971_v25, %v8968_v31  ;;  %v8985_v23 = vld [vmem:[%s8681_s20 + $0x688] sm:$0xff] }
  0x8c   : > { %5453 = vmatpush1.bf16.msra.mxu0 %v5452_v12  ;;  %12404 = vst [vmem:[#allocation49_spill] sm:$0xff] %v8975_v51  ;;  %v443_v12 = vld [vmem:[%s8681_s20 + $0x610] sm:$0xff]  ;;  %v991_v41 = vand.u32 2147483647, %v449_v52  ;;  %12405 = vst [vmem:[#allocation50_spill] sm:$0xff] %v8985_v23  ;;  %v8991_v20 = vld [vmem:[%s8681_s20 + $0x698] sm:$0xff]  ;;  %v8999_v0 = vpack.c.bf16 %v977_v59, %v969_v30  ;;  %v5460_v25 = vpack.c.bf16 %v449_v52, %v441_v24 }
  0x8d   : > { %5517 = vmatpush1.bf16.msra.mxu1 %v5516_v34  ;;  %5455 = vmatprep.subr.bf16.mxu0 %v5454_v4  ;;  %v985_v27 = vand.u32 2147483647, %v443_v12  ;;  %v8988_v34 = vld [vmem:[%s8681_s20 + $0x6c8] sm:$0xff]  ;;  %v993_v4 = vand.u32 2147483647, %v451_v56  ;;  %12407 = vst [vmem:[#allocation52_spill] sm:$0xff] %v8991_v20  ;;  %v5524_v50 = vpack.c.bf16 %v451_v56, %v443_v12 }
  0x8e   : > { %5519 = vmatprep.subr.bf16.mxu1 %v5518_v6  ;;  %12406 = vst [vmem:[#allocation51_spill] sm:$0xff] %v8988_v34  ;;  %v8994_v26 = vld [vmem:[%s8681_s20 + $0x6d8] sm:$0xff]  ;;  %v457_v51 = vld [vmem:[%s8681_s20 + $0x680] sm:$0xff]  ;;  %v8997_v6 = vpack.c.bf16 %v975_v19, %v967_v13  ;;  %12410 = vst [vmem:[#allocation55_spill] sm:$0xff] %v8999_v0  ;;  %v5462_v32 = vpack.c.bf16 %v8988_v34, %v8985_v23 }
  0x8f   : > { %12408 = vst [vmem:[#allocation53_spill] sm:$0xff] %v8994_v26  ;;  %v465_v31 = vld [vmem:[%s8681_s20 + $0x6c0] sm:$0xff]  ;;  %v999_v55 = vand.u32 2147483647, %v457_v51  ;;  %v459_v49 = vld [vmem:[%s8681_s20 + $0x690] sm:$0xff]  ;;  %v9007_v19 = vld [vmem:[%s8681_s20 + $0x708] sm:$0xff]  ;;  %v5526_v52 = vpack.c.bf16 %v8994_v26, %v8991_v20  ;;  %v9029_v26 = vpack.c.bf16 %v993_v4, %v985_v27 }
  0x90   : > { %12409 = vst [vmem:[#allocation54_spill] sm:$0xff] %v8997_v6  ;;  %5457 = vmatpush1.bf16.msra.mxu0 %v5456_v45  ;;  %v467_v9 = vld [vmem:[%s8681_s20 + $0x6d0] sm:$0xff]  ;;  %v1007_v13 = vand.u32 2147483647, %v465_v31  ;;  %12411 = vst [vmem:[#allocation56_spill] sm:$0xff] %v9007_v19  ;;  %v9010_v30 = vld [vmem:[%s8681_s20 + $0x748] sm:$0xff]  ;;  %v5464_v12 = vpack.c.bf16 %v465_v31, %v457_v51 }
  0x91   : > { %5521 = vmatpush1.bf16.msra.mxu1 %v5520_v58  ;;  %5459 = vmatprep.subr.bf16.mxu0 %v5458_v53  ;;  %12412 = vst [vmem:[#allocation57_spill] sm:$0xff] %v9010_v30  ;;  %v9012_v24 = vld [vmem:[#allocation2 + $0x8] sm:$0xff]  ;;  %v1001_v59 = vand.u32 2147483647, %v459_v49  ;;  %v1009_v45 = vand.u32 2147483647, %v467_v9  ;;  %v9020_v53 = vpack.c.bf16 %v991_v41, %v983_v54  ;;  %v5528_v20 = vpack.c.bf16 %v467_v9, %v459_v49 }
  0x92   : > { %5523 = vmatprep.subr.bf16.mxu1 %v5522_v37  ;;  %v9017_v58 = vld [vmem:[%s8681_s20 + $0x718] sm:$0xff]  ;;  %571 = vmatprep.mubr.f32.mxu0 %v9012_v24  ;;  %v473_v0 = vld [vmem:[%s8681_s20 + $0x700] sm:$0xff]  ;;  %v832_v37 = vand.u32 2147483647, %v8721_v42  ;;  %12416 = vst [vmem:[#allocation61_spill] sm:$0xff] %v9029_v26  ;;  %v5466_v34 = vpack.c.bf16 %v9010_v30, %v9007_v19  ;;  %v475_v41 = vld [vmem:[%s8681_s20 + $0x710] sm:$0xff] }
  0x93   : > { %12413 = vst [vmem:[#allocation58_spill] sm:$0xff] %v9017_v58  ;;  %12414 = vst [vmem:[#allocation59_spill] sm:$0xff] %v9020_v53  ;;  %v9023_v56 = vld [vmem:[%s8681_s20 + $0x758] sm:$0xff]  ;;  %v481_v6 = vld [vmem:[%s8681_s20 + $0x740] sm:$0xff]  ;;  %642 = vmatprep.mubr.f32.mxu1 %v9012_v24  ;;  %v1015_v54 = vand.u32 2147483647, %v473_v0 }
  0x94   : > { %12415 = vst [vmem:[#allocation60_spill] sm:$0xff] %v9023_v56  ;;  %5461 = vmatpush1.bf16.msra.mxu0 %v5460_v25  ;;  %v483_v31 = vld [vmem:[%s8681_s20 + $0x750] sm:$0xff]  ;;  %v826_v51 = vand.u32 2147483647, %v8724_v43  ;;  %v1023_v42 = vand.u32 2147483647, %v481_v6  ;;  %v9036_v4 = vpack.c.bf16 %v832_v37, %v824_v18  ;;  %v5530_v9 = vpack.c.bf16 %v9023_v56, %v9017_v58 }
  0x95   : > { %5525 = vmatpush1.bf16.msra.mxu1 %v5524_v50  ;;  %5463 = vmatprep.subr.bf16.mxu0 %v5462_v32  ;;  %v1017_v27 = vand.u32 2147483647, %v475_v41  ;;  %v834_v25 = vand.u32 2147483647, %v8727_v44  ;;  %v1025_v49 = vand.u32 2147483647, %v483_v31  ;;  %v9048_v50 = vpack.c.bf16 %v1007_v13, %v999_v55 }
  0x96   : > { %12417 = vst [vmem:[#allocation62_spill] sm:$0xff] %v9036_v4  ;;  %5527 = vmatprep.subr.bf16.mxu1 %v5526_v52  ;;  %v9042_v26 = vld [vmem:[%s8681_s20 + $0x788] sm:$0xff]  ;;  %v840_v43 = vand.u32 2147483647, %v8741_v57  ;;  %v9051_v32 = vld [vmem:[%s8681_s20 + $0x798] sm:$0xff]  ;;  %v489_v44 = vld [vmem:[%s8681_s20 + $0x780] sm:$0xff]  ;;  %v9060_v4 = vpack.c.bf16 %v1009_v45, %v1001_v59  ;;  %v5468_v56 = vpack.c.bf16 %v481_v6, %v473_v0  ;;  %v5532_v58 = vpack.c.bf16 %v483_v31, %v475_v41 }
  0x97   : > { %12418 = vst [vmem:[#allocation63_spill] sm:$0xff] %v9042_v26  ;;  %v9045_v53 = vld [vmem:[%s8681_s20 + $0x7c8] sm:$0xff]  ;;  %12420 = vst [vmem:[#allocation65_spill] sm:$0xff] %v9048_v50  ;;  %v9054_v18 = vld [vmem:[%s8681_s20 + $0x7d8] sm:$0xff]  ;;  %v9057_v52 = vpack.c.bf16 %v834_v25, %v826_v51  ;;  %v848_v37 = vand.u32 2147483647, %v8746_v62  ;;  %v9080_v41 = vpack.c.bf16 %v1023_v42, %v1015_v54 }
  0x98   : > { %12419 = vst [vmem:[#allocation64_spill] sm:$0xff] %v9045_v53  ;;  %12421 = vst [vmem:[#allocation66_spill] sm:$0xff] %v9051_v32  ;;  %5465 = vmatpush1.bf16.msra.mxu0 %v5464_v12  ;;  %v497_v57 = vld [vmem:[%s8681_s20 + $0x7c0] sm:$0xff]  ;;  %v1031_v55 = vand.u32 2147483647, %v489_v44  ;;  %v5470_v51 = vpack.c.bf16 %v9045_v53, %v9042_v26  ;;  %v491_v62 = vld [vmem:[%s8681_s20 + $0x790] sm:$0xff]  ;;  %v5534_v6 = vpack.c.bf16 %v9054_v18, %v9051_v32 }
  0x99   : > { %12422 = vst [vmem:[#allocation67_spill] sm:$0xff] %v9054_v18  ;;  %12423 = vst [vmem:[#allocation68_spill] sm:$0xff] %v9057_v52  ;;  %v842_v13 = vand.u32 2147483647, %v8749_v63  ;;  %5529 = vmatpush1.bf16.msra.mxu1 %v5528_v20  ;;  %5467 = vmatprep.subr.bf16.mxu0 %v5466_v34  ;;  %v1039_v25 = vand.u32 2147483647, %v497_v57  ;;  %v9068_v45 = vpack.c.bf16 %v848_v37, %v840_v43 }
  0x9a   : > { %12424 = vst [vmem:[#allocation69_spill] sm:$0xff] %v9060_v4  ;;  %v499_v59 = vld [vmem:[%s8681_s20 + $0x7d0] sm:$0xff]  ;;  %v850_v0 = vand.u32 2147483647, %v8756_v2  ;;  %5531 = vmatprep.subr.bf16.mxu1 %v5530_v9  ;;  %v1033_v12 = vand.u32 2147483647, %v491_v62  ;;  %v9091_v4 = vpack.c.bf16 %v1025_v49, %v1017_v27  ;;  %v5472_v50 = vpack.c.bf16 %v497_v57, %v489_v44 }
  0x9b   : > { %12425 = vst [vmem:[#allocation70_spill] sm:$0xff] %v9068_v45  ;;  %v9074_v63 = vld [vmem:[%s8681_s20 + $0x28] sm:$0xff]  ;;  %v856_v34 = vand.u32 2147483647, %v8768_v16  ;;  %12428 = vst [vmem:[#allocation73_spill] sm:$0xff] %v9080_v41  ;;  %v9083_v43 = vld [vmem:[%s8681_s20 + $0x38] sm:$0xff]  ;;  %v5536_v54 = vpack.c.bf16 %v499_v59, %v491_v62 }
  0x9c   : > { %12426 = vst [vmem:[#allocation71_spill] sm:$0xff] %v9074_v63  ;;  %v9077_v20 = vld [vmem:[%s8681_s20 + $0x68] sm:$0xff]  ;;  %v1041_v31 = vand.u32 2147483647, %v499_v59  ;;  %12429 = vst [vmem:[#allocation74_spill] sm:$0xff] %v9083_v43  ;;  %v9086_v2 = vld [vmem:[%s8681_s20 + $0x78] sm:$0xff]  ;;  %v9088_v9 = vpack.c.bf16 %v850_v0, %v842_v13  ;;  %5469 = vmatpush1.bf16.msra.mxu0 %v5468_v56  ;;  %v9122_v59 = vpack.c.bf16 %v1039_v25, %v1031_v55 }
  0x9d   : > { %12427 = vst [vmem:[#allocation72_spill] sm:$0xff] %v9077_v20  ;;  %12430 = vst [vmem:[#allocation75_spill] sm:$0xff] %v9086_v2  ;;  %v864_v37 = vand.u32 2147483647, %v8771_v17  ;;  %v858_v16 = vand.u32 2147483647, %v8778_v21  ;;  %5533 = vmatpush1.bf16.msra.mxu1 %v5532_v58  ;;  %5471 = vmatprep.subr.bf16.mxu0 %v5470_v51  ;;  %v5538_v42 = vpack.c.bf16 %v9077_v20, %v9074_v63 }
  0x9e   : > { %12431 = vst [vmem:[#allocation76_spill] sm:$0xff] %v9088_v9  ;;  %12432 = vst [vmem:[#allocation77_spill] sm:$0xff] %v9091_v4  ;;  %v9097_v13 = vld [vmem:[%s8681_s20 + $0x20] sm:$0xff]  ;;  %v9103_v27 = vld [vmem:[%s8681_s20 + $0x30] sm:$0xff]  ;;  %v866_v49 = vand.u32 2147483647, %v8781_v22  ;;  %5535 = vmatprep.subr.bf16.mxu1 %v5534_v6  ;;  %v5602_v58 = vpack.c.bf16 %v9086_v2, %v9083_v43  ;;  %v9136_v4 = vpack.c.bf16 %v1041_v31, %v1033_v12 }
  0x9f   : > { %12433 = vst [vmem:[#allocation78_spill] sm:$0xff] %v9097_v13  ;;  %v9100_v17 = vld [vmem:[%s8681_s20 + $0x60] sm:$0xff]  ;;  %12435 = vst [vmem:[#allocation80_spill] sm:$0xff] %v9103_v27  ;;  %v9105_v56 = vpack.c.bf16 %v864_v37, %v856_v34  ;;  %v9113_v44 = vld [vmem:[%s8681_s20 + $0x70] sm:$0xff]  ;;  %v872_v62 = vand.u32 2147483647, %v8796_v39 }
  0xa0   : > { %12434 = vst [vmem:[#allocation79_spill] sm:$0xff] %v9100_v17  ;;  %v9108_v21 = vld [vmem:[#allocation2] sm:$0xff]  ;;  %12438 = vst [vmem:[#allocation83_spill] sm:$0xff] %v9113_v44  ;;  %v9116_v57 = vld [vmem:[%s8681_s20 + $0xa8] sm:$0xff]  ;;  %v9133_v34 = vpack.c.bf16 %v866_v49, %v858_v16  ;;  %v880_v37 = vand.u32 2147483647, %v8799_v40  ;;  %5473 = vmatpush1.bf16.msra.mxu0 %v5472_v50  ;;  %v5540_v39 = vpack.c.bf16 %v9100_v17, %v9097_v13 }
  0xa1   : > { %12436 = vst [vmem:[#allocation81_spill] sm:$0xff] %v9105_v56  ;;  %12437 = vst [vmem:[#allocation82_spill] sm:$0xff] %v9108_v21  ;;  %v9119_v51 = vld [vmem:[%s8681_s20 + $0xe8] sm:$0xff]  ;;  %v9125_v22 = vld [vmem:[%s8681_s20 + $0xb8] sm:$0xff]  ;;  %v874_v16 = vand.u32 2147483647, %v8804_v47  ;;  %5537 = vmatpush1.bf16.msra.mxu1 %v5536_v54  ;;  %5539 = vmatprep.subr.bf16.mxu0 %v5538_v42  ;;  %v5604_v40 = vpack.c.bf16 %v9113_v44, %v9103_v27 }
  0xa2   : > { %12439 = vst [vmem:[#allocation84_spill] sm:$0xff] %v9116_v57  ;;  %12440 = vst [vmem:[#allocation85_spill] sm:$0xff] %v9119_v51  ;;  %v9128_v0 = vld [vmem:[%s8681_s20 + $0xf8] sm:$0xff]  ;;  %v9131_v6 = vld [vmem:[%s8681_s20 + $0xa0] sm:$0xff]  ;;  %v5542_v50 = vpack.c.bf16 %v9119_v51, %v9116_v57  ;;  %v9163_v47 = vpack.c.bf16 %v880_v37, %v872_v62  ;;  %v882_v54 = vand.u32 2147483647, %v8807_v48  ;;  %5603 = vmatprep.subr.bf16.mxu1 %v5602_v58 }
  0xa3   : > { %12441 = vst [vmem:[#allocation86_spill] sm:$0xff] %v9122_v59  ;;  %12442 = vst [vmem:[#allocation87_spill] sm:$0xff] %v9125_v22  ;;  %v9141_v55 = vld [vmem:[%s8681_s20 + $0xe0] sm:$0xff]  ;;  %v9144_v25 = vld [vmem:[%s8681_s20 + $0xb0] sm:$0xff]  ;;  %v5606_v42 = vpack.c.bf16 %v9128_v0, %v9125_v22  ;;  %v888_v56 = vand.u32 2147483647, %v8818_v61  ;;  %572 = vmatmul.mubr.f32.vlgmr.msra.gmra.mrb[0].mxu0 %v9108_v21 }
  0xa4   : > { %12443 = vst [vmem:[#allocation88_spill] sm:$0xff] %v9128_v0  ;;  %12444 = vst [vmem:[#allocation89_spill] sm:$0xff] %v9131_v6  ;;  %v9147_v59 = vld [vmem:[%s8681_s20 + $0xf0] sm:$0xff]  ;;  %v9155_v12 = vld [vmem:[%s8681_s20 + $0x128] sm:$0xff]  ;;  %v9197_v45 = vpack.c.bf16 %v882_v54, %v874_v16  ;;  %v896_v61 = vand.u32 2147483647, %v8821_v1  ;;  %643 = vmatmul.mubr.f32.vlgmr.msra.gmra.mrb[0].mxu1 %v9108_v21  ;;  %5541 = vmatpush1.bf16.msra.mxu0 %v5540_v39  ;;  %v5544_v52 = vpack.c.bf16 %v9141_v55, %v9131_v6 }
  0xa5   : > { %12445 = vst [vmem:[#allocation90_spill] sm:$0xff] %v9133_v34  ;;  %12446 = vst [vmem:[#allocation91_spill] sm:$0xff] %v9136_v4  ;;  %v9158_v31 = vld [vmem:[%s8681_s20 + $0x168] sm:$0xff]  ;;  %v9161_v49 = vld [vmem:[%s8681_s20 + $0x138] sm:$0xff]  ;;  %v890_v1 = vand.u32 2147483647, %v8824_v5  ;;  %5605 = vmatpush1.bf16.msra.mxu1 %v5604_v40  ;;  %5543 = vmatprep.subr.bf16.mxu0 %v5542_v50  ;;  %v5608_v39 = vpack.c.bf16 %v9147_v59, %v9144_v25 }
  0xa6   : > { %12447 = vst [vmem:[#allocation92_spill] sm:$0xff] %v9141_v55  ;;  %12448 = vst [vmem:[#allocation93_spill] sm:$0xff] %v9144_v25  ;;  %v9169_v4 = vld [vmem:[%s8681_s20 + $0x178] sm:$0xff]  ;;  %v9172_v41 = vld [vmem:[%s8681_s20 + $0x120] sm:$0xff]  ;;  %v5546_v54 = vpack.c.bf16 %v9158_v31, %v9155_v12  ;;  %5607 = vmatprep.subr.bf16.mxu1 %v5606_v42  ;;  %713 = vmatprep.mubr.f32.mxu0 %v9012_v24  ;;  %v930_v26 = vand.u32 2147483647, %v8875_v10 }
  0xa7   : > { %12449 = vst [vmem:[#allocation94_spill] sm:$0xff] %v9147_v59  ;;  %12450 = vst [vmem:[#allocation95_spill] sm:$0xff] %v9155_v12  ;;  %v9175_v34 = vld [vmem:[%s8681_s20 + $0x160] sm:$0xff]  ;;  %v9180_v62 = vld [vmem:[%s8681_s20 + $0x130] sm:$0xff]  ;;  %v9238_v59 = vpack.c.bf16 %v896_v61, %v888_v56  ;;  %v5610_v12 = vpack.c.bf16 %v9169_v4, %v9161_v49  ;;  %v904_v56 = vand.u32 2147483647, %v8840_v28  ;;  %784 = vmatprep.mubr.f32.mxu1 %v9012_v24 }
  0xa8   : > { %12451 = vst [vmem:[#allocation96_spill] sm:$0xff] %v9158_v31  ;;  %12452 = vst [vmem:[#allocation97_spill] sm:$0xff] %v9161_v49  ;;  %v9183_v48 = vld [vmem:[%s8681_s20 + $0x170] sm:$0xff]  ;;  %v9186_v58 = vld [vmem:[%s8681_s20 + $0x1a8] sm:$0xff]  ;;  %v898_v31 = vand.u32 2147483647, %v8827_v7  ;;  %v5548_v7 = vpack.c.bf16 %v9175_v34, %v9172_v41  ;;  %5545 = vmatpush1.bf16.msra.mxu0 %v5544_v52 }
  0xa9   : > { %12453 = vst [vmem:[#allocation98_spill] sm:$0xff] %v9163_v47  ;;  %12454 = vst [vmem:[#allocation99_spill] sm:$0xff] %v9169_v4  ;;  %v9189_v37 = vld [vmem:[%s8681_s20 + $0x1e8] sm:$0xff]  ;;  %v9192_v47 = vld [vmem:[%s8681_s20 + $0x1b8] sm:$0xff]  ;;  %v906_v52 = vand.u32 2147483647, %v8846_v33  ;;  %5609 = vmatpush1.bf16.msra.mxu1 %v5608_v39  ;;  %5547 = vmatprep.subr.bf16.mxu0 %v5546_v54 }
  0xaa   : > { %12455 = vst [vmem:[#allocation100_spill] sm:$0xff] %v9172_v41  ;;  %12456 = vst [vmem:[#allocation101_spill] sm:$0xff] %v9175_v34  ;;  %v9195_v9 = vld [vmem:[%s8681_s20 + $0x1f8] sm:$0xff]  ;;  %v9204_v0 = vld [vmem:[%s8681_s20 + $0x1a0] sm:$0xff]  ;;  %v9278_v28 = vpack.c.bf16 %v898_v31, %v890_v1  ;;  %v912_v34 = vand.u32 2147483647, %v8843_v29  ;;  %v5612_v41 = vpack.c.bf16 %v9183_v48, %v9180_v62  ;;  %v5550_v17 = vpack.c.bf16 %v9189_v37, %v9186_v58 }
  0xab   : > { %12457 = vst [vmem:[#allocation102_spill] sm:$0xff] %v9180_v62  ;;  %12458 = vst [vmem:[#allocation103_spill] sm:$0xff] %v9183_v48  ;;  %v9207_v22 = vld [vmem:[%s8681_s20 + $0x1e0] sm:$0xff]  ;;  %v9210_v51 = vld [vmem:[%s8681_s20 + $0x1b0] sm:$0xff]  ;;  %v5614_v24 = vpack.c.bf16 %v9195_v9, %v9192_v47  ;;  %5611 = vmatprep.subr.bf16.mxu1 %v5610_v12  ;;  %v928_v12 = vand.u32 2147483647, %v8867_v3 }
  0xac   : > { %12459 = vst [vmem:[#allocation104_spill] sm:$0xff] %v9186_v58  ;;  %12460 = vst [vmem:[#allocation105_spill] sm:$0xff] %v9189_v37  ;;  %v9213_v16 = vld [vmem:[%s8681_s20 + $0x1f0] sm:$0xff]  ;;  %v9224_v21 = vld [vmem:[%s8681_s20 + $0x268] sm:$0xff]  ;;  %v9322_v54 = vpack.c.bf16 %v912_v34, %v904_v56  ;;  %5549 = vmatpush1.bf16.msra.mxu0 %v5548_v7  ;;  %v922_v7 = vand.u32 2147483647, %v8872_v8 }
  0xad   : > { %12461 = vst [vmem:[#allocation106_spill] sm:$0xff] %v9192_v47  ;;  %12462 = vst [vmem:[#allocation107_spill] sm:$0xff] %v9195_v9  ;;  %v9227_v55 = vld [vmem:[%s8681_s20 + $0x238] sm:$0xff]  ;;  %v9233_v40 = vld [vmem:[%s8681_s20 + $0x220] sm:$0xff]  ;;  %v914_v9 = vand.u32 2147483647, %v8849_v35  ;;  %5613 = vmatpush1.bf16.msra.mxu1 %v5612_v41  ;;  %5551 = vmatprep.subr.bf16.mxu0 %v5550_v17 }
  0xae   : > { %12463 = vst [vmem:[#allocation108_spill] sm:$0xff] %v9197_v45  ;;  %12464 = vst [vmem:[#allocation109_spill] sm:$0xff] %v9204_v0  ;;  %v9221_v45 = vld [vmem:[%s8681_s20 + $0x228] sm:$0xff]  ;;  %v9230_v5 = vld [vmem:[%s8681_s20 + $0x278] sm:$0xff]  ;;  %v920_v35 = vand.u32 2147483647, %v8864_v60  ;;  %5615 = vmatprep.subr.bf16.mxu1 %v5614_v24 }
  0xaf   : > { %12465 = vst [vmem:[#allocation110_spill] sm:$0xff] %v9207_v22  ;;  %12466 = vst [vmem:[#allocation111_spill] sm:$0xff] %v9210_v51  ;;  %v9236_v50 = vld [vmem:[%s8681_s20 + $0x260] sm:$0xff]  ;;  %v9244_v25 = vld [vmem:[%s8681_s20 + $0x230] sm:$0xff]  ;;  %v9366_v32 = vpack.c.bf16 %v914_v9, %v906_v52  ;;  %v936_v10 = vand.u32 2147483647, %v8888_v11 }
  0xb0   : > { %12467 = vst [vmem:[#allocation112_spill] sm:$0xff] %v9213_v16  ;;  %12468 = vst [vmem:[#allocation113_spill] sm:$0xff] %v9221_v45  ;;  %v9247_v6 = vld [vmem:[%s8681_s20 + $0x270] sm:$0xff]  ;;  %v9250_v57 = vld [vmem:[%s8681_s20 + $0x2a8] sm:$0xff]  ;;  %v9410_v17 = vpack.c.bf16 %v928_v12, %v920_v35  ;;  %v944_v24 = vand.u32 2147483647, %v8891_v46 }
  0xb1   : > { %12469 = vst [vmem:[#allocation114_spill] sm:$0xff] %v9224_v21  ;;  %12470 = vst [vmem:[#allocation115_spill] sm:$0xff] %v9227_v55  ;;  %v9253_v44 = vld [vmem:[%s8681_s20 + $0x2e8] sm:$0xff]  ;;  %v9260_v42 = vld [vmem:[%s8681_s20 + $0x2b8] sm:$0xff] }
  0xb2   : > { %12471 = vst [vmem:[#allocation116_spill] sm:$0xff] %v9230_v5  ;;  %12472 = vst [vmem:[#allocation117_spill] sm:$0xff] %v9233_v40  ;;  %v9263_v61 = vld [vmem:[%s8681_s20 + $0x2f8] sm:$0xff]  ;;  %v9269_v4 = vld [vmem:[%s8681_s20 + $0x2e0] sm:$0xff] }
  0xb3   : > { %12473 = vst [vmem:[#allocation118_spill] sm:$0xff] %v9236_v50  ;;  %12474 = vst [vmem:[#allocation119_spill] sm:$0xff] %v9238_v59  ;;  %v9266_v59 = vld [vmem:[%s8681_s20 + $0x2a0] sm:$0xff]  ;;  %v9272_v49 = vld [vmem:[%s8681_s20 + $0x2b0] sm:$0xff] }
  0xb4   : > { %12475 = vst [vmem:[#allocation120_spill] sm:$0xff] %v9244_v25  ;;  %12476 = vst [vmem:[#allocation121_spill] sm:$0xff] %v9247_v6  ;;  %v9275_v27 = vld [vmem:[%s8681_s20 + $0x2f0] sm:$0xff]  ;;  %v9288_v13 = vld [vmem:[%s8681_s20 + $0x328] sm:$0xff] }
  0xb5   : > { %12477 = vst [vmem:[#allocation122_spill] sm:$0xff] %v9250_v57  ;;  %12478 = vst [vmem:[#allocation123_spill] sm:$0xff] %v9253_v44  ;;  %v9291_v31 = vld [vmem:[%s8681_s20 + $0x368] sm:$0xff]  ;;  %v9294_v1 = vld [vmem:[%s8681_s20 + $0x338] sm:$0xff] }
  0xb6   : > { %12479 = vst [vmem:[#allocation124_spill] sm:$0xff] %v9260_v42  ;;  %12480 = vst [vmem:[#allocation125_spill] sm:$0xff] %v9263_v61  ;;  %v9297_v29 = vld [vmem:[%s8681_s20 + $0x378] sm:$0xff]  ;;  %v9305_v47 = vld [vmem:[%s8681_s20 + $0x320] sm:$0xff] }
  0xb7   : > { %12481 = vst [vmem:[#allocation126_spill] sm:$0xff] %v9278_v28  ;;  %12482 = vst [vmem:[#allocation127_spill] sm:$0xff] %v9288_v13  ;;  %v9308_v37 = vld [vmem:[%s8681_s20 + $0x360] sm:$0xff]  ;;  %v9311_v58 = vld [vmem:[%s8681_s20 + $0x330] sm:$0xff] }
  0xb8   : > { %12483 = vst [vmem:[#allocation128_spill] sm:$0xff] %v9291_v31  ;;  %12484 = vst [vmem:[#allocation129_spill] sm:$0xff] %v9294_v1  ;;  %v9314_v48 = vld [vmem:[%s8681_s20 + $0x370] sm:$0xff]  ;;  %v9317_v33 = vld [vmem:[%s8681_s20 + $0x3a8] sm:$0xff]  ;;  %v12504_v1 = vpack.c.bf16 %v9207_v22, %v9204_v0 }
  0xb9   : > { %12485 = vst [vmem:[#allocation130_spill] sm:$0xff] %v9297_v29  ;;  %12486 = vst [vmem:[#allocation131_spill] sm:$0xff] %v9311_v58  ;;  %v9320_v39 = vld [vmem:[%s8681_s20 + $0x3e8] sm:$0xff]  ;;  %v9332_v43 = vld [vmem:[%s8681_s20 + $0x3b8] sm:$0xff]  ;;  %v9454_v58 = vpack.c.bf16 %v930_v26, %v922_v7 }
  0xba   : > { %12487 = vst [vmem:[#allocation132_spill] sm:$0xff] %v9314_v48  ;;  %12488 = vst [vmem:[#allocation133_spill] sm:$0xff] %v9317_v33  ;;  %v9335_v20 = vld [vmem:[%s8681_s20 + $0x3f8] sm:$0xff]  ;;  %v9338_v34 = vld [vmem:[%s8681_s20 + $0x3a0] sm:$0xff]  ;;  %5553 = vmatpush1.bf16.msra.mxu0 %v12504_v1  ;;  %v938_v1 = vand.u32 2147483647, %v8896_v38 }
  0xbb   : > { %12489 = vst [vmem:[#allocation134_spill] sm:$0xff] %v9320_v39  ;;  %12490 = vst [vmem:[#allocation135_spill] sm:$0xff] %v9322_v54  ;;  %v9341_v56 = vld [vmem:[%s8681_s20 + $0x3e0] sm:$0xff]  ;;  %v9349_v2 = vld [vmem:[%s8681_s20 + $0x3b0] sm:$0xff] }
  0xbc   : > { %12491 = vst [vmem:[#allocation136_spill] sm:$0xff] %v9332_v43  ;;  %12492 = vst [vmem:[#allocation137_spill] sm:$0xff] %v9335_v20  ;;  %v9352_v28 = vld [vmem:[%s8681_s20 + $0x3f0] sm:$0xff]  ;;  %v9355_v54 = vld [vmem:[%s8681_s20 + $0x428] sm:$0xff]  ;;  %v12508_v43 = vpack.c.bf16 %v9230_v5, %v9227_v55  ;;  %v960_v55 = vand.u32 2147483647, %v8915_v15 }
  0xbd   : > { %12493 = vst [vmem:[#allocation138_spill] sm:$0xff] %v9338_v34  ;;  %12494 = vst [vmem:[#allocation139_spill] sm:$0xff] %v9341_v56  ;;  %v9358_v63 = vld [vmem:[%s8681_s20 + $0x468] sm:$0xff]  ;;  %v9361_v18 = vld [vmem:[%s8681_s20 + $0x438] sm:$0xff]  ;;  %v12505_v34 = vpack.c.bf16 %v9213_v16, %v9210_v51  ;;  %v12506_v56 = vpack.c.bf16 %v9224_v21, %v9221_v45  ;;  %v9501_v21 = vpack.c.bf16 %v944_v24, %v936_v10 }
  0xbe   : > { %12495 = vst [vmem:[#allocation140_spill] sm:$0xff] %v9358_v63  ;;  %v9364_v60 = vld [vmem:[%s8681_s20 + $0x478] sm:$0xff]  ;;  %12496 = vst [vmem:[#allocation141_spill] sm:$0xff] %v9366_v32  ;;  %v9376_v30 = vld [vmem:[%s8681_s20 + $0x420] sm:$0xff]  ;;  %v12520_v24 = vpack.c.bf16 %v9253_v44, %v9250_v57 }
  0xbf   : > { %v9379_v9 = vld [vmem:[%s8681_s20 + $0x460] sm:$0xff]  ;;  %v9382_v52 = vld [vmem:[%s8681_s20 + $0x430] sm:$0xff]  ;;  %v9393_v62 = vld [vmem:[%s8681_s20 + $0x4a8] sm:$0xff]  ;;  %12499 = vst [vmem:[#allocation144_spill] sm:$0xff] %v9410_v17  ;;  %5617 = vmatpush1.bf16.msra.mxu1 %v12505_v34  ;;  %5555 = vmatprep.subr.bf16.mxu0 %v12506_v56  ;;  %v946_v56 = vand.u32 2147483647, %v8899_v36 }
  0xc0   : > { %12497 = vst [vmem:[#allocation142_spill] sm:$0xff] %v9382_v52  ;;  %v9385_v3 = vld [vmem:[%s8681_s20 + $0x470] sm:$0xff]  ;;  %v9396_v32 = vld [vmem:[%s8681_s20 + $0x4e8] sm:$0xff]  ;;  %v9399_v19 = vld [vmem:[%s8681_s20 + $0x4b8] sm:$0xff]  ;;  %5619 = vmatprep.subr.bf16.mxu1 %v12508_v43  ;;  %v952_v43 = vand.u32 2147483647, %v8912_v14  ;;  %v12514_v14 = vpack.c.bf16 %v9236_v50, %v9233_v40 }
  0xc1   : > { %v9402_v23 = vld [vmem:[%s8681_s20 + $0x4f8] sm:$0xff]  ;;  %v9405_v8 = vld [vmem:[%s8681_s20 + $0x4a0] sm:$0xff]  ;;  %v9420_v13 = vld [vmem:[%s8681_s20 + $0x4b0] sm:$0xff]  ;;  %12503 = vst [vmem:[#allocation148_spill] sm:$0xff] %v9454_v58  ;;  %v9536_v5 = vpack.c.bf16 %v946_v56, %v938_v1 }
  0xc2   : > { %12498 = vst [vmem:[#allocation143_spill] sm:$0xff] %v9402_v23  ;;  %v9408_v41 = vld [vmem:[%s8681_s20 + $0x4e0] sm:$0xff]  ;;  %v9423_v31 = vld [vmem:[%s8681_s20 + $0x4f0] sm:$0xff]  ;;  %v9426_v35 = vld [vmem:[%s8681_s20 + $0x528] sm:$0xff]  ;;  %5557 = vmatpush1.bf16.msra.mxu0 %v12514_v14  ;;  %v12519_v14 = vpack.c.bf16 %v9247_v6, %v9244_v25 }
  0xc3   : > { %12500 = vst [vmem:[#allocation145_spill] sm:$0xff] %v9426_v35  ;;  %v9429_v12 = vld [vmem:[%s8681_s20 + $0x568] sm:$0xff]  ;;  %v9437_v29 = vld [vmem:[%s8681_s20 + $0x538] sm:$0xff]  ;;  %v9443_v17 = vld [vmem:[%s8681_s20 + $0x520] sm:$0xff]  ;;  %5559 = vmatprep.subr.bf16.mxu0 %v12520_v24  ;;  %v12526_v24 = vpack.c.bf16 %v9263_v61, %v9260_v42 }
  0xc4   : > { %12501 = vst [vmem:[#allocation146_spill] sm:$0xff] %v9429_v12  ;;  %v9440_v53 = vld [vmem:[%s8681_s20 + $0x578] sm:$0xff]  ;;  %v9446_v33 = vld [vmem:[%s8681_s20 + $0x560] sm:$0xff]  ;;  %v9449_v39 = vld [vmem:[%s8681_s20 + $0x530] sm:$0xff]  ;;  %5621 = vmatpush1.bf16.msra.mxu1 %v12519_v14  ;;  %v9577_v14 = vpack.c.bf16 %v960_v55, %v952_v43 }
  0xc5   : > { %12502 = vst [vmem:[#allocation147_spill] sm:$0xff] %v9440_v53  ;;  %v9452_v11 = vld [vmem:[%s8681_s20 + $0x570] sm:$0xff]  ;;  %v9467_v26 = vld [vmem:[%s8681_s20 + $0x5a8] sm:$0xff]  ;;  %v9473_v46 = vld [vmem:[%s8681_s20 + $0x5b8] sm:$0xff]  ;;  %5623 = vmatprep.subr.bf16.mxu1 %v12526_v24 }
  0xc6   : > { %v9470_v7 = vld [vmem:[%s8681_s20 + $0x5e8] sm:$0xff]  ;;  %v9476_v58 = vld [vmem:[%s8681_s20 + $0x5f8] sm:$0xff]  ;;  %v9490_v0 = vld [vmem:[%s8681_s20 + $0x5a0] sm:$0xff]  ;;  %12507 = vst [vmem:[#allocation149_spill] sm:$0xff] %v9501_v21 }
  0xc7   : > { %v9493_v38 = vld [vmem:[%s8681_s20 + $0x5e0] sm:$0xff]  ;;  %v9496_v16 = vld [vmem:[%s8681_s20 + $0x5b0] sm:$0xff]  ;;  %v9514_v52 = vld [vmem:[%s8681_s20 + $0x628] sm:$0xff]  ;;  %12513 = vst [vmem:[#allocation154_spill] sm:$0xff] %v9536_v5 }
  0xc8   : > { %v9499_v34 = vld [vmem:[%s8681_s20 + $0x5f0] sm:$0xff]  ;;  %12509 = vst [vmem:[#allocation150_spill] sm:$0xff] %v9514_v52  ;;  %v9517_v10 = vld [vmem:[%s8681_s20 + $0x668] sm:$0xff]  ;;  %v9520_v36 = vld [vmem:[%s8681_s20 + $0x638] sm:$0xff] }
  0xc9   : > { %12510 = vst [vmem:[#allocation151_spill] sm:$0xff] %v9517_v10  ;;  %v9528_v22 = vld [vmem:[%s8681_s20 + $0x678] sm:$0xff]  ;;  %v9531_v51 = vld [vmem:[%s8681_s20 + $0x620] sm:$0xff]  ;;  %v9549_v12 = vld [vmem:[%s8681_s20 + $0x630] sm:$0xff] }
  0xca   : > { %12511 = vst [vmem:[#allocation152_spill] sm:$0xff] %v9531_v51  ;;  %v9534_v21 = vld [vmem:[%s8681_s20 + $0x660] sm:$0xff]  ;;  %12515 = vst [vmem:[#allocation155_spill] sm:$0xff] %v9549_v12  ;;  %v9552_v1 = vld [vmem:[%s8681_s20 + $0x670] sm:$0xff] }
  0xcb   : > { %12512 = vst [vmem:[#allocation153_spill] sm:$0xff] %v9534_v21  ;;  %12516 = vst [vmem:[#allocation156_spill] sm:$0xff] %v9552_v1  ;;  %v9555_v56 = vld [vmem:[%s8681_s20 + $0x6a8] sm:$0xff]  ;;  %v12518_v15 = vld [vmem:[#allocation34_spill] sm:$0xff] }
  0xcc   : > { %12517 = vst [vmem:[#allocation157_spill] sm:$0xff] %v9555_v56  ;;  %v954_v5 = vand.u32 2147483647, %v12518_v15  ;;  %v9569_v50 = vld [vmem:[%s8681_s20 + $0x6e8] sm:$0xff]  ;;  %v9572_v15 = vld [vmem:[%s8681_s20 + $0x6b8] sm:$0xff]  ;;  %12524 = vst [vmem:[#allocation160_spill] sm:$0xff] %v9577_v14 }
  0xcd   : > { %12521 = vst [vmem:[#allocation34_spill] sm:$0xff] %v9569_v50  ;;  %12522 = vst [vmem:[#allocation158_spill] sm:$0xff] %v9572_v15  ;;  %v9575_v6 = vld [vmem:[%s8681_s20 + $0x6f8] sm:$0xff]  ;;  %v12525_v25 = vld [vmem:[#allocation35_spill] sm:$0xff] }
  0xce   : > { %12523 = vst [vmem:[#allocation159_spill] sm:$0xff] %v9575_v6  ;;  %v962_v44 = vand.u32 2147483647, %v12525_v25  ;;  %v9590_v40 = vld [vmem:[%s8681_s20 + $0x6a0] sm:$0xff]  ;;  %v9596_v25 = vld [vmem:[%s8681_s20 + $0x6b0] sm:$0xff]  ;;  %v9607_v57 = vld [vmem:[%s8681_s20 + $0x728] sm:$0xff] }
  0xcf   : > { %12527 = vst [vmem:[#allocation35_spill] sm:$0xff] %v9590_v40  ;;  %v9593_v55 = vld [vmem:[%s8681_s20 + $0x6e0] sm:$0xff]  ;;  %12529 = vst [vmem:[#allocation162_spill] sm:$0xff] %v9596_v25  ;;  %v9604_v14 = vld [vmem:[%s8681_s20 + $0x6f0] sm:$0xff] }
  0xd0   : > { %12528 = vst [vmem:[#allocation161_spill] sm:$0xff] %v9593_v55  ;;  %v12530_v43 = vld [vmem:[#allocation38_spill] sm:$0xff]  ;;  %12532 = vst [vmem:[#allocation163_spill] sm:$0xff] %v9607_v57  ;;  %v9610_v61 = vld [vmem:[%s8681_s20 + $0x768] sm:$0xff]  ;;  %v9612_v42 = vpack.c.bf16 %v962_v44, %v954_v5  ;;  %v12562_v57 = vpack.c.bf16 %v9308_v37, %v9305_v47 }
  0xd1   : > { %v968_v24 = vand.u32 2147483647, %v12530_v43  ;;  %12531 = vst [vmem:[#allocation38_spill] sm:$0xff] %v9604_v14  ;;  %12533 = vst [vmem:[#allocation164_spill] sm:$0xff] %v9610_v61  ;;  %v12535_v52 = vld [vmem:[#allocation39_spill] sm:$0xff]  ;;  %v12536_v43 = vpack.c.bf16 %v9269_v4, %v9266_v59  ;;  %v9625_v21 = vld [vmem:[%s8681_s20 + $0x738] sm:$0xff] }
  0xd2   : > { %12534 = vst [vmem:[#allocation165_spill] sm:$0xff] %v9612_v42  ;;  %v976_v10 = vand.u32 2147483647, %v12535_v52  ;;  %12537 = vst [vmem:[#allocation39_spill] sm:$0xff] %v9625_v21  ;;  %v9628_v44 = vld [vmem:[%s8681_s20 + $0x778] sm:$0xff]  ;;  %v9631_v5 = vld [vmem:[%s8681_s20 + $0x720] sm:$0xff] }
  0xd3   : > { %5561 = vmatpush1.bf16.msra.mxu0 %v12536_v43  ;;  %12538 = vst [vmem:[#allocation166_spill] sm:$0xff] %v9628_v44  ;;  %12539 = vst [vmem:[#allocation167_spill] sm:$0xff] %v9631_v5  ;;  %v12540_v52 = vld [vmem:[#allocation41_spill] sm:$0xff]  ;;  %v12541_v43 = vpack.c.bf16 %v9275_v27, %v9272_v49  ;;  %v12542_v35 = vld [vmem:[#allocation128_spill] sm:$0xff] }
  0xd4   : > { %v970_v42 = vand.u32 2147483647, %v12540_v52  ;;  %v12543_v45 = vld [vmem:[#allocation127_spill] sm:$0xff]  ;;  %v9645_v6 = vld [vmem:[%s8681_s20 + $0x760] sm:$0xff]  ;;  %v9648_v52 = vld [vmem:[%s8681_s20 + $0x730] sm:$0xff] }
  0xd5   : > { %5625 = vmatpush1.bf16.msra.mxu1 %v12541_v43  ;;  %v12544_v56 = vpack.c.bf16 %v12542_v35, %v12543_v45  ;;  %12545 = vst [vmem:[#allocation41_spill] sm:$0xff] %v9645_v6  ;;  %12546 = vst [vmem:[#allocation168_spill] sm:$0xff] %v9648_v52  ;;  %v9651_v50 = vld [vmem:[%s8681_s20 + $0x770] sm:$0xff]  ;;  %v9653_v43 = vpack.c.bf16 %v976_v10, %v968_v24  ;;  %v12549_v12 = vld [vmem:[#allocation42_spill] sm:$0xff] }
  0xd6   : > { %12547 = vst [vmem:[#allocation169_spill] sm:$0xff] %v9651_v50  ;;  %v978_v1 = vand.u32 2147483647, %v12549_v12  ;;  %v12551_v35 = vld [vmem:[#allocation129_spill] sm:$0xff]  ;;  %v9666_v14 = vld [vmem:[%s8681_s20 + $0x7a8] sm:$0xff]  ;;  %v12556_v24 = vld [vmem:[#allocation44_spill] sm:$0xff] }
  0xd7   : > { %5563 = vmatprep.subr.bf16.mxu0 %v12544_v56  ;;  %12548 = vst [vmem:[#allocation170_spill] sm:$0xff] %v9653_v43  ;;  %v12550_v56 = vld [vmem:[#allocation130_spill] sm:$0xff]  ;;  %12553 = vst [vmem:[#allocation42_spill] sm:$0xff] %v9666_v14  ;;  %v9669_v10 = vld [vmem:[%s8681_s20 + $0x7e8] sm:$0xff]  ;;  %v984_v43 = vand.u32 2147483647, %v12556_v24 }
  0xd8   : > { %v12552_v45 = vpack.c.bf16 %v12550_v56, %v12551_v35  ;;  %12554 = vst [vmem:[#allocation130_spill] sm:$0xff] %v9669_v10  ;;  %v9672_v12 = vld [vmem:[%s8681_s20 + $0x7b8] sm:$0xff]  ;;  %v9683_v21 = vld [vmem:[%s8681_s20 + $0x7a0] sm:$0xff]  ;;  %v9688_v5 = vpack.c.bf16 %v978_v1, %v970_v42  ;;  %5565 = vmatpush1.bf16.msra.mxu0 %v12562_v57  ;;  %v9702_v14 = vld [vmem:[%s8681_s20 + $0x7f0] sm:$0xff] }
  0xd9   : > { %12555 = vst [vmem:[#allocation129_spill] sm:$0xff] %v9672_v12  ;;  %v9680_v51 = vld [vmem:[%s8681_s20 + $0x7f8] sm:$0xff]  ;;  %12558 = vst [vmem:[#allocation171_spill] sm:$0xff] %v9683_v21  ;;  %v9686_v25 = vld [vmem:[%s8681_s20 + $0x7e0] sm:$0xff] }
  0xda   : > { %5627 = vmatprep.subr.bf16.mxu1 %v12552_v45  ;;  %12557 = vst [vmem:[#allocation44_spill] sm:$0xff] %v9680_v51  ;;  %12559 = vst [vmem:[#allocation172_spill] sm:$0xff] %v9686_v25  ;;  %v12561_v6 = vld [vmem:[#allocation45_spill] sm:$0xff]  ;;  %v9699_v45 = vld [vmem:[%s8681_s20 + $0x7b0] sm:$0xff] }
  0xdb   : > { %12560 = vst [vmem:[#allocation173_spill] sm:$0xff] %v9688_v5  ;;  %v992_v44 = vand.u32 2147483647, %v12561_v6  ;;  %12563 = vst [vmem:[#allocation45_spill] sm:$0xff] %v9699_v45  ;;  %v12565_v10 = vld [vmem:[#allocation47_spill] sm:$0xff]  ;;  %v12566_v42 = vld [vmem:[#allocation48_spill] sm:$0xff] }
  0xdc   : > { %12564 = vst [vmem:[#allocation174_spill] sm:$0xff] %v9702_v14  ;;  %v986_v52 = vand.u32 2147483647, %v12565_v10  ;;  %v994_v1 = vand.u32 2147483647, %v12566_v42  ;;  %v12567_v6 = vld [vmem:[#allocation131_spill] sm:$0xff] }
  0xdd   : > { %v12568_v5 = vpack.c.bf16 %v9314_v48, %v12567_v6  ;;  %v12569_v50 = vld [vmem:[#allocation134_spill] sm:$0xff]  ;;  %v12570_v57 = vld [vmem:[#allocation133_spill] sm:$0xff]  ;;  %v9714_v15 = vpack.c.bf16 %v992_v44, %v984_v43  ;;  %v12574_v12 = vld [vmem:[#allocation51_spill] sm:$0xff] }
  0xde   : > { %v12571_v61 = vpack.c.bf16 %v12569_v50, %v12570_v57  ;;  %v12573_v21 = vld [vmem:[#allocation50_spill] sm:$0xff]  ;;  %v1008_v51 = vand.u32 2147483647, %v12574_v12  ;;  %v12575_v10 = vld [vmem:[#allocation136_spill] sm:$0xff]  ;;  %v9721_v40 = vpack.c.bf16 %v994_v1, %v986_v52  ;;  %v12579_v48 = vld [vmem:[#allocation53_spill] sm:$0xff] }
  0xdf   : > { %5629 = vmatpush1.bf16.msra.mxu1 %v12568_v5  ;;  %12572 = vst [vmem:[#allocation47_spill] sm:$0xff] %v9714_v15  ;;  %v1000_v25 = vand.u32 2147483647, %v12573_v21  ;;  %v12576_v42 = vpack.c.bf16 %v9335_v20, %v12575_v10  ;;  %v12578_v5 = vld [vmem:[#allocation52_spill] sm:$0xff]  ;;  %v1010_v50 = vand.u32 2147483647, %v12579_v48 }
  0xe0   : > { %5567 = vmatprep.subr.bf16.mxu0 %v12571_v61  ;;  %12577 = vst [vmem:[#allocation48_spill] sm:$0xff] %v9721_v40  ;;  %v1002_v55 = vand.u32 2147483647, %v12578_v5  ;;  %v12580_v61 = vld [vmem:[#allocation56_spill] sm:$0xff]  ;;  %v12582_v44 = vld [vmem:[#allocation57_spill] sm:$0xff]  ;;  %v12583_v24 = vld [vmem:[#allocation58_spill] sm:$0xff] }
  0xe1   : > { %5631 = vmatprep.subr.bf16.mxu1 %v12576_v42  ;;  %v1016_v57 = vand.u32 2147483647, %v12580_v61  ;;  %v9726_v6 = vpack.c.bf16 %v1008_v51, %v1000_v25  ;;  %v1024_v43 = vand.u32 2147483647, %v12582_v44  ;;  %v1018_v21 = vand.u32 2147483647, %v12583_v24 }
  0xe2   : > { %v12584_v15 = vld [vmem:[#allocation60_spill] sm:$0xff]  ;;  %v12585_v45 = vld [vmem:[#allocation139_spill] sm:$0xff]  ;;  %v12586_v14 = vld [vmem:[#allocation138_spill] sm:$0xff]  ;;  %v9734_v52 = vpack.c.bf16 %v1010_v50, %v1002_v55  ;;  %v12592_v51 = vpack.c.bf16 %v9352_v28, %v9349_v2  ;;  %v12593_v25 = vpack.c.bf16 %v9358_v63, %v9355_v54 }
  0xe3   : > { %12581 = vst [vmem:[#allocation50_spill] sm:$0xff] %v9726_v6  ;;  %v1026_v12 = vand.u32 2147483647, %v12584_v15  ;;  %v12587_v20 = vpack.c.bf16 %v12585_v45, %v12586_v14  ;;  %v12589_v1 = vld [vmem:[#allocation63_spill] sm:$0xff]  ;;  %v12590_v5 = vld [vmem:[#allocation64_spill] sm:$0xff]  ;;  %v12591_v40 = vld [vmem:[#allocation66_spill] sm:$0xff]  ;;  %v9745_v15 = vpack.c.bf16 %v1024_v43, %v1016_v57 }
  0xe4   : > { %12588 = vst [vmem:[#allocation51_spill] sm:$0xff] %v9734_v52  ;;  %v1032_v42 = vand.u32 2147483647, %v12589_v1  ;;  %v1040_v48 = vand.u32 2147483647, %v12590_v5  ;;  %5633 = vmatpush1.bf16.msra.mxu1 %v12592_v51  ;;  %v12597_v55 = vld [vmem:[#allocation71_spill] sm:$0xff]  ;;  %v12598_v1 = vpack.c.bf16 %v9364_v60, %v9361_v18 }
  0xe5   : > { %5569 = vmatpush1.bf16.msra.mxu0 %v12587_v20  ;;  %v1034_v61 = vand.u32 2147483647, %v12591_v40  ;;  %12594 = vst [vmem:[#allocation136_spill] sm:$0xff] %v9745_v15  ;;  %v9747_v24 = vpack.c.bf16 %v1026_v12, %v1018_v21  ;;  %v12596_v20 = vld [vmem:[#allocation67_spill] sm:$0xff]  ;;  %v796_v44 = vand.u32 2147483647, %v12597_v55  ;;  %v12607_v15 = vpack.c.bf16 %v9379_v9, %v9376_v30 }
  0xe6   : > { %5571 = vmatprep.subr.bf16.mxu0 %v12593_v25  ;;  %v1042_v50 = vand.u32 2147483647, %v12596_v20  ;;  %5635 = vmatprep.subr.bf16.mxu1 %v12598_v1  ;;  %v9754_v40 = vpack.c.bf16 %v1040_v48, %v1032_v42  ;;  %v12600_v5 = vld [vmem:[#allocation72_spill] sm:$0xff]  ;;  %v12601_v52 = vld [vmem:[#allocation74_spill] sm:$0xff]  ;;  %v12602_v63 = vld [vmem:[#allocation75_spill] sm:$0xff] }
  0xe7   : > { %12595 = vst [vmem:[#allocation52_spill] sm:$0xff] %v9747_v24  ;;  %v804_v51 = vand.u32 2147483647, %v12600_v5  ;;  %v798_v6 = vand.u32 2147483647, %v12601_v52  ;;  %v12604_v43 = vld [vmem:[#allocation78_spill] sm:$0xff] }
  0xe8   : > { %12599 = vst [vmem:[#allocation53_spill] sm:$0xff] %v9754_v40  ;;  %v806_v25 = vand.u32 2147483647, %v12602_v63  ;;  %v9759_v57 = vpack.c.bf16 %v1042_v50, %v1034_v61  ;;  %v795_v21 = vand.u32 2147483647, %v12604_v43  ;;  %v12605_v12 = vld [vmem:[#allocation79_spill] sm:$0xff]  ;;  %v12614_v43 = vpack.c.bf16 %v9396_v32, %v9393_v62 }
  0xe9   : > { %v803_v20 = vand.u32 2147483647, %v12605_v12  ;;  %v12606_v24 = vld [vmem:[#allocation80_spill] sm:$0xff]  ;;  %5573 = vmatpush1.bf16.msra.mxu0 %v12607_v15  ;;  %v9767_v42 = vpack.c.bf16 %v804_v51, %v796_v44  ;;  %v12610_v1 = vld [vmem:[#allocation83_spill] sm:$0xff]  ;;  %v12612_v61 = vld [vmem:[#allocation142_spill] sm:$0xff] }
  0xea   : > { %12603 = vst [vmem:[#allocation56_spill] sm:$0xff] %v9759_v57  ;;  %v797_v55 = vand.u32 2147483647, %v12606_v24  ;;  %v9769_v48 = vpack.c.bf16 %v806_v25, %v798_v6  ;;  %v805_v52 = vand.u32 2147483647, %v12610_v1  ;;  %v12611_v5 = vld [vmem:[#allocation84_spill] sm:$0xff]  ;;  %v12613_v50 = vpack.c.bf16 %v9385_v3, %v12612_v61  ;;  %5575 = vmatprep.subr.bf16.mxu0 %v12614_v43 }
  0xeb   : > { %12608 = vst [vmem:[#allocation57_spill] sm:$0xff] %v9767_v42  ;;  %v812_v63 = vand.u32 2147483647, %v12611_v5  ;;  %v9779_v24 = vpack.c.bf16 %v803_v20, %v795_v21  ;;  %v12616_v12 = vld [vmem:[#allocation85_spill] sm:$0xff]  ;;  %v12617_v44 = vld [vmem:[#allocation87_spill] sm:$0xff]  ;;  %v12618_v6 = vld [vmem:[#allocation88_spill] sm:$0xff]  ;;  %v12619_v1 = vpack.c.bf16 %v9402_v23, %v9399_v19  ;;  %v12628_v23 = vpack.c.bf16 %v9408_v41, %v9405_v8 }
  0xec   : > { %12609 = vst [vmem:[#allocation58_spill] sm:$0xff] %v9769_v48  ;;  %5637 = vmatpush1.bf16.msra.mxu1 %v12613_v50  ;;  %v820_v15 = vand.u32 2147483647, %v12616_v12  ;;  %v814_v51 = vand.u32 2147483647, %v12617_v44  ;;  %v9787_v5 = vpack.c.bf16 %v805_v52, %v797_v55  ;;  %v12621_v48 = vld [vmem:[#allocation89_spill] sm:$0xff] }
  0xed   : > { %12615 = vst [vmem:[#allocation60_spill] sm:$0xff] %v9779_v24  ;;  %v822_v25 = vand.u32 2147483647, %v12618_v6  ;;  %5639 = vmatprep.subr.bf16.mxu1 %v12619_v1  ;;  %v811_v50 = vand.u32 2147483647, %v12621_v48  ;;  %v12622_v42 = vld [vmem:[#allocation92_spill] sm:$0xff]  ;;  %5577 = vmatpush1.bf16.msra.mxu0 %v12628_v23 }
  0xee   : > { %12620 = vst [vmem:[#allocation139_spill] sm:$0xff] %v9787_v5  ;;  %v819_v57 = vand.u32 2147483647, %v12622_v42  ;;  %v12623_v40 = vld [vmem:[#allocation93_spill] sm:$0xff]  ;;  %v9792_v21 = vpack.c.bf16 %v820_v15, %v812_v63  ;;  %v12626_v12 = vld [vmem:[#allocation94_spill] sm:$0xff]  ;;  %v12627_v24 = vld [vmem:[#allocation95_spill] sm:$0xff]  ;;  %v12633_v63 = vpack.c.bf16 %v9423_v31, %v9420_v13 }
  0xef   : > { %v813_v43 = vand.u32 2147483647, %v12623_v40  ;;  %v9794_v20 = vpack.c.bf16 %v822_v25, %v814_v51  ;;  %v821_v44 = vand.u32 2147483647, %v12626_v12  ;;  %v828_v6 = vand.u32 2147483647, %v12627_v24 }
  0xf0   : > { %12624 = vst [vmem:[#allocation138_spill] sm:$0xff] %v9792_v21  ;;  %v9801_v55 = vpack.c.bf16 %v819_v57, %v811_v50  ;;  %v12630_v52 = vld [vmem:[#allocation96_spill] sm:$0xff]  ;;  %v12631_v1 = vld [vmem:[#allocation97_spill] sm:$0xff]  ;;  %v12632_v5 = vld [vmem:[#allocation99_spill] sm:$0xff]  ;;  %5641 = vmatpush1.bf16.msra.mxu1 %v12633_v63 }
  0xf1   : > { %12625 = vst [vmem:[#allocation63_spill] sm:$0xff] %v9794_v20  ;;  %v836_v48 = vand.u32 2147483647, %v12630_v52  ;;  %v830_v42 = vand.u32 2147483647, %v12631_v1  ;;  %v12634_v15 = vld [vmem:[#allocation146_spill] sm:$0xff]  ;;  %v9812_v24 = vpack.c.bf16 %v821_v44, %v813_v43  ;;  %v12641_v1 = vpack.c.bf16 %v9440_v53, %v9437_v29 }
  0xf2   : > { %12629 = vst [vmem:[#allocation64_spill] sm:$0xff] %v9801_v55  ;;  %v838_v40 = vand.u32 2147483647, %v12632_v5  ;;  %v12635_v51 = vld [vmem:[#allocation145_spill] sm:$0xff]  ;;  %v12638_v12 = vld [vmem:[#allocation100_spill] sm:$0xff]  ;;  %v12640_v55 = vld [vmem:[#allocation102_spill] sm:$0xff]  ;;  %v12650_v53 = vpack.c.bf16 %v9446_v33, %v9443_v17 }
  0xf3   : > { %v12636_v25 = vpack.c.bf16 %v12634_v15, %v12635_v51  ;;  %12637 = vst [vmem:[#allocation66_spill] sm:$0xff] %v9812_v24  ;;  %v827_v23 = vand.u32 2147483647, %v12638_v12  ;;  %v12639_v57 = vld [vmem:[#allocation101_spill] sm:$0xff]  ;;  %v829_v52 = vand.u32 2147483647, %v12640_v55  ;;  %5643 = vmatprep.subr.bf16.mxu1 %v12641_v1  ;;  %v9820_v5 = vpack.c.bf16 %v836_v48, %v828_v6 }
  0xf4   : > { %v835_v50 = vand.u32 2147483647, %v12639_v57  ;;  %v9822_v20 = vpack.c.bf16 %v838_v40, %v830_v42  ;;  %v12644_v63 = vld [vmem:[#allocation103_spill] sm:$0xff]  ;;  %v12645_v15 = vld [vmem:[#allocation104_spill] sm:$0xff]  ;;  %v12647_v44 = vld [vmem:[#allocation105_spill] sm:$0xff] }
  0xf5   : > { %5579 = vmatprep.subr.bf16.mxu0 %v12636_v25  ;;  %12642 = vst [vmem:[#allocation67_spill] sm:$0xff] %v9820_v5  ;;  %v837_v21 = vand.u32 2147483647, %v12644_v63  ;;  %v844_v25 = vand.u32 2147483647, %v12645_v15  ;;  %v12648_v24 = vld [vmem:[#allocation106_spill] sm:$0xff] }
  0xf6   : > { %12643 = vst [vmem:[#allocation71_spill] sm:$0xff] %v9822_v20  ;;  %v9826_v43 = vpack.c.bf16 %v835_v50, %v827_v23  ;;  %v852_v12 = vand.u32 2147483647, %v12647_v44  ;;  %v846_v57 = vand.u32 2147483647, %v12648_v24  ;;  %v12649_v51 = vld [vmem:[#allocation107_spill] sm:$0xff]  ;;  %5581 = vmatpush1.bf16.msra.mxu0 %v12650_v53  ;;  %v12655_v23 = vpack.c.bf16 %v9452_v11, %v9449_v39 }
  0xf7   : > { %v854_v55 = vand.u32 2147483647, %v12649_v51  ;;  %v9834_v6 = vpack.c.bf16 %v837_v21, %v829_v52  ;;  %v12652_v48 = vld [vmem:[#allocation109_spill] sm:$0xff]  ;;  %v12653_v40 = vld [vmem:[#allocation110_spill] sm:$0xff]  ;;  %v12654_v63 = vld [vmem:[#allocation111_spill] sm:$0xff]  ;;  %v12656_v24 = vpack.c.bf16 %v9470_v7, %v9467_v26 }
  0xf8   : > { %12646 = vst [vmem:[#allocation72_spill] sm:$0xff] %v9826_v43  ;;  %v843_v42 = vand.u32 2147483647, %v12652_v48  ;;  %v851_v1 = vand.u32 2147483647, %v12653_v40  ;;  %5645 = vmatpush1.bf16.msra.mxu1 %v12655_v23  ;;  %v9845_v51 = vpack.c.bf16 %v852_v12, %v844_v25  ;;  %v12659_v53 = vld [vmem:[#allocation112_spill] sm:$0xff]  ;;  %v12661_v48 = vpack.c.bf16 %v9476_v58, %v9473_v46 }
  0xf9   : > { %12651 = vst [vmem:[#allocation74_spill] sm:$0xff] %v9834_v6  ;;  %v845_v15 = vand.u32 2147483647, %v12654_v63  ;;  %5583 = vmatprep.subr.bf16.mxu0 %v12656_v24  ;;  %v9847_v50 = vpack.c.bf16 %v854_v55, %v846_v57  ;;  %v853_v21 = vand.u32 2147483647, %v12659_v53  ;;  %v12660_v52 = vld [vmem:[#allocation113_spill] sm:$0xff] }
  0xfa   : > { %12657 = vst [vmem:[#allocation75_spill] sm:$0xff] %v9845_v51  ;;  %v860_v44 = vand.u32 2147483647, %v12660_v52  ;;  %5647 = vmatprep.subr.bf16.mxu1 %v12661_v48  ;;  %v9854_v40 = vpack.c.bf16 %v851_v1, %v843_v42  ;;  %v12663_v63 = vld [vmem:[#allocation114_spill] sm:$0xff]  ;;  %v12664_v6 = vld [vmem:[#allocation115_spill] sm:$0xff]  ;;  %v12665_v20 = vld [vmem:[#allocation116_spill] sm:$0xff]  ;;  %v12670_v51 = vpack.c.bf16 %v9493_v38, %v9490_v0 }
  0xfb   : > { %12658 = vst [vmem:[#allocation78_spill] sm:$0xff] %v9847_v50  ;;  %v868_v23 = vand.u32 2147483647, %v12663_v63  ;;  %v862_v43 = vand.u32 2147483647, %v12664_v6  ;;  %v9859_v25 = vpack.c.bf16 %v853_v21, %v845_v15  ;;  %v12667_v12 = vld [vmem:[#allocation117_spill] sm:$0xff]  ;;  %v12675_v15 = vpack.c.bf16 %v9499_v34, %v9496_v16 }
  0xfc   : > { %12662 = vst [vmem:[#allocation79_spill] sm:$0xff] %v9854_v40  ;;  %v870_v24 = vand.u32 2147483647, %v12665_v20  ;;  %v859_v57 = vand.u32 2147483647, %v12667_v12  ;;  %v12668_v55 = vld [vmem:[#allocation118_spill] sm:$0xff]  ;;  %5585 = vmatpush1.bf16.msra.mxu0 %v12670_v51 }
  0xfd   : > { %12666 = vst [vmem:[#allocation80_spill] sm:$0xff] %v9859_v25  ;;  %v867_v53 = vand.u32 2147483647, %v12668_v55  ;;  %v12669_v50 = vld [vmem:[#allocation120_spill] sm:$0xff]  ;;  %v9867_v42 = vpack.c.bf16 %v868_v23, %v860_v44  ;;  %v12673_v48 = vld [vmem:[#allocation121_spill] sm:$0xff]  ;;  %v12674_v63 = vld [vmem:[#allocation122_spill] sm:$0xff]  ;;  %5649 = vmatpush1.bf16.msra.mxu1 %v12675_v15 }
  0xfe   : > { %v861_v52 = vand.u32 2147483647, %v12669_v50  ;;  %v9869_v1 = vpack.c.bf16 %v870_v24, %v862_v43  ;;  %v869_v6 = vand.u32 2147483647, %v12673_v48  ;;  %v876_v20 = vand.u32 2147483647, %v12674_v63 }
  0xff   : > { %12671 = vst [vmem:[#allocation83_spill] sm:$0xff] %v9867_v42  ;;  %v12676_v21 = vld [vmem:[#allocation151_spill] sm:$0xff]  ;;  %v12677_v12 = vld [vmem:[#allocation150_spill] sm:$0xff]  ;;  %v9879_v50 = vpack.c.bf16 %v867_v53, %v859_v57  ;;  %v12681_v44 = vld [vmem:[#allocation124_spill] sm:$0xff]  ;;  %v12683_v48 = vpack.c.bf16 %v9528_v22, %v9520_v36  ;;  %v875_v15 = vand.u32 2147483647, %v9266_v59 }
 0x100   : > { %12672 = vst [vmem:[#allocation84_spill] sm:$0xff] %v9869_v1  ;;  %v12678_v55 = vpack.c.bf16 %v12676_v21, %v12677_v12  ;;  %v12680_v25 = vld [vmem:[#allocation123_spill] sm:$0xff]  ;;  %v878_v23 = vand.u32 2147483647, %v12681_v44  ;;  %v12682_v43 = vld [vmem:[#allocation125_spill] sm:$0xff]  ;;  %v9887_v63 = vpack.c.bf16 %v869_v6, %v861_v52  ;;  %v12689_v42 = vld [vmem:[#allocation152_spill] sm:$0xff] }
 0x101   : > { %12679 = vst [vmem:[#allocation142_spill] sm:$0xff] %v9879_v50  ;;  %v884_v51 = vand.u32 2147483647, %v12680_v25  ;;  %v886_v24 = vand.u32 2147483647, %v12682_v43  ;;  %5651 = vmatprep.subr.bf16.mxu1 %v12683_v48  ;;  %v12687_v44 = vld [vmem:[#allocation127_spill] sm:$0xff] }
 0x102   : > { %5587 = vmatprep.subr.bf16.mxu0 %v12678_v55  ;;  %12684 = vst [vmem:[#allocation85_spill] sm:$0xff] %v9887_v63  ;;  %v883_v1 = vand.u32 2147483647, %v9269_v4  ;;  %v877_v55 = vand.u32 2147483647, %v9272_v49  ;;  %v12688_v50 = vld [vmem:[#allocation153_spill] sm:$0xff] }
 0x103   : > { %v9892_v57 = vpack.c.bf16 %v884_v51, %v876_v20  ;;  %v9894_v53 = vpack.c.bf16 %v886_v24, %v878_v23  ;;  %v885_v25 = vand.u32 2147483647, %v9275_v27  ;;  %v892_v43 = vand.u32 2147483647, %v12687_v44  ;;  %v12692_v6 = vld [vmem:[#allocation128_spill] sm:$0xff]  ;;  %v12694_v51 = vld [vmem:[#allocation155_spill] sm:$0xff] }
 0x104   : > { %v12690_v40 = vpack.c.bf16 %v12688_v50, %v12689_v42  ;;  %v9901_v52 = vpack.c.bf16 %v883_v1, %v875_v15  ;;  %v900_v59 = vand.u32 2147483647, %v12692_v6  ;;  %v894_v4 = vand.u32 2147483647, %v12551_v35  ;;  %v12693_v20 = vld [vmem:[#allocation156_spill] sm:$0xff]  ;;  %v12696_v24 = vld [vmem:[#allocation34_spill] sm:$0xff] }
 0x105   : > { %12685 = vst [vmem:[#allocation87_spill] sm:$0xff] %v9892_v57  ;;  %12686 = vst [vmem:[#allocation88_spill] sm:$0xff] %v9894_v53  ;;  %v902_v49 = vand.u32 2147483647, %v12550_v56  ;;  %v12695_v23 = vpack.c.bf16 %v12693_v20, %v12694_v51  ;;  %v12697_v27 = vld [vmem:[#allocation157_spill] sm:$0xff]  ;;  %v9912_v44 = vpack.c.bf16 %v885_v25, %v877_v55  ;;  %v12700_v15 = vld [vmem:[#allocation131_spill] sm:$0xff] }
 0x106   : > { %5589 = vmatpush1.bf16.msra.mxu0 %v12690_v40  ;;  %12691 = vst [vmem:[#allocation89_spill] sm:$0xff] %v9901_v52  ;;  %v12698_v48 = vpack.c.bf16 %v12696_v24, %v12697_v27  ;;  %v891_v40 = vand.u32 2147483647, %v9305_v47  ;;  %v899_v1 = vand.u32 2147483647, %v9308_v37  ;;  %v12701_v52 = vld [vmem:[#allocation159_spill] sm:$0xff]  ;;  %v9920_v56 = vpack.c.bf16 %v900_v59, %v892_v43 }
 0x107   : > { %5653 = vmatpush1.bf16.msra.mxu1 %v12695_v23  ;;  %12699 = vst [vmem:[#allocation92_spill] sm:$0xff] %v9912_v44  ;;  %v893_v6 = vand.u32 2147483647, %v12700_v15  ;;  %v12702_v35 = vld [vmem:[#allocation158_spill] sm:$0xff]  ;;  %v9922_v57 = vpack.c.bf16 %v902_v49, %v894_v4  ;;  %v12704_v23 = vld [vmem:[#allocation132_spill] sm:$0xff]  ;;  %v12705_v5 = vld [vmem:[#allocation133_spill] sm:$0xff] }
 0x108   : > { %5591 = vmatprep.subr.bf16.mxu0 %v12698_v48  ;;  %v12703_v53 = vpack.c.bf16 %v12701_v52, %v12702_v35  ;;  %v901_v63 = vand.u32 2147483647, %v12704_v23  ;;  %v908_v48 = vand.u32 2147483647, %v12705_v5  ;;  %v9926_v55 = vpack.c.bf16 %v899_v1, %v891_v40  ;;  %v12707_v25 = vld [vmem:[#allocation134_spill] sm:$0xff]  ;;  %v12708_v44 = vld [vmem:[#allocation137_spill] sm:$0xff] }
 0x109   : > { %v916_v47 = vand.u32 2147483647, %v12707_v25  ;;  %v910_v37 = vand.u32 2147483647, %v12575_v10  ;;  %v918_v15 = vand.u32 2147483647, %v12708_v44 }
 0x10a   : > { %5655 = vmatprep.subr.bf16.mxu1 %v12703_v53  ;;  %12706 = vst [vmem:[#allocation93_spill] sm:$0xff] %v9926_v55  ;;  %v12709_v24 = vld [vmem:[#allocation161_spill] sm:$0xff]  ;;  %v12710_v27 = vld [vmem:[#allocation35_spill] sm:$0xff]  ;;  %v9934_v53 = vpack.c.bf16 %v901_v63, %v893_v6  ;;  %v907_v43 = vand.u32 2147483647, %v12586_v14  ;;  %v12713_v4 = vld [vmem:[#allocation38_spill] sm:$0xff] }
 0x10b   : > { %v12711_v52 = vpack.c.bf16 %v12709_v24, %v12710_v27  ;;  %v915_v59 = vand.u32 2147483647, %v12585_v45  ;;  %v909_v5 = vand.u32 2147483647, %v9349_v2  ;;  %v12714_v49 = vld [vmem:[#allocation162_spill] sm:$0xff]  ;;  %v12716_v1 = vld [vmem:[#allocation164_spill] sm:$0xff]  ;;  %v9945_v44 = vpack.c.bf16 %v916_v47, %v908_v48 }
 0x10c   : > { %12712 = vst [vmem:[#allocation94_spill] sm:$0xff] %v9934_v53  ;;  %v12715_v40 = vpack.c.bf16 %v12713_v4, %v12714_v49  ;;  %v12717_v10 = vld [vmem:[#allocation163_spill] sm:$0xff]  ;;  %v9947_v25 = vpack.c.bf16 %v918_v15, %v910_v37  ;;  %v917_v63 = vand.u32 2147483647, %v9352_v28  ;;  %v924_v14 = vand.u32 2147483647, %v9355_v54 }
 0x10d   : > { %5593 = vmatpush1.bf16.msra.mxu0 %v12711_v52  ;;  %v12718_v23 = vpack.c.bf16 %v12716_v1, %v12717_v10  ;;  %v12720_v52 = vld [vmem:[#allocation166_spill] sm:$0xff]  ;;  %v12721_v45 = vld [vmem:[#allocation39_spill] sm:$0xff]  ;;  %v9954_v2 = vpack.c.bf16 %v915_v59, %v907_v43  ;;  %v12724_v53 = vld [vmem:[#allocation140_spill] sm:$0xff]  ;;  %v926_v55 = vand.u32 2147483647, %v9361_v18 }
 0x10e   : > { %5657 = vmatpush1.bf16.msra.mxu1 %v12715_v40  ;;  %12719 = vst [vmem:[#allocation95_spill] sm:$0xff] %v9947_v25  ;;  %v12722_v6 = vpack.c.bf16 %v12720_v52, %v12721_v45  ;;  %v932_v40 = vand.u32 2147483647, %v12724_v53  ;;  %v9959_v48 = vpack.c.bf16 %v917_v63, %v909_v5  ;;  %v923_v47 = vand.u32 2147483647, %v9376_v30  ;;  %v12726_v37 = vld [vmem:[#allocation41_spill] sm:$0xff] }
 0x10f   : > { %5595 = vmatprep.subr.bf16.mxu0 %v12718_v23  ;;  %12723 = vst [vmem:[#allocation96_spill] sm:$0xff] %v9954_v2  ;;  %v934_v23 = vand.u32 2147483647, %v9364_v60  ;;  %v931_v28 = vand.u32 2147483647, %v9379_v9  ;;  %v12727_v15 = vld [vmem:[#allocation167_spill] sm:$0xff] }
 0x110   : > { %5659 = vmatprep.subr.bf16.mxu1 %v12722_v6  ;;  %12725 = vst [vmem:[#allocation97_spill] sm:$0xff] %v9959_v48  ;;  %v925_v54 = vand.u32 2147483647, %v12612_v61  ;;  %v12728_v25 = vpack.c.bf16 %v12726_v37, %v12727_v15  ;;  %v9967_v43 = vpack.c.bf16 %v932_v40, %v924_v14  ;;  %v933_v18 = vand.u32 2147483647, %v9385_v3  ;;  %v12731_v53 = vld [vmem:[#allocation169_spill] sm:$0xff] }
 0x111   : > { %v9969_v59 = vpack.c.bf16 %v934_v23, %v926_v55  ;;  %v940_v60 = vand.u32 2147483647, %v9393_v62  ;;  %v12732_v5 = vld [vmem:[#allocation168_spill] sm:$0xff]  ;;  %v12734_v30 = vld [vmem:[#allocation130_spill] sm:$0xff]  ;;  %v9979_v61 = vpack.c.bf16 %v931_v28, %v923_v47  ;;  %v942_v14 = vand.u32 2147483647, %v9399_v19 }
 0x112   : > { %5597 = vmatpush1.bf16.msra.mxu0 %v12728_v25  ;;  %12729 = vst [vmem:[#allocation99_spill] sm:$0xff] %v9967_v43  ;;  %v12733_v63 = vpack.c.bf16 %v12731_v53, %v12732_v5  ;;  %v12735_v9 = vld [vmem:[#allocation42_spill] sm:$0xff]  ;;  %v948_v25 = vand.u32 2147483647, %v9396_v32  ;;  %v12738_v55 = vld [vmem:[#allocation143_spill] sm:$0xff]  ;;  %v12739_v23 = vld [vmem:[#allocation44_spill] sm:$0xff]  ;;  %v9987_v62 = vpack.c.bf16 %v933_v18, %v925_v54 }
 0x113   : > { %12730 = vst [vmem:[#allocation100_spill] sm:$0xff] %v9969_v59  ;;  %v12736_v6 = vpack.c.bf16 %v12734_v30, %v12735_v9  ;;  %12737 = vst [vmem:[#allocation101_spill] sm:$0xff] %v9979_v61  ;;  %v950_v40 = vand.u32 2147483647, %v12738_v55  ;;  %v12740_v3 = vld [vmem:[#allocation129_spill] sm:$0xff]  ;;  %v12743_v61 = vld [vmem:[#allocation172_spill] sm:$0xff] }
 0x114   : > { %5661 = vmatpush1.bf16.msra.mxu1 %v12733_v63  ;;  %v12741_v59 = vpack.c.bf16 %v12739_v23, %v12740_v3  ;;  %v939_v63 = vand.u32 2147483647, %v9405_v8  ;;  %v947_v43 = vand.u32 2147483647, %v9408_v41  ;;  %v9992_v47 = vpack.c.bf16 %v948_v25, %v940_v60  ;;  %v12742_v32 = vld [vmem:[#allocation145_spill] sm:$0xff]  ;;  %v12744_v48 = vld [vmem:[#allocation171_spill] sm:$0xff] }
 0x115   : > { %5599 = vmatprep.subr.bf16.mxu0 %v12736_v6  ;;  %v941_v6 = vand.u32 2147483647, %v9420_v13  ;;  %v9994_v28 = vpack.c.bf16 %v950_v40, %v942_v14  ;;  %v949_v19 = vand.u32 2147483647, %v9423_v31  ;;  %v956_v55 = vand.u32 2147483647, %v12742_v32 }
 0x116   : > { %5663 = vmatprep.subr.bf16.mxu1 %v12741_v59  ;;  %v12745_v2 = vpack.c.bf16 %v12743_v61, %v12744_v48  ;;  %v10001_v54 = vpack.c.bf16 %v947_v43, %v939_v63  ;;  %v12747_v59 = vld [vmem:[#allocation146_spill] sm:$0xff]  ;;  %v958_v41 = vand.u32 2147483647, %v9437_v29  ;;  %v12748_v18 = vld [vmem:[#allocation147_spill] sm:$0xff]  ;;  %v12750_v25 = vld [vmem:[#allocation45_spill] sm:$0xff] }
 0x117   : > { %v964_v8 = vand.u32 2147483647, %v12747_v59  ;;  %v966_v13 = vand.u32 2147483647, %v12748_v18  ;;  %v12749_v60 = vld [vmem:[#allocation174_spill] sm:$0xff]  ;;  %v10010_v31 = vpack.c.bf16 %v949_v19, %v941_v6  ;;  %v12753_v63 = vld [vmem:[#allocation15_spill] sm:$0xff] }
 0x118   : > { %5601 = vmatpush1.bf16.msra.mxu0 %v12745_v2  ;;  %12746 = vst [vmem:[#allocation102_spill] sm:$0xff] %v10001_v54  ;;  %v12751_v14 = vpack.c.bf16 %v12749_v60, %v12750_v25  ;;  %v12752_v40 = vld [vmem:[#allocation14_spill] sm:$0xff]  ;;  %v955_v32 = vand.u32 2147483647, %v9443_v17  ;;  %v963_v2 = vand.u32 2147483647, %v9446_v33 }
 0x119   : > { %5667 = vmatprep.subr.bf16.mxu0 %v12752_v40  ;;  %v957_v43 = vand.u32 2147483647, %v9449_v39  ;;  %v10016_v59 = vpack.c.bf16 %v964_v8, %v956_v55  ;;  %v10018_v29 = vpack.c.bf16 %v966_v13, %v958_v41  ;;  %v965_v18 = vand.u32 2147483647, %v9452_v11  ;;  %v12754_v54 = vld [vmem:[#allocation82_spill] sm:$0xff]  ;;  %v12755_v19 = vld [vmem:[#allocation16_spill] sm:$0xff] }
 0x11a   : > { %5665 = vmatpush1.bf16.msra.mxu1 %v12751_v14  ;;  %v972_v14 = vand.u32 2147483647, %v9467_v26  ;;  %v10023_v6 = vpack.c.bf16 %v963_v2, %v955_v32  ;;  %v980_v17 = vand.u32 2147483647, %v9470_v7  ;;  %v974_v33 = vand.u32 2147483647, %v9473_v46 }
 0x11b   : > { %5731 = vmatprep.subr.bf16.mxu1 %v12753_v63  ;;  %714 = vmatmul.mubr.f32.vlgmr.msra.gmra.mrb[2].mxu0 %v12754_v54  ;;  %v982_v39 = vand.u32 2147483647, %v9476_v58  ;;  %v10030_v55 = vpack.c.bf16 %v965_v18, %v957_v43  ;;  %v971_v11 = vand.u32 2147483647, %v9490_v0  ;;  %v979_v26 = vand.u32 2147483647, %v9493_v38 }
 0x11c   : > { %5669 = vmatpush1.bf16.msra.mxu0 %v12755_v19  ;;  %v973_v8 = vand.u32 2147483647, %v9496_v16  ;;  %v12756_v41 = vld [vmem:[#allocation17_spill] sm:$0xff]  ;;  %v12757_v13 = vld [vmem:[#allocation19_spill] sm:$0xff]  ;;  %v10037_v7 = vpack.c.bf16 %v980_v17, %v972_v14  ;;  %v981_v58 = vand.u32 2147483647, %v9499_v34 }
 0x11d   : > { %785 = vmatmul.mubr.f32.vlgmr.msra.gmra.mrb[2].mxu1 %v12754_v54  ;;  %5671 = vmatprep.subr.bf16.mxu0 %v12757_v13  ;;  %v10039_v46 = vpack.c.bf16 %v982_v39, %v974_v33  ;;  %v988_v54 = vand.u32 2147483647, %v12677_v12  ;;  %v12758_v40 = vld [vmem:[#allocation22_spill] sm:$0xff]  ;;  %v10044_v32 = vld [vmem:[#allocation2 + $0x8] sm:$0xff]  ;;  %v10047_v0 = vpack.c.bf16 %v979_v26, %v971_v11  ;;  %v996_v16 = vand.u32 2147483647, %v12676_v21 }
 0x11e   : > { %5733 = vmatpush1.bf16.msra.mxu1 %v12756_v41  ;;  %1111 = vmatprep.mubr.f32.mxu0 %v10044_v32  ;;  %v990_v38 = vand.u32 2147483647, %v9520_v36  ;;  %v998_v2 = vand.u32 2147483647, %v9528_v22  ;;  %v10053_v43 = vpack.c.bf16 %v981_v58, %v973_v8  ;;  %v987_v34 = vand.u32 2147483647, %v12689_v42 }
 0x11f   : > { %5735 = vmatprep.subr.bf16.mxu1 %v12758_v40  ;;  %1182 = vmatprep.mubr.f32.mxu1 %v10044_v32  ;;  %v995_v12 = vand.u32 2147483647, %v12688_v50  ;;  %v989_v63 = vand.u32 2147483647, %v12694_v51  ;;  %v12759_v18 = vld [vmem:[#allocation18_spill] sm:$0xff]  ;;  %v10059_v14 = vpack.c.bf16 %v996_v16, %v988_v54  ;;  %v12760_v21 = vld [vmem:[#allocation157_spill] sm:$0xff] }
 0x120   : > { %5673 = vmatpush1.bf16.msra.mxu0 %v12759_v18  ;;  %v10061_v17 = vpack.c.bf16 %v998_v2, %v990_v38  ;;  %v997_v36 = vand.u32 2147483647, %v12693_v20  ;;  %v1004_v22 = vand.u32 2147483647, %v12760_v21  ;;  %v12761_v33 = vld [vmem:[#allocation20_spill] sm:$0xff]  ;;  %v12762_v39 = vld [vmem:[#allocation62_spill] sm:$0xff] }
 0x121   : > { %5675 = vmatprep.subr.bf16.mxu0 %v12762_v39  ;;  %v10067_v19 = vpack.c.bf16 %v995_v12, %v987_v34  ;;  %v12763_v42 = vld [vmem:[#allocation34_spill] sm:$0xff]  ;;  %v1006_v51 = vand.u32 2147483647, %v12702_v35  ;;  %v12764_v11 = vld [vmem:[#allocation159_spill] sm:$0xff]  ;;  %v12765_v8 = vld [vmem:[#allocation68_spill] sm:$0xff] }
 0x122   : > { %5737 = vmatpush1.bf16.msra.mxu1 %v12761_v33  ;;  %v1012_v50 = vand.u32 2147483647, %v12763_v42  ;;  %v1014_v26 = vand.u32 2147483647, %v12764_v11  ;;  %v10073_v41 = vpack.c.bf16 %v997_v36, %v989_v63  ;;  %v1003_v20 = vand.u32 2147483647, %v12710_v27 }
 0x123   : > { %5739 = vmatprep.subr.bf16.mxu1 %v12765_v8  ;;  %v1011_v13 = vand.u32 2147483647, %v12709_v24  ;;  %v1005_v58 = vand.u32 2147483647, %v12714_v49  ;;  %v1013_v16 = vand.u32 2147483647, %v12713_v4 }
 0x124   : > { %v10078_v54 = vpack.c.bf16 %v1012_v50, %v1004_v22  ;;  %v10080_v40 = vpack.c.bf16 %v1014_v26, %v1006_v51  ;;  %v1020_v35 = vand.u32 2147483647, %v12717_v10  ;;  %v12766_v38 = vld [vmem:[#allocation21_spill] sm:$0xff]  ;;  %v1028_v34 = vand.u32 2147483647, %v12716_v1  ;;  %v12767_v12 = vld [vmem:[#allocation23_spill] sm:$0xff] }
 0x125   : > { %5677 = vmatpush1.bf16.msra.mxu0 %v12766_v38  ;;  %v10085_v2 = vpack.c.bf16 %v1011_v13, %v1003_v20  ;;  %v1022_v27 = vand.u32 2147483647, %v12721_v45  ;;  %v1030_v24 = vand.u32 2147483647, %v12720_v52  ;;  %v12768_v49 = vld [vmem:[#allocation70_spill] sm:$0xff]  ;;  %v10092_v63 = vpack.c.bf16 %v1013_v16, %v1005_v58  ;;  %v12769_v36 = vld [vmem:[#allocation76_spill] sm:$0xff] }
 0x126   : > { %5741 = vmatpush1.bf16.msra.mxu1 %v12767_v12  ;;  %5679 = vmatprep.subr.bf16.mxu0 %v12768_v49  ;;  %v1019_v4 = vand.u32 2147483647, %v12727_v15  ;;  %v1027_v10 = vand.u32 2147483647, %v12726_v37  ;;  %v1021_v18 = vand.u32 2147483647, %v12732_v5  ;;  %v10098_v21 = vpack.c.bf16 %v1028_v34, %v1020_v35 }
 0x127   : > { %5743 = vmatprep.subr.bf16.mxu1 %v12769_v36  ;;  %v10100_v1 = vpack.c.bf16 %v1030_v24, %v1022_v27  ;;  %v1029_v52 = vand.u32 2147483647, %v12731_v53  ;;  %v1036_v45 = vand.u32 2147483647, %v12735_v9  ;;  %v1044_v33 = vand.u32 2147483647, %v12734_v30 }
 0x128   : > { %v10104_v22 = vpack.c.bf16 %v1027_v10, %v1019_v4  ;;  %v1038_v15 = vand.u32 2147483647, %v12740_v3  ;;  %v1046_v37 = vand.u32 2147483647, %v12739_v23  ;;  %v12770_v39 = vld [vmem:[#allocation24_spill] sm:$0xff]  ;;  %v12771_v51 = vld [vmem:[#allocation25_spill] sm:$0xff] }
 0x129   : > { %5681 = vmatpush1.bf16.msra.mxu0 %v12770_v39  ;;  %v10110_v5 = vpack.c.bf16 %v1029_v52, %v1021_v18  ;;  %v1035_v42 = vand.u32 2147483647, %v12744_v48  ;;  %v1043_v50 = vand.u32 2147483647, %v12743_v61  ;;  %v1037_v53 = vand.u32 2147483647, %v12750_v25 }
 0x12a   : > { %5745 = vmatpush1.bf16.msra.mxu1 %v12771_v51  ;;  %v12772_v9 = vld [vmem:[#allocation81_spill] sm:$0xff]  ;;  %v10117_v11 = vpack.c.bf16 %v1044_v33, %v1036_v45  ;;  %v10119_v30 = vpack.c.bf16 %v1046_v37, %v1038_v15  ;;  %v1045_v23 = vand.u32 2147483647, %v12749_v60  ;;  %v12773_v3 = vld [vmem:[#allocation90_spill] sm:$0xff]  ;;  %v12775_v61 = vld [vmem:[#allocation27_spill] sm:$0xff] }
 0x12b   : > { %5683 = vmatprep.subr.bf16.mxu0 %v12772_v9  ;;  %5747 = vmatprep.subr.bf16.mxu1 %v12773_v3  ;;  %v10123_v26 = vpack.c.bf16 %v1043_v50, %v1035_v42  ;;  %v12774_v48 = vld [vmem:[#allocation26_spill] sm:$0xff]  ;;  %v12777_v20 = vld [vmem:[#allocation108_spill] sm:$0xff]  ;;  %v12779_v58 = vld [vmem:[#allocation29_spill] sm:$0xff] }
 0x12c   : > { %v10125_v8 = vpack.c.bf16 %v1045_v23, %v1037_v53  ;;  %v12776_v25 = vld [vmem:[#allocation98_spill] sm:$0xff]  ;;  %v12778_v13 = vld [vmem:[#allocation28_spill] sm:$0xff]  ;;  %v12780_v16 = vld [vmem:[#allocation119_spill] sm:$0xff] }
 0x12d   : > { %5685 = vmatpush1.bf16.msra.mxu0 %v12774_v48  ;;  %v12781_v60 = vld [vmem:[#allocation126_spill] sm:$0xff]  ;;  %v12783_v38 = vld [vmem:[#allocation31_spill] sm:$0xff]  ;;  %v12785_v27 = vld [vmem:[#allocation141_spill] sm:$0xff] }
 0x12e   : > { %5749 = vmatpush1.bf16.msra.mxu1 %v12775_v61  ;;  %5687 = vmatprep.subr.bf16.mxu0 %v12776_v25  ;;  %v12782_v35 = vld [vmem:[#allocation30_spill] sm:$0xff]  ;;  %v12784_v34 = vld [vmem:[#allocation135_spill] sm:$0xff]  ;;  %v12786_v24 = vld [vmem:[#allocation32_spill] sm:$0xff] }
 0x12f   : > { %5751 = vmatprep.subr.bf16.mxu1 %v12777_v20  ;;  %v12787_v12 = vld [vmem:[#allocation33_spill] sm:$0xff]  ;;  %v12788_v49 = vld [vmem:[#allocation144_spill] sm:$0xff]  ;;  %v12793_v52 = vld [vmem:[#allocation154_spill] sm:$0xff] }
 0x130   : > { %v12789_v4 = vld [vmem:[#allocation148_spill] sm:$0xff]  ;;  %v12791_v18 = vld [vmem:[#allocation37_spill] sm:$0xff]  ;;  %v12795_v33 = vld [vmem:[#allocation43_spill] sm:$0xff] }
 0x131   : > { %5689 = vmatpush1.bf16.msra.mxu0 %v12778_v13  ;;  %v12790_v10 = vld [vmem:[#allocation36_spill] sm:$0xff]  ;;  %v12792_v36 = vld [vmem:[#allocation149_spill] sm:$0xff]  ;;  %v12798_v39 = vld [vmem:[#allocation46_spill] sm:$0xff] }
 0x132   : > { %5753 = vmatpush1.bf16.msra.mxu1 %v12779_v58  ;;  %5691 = vmatprep.subr.bf16.mxu0 %v12780_v16  ;;  %v12794_v45 = vld [vmem:[#allocation40_spill] sm:$0xff]  ;;  %v12797_v37 = vld [vmem:[#allocation165_spill] sm:$0xff]  ;;  %v12800_v50 = vld [vmem:[#allocation170_spill] sm:$0xff] }
 0x133   : > { %5755 = vmatprep.subr.bf16.mxu1 %v12781_v60  ;;  %v12796_v15 = vld [vmem:[#allocation160_spill] sm:$0xff]  ;;  %v12799_v42 = vld [vmem:[#allocation49_spill] sm:$0xff]  ;;  %v12802_v51 = vld [vmem:[#allocation54_spill] sm:$0xff] }
 0x134   : > { %v12801_v53 = vld [vmem:[#allocation173_spill] sm:$0xff]  ;;  %v12803_v9 = vld [vmem:[#allocation55_spill] sm:$0xff]  ;;  %v12805_v3 = vld [vmem:[#allocation48_spill] sm:$0xff] }
 0x135   : > { %5693 = vmatpush1.bf16.msra.mxu0 %v12782_v35  ;;  %v12804_v23 = vld [vmem:[#allocation47_spill] sm:$0xff]  ;;  %v12807_v61 = vld [vmem:[#allocation61_spill] sm:$0xff]  ;;  %v12808_v25 = vld [vmem:[#allocation50_spill] sm:$0xff] }
 0x136   : > { %5757 = vmatpush1.bf16.msra.mxu1 %v12783_v38  ;;  %5695 = vmatprep.subr.bf16.mxu0 %v12784_v34  ;;  %v12806_v48 = vld [vmem:[#allocation59_spill] sm:$0xff]  ;;  %v12810_v13 = vld [vmem:[#allocation65_spill] sm:$0xff]  ;;  %v12812_v16 = vld [vmem:[#allocation136_spill] sm:$0xff] }
 0x137   : > { %5759 = vmatprep.subr.bf16.mxu1 %v12785_v27  ;;  %v12809_v20 = vld [vmem:[#allocation51_spill] sm:$0xff]  ;;  %v12811_v58 = vld [vmem:[#allocation69_spill] sm:$0xff]  ;;  %v12813_v60 = vld [vmem:[#allocation52_spill] sm:$0xff] }
 0x138   : > { %v12814_v35 = vld [vmem:[#allocation73_spill] sm:$0xff]  ;;  %v12817_v27 = vld [vmem:[#allocation56_spill] sm:$0xff] }
 0x139   : > { %5697 = vmatpush1.bf16.msra.mxu0 %v12786_v24  ;;  %v12815_v38 = vld [vmem:[#allocation77_spill] sm:$0xff]  ;;  %v12818_v24 = vld [vmem:[#allocation86_spill] sm:$0xff] }
 0x13a   : > { %5761 = vmatpush1.bf16.msra.mxu1 %v12787_v12  ;;  %5699 = vmatprep.subr.bf16.mxu0 %v12788_v49  ;;  %v12816_v34 = vld [vmem:[#allocation53_spill] sm:$0xff]  ;;  %v12819_v12 = vld [vmem:[#allocation91_spill] sm:$0xff] }
 0x13b   : > { %5763 = vmatprep.subr.bf16.mxu1 %v12789_v4  ;;  %v12820_v49 = vld [vmem:[#allocation57_spill] sm:$0xff]  ;;  %v12821_v4 = vld [vmem:[#allocation58_spill] sm:$0xff] }
 0x13d   : > { %5701 = vmatpush1.bf16.msra.mxu0 %v12790_v10  ;;  %v10175_v10 = vld [vmem:[#allocation2] sm:$0xff] }
 0x13e   : > { %5765 = vmatpush1.bf16.msra.mxu1 %v12791_v18  ;;  %5703 = vmatprep.subr.bf16.mxu0 %v12792_v36  ;;  %v12822_v18 = vld [vmem:[#allocation60_spill] sm:$0xff]  ;;  %v12823_v36 = vld [vmem:[#allocation139_spill] sm:$0xff] }
 0x13f   : > { %5767 = vmatprep.subr.bf16.mxu1 %v12793_v52  ;;  %v12824_v52 = vld [vmem:[#allocation138_spill] sm:$0xff] }
 0x141   : > { %5705 = vmatpush1.bf16.msra.mxu0 %v12794_v45  ;;  %v12825_v45 = vld [vmem:[#allocation63_spill] sm:$0xff] }
 0x142   : > { %5769 = vmatpush1.bf16.msra.mxu1 %v12795_v33  ;;  %5707 = vmatprep.subr.bf16.mxu0 %v12796_v15  ;;  %v12826_v33 = vld [vmem:[#allocation64_spill] sm:$0xff]  ;;  %v12827_v15 = vld [vmem:[#allocation66_spill] sm:$0xff] }
 0x143   : > { %5771 = vmatprep.subr.bf16.mxu1 %v12797_v37  ;;  %v12828_v37 = vld [vmem:[#allocation67_spill] sm:$0xff] }
 0x145   : > { %5709 = vmatpush1.bf16.msra.mxu0 %v12798_v39  ;;  %v12829_v39 = vld [vmem:[#allocation71_spill] sm:$0xff] }
 0x146   : > { %5773 = vmatpush1.bf16.msra.mxu1 %v12799_v42  ;;  %5711 = vmatprep.subr.bf16.mxu0 %v12800_v50  ;;  %v12830_v42 = vld [vmem:[#allocation72_spill] sm:$0xff]  ;;  %v12831_v50 = vld [vmem:[#allocation74_spill] sm:$0xff] }
 0x147   : > { %5775 = vmatprep.subr.bf16.mxu1 %v12801_v53  ;;  %v12832_v53 = vld [vmem:[#allocation75_spill] sm:$0xff] }
 0x149   : > { %5713 = vmatpush1.bf16.msra.mxu0 %v12802_v51  ;;  %v12833_v51 = vld [vmem:[#allocation78_spill] sm:$0xff] }
 0x14a   : > { %5777 = vmatpush1.bf16.msra.mxu1 %v12803_v9  ;;  %5715 = vmatprep.subr.bf16.mxu0 %v12804_v23  ;;  %v12834_v9 = vld [vmem:[#allocation79_spill] sm:$0xff]  ;;  %v12835_v23 = vld [vmem:[#allocation80_spill] sm:$0xff] }
 0x14b   : > { %5779 = vmatprep.subr.bf16.mxu1 %v12805_v3  ;;  %v12837_v3 = vld [vmem:[#allocation84_spill] sm:$0xff] }
 0x14d   : > { %5717 = vmatpush1.bf16.msra.mxu0 %v12806_v48  ;;  %v12838_v48 = vld [vmem:[#allocation142_spill] sm:$0xff] }
 0x14e   : > { %5781 = vmatpush1.bf16.msra.mxu1 %v12807_v61  ;;  %5719 = vmatprep.subr.bf16.mxu0 %v12808_v25  ;;  %v12839_v61 = vld [vmem:[#allocation85_spill] sm:$0xff]  ;;  %v12840_v25 = vld [vmem:[#allocation87_spill] sm:$0xff] }
 0x14f   : > { %5783 = vmatprep.subr.bf16.mxu1 %v12809_v20  ;;  %v12841_v20 = vld [vmem:[#allocation88_spill] sm:$0xff] }
 0x151   : > { %5721 = vmatpush1.bf16.msra.mxu0 %v12810_v13  ;;  %v12842_v13 = vld [vmem:[#allocation89_spill] sm:$0xff] }
 0x152   : > { %5785 = vmatpush1.bf16.msra.mxu1 %v12811_v58  ;;  %5723 = vmatprep.subr.bf16.mxu0 %v12812_v16  ;;  %v12843_v58 = vld [vmem:[#allocation92_spill] sm:$0xff]  ;;  %v12844_v16 = vld [vmem:[#allocation93_spill] sm:$0xff] }
 0x153   : > { %5787 = vmatprep.subr.bf16.mxu1 %v12813_v60  ;;  %v12845_v60 = vld [vmem:[#allocation94_spill] sm:$0xff] }
 0x155   : > { %5725 = vmatpush1.bf16.msra.mxu0 %v12814_v35  ;;  %v12846_v35 = vld [vmem:[#allocation95_spill] sm:$0xff] }
 0x156   : > { %5789 = vmatpush1.bf16.msra.mxu1 %v12815_v38  ;;  %5727 = vmatprep.subr.bf16.mxu0 %v12816_v34  ;;  %v12847_v38 = vld [vmem:[#allocation96_spill] sm:$0xff]  ;;  %v12848_v34 = vld [vmem:[#allocation97_spill] sm:$0xff] }
 0x157   : > { %5791 = vmatprep.subr.bf16.mxu1 %v12817_v27  ;;  %v12849_v27 = vld [vmem:[#allocation99_spill] sm:$0xff] }
 0x159   : > { %5729 = vmatpush1.bf16.msra.mxu0 %v12818_v24  ;;  %v12850_v24 = vld [vmem:[#allocation100_spill] sm:$0xff] }
 0x15a   : > { %5793 = vmatpush1.bf16.msra.mxu1 %v12819_v12  ;;  %5795 = vmatprep.subr.bf16.mxu0 %v12820_v49  ;;  %v12851_v12 = vld [vmem:[#allocation101_spill] sm:$0xff]  ;;  %v1525_v49 = vld [vmem:[%s8681_s20 + $0x900] sm:$0xff] }
 0x15b   : > { %5859 = vmatprep.subr.bf16.mxu1 %v12821_v4  ;;  %v1533_v4 = vld [vmem:[%s8681_s20 + $0x940] sm:$0xff] }
 0x15c   : > { %1112 = vmatmul.mubr.f32.vlgmr.msra.gmra.mrb[4].mxu0 %v10175_v10 }
 0x15d   : > { %1183 = vmatmul.mubr.f32.vlgmr.msra.gmra.mrb[4].mxu1 %v10175_v10  ;;  %5797 = vmatpush1.bf16.msra.mxu0 %v12822_v18  ;;  %v1527_v18 = vld [vmem:[%s8681_s20 + $0x910] sm:$0xff] }
 0x15e   : > { %5861 = vmatpush1.bf16.msra.mxu1 %v12823_v36  ;;  %5799 = vmatprep.subr.bf16.mxu0 %v12824_v52  ;;  %v1535_v52 = vld [vmem:[%s8681_s20 + $0x950] sm:$0xff] }
 0x15f   : > { %5863 = vmatprep.subr.bf16.mxu1 %v12825_v45  ;;  %1253 = vmatprep.mubr.f32.mxu0 %v10044_v32  ;;  %v1542_v45 = vld [vmem:[%s8681_s20 + $0x988] sm:$0xff] }
 0x160   : > { %1324 = vmatprep.mubr.f32.mxu1 %v10044_v32  ;;  %v12836_v32 = vld [vmem:[#allocation83_spill] sm:$0xff] }
 0x161   : > { %5801 = vmatpush1.bf16.msra.mxu0 %v12826_v33  ;;  %v1550_v33 = vld [vmem:[%s8681_s20 + $0x9c8] sm:$0xff] }
 0x162   : > { %5865 = vmatpush1.bf16.msra.mxu1 %v12827_v15  ;;  %5803 = vmatprep.subr.bf16.mxu0 %v12828_v37  ;;  %v1552_v15 = vld [vmem:[%s8681_s20 + $0x9d8] sm:$0xff]  ;;  %v5932_v37 = vpack.c.bf16 %v1533_v4, %v1525_v49  ;;  %v1605_v4 = vld [vmem:[%s8681_s20 + $0xb80] sm:$0xff] }
 0x163   : > { %5867 = vmatprep.subr.bf16.mxu1 %v12829_v39  ;;  %v5996_v39 = vpack.c.bf16 %v1535_v52, %v1527_v18  ;;  %v1613_v18 = vld [vmem:[%s8681_s20 + $0xbc0] sm:$0xff] }
 0x165   : > { %5805 = vmatpush1.bf16.msra.mxu0 %v12830_v42  ;;  %v5934_v42 = vpack.c.bf16 %v1550_v33, %v1542_v45  ;;  %v1615_v45 = vld [vmem:[%s8681_s20 + $0xbd0] sm:$0xff]  ;;  %v1622_v33 = vld [vmem:[%s8681_s20 + $0xc08] sm:$0xff] }
 0x166   : > { %5869 = vmatpush1.bf16.msra.mxu1 %v12831_v50  ;;  %5807 = vmatprep.subr.bf16.mxu0 %v12832_v53  ;;  %v1541_v50 = vld [vmem:[%s8681_s20 + $0x980] sm:$0xff] }
 0x167   : > { %5871 = vmatprep.subr.bf16.mxu1 %v12833_v51  ;;  %v1549_v53 = vld [vmem:[%s8681_s20 + $0x9c0] sm:$0xff]  ;;  %v1543_v51 = vld [vmem:[%s8681_s20 + $0x990] sm:$0xff] }
 0x169   : > { %5809 = vmatpush1.bf16.msra.mxu0 %v12834_v9 }
 0x16a   : > { %5873 = vmatpush1.bf16.msra.mxu1 %v12835_v23  ;;  %5811 = vmatprep.subr.bf16.mxu0 %v12836_v32  ;;  %v1551_v23 = vld [vmem:[%s8681_s20 + $0x9d0] sm:$0xff]  ;;  %v1558_v32 = vld [vmem:[%s8681_s20 + $0xa08] sm:$0xff] }
 0x16b   : > { %5875 = vmatprep.subr.bf16.mxu1 %v12837_v3  ;;  %v1566_v3 = vld [vmem:[%s8681_s20 + $0xa48] sm:$0xff] }
 0x16d   : > { %5813 = vmatpush1.bf16.msra.mxu0 %v12838_v48  ;;  %v1560_v48 = vld [vmem:[%s8681_s20 + $0xa18] sm:$0xff] }
 0x16e   : > { %5877 = vmatpush1.bf16.msra.mxu1 %v12839_v61  ;;  %5815 = vmatprep.subr.bf16.mxu0 %v12840_v25  ;;  %v1568_v61 = vld [vmem:[%s8681_s20 + $0xa58] sm:$0xff]  ;;  %v5936_v25 = vpack.c.bf16 %v1549_v53, %v1541_v50  ;;  %v1621_v53 = vld [vmem:[%s8681_s20 + $0xc00] sm:$0xff] }
 0x16f   : > { %5879 = vmatprep.subr.bf16.mxu1 %v12841_v20  ;;  %v6000_v20 = vpack.c.bf16 %v1551_v23, %v1543_v51  ;;  %v1629_v51 = vld [vmem:[%s8681_s20 + $0xc40] sm:$0xff] }
 0x171   : > { %5817 = vmatpush1.bf16.msra.mxu0 %v12842_v13  ;;  %v5938_v13 = vpack.c.bf16 %v1566_v3, %v1558_v32  ;;  %v1631_v32 = vld [vmem:[%s8681_s20 + $0xc50] sm:$0xff]  ;;  %v1638_v3 = vld [vmem:[%s8681_s20 + $0xc88] sm:$0xff] }
 0x172   : > { %5881 = vmatpush1.bf16.msra.mxu1 %v12843_v58  ;;  %5819 = vmatprep.subr.bf16.mxu0 %v9920_v56  ;;  %v1494_v56 = vld [vmem:[%s8681_s20 + $0x808] sm:$0xff]  ;;  %v1557_v58 = vld [vmem:[%s8681_s20 + $0xa00] sm:$0xff] }
 0x173   : > { %5883 = vmatprep.subr.bf16.mxu1 %v9922_v57  ;;  %v12852_v57 = vld [vmem:[#allocation102_spill] sm:$0xff] }
 0x175   : > { %5821 = vmatpush1.bf16.msra.mxu0 %v12844_v16  ;;  %v1565_v16 = vld [vmem:[%s8681_s20 + $0xa40] sm:$0xff] }
 0x176   : > { %5885 = vmatpush1.bf16.msra.mxu1 %v12845_v60  ;;  %5823 = vmatprep.subr.bf16.mxu0 %v9945_v44  ;;  %v1502_v44 = vld [vmem:[%s8681_s20 + $0x848] sm:$0xff]  ;;  %v1559_v60 = vld [vmem:[%s8681_s20 + $0xa10] sm:$0xff] }
 0x177   : > { %5887 = vmatprep.subr.bf16.mxu1 %v12846_v35  ;;  %v6002_v35 = vpack.c.bf16 %v1568_v61, %v1560_v48  ;;  %v1646_v48 = vld [vmem:[%s8681_s20 + $0xcc8] sm:$0xff]  ;;  %v1640_v61 = vld [vmem:[%s8681_s20 + $0xc98] sm:$0xff] }
 0x179   : > { %5825 = vmatpush1.bf16.msra.mxu0 %v12847_v38  ;;  %v1567_v38 = vld [vmem:[%s8681_s20 + $0xa50] sm:$0xff] }
 0x17a   : > { %5889 = vmatpush1.bf16.msra.mxu1 %v12848_v34  ;;  %5827 = vmatprep.subr.bf16.mxu0 %v12849_v27  ;;  %v1574_v34 = vld [vmem:[%s8681_s20 + $0xa88] sm:$0xff] }
 0x17b   : > { %5891 = vmatprep.subr.bf16.mxu1 %v12850_v24  ;;  %v1582_v27 = vld [vmem:[%s8681_s20 + $0xac8] sm:$0xff]  ;;  %v1576_v24 = vld [vmem:[%s8681_s20 + $0xa98] sm:$0xff] }
 0x17d   : > { %5829 = vmatpush1.bf16.msra.mxu0 %v12851_v12  ;;  %v1584_v12 = vld [vmem:[%s8681_s20 + $0xad8] sm:$0xff] }
 0x17e   : > { %5893 = vmatpush1.bf16.msra.mxu1 %v9987_v62  ;;  %5831 = vmatprep.subr.bf16.mxu0 %v9992_v47  ;;  %v1496_v62 = vld [vmem:[%s8681_s20 + $0x818] sm:$0xff] }
 0x17f   : > { %5895 = vmatprep.subr.bf16.mxu1 %v9994_v28  ;;  %v1504_v47 = vld [vmem:[%s8681_s20 + $0x858] sm:$0xff]  ;;  %v5922_v28 = vpack.c.bf16 %v1502_v44, %v1494_v56  ;;  %v6004_v56 = vpack.c.bf16 %v1567_v38, %v1559_v60  ;;  %v5942_v44 = vpack.c.bf16 %v1582_v27, %v1574_v34  ;;  %v1645_v60 = vld [vmem:[%s8681_s20 + $0xcc0] sm:$0xff]  ;;  %v1647_v34 = vld [vmem:[%s8681_s20 + $0xcd0] sm:$0xff] }
 0x180   : > { %v1654_v27 = vld [vmem:[%s8681_s20 + $0xd08] sm:$0xff] }
 0x181   : > { %5833 = vmatpush1.bf16.msra.mxu0 %v12852_v57  ;;  %v5940_v57 = vpack.c.bf16 %v1565_v16, %v1557_v58  ;;  %v5958_v58 = vpack.c.bf16 %v1646_v48, %v1638_v3  ;;  %v1637_v16 = vld [vmem:[%s8681_s20 + $0xc80] sm:$0xff]  ;;  %v1711_v3 = vld [vmem:[%s8681_s20 + $0xed0] sm:$0xff]  ;;  %v1718_v48 = vld [vmem:[%s8681_s20 + $0xf08] sm:$0xff] }
 0x182   : > { %5897 = vmatpush1.bf16.msra.mxu1 %v10010_v31  ;;  %5835 = vmatprep.subr.bf16.mxu0 %v10016_v59  ;;  %v1493_v31 = vld [vmem:[%s8681_s20 + $0x800] sm:$0xff] }
 0x183   : > { %5899 = vmatprep.subr.bf16.mxu1 %v10018_v29  ;;  %v1501_v59 = vld [vmem:[%s8681_s20 + $0x840] sm:$0xff]  ;;  %v1495_v29 = vld [vmem:[%s8681_s20 + $0x810] sm:$0xff] }
 0x185   : > { %5837 = vmatpush1.bf16.msra.mxu0 %v10023_v6  ;;  %v5986_v6 = vpack.c.bf16 %v1504_v47, %v1496_v62  ;;  %v1573_v62 = vld [vmem:[%s8681_s20 + $0xa80] sm:$0xff] }
 0x186   : > { %5901 = vmatpush1.bf16.msra.mxu1 %v10030_v55  ;;  %5839 = vmatprep.subr.bf16.mxu0 %v10037_v7  ;;  %v1503_v55 = vld [vmem:[%s8681_s20 + $0x850] sm:$0xff]  ;;  %v1510_v7 = vld [vmem:[%s8681_s20 + $0x888] sm:$0xff]  ;;  %v1581_v47 = vld [vmem:[%s8681_s20 + $0xac0] sm:$0xff] }
 0x187   : > { %5903 = vmatprep.subr.bf16.mxu1 %v10039_v46  ;;  %v1518_v46 = vld [vmem:[%s8681_s20 + $0x8c8] sm:$0xff] }
 0x189   : > { %5841 = vmatpush1.bf16.msra.mxu0 %v10047_v0  ;;  %v1512_v0 = vld [vmem:[%s8681_s20 + $0x898] sm:$0xff] }
 0x18a   : > { %5905 = vmatpush1.bf16.msra.mxu1 %v10053_v43  ;;  %5843 = vmatprep.subr.bf16.mxu0 %v10059_v14  ;;  %v1520_v43 = vld [vmem:[%s8681_s20 + $0x8d8] sm:$0xff]  ;;  %v5924_v14 = vpack.c.bf16 %v1501_v59, %v1493_v31  ;;  %v6006_v31 = vpack.c.bf16 %v1584_v12, %v1576_v24  ;;  %v1583_v59 = vld [vmem:[%s8681_s20 + $0xad0] sm:$0xff]  ;;  %v1662_v24 = vld [vmem:[%s8681_s20 + $0xd48] sm:$0xff] }
 0x18b   : > { %5907 = vmatprep.subr.bf16.mxu1 %v10061_v17  ;;  %v5988_v17 = vpack.c.bf16 %v1503_v55, %v1495_v29  ;;  %v1590_v29 = vld [vmem:[%s8681_s20 + $0xb08] sm:$0xff]  ;;  %v1592_v55 = vld [vmem:[%s8681_s20 + $0xb18] sm:$0xff] }
 0x18c   : > { %v1656_v12 = vld [vmem:[%s8681_s20 + $0xd18] sm:$0xff] }
 0x18d   : > { %5845 = vmatpush1.bf16.msra.mxu0 %v10067_v19  ;;  %v5926_v19 = vpack.c.bf16 %v1518_v46, %v1510_v7  ;;  %v1600_v7 = vld [vmem:[%s8681_s20 + $0xb58] sm:$0xff]  ;;  %v5944_v46 = vpack.c.bf16 %v1581_v47, %v1573_v62  ;;  %v5962_v62 = vpack.c.bf16 %v1662_v24, %v1654_v27  ;;  %v1653_v47 = vld [vmem:[%s8681_s20 + $0xd00] sm:$0xff]  ;;  %v1727_v27 = vld [vmem:[%s8681_s20 + $0xf50] sm:$0xff] }
 0x18e   : > { %5909 = vmatpush1.bf16.msra.mxu1 %v10073_v41  ;;  %5847 = vmatprep.subr.bf16.mxu0 %v10078_v54  ;;  %v1509_v41 = vld [vmem:[%s8681_s20 + $0x880] sm:$0xff]  ;;  %v1734_v24 = vld [vmem:[%s8681_s20 + $0xf88] sm:$0xff] }
 0x18f   : > { %5911 = vmatprep.subr.bf16.mxu1 %v10080_v40  ;;  %v1517_v54 = vld [vmem:[%s8681_s20 + $0x8c0] sm:$0xff]  ;;  %v1511_v40 = vld [vmem:[%s8681_s20 + $0x890] sm:$0xff] }
 0x191   : > { %5849 = vmatpush1.bf16.msra.mxu0 %v10085_v2  ;;  %v5990_v2 = vpack.c.bf16 %v1520_v43, %v1512_v0 }
 0x192   : > { %5913 = vmatpush1.bf16.msra.mxu1 %v10092_v63  ;;  %5851 = vmatprep.subr.bf16.mxu0 %v10098_v21  ;;  %v1519_v63 = vld [vmem:[%s8681_s20 + $0x8d0] sm:$0xff]  ;;  %v1526_v21 = vld [vmem:[%s8681_s20 + $0x908] sm:$0xff] }
 0x193   : > { %5915 = vmatprep.subr.bf16.mxu1 %v10100_v1  ;;  %v1534_v1 = vld [vmem:[%s8681_s20 + $0x948] sm:$0xff] }
 0x195   : > { %5853 = vmatpush1.bf16.msra.mxu0 %v10104_v22  ;;  %v1528_v22 = vld [vmem:[%s8681_s20 + $0x918] sm:$0xff] }
 0x196   : > { %5917 = vmatpush1.bf16.msra.mxu1 %v10110_v5  ;;  %5855 = vmatprep.subr.bf16.mxu0 %v10117_v11  ;;  %v1536_v5 = vld [vmem:[%s8681_s20 + $0x958] sm:$0xff] }
 0x197   : > { %5919 = vmatprep.subr.bf16.mxu1 %v10119_v30  ;;  %v10264_v11 = vld [vmem:[#allocation2 + $0x18] sm:$0xff]  ;;  %v5928_v30 = vpack.c.bf16 %v1517_v54, %v1509_v41  ;;  %v5994_v36 = vpack.c.bf16 %v1536_v5, %v1528_v22  ;;  %v10304_v41 = vpop.f32.mrb[0].mxu0  ;;  %v6010_v54 = vpack.c.bf16 %v1600_v7, %v1592_v55  ;;  %v1678_v55 = vld [vmem:[%s8681_s20 + $0xdc8] sm:$0xff] }
 0x198   : > { %v1608_v22 = vld [vmem:[%s8681_s20 + $0xb98] sm:$0xff] }
 0x199   : > { %5857 = vmatpush1.bf16.msra.mxu0 %v10123_v26  ;;  %v5992_v26 = vpack.c.bf16 %v1519_v63, %v1511_v40  ;;  %v1599_v40 = vld [vmem:[%s8681_s20 + $0xb50] sm:$0xff]  ;;  %v1614_v63 = vld [vmem:[%s8681_s20 + $0xbc8] sm:$0xff]  ;;  %v1616_v5 = vld [vmem:[%s8681_s20 + $0xbd8] sm:$0xff] }
 0x19a   : > { %5921 = vmatpush1.bf16.msra.mxu1 %v10125_v8  ;;  %5923 = vmatprep.subr.bf16.mxu0 %v5922_v28  ;;  %v5930_v8 = vpack.c.bf16 %v1534_v1, %v1526_v21  ;;  %v1575_v28 = vld [vmem:[%s8681_s20 + $0xa90] sm:$0xff]  ;;  %v10309_v21 = vpop.f32.mrb[0].mxu1  ;;  %v10311_v1 = vpop.f32.mrb[1].mxu0  ;;  %v6014_v52 = vpack.c.bf16 %v1616_v5, %v1608_v22  ;;  %v1672_v7 = vld [vmem:[%s8681_s20 + $0xd98] sm:$0xff]  ;;  %v1694_v22 = vld [vmem:[%s8681_s20 + $0xe48] sm:$0xff] }
 0x19b   : > { %5987 = vmatprep.subr.bf16.mxu1 %v5986_v6  ;;  %v1598_v6 = vld [vmem:[%s8681_s20 + $0xb48] sm:$0xff]  ;;  %v6008_v0 = vpack.c.bf16 %v1583_v59, %v1575_v28  ;;  %v1661_v28 = vld [vmem:[%s8681_s20 + $0xd40] sm:$0xff]  ;;  %v1688_v5 = vld [vmem:[%s8681_s20 + $0xe18] sm:$0xff] }
 0x19c   : > { %1254 = vmatmul.mubr.f32.vlgmr.msra.gmra.mrb[6].mxu0 %v10175_v10  ;;  %v5946_v43 = vpack.c.bf16 %v1598_v6, %v1590_v29  ;;  %v1663_v29 = vld [vmem:[%s8681_s20 + $0xd50] sm:$0xff]  ;;  %v1670_v6 = vld [vmem:[%s8681_s20 + $0xd88] sm:$0xff] }
 0x19d   : > { %1325 = vmatmul.mubr.f32.vlgmr.msra.gmra.mrb[6].mxu1 %v10175_v10  ;;  %5925 = vmatpush1.bf16.msra.mxu0 %v5924_v14  ;;  %v1544_v10 = vld [vmem:[%s8681_s20 + $0x998] sm:$0xff]  ;;  %v1589_v14 = vld [vmem:[%s8681_s20 + $0xb00] sm:$0xff] }
 0x19e   : > { %5989 = vmatpush1.bf16.msra.mxu1 %v5988_v17  ;;  %5927 = vmatprep.subr.bf16.mxu0 %v5926_v19  ;;  %v5998_v9 = vpack.c.bf16 %v1552_v15, %v1544_v10  ;;  %v1597_v17 = vld [vmem:[%s8681_s20 + $0xb40] sm:$0xff]  ;;  %v1591_v19 = vld [vmem:[%s8681_s20 + $0xb10] sm:$0xff]  ;;  %v1630_v10 = vld [vmem:[%s8681_s20 + $0xc48] sm:$0xff] }
 0x19f   : > { %5991 = vmatprep.subr.bf16.mxu1 %v5990_v2  ;;  %1815 = vmatprep.mubr.f32.mxu0 %v10264_v11  ;;  %v1606_v2 = vld [vmem:[%s8681_s20 + $0xb88] sm:$0xff]  ;;  %v1624_v15 = vld [vmem:[%s8681_s20 + $0xc18] sm:$0xff]  ;;  %v5954_v50 = vpack.c.bf16 %v1630_v10, %v1622_v33  ;;  %v1695_v33 = vld [vmem:[%s8681_s20 + $0xe50] sm:$0xff] }
 0x1a0   : > { %1886 = vmatprep.mubr.f32.mxu1 %v10264_v11  ;;  %v5950_v49 = vpack.c.bf16 %v1614_v63, %v1606_v2  ;;  %v1679_v2 = vld [vmem:[%s8681_s20 + $0xdd0] sm:$0xff]  ;;  %v1686_v63 = vld [vmem:[%s8681_s20 + $0xe08] sm:$0xff] }
 0x1a1   : > { %5929 = vmatpush1.bf16.msra.mxu0 %v5928_v30  ;;  %v10315_v30 = vpop.f32.mrb[1].mxu1  ;;  %v1702_v10 = vld [vmem:[%s8681_s20 + $0xe88] sm:$0xff] }
 0x1a2   : > { %5993 = vmatpush1.bf16.msra.mxu1 %v5992_v26  ;;  %5931 = vmatprep.subr.bf16.mxu0 %v5930_v8  ;;  %v5948_v26 = vpack.c.bf16 %v1597_v17, %v1589_v14  ;;  %v6012_v8 = vpack.c.bf16 %v1599_v40, %v1591_v19  ;;  %v5966_v14 = vpack.c.bf16 %v1678_v55, %v1670_v6  ;;  %v1669_v17 = vld [vmem:[%s8681_s20 + $0xd80] sm:$0xff]  ;;  %v1743_v6 = vld [vmem:[%s8681_s20 + $0xfd0] sm:$0xff]  ;;  %v1498_v55 = vld [vmem:[%s8681_s20 + $0x828] sm:$0xff] }
 0x1a3   : > { %5995 = vmatprep.subr.bf16.mxu1 %v5994_v36  ;;  %v1607_v36 = vld [vmem:[%s8681_s20 + $0xb90] sm:$0xff]  ;;  %v1677_v19 = vld [vmem:[%s8681_s20 + $0xdc0] sm:$0xff] }
 0x1a5   : > { %5933 = vmatpush1.bf16.msra.mxu0 %v5932_v37  ;;  %v1632_v37 = vld [vmem:[%s8681_s20 + $0xc58] sm:$0xff] }
 0x1a6   : > { %5997 = vmatpush1.bf16.msra.mxu1 %v5996_v39  ;;  %5935 = vmatprep.subr.bf16.mxu0 %v5934_v42  ;;  %v5952_v39 = vpack.c.bf16 %v1613_v18, %v1605_v4  ;;  %v6016_v42 = vpack.c.bf16 %v1615_v45, %v1607_v36  ;;  %v6018_v23 = vpack.c.bf16 %v1632_v37, %v1624_v15  ;;  %v1685_v18 = vld [vmem:[%s8681_s20 + $0xe00] sm:$0xff]  ;;  %v1710_v15 = vld [vmem:[%s8681_s20 + $0xec8] sm:$0xff]  ;;  %v1704_v37 = vld [vmem:[%s8681_s20 + $0xe98] sm:$0xff] }
 0x1a7   : > { %5999 = vmatprep.subr.bf16.mxu1 %v5998_v9  ;;  %v1623_v9 = vld [vmem:[%s8681_s20 + $0xc10] sm:$0xff]  ;;  %v5970_v4 = vpack.c.bf16 %v1694_v22, %v1686_v63  ;;  %v1693_v36 = vld [vmem:[%s8681_s20 + $0xe40] sm:$0xff]  ;;  %v1514_v22 = vld [vmem:[%s8681_s20 + $0x8a8] sm:$0xff] }
 0x1a8   : > { %v1507_v63 = vld [vmem:[%s8681_s20 + $0x870] sm:$0xff] }
 0x1a9   : > { %5937 = vmatpush1.bf16.msra.mxu0 %v5936_v25  ;;  %v1648_v25 = vld [vmem:[%s8681_s20 + $0xcd8] sm:$0xff] }
 0x1aa   : > { %6001 = vmatpush1.bf16.msra.mxu1 %v6000_v20  ;;  %5939 = vmatprep.subr.bf16.mxu0 %v5938_v13  ;;  %v5956_v20 = vpack.c.bf16 %v1629_v51, %v1621_v53  ;;  %v6020_v13 = vpack.c.bf16 %v1631_v32, %v1623_v9  ;;  %v6022_v38 = vpack.c.bf16 %v1648_v25, %v1640_v61  ;;  %v1701_v51 = vld [vmem:[%s8681_s20 + $0xe80] sm:$0xff]  ;;  %v1726_v61 = vld [vmem:[%s8681_s20 + $0xf48] sm:$0xff]  ;;  %v1720_v25 = vld [vmem:[%s8681_s20 + $0xf18] sm:$0xff] }
 0x1ab   : > { %6003 = vmatprep.subr.bf16.mxu1 %v6002_v35  ;;  %v1639_v35 = vld [vmem:[%s8681_s20 + $0xc90] sm:$0xff]  ;;  %v5974_v53 = vpack.c.bf16 %v1710_v15, %v1702_v10  ;;  %v1709_v9 = vld [vmem:[%s8681_s20 + $0xec0] sm:$0xff] }
 0x1ac   : > { %v1523_v15 = vld [vmem:[%s8681_s20 + $0x8f0] sm:$0xff] }
 0x1ad   : > { %5941 = vmatpush1.bf16.msra.mxu0 %v5940_v57  ;;  %v1664_v57 = vld [vmem:[%s8681_s20 + $0xd58] sm:$0xff] }
 0x1ae   : > { %6005 = vmatpush1.bf16.msra.mxu1 %v6004_v56  ;;  %5943 = vmatprep.subr.bf16.mxu0 %v5942_v44  ;;  %v5960_v56 = vpack.c.bf16 %v1645_v60, %v1637_v16  ;;  %v6024_v44 = vpack.c.bf16 %v1647_v34, %v1639_v35  ;;  %v6026_v59 = vpack.c.bf16 %v1664_v57, %v1656_v12  ;;  %v1717_v60 = vld [vmem:[%s8681_s20 + $0xf00] sm:$0xff]  ;;  %v1742_v12 = vld [vmem:[%s8681_s20 + $0xfc8] sm:$0xff]  ;;  %v1736_v57 = vld [vmem:[%s8681_s20 + $0xf98] sm:$0xff] }
 0x1af   : > { %6007 = vmatprep.subr.bf16.mxu1 %v6006_v31  ;;  %v1655_v31 = vld [vmem:[%s8681_s20 + $0xd10] sm:$0xff]  ;;  %v5978_v16 = vpack.c.bf16 %v1726_v61, %v1718_v48  ;;  %v1725_v35 = vld [vmem:[%s8681_s20 + $0xf40] sm:$0xff] }
 0x1b0   : > { %v1539_v61 = vld [vmem:[%s8681_s20 + $0x970] sm:$0xff] }
 0x1b1   : > { %5945 = vmatpush1.bf16.msra.mxu0 %v5944_v46  ;;  %v1680_v46 = vld [vmem:[%s8681_s20 + $0xdd8] sm:$0xff] }
 0x1b2   : > { %6009 = vmatpush1.bf16.msra.mxu1 %v6008_v0  ;;  %5947 = vmatprep.subr.bf16.mxu0 %v5946_v43  ;;  %v5964_v0 = vpack.c.bf16 %v1661_v28, %v1653_v47  ;;  %v6028_v43 = vpack.c.bf16 %v1663_v29, %v1655_v31  ;;  %v6030_v40 = vpack.c.bf16 %v1680_v46, %v1672_v7  ;;  %v1733_v28 = vld [vmem:[%s8681_s20 + $0xf80] sm:$0xff]  ;;  %v1506_v7 = vld [vmem:[%s8681_s20 + $0x868] sm:$0xff]  ;;  %v1500_v46 = vld [vmem:[%s8681_s20 + $0x838] sm:$0xff] }
 0x1b3   : > { %6011 = vmatprep.subr.bf16.mxu1 %v6010_v54  ;;  %v1671_v54 = vld [vmem:[%s8681_s20 + $0xd90] sm:$0xff]  ;;  %v5982_v47 = vpack.c.bf16 %v1742_v12, %v1734_v24  ;;  %v1741_v31 = vld [vmem:[%s8681_s20 + $0xfc0] sm:$0xff] }
 0x1b4   : > { %v1555_v12 = vld [vmem:[%s8681_s20 + $0x9f0] sm:$0xff] }
 0x1b5   : > { %5949 = vmatpush1.bf16.msra.mxu0 %v5948_v26  ;;  %v1696_v26 = vld [vmem:[%s8681_s20 + $0xe58] sm:$0xff] }
 0x1b6   : > { %6013 = vmatpush1.bf16.msra.mxu1 %v6012_v8  ;;  %5951 = vmatprep.subr.bf16.mxu0 %v5950_v49  ;;  %v5968_v8 = vpack.c.bf16 %v1677_v19, %v1669_v17  ;;  %v6032_v49 = vpack.c.bf16 %v1679_v2, %v1671_v54  ;;  %v6034_v45 = vpack.c.bf16 %v1696_v26, %v1688_v5  ;;  %v1497_v19 = vld [vmem:[%s8681_s20 + $0x820] sm:$0xff]  ;;  %v1522_v5 = vld [vmem:[%s8681_s20 + $0x8e8] sm:$0xff]  ;;  %v1516_v26 = vld [vmem:[%s8681_s20 + $0x8b8] sm:$0xff] }
 0x1b7   : > { %6015 = vmatprep.subr.bf16.mxu1 %v6014_v52  ;;  %v1687_v52 = vld [vmem:[%s8681_s20 + $0xe10] sm:$0xff]  ;;  %v6050_v17 = vpack.c.bf16 %v1506_v7, %v1498_v55  ;;  %v1505_v54 = vld [vmem:[%s8681_s20 + $0x860] sm:$0xff]  ;;  %v1578_v7 = vld [vmem:[%s8681_s20 + $0xaa8] sm:$0xff] }
 0x1b8   : > { %v1571_v55 = vld [vmem:[%s8681_s20 + $0xa70] sm:$0xff] }
 0x1b9   : > { %5953 = vmatpush1.bf16.msra.mxu0 %v5952_v39  ;;  %v1712_v39 = vld [vmem:[%s8681_s20 + $0xed8] sm:$0xff] }
 0x1ba   : > { %6017 = vmatpush1.bf16.msra.mxu1 %v6016_v42  ;;  %5955 = vmatprep.subr.bf16.mxu0 %v5954_v50  ;;  %v5972_v42 = vpack.c.bf16 %v1693_v36, %v1685_v18  ;;  %v6036_v50 = vpack.c.bf16 %v1695_v33, %v1687_v52  ;;  %v6038_v32 = vpack.c.bf16 %v1712_v39, %v1704_v37  ;;  %v1513_v52 = vld [vmem:[%s8681_s20 + $0x8a0] sm:$0xff]  ;;  %v1515_v33 = vld [vmem:[%s8681_s20 + $0x8b0] sm:$0xff]  ;;  %v1530_v37 = vld [vmem:[%s8681_s20 + $0x928] sm:$0xff] }
 0x1bb   : > { %6019 = vmatprep.subr.bf16.mxu1 %v6018_v23  ;;  %v1703_v23 = vld [vmem:[%s8681_s20 + $0xe90] sm:$0xff]  ;;  %v6054_v36 = vpack.c.bf16 %v1522_v5, %v1514_v22  ;;  %v1538_v39 = vld [vmem:[%s8681_s20 + $0x968] sm:$0xff] }
 0x1bc   : > { %v1587_v22 = vld [vmem:[%s8681_s20 + $0xaf0] sm:$0xff]  ;;  %v1594_v5 = vld [vmem:[%s8681_s20 + $0xb28] sm:$0xff] }
 0x1bd   : > { %5957 = vmatpush1.bf16.msra.mxu0 %v5956_v20  ;;  %v1728_v20 = vld [vmem:[%s8681_s20 + $0xf58] sm:$0xff] }
 0x1be   : > { %6021 = vmatpush1.bf16.msra.mxu1 %v6020_v13  ;;  %5959 = vmatprep.subr.bf16.mxu0 %v5958_v58  ;;  %v5976_v13 = vpack.c.bf16 %v1709_v9, %v1701_v51  ;;  %v6040_v58 = vpack.c.bf16 %v1711_v3, %v1703_v23  ;;  %v6042_v34 = vpack.c.bf16 %v1728_v20, %v1720_v25  ;;  %v1529_v23 = vld [vmem:[%s8681_s20 + $0x920] sm:$0xff]  ;;  %v1531_v3 = vld [vmem:[%s8681_s20 + $0x930] sm:$0xff]  ;;  %v1546_v25 = vld [vmem:[%s8681_s20 + $0x9a8] sm:$0xff] }
 0x1bf   : > { %6023 = vmatprep.subr.bf16.mxu1 %v6022_v38  ;;  %v1719_v38 = vld [vmem:[%s8681_s20 + $0xf10] sm:$0xff]  ;;  %v6120_v51 = vpack.c.bf16 %v1523_v15, %v1515_v33  ;;  %v6058_v9 = vpack.c.bf16 %v1538_v39, %v1530_v37  ;;  %v1554_v20 = vld [vmem:[%s8681_s20 + $0x9e8] sm:$0xff]  ;;  %v1601_v33 = vld [vmem:[%s8681_s20 + $0xb60] sm:$0xff] }
 0x1c0   : > { %v1603_v39 = vld [vmem:[%s8681_s20 + $0xb70] sm:$0xff] }
 0x1c1   : > { %5961 = vmatpush1.bf16.msra.mxu0 %v5960_v56  ;;  %v1744_v56 = vld [vmem:[%s8681_s20 + $0xfd8] sm:$0xff] }
 0x1c2   : > { %6025 = vmatpush1.bf16.msra.mxu1 %v6024_v44  ;;  %5963 = vmatprep.subr.bf16.mxu0 %v5962_v62  ;;  %v5980_v44 = vpack.c.bf16 %v1725_v35, %v1717_v60  ;;  %v6044_v62 = vpack.c.bf16 %v1727_v27, %v1719_v38  ;;  %v6046_v29 = vpack.c.bf16 %v1744_v56, %v1736_v57  ;;  %v1545_v38 = vld [vmem:[%s8681_s20 + $0x9a0] sm:$0xff]  ;;  %v1547_v27 = vld [vmem:[%s8681_s20 + $0x9b0] sm:$0xff]  ;;  %v1562_v57 = vld [vmem:[%s8681_s20 + $0xa28] sm:$0xff] }
 0x1c3   : > { %6027 = vmatprep.subr.bf16.mxu1 %v6026_v59  ;;  %v1735_v59 = vld [vmem:[%s8681_s20 + $0xf90] sm:$0xff]  ;;  %v6124_v60 = vpack.c.bf16 %v1539_v61, %v1531_v3  ;;  %v6062_v35 = vpack.c.bf16 %v1554_v20, %v1546_v25  ;;  %v1564_v56 = vld [vmem:[%s8681_s20 + $0xa38] sm:$0xff]  ;;  %v1609_v25 = vld [vmem:[%s8681_s20 + $0xba0] sm:$0xff] }
 0x1c4   : > { %v1617_v20 = vld [vmem:[%s8681_s20 + $0xbe0] sm:$0xff] }
 0x1c5   : > { %5965 = vmatpush1.bf16.msra.mxu0 %v5964_v0  ;;  %v1508_v0 = vld [vmem:[%s8681_s20 + $0x878] sm:$0xff] }
 0x1c6   : > { %6029 = vmatpush1.bf16.msra.mxu1 %v6028_v43  ;;  %5967 = vmatprep.subr.bf16.mxu0 %v5966_v14  ;;  %v5984_v43 = vpack.c.bf16 %v1741_v31, %v1733_v28  ;;  %v6048_v14 = vpack.c.bf16 %v1743_v6, %v1735_v59  ;;  %v6114_v2 = vpack.c.bf16 %v1508_v0, %v1500_v46  ;;  %v1561_v31 = vld [vmem:[%s8681_s20 + $0xa20] sm:$0xff]  ;;  %v1586_v46 = vld [vmem:[%s8681_s20 + $0xae8] sm:$0xff]  ;;  %v1580_v0 = vld [vmem:[%s8681_s20 + $0xab8] sm:$0xff] }
 0x1c7   : > { %6031 = vmatprep.subr.bf16.mxu1 %v6030_v40  ;;  %v1499_v40 = vld [vmem:[%s8681_s20 + $0x830] sm:$0xff]  ;;  %v1569_v59 = vld [vmem:[%s8681_s20 + $0xa60] sm:$0xff] }
 0x1c8   : > { %v6116_v18 = vpack.c.bf16 %v1507_v63, %v1499_v40  ;;  %v1585_v40 = vld [vmem:[%s8681_s20 + $0xae0] sm:$0xff] }
 0x1c9   : > { %5969 = vmatpush1.bf16.msra.mxu0 %v5968_v8  ;;  %v1524_v8 = vld [vmem:[%s8681_s20 + $0x8f8] sm:$0xff] }
 0x1ca   : > { %6033 = vmatpush1.bf16.msra.mxu1 %v6032_v49  ;;  %5971 = vmatprep.subr.bf16.mxu0 %v5970_v4  ;;  %v10397_v49 = vld [vmem:[#allocation2 + $0x10] sm:$0xff]  ;;  %v6052_v4 = vpack.c.bf16 %v1505_v54, %v1497_v19  ;;  %v6118_v10 = vpack.c.bf16 %v1524_v8, %v1516_v26  ;;  %v6070_v19 = vpack.c.bf16 %v1586_v46, %v1578_v7  ;;  %v1577_v54 = vld [vmem:[%s8681_s20 + $0xaa0] sm:$0xff]  ;;  %v1602_v26 = vld [vmem:[%s8681_s20 + $0xb68] sm:$0xff] }
 0x1cb   : > { %6035 = vmatprep.subr.bf16.mxu1 %v6034_v45  ;;  %v1521_v45 = vld [vmem:[%s8681_s20 + $0x8e0] sm:$0xff]  ;;  %v1596_v8 = vld [vmem:[%s8681_s20 + $0xb38] sm:$0xff] }
 0x1cc   : > { %v1641_v7 = vld [vmem:[%s8681_s20 + $0xca0] sm:$0xff] }
 0x1cd   : > { %5973 = vmatpush1.bf16.msra.mxu0 %v5972_v42  ;;  %v1532_v42 = vld [vmem:[%s8681_s20 + $0x938] sm:$0xff]  ;;  %v1649_v46 = vld [vmem:[%s8681_s20 + $0xce0] sm:$0xff] }
 0x1ce   : > { %6037 = vmatpush1.bf16.msra.mxu1 %v6036_v50  ;;  %5975 = vmatprep.subr.bf16.mxu0 %v5974_v53  ;;  %v1540_v50 = vld [vmem:[%s8681_s20 + $0x978] sm:$0xff]  ;;  %v6056_v53 = vpack.c.bf16 %v1521_v45, %v1513_v52  ;;  %v6074_v52 = vpack.c.bf16 %v1602_v26, %v1594_v5  ;;  %v1593_v45 = vld [vmem:[%s8681_s20 + $0xb20] sm:$0xff] }
 0x1cf   : > { %6039 = vmatprep.subr.bf16.mxu1 %v6038_v32  ;;  %v1537_v32 = vld [vmem:[%s8681_s20 + $0x960] sm:$0xff]  ;;  %v6122_v48 = vpack.c.bf16 %v1540_v50, %v1532_v42  ;;  %v1610_v42 = vld [vmem:[%s8681_s20 + $0xba8] sm:$0xff]  ;;  %v6076_v3 = vpack.c.bf16 %v1601_v33, %v1593_v45  ;;  %v1676_v45 = vld [vmem:[%s8681_s20 + $0xdb8] sm:$0xff] }
 0x1d0   : > { %v1618_v50 = vld [vmem:[%s8681_s20 + $0xbe8] sm:$0xff]  ;;  %v1657_v5 = vld [vmem:[%s8681_s20 + $0xd20] sm:$0xff]  ;;  %v1684_v33 = vld [vmem:[%s8681_s20 + $0xdf8] sm:$0xff] }
 0x1d1   : > { %5977 = vmatpush1.bf16.msra.mxu0 %v5976_v13  ;;  %v1548_v13 = vld [vmem:[%s8681_s20 + $0x9b8] sm:$0xff]  ;;  %v6078_v61 = vpack.c.bf16 %v1618_v50, %v1610_v42  ;;  %v1665_v26 = vld [vmem:[%s8681_s20 + $0xd60] sm:$0xff] }
 0x1d2   : > { %6041 = vmatpush1.bf16.msra.mxu1 %v6040_v58  ;;  %5979 = vmatprep.subr.bf16.mxu0 %v5978_v16  ;;  %v1556_v58 = vld [vmem:[%s8681_s20 + $0x9f8] sm:$0xff]  ;;  %v6060_v16 = vpack.c.bf16 %v1537_v32, %v1529_v23  ;;  %v1673_v42 = vld [vmem:[%s8681_s20 + $0xda0] sm:$0xff] }
 0x1d3   : > { %6043 = vmatprep.subr.bf16.mxu1 %v6042_v34  ;;  %v1553_v34 = vld [vmem:[%s8681_s20 + $0x9e0] sm:$0xff]  ;;  %v6126_v24 = vpack.c.bf16 %v1556_v58, %v1548_v13  ;;  %v1620_v23 = vld [vmem:[%s8681_s20 + $0xbf8] sm:$0xff]  ;;  %v1611_v13 = vld [vmem:[%s8681_s20 + $0xbb0] sm:$0xff] }
 0x1d4   : > { %v1681_v50 = vld [vmem:[%s8681_s20 + $0xde0] sm:$0xff] }
 0x1d5   : > { %5981 = vmatpush1.bf16.msra.mxu0 %v5980_v44  ;;  %v1572_v44 = vld [vmem:[%s8681_s20 + $0xa78] sm:$0xff] }
 0x1d6   : > { %6045 = vmatpush1.bf16.msra.mxu1 %v6044_v62  ;;  %5983 = vmatprep.subr.bf16.mxu0 %v5982_v47  ;;  %v6064_v62 = vpack.c.bf16 %v1553_v34, %v1545_v38  ;;  %v6128_v47 = vpack.c.bf16 %v1555_v12, %v1547_v27  ;;  %v6130_v6 = vpack.c.bf16 %v1572_v44, %v1564_v56  ;;  %v1628_v38 = vld [vmem:[%s8681_s20 + $0xc38] sm:$0xff]  ;;  %v1627_v56 = vld [vmem:[%s8681_s20 + $0xc30] sm:$0xff] }
 0x1d7   : > { %6047 = vmatprep.subr.bf16.mxu1 %v6046_v29  ;;  %v1563_v29 = vld [vmem:[%s8681_s20 + $0xa30] sm:$0xff]  ;;  %v1636_v34 = vld [vmem:[%s8681_s20 + $0xc78] sm:$0xff]  ;;  %v6080_v27 = vpack.c.bf16 %v1617_v20, %v1609_v25 }
 0x1d8   : > { %v6146_v44 = vpack.c.bf16 %v1636_v34, %v1628_v38  ;;  %v1692_v25 = vld [vmem:[%s8681_s20 + $0xe38] sm:$0xff]  ;;  %v1691_v38 = vld [vmem:[%s8681_s20 + $0xe30] sm:$0xff] }
 0x1d9   : > { %5985 = vmatpush1.bf16.msra.mxu0 %v5984_v43  ;;  %v1588_v43 = vld [vmem:[%s8681_s20 + $0xaf8] sm:$0xff] }
 0x1da   : > { %6049 = vmatpush1.bf16.msra.mxu1 %v6048_v14  ;;  %6051 = vmatprep.subr.bf16.mxu0 %v6050_v17  ;;  %v6068_v14 = vpack.c.bf16 %v1569_v59, %v1561_v31  ;;  %v6132_v17 = vpack.c.bf16 %v1571_v55, %v1563_v29  ;;  %v6134_v63 = vpack.c.bf16 %v1588_v43, %v1580_v0  ;;  %v1644_v31 = vld [vmem:[%s8681_s20 + $0xcb8] sm:$0xff]  ;;  %v1643_v0 = vld [vmem:[%s8681_s20 + $0xcb0] sm:$0xff] }
 0x1db   : > { %6115 = vmatprep.subr.bf16.mxu1 %v6114_v2  ;;  %v1579_v2 = vld [vmem:[%s8681_s20 + $0xab0] sm:$0xff]  ;;  %v1652_v59 = vld [vmem:[%s8681_s20 + $0xcf8] sm:$0xff] }
 0x1dc   : > { %1816 = vmatmul.mubr.f32.vlgmr.msra.gmra.mrb[8].mxu0 %v10397_v49  ;;  %v6150_v43 = vpack.c.bf16 %v1652_v59, %v1644_v31  ;;  %v1700_v20 = vld [vmem:[%s8681_s20 + $0xe78] sm:$0xff]  ;;  %v1707_v31 = vld [vmem:[%s8681_s20 + $0xeb0] sm:$0xff] }
 0x1dd   : > { %1887 = vmatmul.mubr.f32.vlgmr.msra.gmra.mrb[8].mxu1 %v10397_v49  ;;  %6053 = vmatpush1.bf16.msra.mxu0 %v6052_v4  ;;  %v1604_v4 = vld [vmem:[%s8681_s20 + $0xb78] sm:$0xff]  ;;  %v6162_v34 = vpack.c.bf16 %v1700_v20, %v1692_v25  ;;  %v7547_v20 = vld [vmem:[%s8681_s20 + $0x800] sm:$0xff] }
 0x1de   : > { %6117 = vmatpush1.bf16.msra.mxu1 %v6116_v18  ;;  %6055 = vmatprep.subr.bf16.mxu0 %v6054_v36  ;;  %v6072_v18 = vpack.c.bf16 %v1585_v40, %v1577_v54  ;;  %v6136_v36 = vpack.c.bf16 %v1587_v22, %v1579_v2  ;;  %v6138_v37 = vpack.c.bf16 %v1604_v4, %v1596_v8  ;;  %v1660_v54 = vld [vmem:[%s8681_s20 + $0xd38] sm:$0xff]  ;;  %v1659_v8 = vld [vmem:[%s8681_s20 + $0xd30] sm:$0xff] }
 0x1df   : > { %6119 = vmatprep.subr.bf16.mxu1 %v6118_v10  ;;  %1957 = vmatprep.mubr.f32.mxu0 %v10264_v11  ;;  %v1595_v10 = vld [vmem:[%s8681_s20 + $0xb30] sm:$0xff]  ;;  %v1668_v40 = vld [vmem:[%s8681_s20 + $0xd78] sm:$0xff]  ;;  %v6088_v2 = vpack.c.bf16 %v1649_v46, %v1641_v7 }
 0x1e0   : > { %2028 = vmatprep.mubr.f32.mxu1 %v10264_v11  ;;  %v1570_v11 = vld [vmem:[%s8681_s20 + $0xa68] sm:$0xff]  ;;  %v6154_v4 = vpack.c.bf16 %v1668_v40, %v1660_v54  ;;  %v1724_v7 = vld [vmem:[%s8681_s20 + $0xf38] sm:$0xff]  ;;  %v1723_v54 = vld [vmem:[%s8681_s20 + $0xf30] sm:$0xff] }
 0x1e1   : > { %6057 = vmatpush1.bf16.msra.mxu0 %v6056_v53  ;;  %v6066_v28 = vpack.c.bf16 %v1570_v11, %v1562_v57  ;;  %v1625_v57 = vld [vmem:[%s8681_s20 + $0xc20] sm:$0xff]  ;;  %v1732_v46 = vld [vmem:[%s8681_s20 + $0xf78] sm:$0xff] }
 0x1e2   : > { %6121 = vmatpush1.bf16.msra.mxu1 %v6120_v51  ;;  %6059 = vmatprep.subr.bf16.mxu0 %v6058_v9  ;;  %v1612_v9 = vld [vmem:[%s8681_s20 + $0xbb8] sm:$0xff]  ;;  %v1633_v11 = vld [vmem:[%s8681_s20 + $0xc60] sm:$0xff]  ;;  %v6170_v40 = vpack.c.bf16 %v1732_v46, %v1724_v7  ;;  %v7557_v7 = vld [vmem:[%s8681_s20 + $0x890] sm:$0xff] }
 0x1e3   : > { %6123 = vmatprep.subr.bf16.mxu1 %v6122_v48  ;;  %v6140_v48 = vpack.c.bf16 %v1603_v39, %v1595_v10  ;;  %v6142_v58 = vpack.c.bf16 %v1620_v23, %v1612_v9  ;;  %v6084_v29 = vpack.c.bf16 %v1633_v11, %v1625_v57  ;;  %v6092_v10 = vpack.c.bf16 %v1665_v26, %v1657_v5  ;;  %v1675_v9 = vld [vmem:[%s8681_s20 + $0xdb0] sm:$0xff]  ;;  %v1708_v57 = vld [vmem:[%s8681_s20 + $0xeb8] sm:$0xff] }
 0x1e4   : > { %v6158_v23 = vpack.c.bf16 %v1684_v33, %v1676_v45  ;;  %v1716_v11 = vld [vmem:[%s8681_s20 + $0xef8] sm:$0xff]  ;;  %v1739_v45 = vld [vmem:[%s8681_s20 + $0xfb0] sm:$0xff]  ;;  %v2053_v46 = vand.u32 2147483647, %v7557_v7  ;;  %v7581_v7 = vld [vmem:[%s8681_s20 + $0xa40] sm:$0xff] }
 0x1e5   : > { %6061 = vmatpush1.bf16.msra.mxu0 %v6060_v16  ;;  %v1619_v16 = vld [vmem:[%s8681_s20 + $0xbf0] sm:$0xff]  ;;  %v6166_v59 = vpack.c.bf16 %v1716_v11, %v1708_v57  ;;  %v1740_v5 = vld [vmem:[%s8681_s20 + $0xfb8] sm:$0xff]  ;;  %v7552_v57 = vld [vmem:[%s8681_s20 + $0x8c8] sm:$0xff] }
 0x1e6   : > { %6125 = vmatpush1.bf16.msra.mxu1 %v6124_v60  ;;  %6063 = vmatprep.subr.bf16.mxu0 %v6062_v35  ;;  %v1626_v60 = vld [vmem:[%s8681_s20 + $0xc28] sm:$0xff]  ;;  %v1748_v26 = vld [vmem:[%s8681_s20 + $0xff8] sm:$0xff]  ;;  %v1747_v33 = vld [vmem:[%s8681_s20 + $0xff0] sm:$0xff]  ;;  %v2060_v11 = vand.u32 2147483647, %v7552_v57 }
 0x1e7   : > { %6127 = vmatprep.subr.bf16.mxu1 %v6126_v24  ;;  %v1634_v35 = vld [vmem:[%s8681_s20 + $0xc68] sm:$0xff]  ;;  %v6144_v24 = vpack.c.bf16 %v1619_v16, %v1611_v13  ;;  %v6096_v13 = vpack.c.bf16 %v1681_v50, %v1673_v42  ;;  %v6174_v50 = vpack.c.bf16 %v1748_v26, %v1740_v5  ;;  %v6176_v25 = vpack.c.bf16 %v1747_v33, %v1739_v45  ;;  %v7562_v26 = vld [vmem:[%s8681_s20 + $0x958] sm:$0xff]  ;;  %v7565_v33 = vld [vmem:[%s8681_s20 + $0x910] sm:$0xff] }
 0x1e8   : > { %v6082_v12 = vpack.c.bf16 %v1634_v35, %v1626_v60  ;;  %v1689_v60 = vld [vmem:[%s8681_s20 + $0xe20] sm:$0xff] }
 0x1e9   : > { %6065 = vmatpush1.bf16.msra.mxu0 %v6064_v62  ;;  %v1635_v62 = vld [vmem:[%s8681_s20 + $0xc70] sm:$0xff]  ;;  %v1697_v35 = vld [vmem:[%s8681_s20 + $0xe60] sm:$0xff] }
 0x1ea   : > { %6129 = vmatpush1.bf16.msra.mxu1 %v6128_v47  ;;  %6067 = vmatprep.subr.bf16.mxu0 %v6066_v28  ;;  %v1642_v47 = vld [vmem:[%s8681_s20 + $0xca8] sm:$0xff] }
 0x1eb   : > { %6131 = vmatprep.subr.bf16.mxu1 %v6130_v6  ;;  %v1650_v28 = vld [vmem:[%s8681_s20 + $0xce8] sm:$0xff]  ;;  %v6148_v6 = vpack.c.bf16 %v1635_v62, %v1627_v56  ;;  %v6100_v56 = vpack.c.bf16 %v1697_v35, %v1689_v60  ;;  %v7549_v60 = vld [vmem:[%s8681_s20 + $0x810] sm:$0xff] }
 0x1ec   : > { %v6086_v55 = vpack.c.bf16 %v1650_v28, %v1642_v47  ;;  %v1705_v47 = vld [vmem:[%s8681_s20 + $0xea0] sm:$0xff]  ;;  %v2037_v35 = vand.u32 2147483647, %v7549_v60 }
 0x1ed   : > { %6069 = vmatpush1.bf16.msra.mxu0 %v6068_v14  ;;  %v1651_v14 = vld [vmem:[%s8681_s20 + $0xcf0] sm:$0xff]  ;;  %v1713_v28 = vld [vmem:[%s8681_s20 + $0xee0] sm:$0xff] }
 0x1ee   : > { %6133 = vmatpush1.bf16.msra.mxu1 %v6132_v17  ;;  %6071 = vmatprep.subr.bf16.mxu0 %v6070_v19  ;;  %v10446_v15 = vpop.f32.mrb[2].mxu0  ;;  %v1658_v17 = vld [vmem:[%s8681_s20 + $0xd28] sm:$0xff] }
 0x1ef   : > { %6135 = vmatprep.subr.bf16.mxu1 %v6134_v63  ;;  %v10453_v51 = vpop.f32.mrb[3].mxu0  ;;  %v1666_v19 = vld [vmem:[%s8681_s20 + $0xd68] sm:$0xff]  ;;  %v6152_v63 = vpack.c.bf16 %v1651_v14, %v1643_v0  ;;  %v6104_v0 = vpack.c.bf16 %v1713_v28, %v1705_v47  ;;  %v7554_v47 = vld [vmem:[%s8681_s20 + $0x8d8] sm:$0xff] }
 0x1f0   : > { %v10451_v53 = vpop.f32.mrb[2].mxu1  ;;  %v6090_v22 = vpack.c.bf16 %v1666_v19, %v1658_v17  ;;  %v1721_v17 = vld [vmem:[%s8681_s20 + $0xf20] sm:$0xff]  ;;  %v2062_v28 = vand.u32 2147483647, %v7554_v47 }
 0x1f1   : > { %v10457_v32 = vpop.f32.mrb[3].mxu1  ;;  %6073 = vmatpush1.bf16.msra.mxu0 %v6072_v18  ;;  %v1667_v18 = vld [vmem:[%s8681_s20 + $0xd70] sm:$0xff]  ;;  %v1729_v19 = vld [vmem:[%s8681_s20 + $0xf60] sm:$0xff] }
 0x1f2   : > { %6137 = vmatpush1.bf16.msra.mxu1 %v6136_v36  ;;  %6075 = vmatprep.subr.bf16.mxu0 %v6074_v52  ;;  %v1674_v36 = vld [vmem:[%s8681_s20 + $0xda8] sm:$0xff] }
 0x1f3   : > { %6139 = vmatprep.subr.bf16.mxu1 %v6138_v37  ;;  %v1682_v52 = vld [vmem:[%s8681_s20 + $0xde8] sm:$0xff]  ;;  %v6156_v37 = vpack.c.bf16 %v1667_v18, %v1659_v8  ;;  %v6108_v8 = vpack.c.bf16 %v1729_v19, %v1721_v17  ;;  %v1745_v18 = vld [vmem:[%s8681_s20 + $0xfe0] sm:$0xff] }
 0x1f4   : > { %v6094_v39 = vpack.c.bf16 %v1682_v52, %v1674_v36  ;;  %v7559_v19 = vld [vmem:[%s8681_s20 + $0x908] sm:$0xff] }
 0x1f5   : > { %6077 = vmatpush1.bf16.msra.mxu0 %v6076_v3  ;;  %v1683_v3 = vld [vmem:[%s8681_s20 + $0xdf0] sm:$0xff] }
 0x1f6   : > { %6141 = vmatpush1.bf16.msra.mxu1 %v6140_v48  ;;  %6079 = vmatprep.subr.bf16.mxu0 %v6078_v61  ;;  %v1690_v48 = vld [vmem:[%s8681_s20 + $0xe28] sm:$0xff] }
 0x1f7   : > { %6143 = vmatprep.subr.bf16.mxu1 %v6142_v58  ;;  %v1698_v61 = vld [vmem:[%s8681_s20 + $0xe68] sm:$0xff]  ;;  %v6160_v58 = vpack.c.bf16 %v1683_v3, %v1675_v9  ;;  %v7545_v9 = vld [vmem:[%s8681_s20 + $0x818] sm:$0xff] }
 0x1f8   : > { %v6098_v16 = vpack.c.bf16 %v1698_v61, %v1690_v48  ;;  %v7546_v3 = vld [vmem:[%s8681_s20 + $0x858] sm:$0xff] }
 0x1f9   : > { %6081 = vmatpush1.bf16.msra.mxu0 %v6080_v27  ;;  %v1699_v27 = vld [vmem:[%s8681_s20 + $0xe70] sm:$0xff]  ;;  %v2046_v48 = vand.u32 2147483647, %v7546_v3 }
 0x1fa   : > { %6145 = vmatpush1.bf16.msra.mxu1 %v6144_v24  ;;  %6083 = vmatprep.subr.bf16.mxu0 %v6082_v12  ;;  %v1706_v24 = vld [vmem:[%s8681_s20 + $0xea8] sm:$0xff] }
 0x1fb   : > { %6147 = vmatprep.subr.bf16.mxu1 %v6146_v44  ;;  %v1714_v12 = vld [vmem:[%s8681_s20 + $0xee8] sm:$0xff]  ;;  %v6164_v44 = vpack.c.bf16 %v1699_v27, %v1691_v38 }
 0x1fc   : > { %v6102_v62 = vpack.c.bf16 %v1714_v12, %v1706_v24  ;;  %v7551_v24 = vld [vmem:[%s8681_s20 + $0x888] sm:$0xff] }
 0x1fd   : > { %6085 = vmatpush1.bf16.msra.mxu0 %v6084_v29  ;;  %v1715_v29 = vld [vmem:[%s8681_s20 + $0xef0] sm:$0xff]  ;;  %v2052_v12 = vand.u32 2147483647, %v7551_v24 }
 0x1fe   : > { %6149 = vmatpush1.bf16.msra.mxu1 %v6148_v6  ;;  %6087 = vmatprep.subr.bf16.mxu0 %v6086_v55  ;;  %v1722_v6 = vld [vmem:[%s8681_s20 + $0xf28] sm:$0xff] }
 0x1ff   : > { %6151 = vmatprep.subr.bf16.mxu1 %v6150_v43  ;;  %v1730_v55 = vld [vmem:[%s8681_s20 + $0xf68] sm:$0xff]  ;;  %v6168_v43 = vpack.c.bf16 %v1715_v29, %v1707_v31  ;;  %v7555_v31 = vld [vmem:[%s8681_s20 + $0x880] sm:$0xff]  ;;  %v6182_v17 = vpack.c.bf16 %v2060_v11, %v2052_v12  ;;  %v10562_v11 = vld [vmem:[#allocation2 + $0x18] sm:$0xff] }
 0x200   : > { %v6106_v14 = vpack.c.bf16 %v1730_v55, %v1722_v6  ;;  %v7556_v29 = vld [vmem:[%s8681_s20 + $0x8c0] sm:$0xff]  ;;  %v7575_v12 = vld [vmem:[%s8681_s20 + $0xa08] sm:$0xff] }
 0x201   : > { %6089 = vmatpush1.bf16.msra.mxu0 %v6088_v2  ;;  %v1731_v2 = vld [vmem:[%s8681_s20 + $0xf70] sm:$0xff]  ;;  %v2059_v6 = vand.u32 2147483647, %v7556_v29  ;;  %v2100_v57 = vand.u32 2147483647, %v7575_v12 }
 0x202   : > { %6153 = vmatpush1.bf16.msra.mxu1 %v6152_v63  ;;  %6091 = vmatprep.subr.bf16.mxu0 %v6090_v22  ;;  %v1738_v63 = vld [vmem:[%s8681_s20 + $0xfa8] sm:$0xff]  ;;  %v6172_v36 = vpack.c.bf16 %v1731_v2, %v1723_v54  ;;  %v2068_v54 = vand.u32 2147483647, %v7559_v19  ;;  %v7582_v19 = vld [vmem:[%s8681_s20 + $0xa10] sm:$0xff] }
 0x203   : > { %6155 = vmatprep.subr.bf16.mxu1 %v6154_v4  ;;  %v1746_v22 = vld [vmem:[%s8681_s20 + $0xfe8] sm:$0xff]  ;;  %v1737_v4 = vld [vmem:[%s8681_s20 + $0xfa0] sm:$0xff] }
 0x204   : > { %v6110_v52 = vpack.c.bf16 %v1746_v22, %v1738_v63  ;;  %v6112_v61 = vpack.c.bf16 %v1745_v18, %v1737_v4  ;;  %v7561_v22 = vld [vmem:[%s8681_s20 + $0x918] sm:$0xff]  ;;  %v7563_v4 = vld [vmem:[%s8681_s20 + $0x900] sm:$0xff] }
 0x205   : > { %6093 = vmatpush1.bf16.msra.mxu0 %v6092_v10  ;;  %v7543_v10 = vld [vmem:[%s8681_s20 + $0x808] sm:$0xff]  ;;  %v2070_v5 = vand.u32 2147483647, %v7561_v22  ;;  %v2067_v18 = vand.u32 2147483647, %v7563_v4 }
 0x206   : > { %6157 = vmatpush1.bf16.msra.mxu1 %v6156_v37  ;;  %6095 = vmatprep.subr.bf16.mxu0 %v6094_v39  ;;  %v2036_v37 = vand.u32 2147483647, %v7543_v10  ;;  %v7544_v39 = vld [vmem:[%s8681_s20 + $0x848] sm:$0xff]  ;;  %v2069_v10 = vand.u32 2147483647, %v7565_v33  ;;  %v7587_v33 = vld [vmem:[%s8681_s20 + $0xad8] sm:$0xff] }
 0x207   : > { %6159 = vmatprep.subr.bf16.mxu1 %v6158_v23  ;;  %v2044_v42 = vand.u32 2147483647, %v7544_v39  ;;  %v2038_v23 = vand.u32 2147483647, %v7545_v9 }
 0x209   : > { %6097 = vmatpush1.bf16.msra.mxu0 %v6096_v13  ;;  %v2035_v13 = vand.u32 2147483647, %v7547_v20  ;;  %v6178_v38 = vpack.c.bf16 %v2044_v42, %v2036_v37  ;;  %v7566_v37 = vld [vmem:[%s8681_s20 + $0x950] sm:$0xff]  ;;  %v7570_v20 = vld [vmem:[%s8681_s20 + $0x9d8] sm:$0xff] }
 0x20a   : > { %6161 = vmatpush1.bf16.msra.mxu1 %v6160_v58  ;;  %6099 = vmatprep.subr.bf16.mxu0 %v6098_v16  ;;  %v7548_v58 = vld [vmem:[%s8681_s20 + $0x840] sm:$0xff]  ;;  %v2077_v39 = vand.u32 2147483647, %v7566_v37  ;;  %v8496_v37 = vmov 1966171168  }
 0x20b   : > { %6163 = vmatprep.subr.bf16.mxu1 %v6162_v34  ;;  %v2043_v16 = vand.u32 2147483647, %v7548_v58  ;;  %v7550_v34 = vld [vmem:[%s8681_s20 + $0x850] sm:$0xff]  ;;  %v7571_v58 = vld [vmem:[%s8681_s20 + $0x980] sm:$0xff] }
 0x20c   : > { %v2045_v27 = vand.u32 2147483647, %v7550_v34  ;;  %v6252_v29 = vpack.c.bf16 %v2077_v39, %v2069_v10  ;;  %v2126_v10 = vand.u32 2147483647, %v7587_v33  ;;  %v1377_v39 = vunpack.c.l.s4 %v8496_v37 }
 0x20d   : > { %6101 = vmatpush1.bf16.msra.mxu0 %v6100_v56  ;;  %v6242_v56 = vpack.c.bf16 %v2046_v48, %v2038_v23  ;;  %v6180_v55 = vpack.c.bf16 %v2043_v16, %v2035_v13  ;;  %v7568_v23 = vld [vmem:[%s8681_s20 + $0x9c8] sm:$0xff]  ;;  %v7569_v48 = vld [vmem:[%s8681_s20 + $0x998] sm:$0xff]  ;;  %v2094_v13 = vand.u32 2147483647, %v7570_v20  ;;  %v7572_v16 = vld [vmem:[%s8681_s20 + $0x9c0] sm:$0xff] }
 0x20e   : > { %6165 = vmatpush1.bf16.msra.mxu1 %v6164_v44  ;;  %6103 = vmatprep.subr.bf16.mxu0 %v6102_v62  ;;  %v7553_v44 = vld [vmem:[%s8681_s20 + $0x898] sm:$0xff]  ;;  %v2092_v3 = vand.u32 2147483647, %v7568_v23  ;;  %v2091_v60 = vand.u32 2147483647, %v7572_v16 }
 0x20f   : > { %6167 = vmatprep.subr.bf16.mxu1 %v6166_v59  ;;  %v2054_v62 = vand.u32 2147483647, %v7553_v44  ;;  %v2051_v59 = vand.u32 2147483647, %v7555_v31 }
 0x211   : > { %6105 = vmatpush1.bf16.msra.mxu0 %v6104_v0  ;;  %v7558_v0 = vld [vmem:[%s8681_s20 + $0x8d0] sm:$0xff]  ;;  %v6246_v63 = vpack.c.bf16 %v2062_v28, %v2054_v62  ;;  %v7578_v62 = vld [vmem:[%s8681_s20 + $0xa18] sm:$0xff] }
 0x212   : > { %6169 = vmatpush1.bf16.msra.mxu1 %v6168_v43  ;;  %6107 = vmatprep.subr.bf16.mxu0 %v6106_v14  ;;  %v2061_v43 = vand.u32 2147483647, %v7558_v0  ;;  %v6244_v14 = vpack.c.bf16 %v2045_v27, %v2037_v35  ;;  %v7574_v27 = vld [vmem:[%s8681_s20 + $0x9d0] sm:$0xff]  ;;  %v2102_v47 = vand.u32 2147483647, %v7578_v62  ;;  %v7579_v28 = vld [vmem:[%s8681_s20 + $0xa58] sm:$0xff] }
 0x213   : > { %6171 = vmatprep.subr.bf16.mxu1 %v6170_v40  ;;  %v7560_v40 = vld [vmem:[%s8681_s20 + $0x948] sm:$0xff]  ;;  %v2093_v24 = vand.u32 2147483647, %v7574_v27  ;;  %v2110_v31 = vand.u32 2147483647, %v7579_v28 }
 0x214   : > { %v2076_v2 = vand.u32 2147483647, %v7560_v40  ;;  %v6248_v42 = vpack.c.bf16 %v2061_v43, %v2053_v46  ;;  %v2107_v46 = vand.u32 2147483647, %v7581_v7  ;;  %v7583_v40 = vld [vmem:[%s8681_s20 + $0xa50] sm:$0xff]  ;;  %v7601_v7 = vld [vmem:[%s8681_s20 + $0xbc8] sm:$0xff] }
 0x215   : > { %6109 = vmatpush1.bf16.msra.mxu0 %v6108_v8  ;;  %v2078_v8 = vand.u32 2147483647, %v7562_v26  ;;  %v6258_v22 = vpack.c.bf16 %v2110_v31, %v2102_v47  ;;  %v7598_v47 = vld [vmem:[%s8681_s20 + $0xb10] sm:$0xff]  ;;  %v1378_v31 = vunpack.c.0.s8 %v1377_v39 }
 0x216   : > { %6173 = vmatpush1.bf16.msra.mxu1 %v6172_v36  ;;  %6111 = vmatprep.subr.bf16.mxu0 %v6110_v52  ;;  %v6184_v36 = vpack.c.bf16 %v2059_v6, %v2051_v59  ;;  %v7564_v52 = vld [vmem:[%s8681_s20 + $0x940] sm:$0xff]  ;;  %v2133_v28 = vand.u32 2147483647, %v7598_v47  ;;  %v7614_v47 = vld [vmem:[%s8681_s20 + $0xc10] sm:$0xff] }
 0x217   : > { %6175 = vmatprep.subr.bf16.mxu1 %v6174_v50  ;;  %v2075_v45 = vand.u32 2147483647, %v7564_v52  ;;  %v7567_v50 = vld [vmem:[%s8681_s20 + $0x988] sm:$0xff]  ;;  %v6250_v35 = vpack.c.bf16 %v2078_v8, %v2070_v5  ;;  %v7580_v6 = vld [vmem:[%s8681_s20 + $0xa00] sm:$0xff]  ;;  %v7586_v52 = vld [vmem:[%s8681_s20 + $0xa98] sm:$0xff] }
 0x218   : > { %v2084_v9 = vand.u32 2147483647, %v7567_v50  ;;  %v7584_v5 = vld [vmem:[%s8681_s20 + $0xa88] sm:$0xff] }
 0x219   : > { %6113 = vmatpush1.bf16.msra.mxu0 %v6112_v61  ;;  %v2086_v61 = vand.u32 2147483647, %v7569_v48  ;;  %v6188_v59 = vpack.c.bf16 %v2075_v45, %v2067_v18  ;;  %v2116_v26 = vand.u32 2147483647, %v7584_v5  ;;  %v7585_v8 = vld [vmem:[%s8681_s20 + $0xac8] sm:$0xff] }
 0x21a   : > { %6177 = vmatpush1.bf16.msra.mxu1 %v6176_v25  ;;  %6179 = vmatprep.subr.bf16.mxu0 %v6178_v38  ;;  %v6186_v25 = vpack.c.bf16 %v2076_v2, %v2068_v54  ;;  %v7573_v38 = vld [vmem:[%s8681_s20 + $0x990] sm:$0xff]  ;;  %v6190_v0 = vpack.c.bf16 %v2092_v3, %v2084_v9  ;;  %v2101_v54 = vand.u32 2147483647, %v7582_v19  ;;  %v2109_v2 = vand.u32 2147483647, %v7583_v40  ;;  %v7589_v9 = vld [vmem:[%s8681_s20 + $0xac0] sm:$0xff] }
 0x21b   : > { %6243 = vmatprep.subr.bf16.mxu1 %v6242_v56  ;;  %v2085_v34 = vand.u32 2147483647, %v7573_v38  ;;  %v7577_v56 = vld [vmem:[%s8681_s20 + $0xa48] sm:$0xff]  ;;  %v6254_v43 = vpack.c.bf16 %v2094_v13, %v2086_v61  ;;  %v2124_v4 = vand.u32 2147483647, %v7585_v8  ;;  %v7590_v3 = vld [vmem:[%s8681_s20 + $0xa90] sm:$0xff] }
 0x21c   : > { %1958 = vmatmul.mubr.f32.vlgmr.msra.gmra.mrb[10].mxu0 %v10397_v49  ;;  %v2108_v44 = vand.u32 2147483647, %v7577_v56  ;;  %v2118_v45 = vand.u32 2147483647, %v7586_v52  ;;  %v2123_v23 = vand.u32 2147483647, %v7589_v9  ;;  %v6260_v61 = vpack.c.bf16 %v2109_v2, %v2101_v54 }
 0x21d   : > { %2029 = vmatmul.mubr.f32.vlgmr.msra.gmra.mrb[10].mxu1 %v10397_v49  ;;  %6181 = vmatpush1.bf16.msra.mxu0 %v6180_v55  ;;  %v2083_v49 = vand.u32 2147483647, %v7571_v58  ;;  %v2099_v55 = vand.u32 2147483647, %v7580_v6  ;;  %v2117_v48 = vand.u32 2147483647, %v7590_v3 }
 0x21e   : > { %6245 = vmatpush1.bf16.msra.mxu1 %v6244_v14  ;;  %6183 = vmatprep.subr.bf16.mxu0 %v6182_v17  ;;  %v6256_v17 = vpack.c.bf16 %v2093_v24, %v2085_v34  ;;  %v7592_v13 = vld [vmem:[%s8681_s20 + $0xb08] sm:$0xff]  ;;  %v7595_v34 = vld [vmem:[%s8681_s20 + $0xb58] sm:$0xff]  ;;  %v7596_v24 = vld [vmem:[%s8681_s20 + $0xb00] sm:$0xff]  ;;  %v6262_v56 = vpack.c.bf16 %v2126_v10, %v2118_v45 }
 0x21f   : > { %6247 = vmatprep.subr.bf16.mxu1 %v6246_v63  ;;  %2355 = vmatprep.mubr.f32.mxu0 %v10562_v11  ;;  %v6192_v14 = vpack.c.bf16 %v2091_v60, %v2083_v49  ;;  %v6194_v63 = vpack.c.bf16 %v2108_v44, %v2100_v57  ;;  %v6196_v18 = vpack.c.bf16 %v2107_v46, %v2099_v55  ;;  %v2132_v58 = vand.u32 2147483647, %v7592_v13  ;;  %v7593_v49 = vld [vmem:[%s8681_s20 + $0xb48] sm:$0xff]  ;;  %v7597_v44 = vld [vmem:[%s8681_s20 + $0xb40] sm:$0xff]  ;;  %v7603_v19 = vld [vmem:[%s8681_s20 + $0xbd8] sm:$0xff] }
 0x220   : > { %2426 = vmatprep.mubr.f32.mxu1 %v10562_v11  ;;  %v2140_v16 = vand.u32 2147483647, %v7593_v49  ;;  %v6198_v60 = vpack.c.bf16 %v2124_v4, %v2116_v26  ;;  %v2142_v27 = vand.u32 2147483647, %v7595_v34  ;;  %v2131_v12 = vand.u32 2147483647, %v7596_v24 }
 0x221   : > { %6185 = vmatpush1.bf16.msra.mxu0 %v6184_v36  ;;  %v1379_v36 = vlaneseq  ;;  %v2139_v62 = vand.u32 2147483647, %v7597_v44  ;;  %v7600_v6 = vld [vmem:[%s8681_s20 + $0xb88] sm:$0xff]  ;;  %v2156_v46 = vand.u32 2147483647, %v7601_v7  ;;  %v7606_v26 = vld [vmem:[%s8681_s20 + $0xb90] sm:$0xff] }
 0x222   : > { %6249 = vmatpush1.bf16.msra.mxu1 %v6248_v42  ;;  %6187 = vmatprep.subr.bf16.mxu0 %v6186_v25  ;;  %v7588_v42 = vld [vmem:[%s8681_s20 + $0xa80] sm:$0xff]  ;;  %v7591_v25 = vld [vmem:[%s8681_s20 + $0xad0] sm:$0xff]  ;;  %v2148_v55 = vand.u32 2147483647, %v7600_v6  ;;  %v2158_v54 = vand.u32 2147483647, %v7603_v19  ;;  %v6202_v52 = vpack.c.bf16 %v2140_v16, %v2132_v58 }
 0x223   : > { %6251 = vmatprep.subr.bf16.mxu1 %v6250_v35  ;;  %v2115_v50 = vand.u32 2147483647, %v7588_v42  ;;  %v2125_v20 = vand.u32 2147483647, %v7591_v25  ;;  %v7594_v35 = vld [vmem:[%s8681_s20 + $0xb18] sm:$0xff]  ;;  %v1380_v57 = vshrl.u32 %v1379_v36, 7  ;;  %v6204_v42 = vpack.c.bf16 %v2139_v62, %v2131_v12 }
 0x224   : > { %v2134_v38 = vand.u32 2147483647, %v7594_v35  ;;  %v2149_v8 = vand.u32 2147483647, %v7606_v26  ;;  %v7607_v4 = vld [vmem:[%s8681_s20 + $0xbd0] sm:$0xff]  ;;  %v7608_v45 = vld [vmem:[%s8681_s20 + $0xc08] sm:$0xff] }
 0x225   : > { %6189 = vmatpush1.bf16.msra.mxu0 %v6188_v59  ;;  %v7599_v59 = vld [vmem:[%s8681_s20 + $0xb50] sm:$0xff]  ;;  %v6264_v2 = vpack.c.bf16 %v2125_v20, %v2117_v48  ;;  %v2157_v36 = vand.u32 2147483647, %v7607_v4  ;;  %v2164_v33 = vand.u32 2147483647, %v7608_v45  ;;  %v7609_v10 = vld [vmem:[%s8681_s20 + $0xc48] sm:$0xff]  ;;  %v10599_v39 = vsub.s32 %v1378_v31, %v1380_v57 }
 0x226   : > { %6253 = vmatpush1.bf16.msra.mxu1 %v6252_v29  ;;  %6191 = vmatprep.subr.bf16.mxu0 %v6190_v0  ;;  %v2141_v29 = vand.u32 2147483647, %v7599_v59  ;;  %v6200_v0 = vpack.c.bf16 %v2123_v23, %v2115_v50  ;;  %v2172_v37 = vand.u32 2147483647, %v7609_v10  ;;  %v6206_v23 = vpack.c.bf16 %v2156_v46, %v2148_v55  ;;  %v7611_v25 = vld [vmem:[%s8681_s20 + $0xc58] sm:$0xff]  ;;  %v7612_v35 = vld [vmem:[%s8681_s20 + $0xc00] sm:$0xff] }
 0x227   : > { %6255 = vmatprep.subr.bf16.mxu1 %v6254_v43  ;;  %v7602_v43 = vld [vmem:[%s8681_s20 + $0xb98] sm:$0xff]  ;;  %v2174_v20 = vand.u32 2147483647, %v7611_v25  ;;  %v7613_v12 = vld [vmem:[%s8681_s20 + $0xc40] sm:$0xff]  ;;  %v7615_v46 = vld [vmem:[%s8681_s20 + $0xc50] sm:$0xff] }
 0x228   : > { %v6268_v50 = vpack.c.bf16 %v2141_v29, %v2133_v28  ;;  %v6210_v24 = vpack.c.bf16 %v2172_v37, %v2164_v33  ;;  %v2171_v57 = vand.u32 2147483647, %v7613_v12  ;;  %v2165_v28 = vand.u32 2147483647, %v7614_v47  ;;  %v7616_v19 = vld [vmem:[%s8681_s20 + $0xc88] sm:$0xff]  ;;  %v7621_v33 = vld [vmem:[%s8681_s20 + $0xcc0] sm:$0xff] }
 0x229   : > { %6193 = vmatpush1.bf16.msra.mxu0 %v6192_v14  ;;  %v2150_v14 = vand.u32 2147483647, %v7602_v43  ;;  %v2187_v10 = vand.u32 2147483647, %v7621_v33  ;;  %v7624_v25 = vld [vmem:[%s8681_s20 + $0xd08] sm:$0xff]  ;;  %v7629_v12 = vld [vmem:[%s8681_s20 + $0xd40] sm:$0xff] }
 0x22a   : > { %6257 = vmatpush1.bf16.msra.mxu1 %v6256_v17  ;;  %6195 = vmatprep.subr.bf16.mxu0 %v6194_v63  ;;  %v7604_v17 = vld [vmem:[%s8681_s20 + $0xb80] sm:$0xff]  ;;  %v7631_v47 = vld [vmem:[%s8681_s20 + $0xd50] sm:$0xff] }
 0x22b   : > { %6259 = vmatprep.subr.bf16.mxu1 %v6258_v22  ;;  %v2147_v40 = vand.u32 2147483647, %v7604_v17  ;;  %v7605_v63 = vld [vmem:[%s8681_s20 + $0xbc0] sm:$0xff]  ;;  %v6266_v22 = vpack.c.bf16 %v2142_v27, %v2134_v38  ;;  %v6270_v3 = vpack.c.bf16 %v2158_v54, %v2150_v14  ;;  %v2180_v54 = vand.u32 2147483647, %v7616_v19 }
 0x22c   : > { %v2155_v5 = vand.u32 2147483647, %v7605_v63  ;;  %v7637_v19 = vld [vmem:[%s8681_s20 + $0xdc0] sm:$0xff] }
 0x22d   : > { %6197 = vmatpush1.bf16.msra.mxu0 %v6196_v18  ;;  %v7610_v18 = vld [vmem:[%s8681_s20 + $0xc18] sm:$0xff] }
 0x22e   : > { %6261 = vmatpush1.bf16.msra.mxu1 %v6260_v61  ;;  %6199 = vmatprep.subr.bf16.mxu0 %v6198_v60  ;;  %v2166_v48 = vand.u32 2147483647, %v7610_v18  ;;  %v6208_v16 = vpack.c.bf16 %v2155_v5, %v2147_v40  ;;  %v6272_v61 = vpack.c.bf16 %v2157_v36, %v2149_v8  ;;  %v2163_v60 = vand.u32 2147483647, %v7612_v35  ;;  %v7618_v5 = vld [vmem:[%s8681_s20 + $0xc98] sm:$0xff] }
 0x22f   : > { %v1113_v9 = vpop.f32.mrb[4].mxu0  ;;  %6263 = vmatprep.subr.bf16.mxu1 %v6262_v56  ;;  %v2182_v26 = vand.u32 2147483647, %v7618_v5  ;;  %v7619_v8 = vld [vmem:[%s8681_s20 + $0xcd8] sm:$0xff] }
 0x230   : > { %v1340_v13 = vrot.slane %v1113_v9, 1  ;;  %v1184_v58 = vpop.f32.mrb[4].mxu1  ;;  %v1115_v49 = vpop.f32.mrb[5].mxu0  ;;  %v6274_v7 = vpack.c.bf16 %v2174_v20, %v2166_v48  ;;  %v2190_v4 = vand.u32 2147483647, %v7619_v8  ;;  %v7640_v8 = vld [vmem:[%s8681_s20 + $0xe08] sm:$0xff] }
 0x231   : > { %v1342_v38 = vrot.slane %v1184_v58, 1  ;;  %v1341_v34 = vrot.slane %v1115_v49, 1  ;;  %v1186_v27 = vpop.f32.mrb[5].mxu1  ;;  %6201 = vmatpush1.bf16.msra.mxu0 %v6200_v0  ;;  %v2173_v0 = vand.u32 2147483647, %v7615_v46  ;;  %v7635_v46 = vld [vmem:[%s8681_s20 + $0xdd8] sm:$0xff] }
 0x232   : > { %v1356_v56 = vsub.f32 %v10304_v41, %v1340_v13  ;;  %v1425_v44 = vadd.f32 %v1340_v13, %v10304_v41  ;;  %v1343_v62 = vrot.slane %v1186_v27, 1  ;;  %6265 = vmatpush1.bf16.msra.mxu1 %v6264_v2  ;;  %6203 = vmatprep.subr.bf16.mxu0 %v6202_v52  ;;  %v6212_v2 = vpack.c.bf16 %v2171_v57, %v2163_v60  ;;  %v7625_v13 = vld [vmem:[%s8681_s20 + $0xd48] sm:$0xff]  ;;  %v7627_v60 = vld [vmem:[%s8681_s20 + $0xd58] sm:$0xff] }
 0x233   : > { %v1358_v31 = vsub.f32 %v10309_v21, %v1342_v38  ;;  %v1427_v59 = vadd.f32 %v1342_v38, %v10309_v21  ;;  %v1357_v29 = vsub.f32 %v10311_v1, %v1341_v34  ;;  %v1426_v6 = vadd.f32 %v1341_v34, %v10311_v1  ;;  %6267 = vmatprep.subr.bf16.mxu1 %v6266_v22  ;;  %v7617_v21 = vld [vmem:[%s8681_s20 + $0xcc8] sm:$0xff]  ;;  %v7620_v22 = vld [vmem:[%s8681_s20 + $0xc80] sm:$0xff] }
 0x234   : > { %v1359_v55 = vsub.f32 %v10315_v30, %v1343_v62  ;;  %v1428_v41 = vadd.f32 %v1343_v62, %v10315_v30  ;;  %v2188_v17 = vand.u32 2147483647, %v7617_v21  ;;  %v2179_v45 = vand.u32 2147483647, %v7620_v22  ;;  %v7641_v22 = vld [vmem:[%s8681_s20 + $0xe48] sm:$0xff] }
 0x235   : > { %v1372_v43 = vcombine.low %v1356_v56, %v1357_v29  ;;  %v1441_v14 = vcombine.low %v1425_v44, %v1426_v6  ;;  %6205 = vmatpush1.bf16.msra.mxu0 %v6204_v42  ;;  %v6276_v37 = vpack.c.bf16 %v2173_v0, %v2165_v28  ;;  %v2196_v20 = vand.u32 2147483647, %v7624_v25  ;;  %v7630_v56 = vld [vmem:[%s8681_s20 + $0xd10] sm:$0xff]  ;;  %v7633_v29 = vld [vmem:[%s8681_s20 + $0xdc8] sm:$0xff] }
 0x236   : > { %v1373_v40 = vcombine.low %v1358_v31, %v1359_v55  ;;  %v1442_v1 = vcombine.low %v1427_v59, %v1428_v41  ;;  %6269 = vmatpush1.bf16.msra.mxu1 %v6268_v50  ;;  %6207 = vmatprep.subr.bf16.mxu0 %v6206_v23  ;;  %v6214_v42 = vpack.c.bf16 %v2188_v17, %v2180_v54  ;;  %v7622_v50 = vld [vmem:[%s8681_s20 + $0xc90] sm:$0xff]  ;;  %v2204_v58 = vand.u32 2147483647, %v7625_v13  ;;  %v7632_v31 = vld [vmem:[%s8681_s20 + $0xd88] sm:$0xff]  ;;  %v7634_v41 = vld [vmem:[%s8681_s20 + $0xd98] sm:$0xff] }
 0x237   : > { %v10618_v30 = vrot.slane %v1372_v43, %v10599_v39  ;;  %v10621_v63 = vrot.slane %v1441_v14, %v10599_v39  ;;  %6271 = vmatprep.subr.bf16.mxu1 %v6270_v3  ;;  %v2181_v9 = vand.u32 2147483647, %v7622_v50  ;;  %v7623_v23 = vld [vmem:[%s8681_s20 + $0xcd0] sm:$0xff]  ;;  %v6278_v49 = vpack.c.bf16 %v2190_v4, %v2182_v26  ;;  %v7636_v43 = vld [vmem:[%s8681_s20 + $0xd80] sm:$0xff] }
 0x238   : > { %v10626_v36 = vrot.slane %v1373_v40, %v10599_v39  ;;  %v10629_v52 = vrot.slane %v1442_v1, %v10599_v39  ;;  %v2189_v3 = vand.u32 2147483647, %v7623_v23  ;;  %v2206_v38 = vand.u32 2147483647, %v7627_v60  ;;  %v7638_v17 = vld [vmem:[%s8681_s20 + $0xd90] sm:$0xff] }
 0x239   : > { %6209 = vmatpush1.bf16.msra.mxu0 %v6208_v16  ;;  %v7626_v16 = vld [vmem:[%s8681_s20 + $0xd18] sm:$0xff]  ;;  %v6216_v34 = vpack.c.bf16 %v2187_v10, %v2179_v45  ;;  %v2203_v57 = vand.u32 2147483647, %v7629_v12  ;;  %v2197_v44 = vand.u32 2147483647, %v7630_v56  ;;  %v6218_v62 = vpack.c.bf16 %v2204_v58, %v2196_v20  ;;  %v7639_v1 = vld [vmem:[%s8681_s20 + $0xdd0] sm:$0xff] }
 0x23a   : > { %v1404_v18 = vcombine.low %v10618_v30, %v10626_v36  ;;  %v1473_v48 = vcombine.low %v10621_v63, %v10629_v52  ;;  %6273 = vmatpush1.bf16.msra.mxu1 %v6272_v61  ;;  %6211 = vmatprep.subr.bf16.mxu0 %v6210_v24  ;;  %v2198_v35 = vand.u32 2147483647, %v7626_v16  ;;  %v6280_v27 = vpack.c.bf16 %v2189_v3, %v2181_v9  ;;  %v7628_v61 = vld [vmem:[%s8681_s20 + $0xd00] sm:$0xff]  ;;  %v7642_v10 = vld [vmem:[%s8681_s20 + $0xe18] sm:$0xff]  ;;  %v7646_v58 = vld [vmem:[%s8681_s20 + $0xe10] sm:$0xff] }
 0x23b   : > { %6275 = vmatprep.subr.bf16.mxu1 %v6274_v7  ;;  %v2195_v24 = vand.u32 2147483647, %v7628_v61  ;;  %v2205_v28 = vand.u32 2147483647, %v7631_v47  ;;  %v2212_v59 = vand.u32 2147483647, %v7632_v31 }
 0x23c   : > { %v2220_v6 = vand.u32 2147483647, %v7633_v29  ;;  %v6282_v55 = vpack.c.bf16 %v2206_v38, %v2198_v35  ;;  %v2214_v7 = vand.u32 2147483647, %v7634_v41  ;;  %v2222_v0 = vand.u32 2147483647, %v7635_v46 }
 0x23d   : > { %6213 = vmatpush1.bf16.msra.mxu0 %v6212_v2  ;;  %v2211_v14 = vand.u32 2147483647, %v7636_v43  ;;  %v2219_v54 = vand.u32 2147483647, %v7637_v19  ;;  %v6220_v21 = vpack.c.bf16 %v2203_v57, %v2195_v24  ;;  %v2213_v40 = vand.u32 2147483647, %v7638_v17 }
 0x23e   : > { %6277 = vmatpush1.bf16.msra.mxu1 %v6276_v37  ;;  %6215 = vmatprep.subr.bf16.mxu0 %v6214_v42  ;;  %v2221_v2 = vand.u32 2147483647, %v7639_v1  ;;  %v6284_v5 = vpack.c.bf16 %v2205_v28, %v2197_v44  ;;  %v6222_v26 = vpack.c.bf16 %v2220_v6, %v2212_v59  ;;  %v2228_v4 = vand.u32 2147483647, %v7640_v8  ;;  %v7643_v42 = vld [vmem:[%s8681_s20 + $0xe58] sm:$0xff]  ;;  %v7644_v3 = vld [vmem:[%s8681_s20 + $0xe00] sm:$0xff] }
 0x23f   : > { %6279 = vmatprep.subr.bf16.mxu1 %v6278_v49  ;;  %v2236_v45 = vand.u32 2147483647, %v7641_v22  ;;  %v6286_v33 = vpack.c.bf16 %v2222_v0, %v2214_v7  ;;  %v2230_v37 = vand.u32 2147483647, %v7642_v10  ;;  %v2238_v50 = vand.u32 2147483647, %v7643_v42 }
 0x240   : > { %v6224_v9 = vpack.c.bf16 %v2219_v54, %v2211_v14  ;;  %v6288_v23 = vpack.c.bf16 %v2221_v2, %v2213_v40  ;;  %v2227_v25 = vand.u32 2147483647, %v7644_v3  ;;  %v7645_v20 = vld [vmem:[%s8681_s20 + $0xe40] sm:$0xff]  ;;  %v2229_v49 = vand.u32 2147483647, %v7646_v58  ;;  %v7647_v35 = vld [vmem:[%s8681_s20 + $0xe50] sm:$0xff] }
 0x241   : > { %6217 = vmatpush1.bf16.msra.mxu0 %v6216_v34  ;;  %v2235_v13 = vand.u32 2147483647, %v7645_v20  ;;  %v6226_v16 = vpack.c.bf16 %v2236_v45, %v2228_v4  ;;  %v2237_v60 = vand.u32 2147483647, %v7647_v35  ;;  %v7648_v38 = vld [vmem:[%s8681_s20 + $0xe88] sm:$0xff]  ;;  %v6290_v24 = vpack.c.bf16 %v2238_v50, %v2230_v37  ;;  %v7650_v12 = vld [vmem:[%s8681_s20 + $0xe98] sm:$0xff] }
 0x242   : > { %6281 = vmatpush1.bf16.msra.mxu1 %v6280_v27  ;;  %6219 = vmatprep.subr.bf16.mxu0 %v6218_v62  ;;  %v2244_v34 = vand.u32 2147483647, %v7648_v38  ;;  %v7649_v27 = vld [vmem:[%s8681_s20 + $0xec8] sm:$0xff]  ;;  %v2246_v57 = vand.u32 2147483647, %v7650_v12  ;;  %v7651_v56 = vld [vmem:[%s8681_s20 + $0xed8] sm:$0xff] }
 0x243   : > { %6283 = vmatprep.subr.bf16.mxu1 %v6282_v55  ;;  %v2252_v61 = vand.u32 2147483647, %v7649_v27  ;;  %v2254_v44 = vand.u32 2147483647, %v7651_v56  ;;  %v7652_v62 = vld [vmem:[%s8681_s20 + $0xe80] sm:$0xff]  ;;  %v6228_v59 = vpack.c.bf16 %v2235_v13, %v2227_v25  ;;  %v7654_v29 = vld [vmem:[%s8681_s20 + $0xe90] sm:$0xff]  ;;  %v6292_v7 = vpack.c.bf16 %v2237_v60, %v2229_v49 }
 0x244   : > { %v2243_v47 = vand.u32 2147483647, %v7652_v62  ;;  %v7653_v28 = vld [vmem:[%s8681_s20 + $0xec0] sm:$0xff]  ;;  %v2245_v6 = vand.u32 2147483647, %v7654_v29  ;;  %v7655_v55 = vld [vmem:[%s8681_s20 + $0xed0] sm:$0xff] }
 0x245   : > { %6221 = vmatpush1.bf16.msra.mxu0 %v6220_v21  ;;  %v2251_v31 = vand.u32 2147483647, %v7653_v28  ;;  %v2253_v41 = vand.u32 2147483647, %v7655_v55  ;;  %v6230_v46 = vpack.c.bf16 %v2252_v61, %v2244_v34  ;;  %v7656_v0 = vld [vmem:[%s8681_s20 + $0xf08] sm:$0xff]  ;;  %v6294_v54 = vpack.c.bf16 %v2254_v44, %v2246_v57  ;;  %v7658_v21 = vld [vmem:[%s8681_s20 + $0xf18] sm:$0xff] }
 0x246   : > { %6285 = vmatpush1.bf16.msra.mxu1 %v6284_v5  ;;  %6223 = vmatprep.subr.bf16.mxu0 %v6222_v26  ;;  %v2260_v43 = vand.u32 2147483647, %v7656_v0  ;;  %v7657_v14 = vld [vmem:[%s8681_s20 + $0xf48] sm:$0xff]  ;;  %v2262_v17 = vand.u32 2147483647, %v7658_v21  ;;  %v7659_v40 = vld [vmem:[%s8681_s20 + $0xf58] sm:$0xff] }
 0x247   : > { %6287 = vmatprep.subr.bf16.mxu1 %v6286_v33  ;;  %v2268_v19 = vand.u32 2147483647, %v7657_v14  ;;  %v2270_v1 = vand.u32 2147483647, %v7659_v40  ;;  %v6232_v2 = vpack.c.bf16 %v2251_v31, %v2243_v47  ;;  %v6296_v5 = vpack.c.bf16 %v2253_v41, %v2245_v6  ;;  %v7660_v26 = vld [vmem:[%s8681_s20 + $0xf00] sm:$0xff]  ;;  %v7662_v45 = vld [vmem:[%s8681_s20 + $0xf10] sm:$0xff] }
 0x248   : > { %v2259_v8 = vand.u32 2147483647, %v7660_v26  ;;  %v7661_v4 = vld [vmem:[%s8681_s20 + $0xf40] sm:$0xff]  ;;  %v2261_v33 = vand.u32 2147483647, %v7662_v45  ;;  %v7663_v37 = vld [vmem:[%s8681_s20 + $0xf50] sm:$0xff] }
 0x249   : > { %6225 = vmatpush1.bf16.msra.mxu0 %v6224_v9  ;;  %v2267_v22 = vand.u32 2147483647, %v7661_v4  ;;  %v6234_v10 = vpack.c.bf16 %v2268_v19, %v2260_v43  ;;  %v2269_v42 = vand.u32 2147483647, %v7663_v37  ;;  %v7664_v50 = vld [vmem:[%s8681_s20 + $0xf88] sm:$0xff]  ;;  %v6298_v25 = vpack.c.bf16 %v2270_v1, %v2262_v17  ;;  %v7666_v20 = vld [vmem:[%s8681_s20 + $0xf98] sm:$0xff] }
 0x24a   : > { %6289 = vmatpush1.bf16.msra.mxu1 %v6288_v23  ;;  %6227 = vmatprep.subr.bf16.mxu0 %v6226_v16  ;;  %v2276_v9 = vand.u32 2147483647, %v7664_v50  ;;  %v7665_v23 = vld [vmem:[%s8681_s20 + $0xfc8] sm:$0xff]  ;;  %v2278_v13 = vand.u32 2147483647, %v7666_v20  ;;  %v7667_v58 = vld [vmem:[%s8681_s20 + $0xfd8] sm:$0xff] }
 0x24b   : > { %6291 = vmatprep.subr.bf16.mxu1 %v6290_v24  ;;  %v2284_v3 = vand.u32 2147483647, %v7665_v23  ;;  %v2286_v49 = vand.u32 2147483647, %v7667_v58  ;;  %v7668_v16 = vld [vmem:[%s8681_s20 + $0xf80] sm:$0xff]  ;;  %v6236_v34 = vpack.c.bf16 %v2267_v22, %v2259_v8  ;;  %v7670_v27 = vld [vmem:[%s8681_s20 + $0xf90] sm:$0xff]  ;;  %v6300_v57 = vpack.c.bf16 %v2269_v42, %v2261_v33 }
 0x24c   : > { %v2275_v35 = vand.u32 2147483647, %v7668_v16  ;;  %v7669_v60 = vld [vmem:[%s8681_s20 + $0xfc0] sm:$0xff]  ;;  %v2277_v61 = vand.u32 2147483647, %v7670_v27  ;;  %v7671_v24 = vld [vmem:[%s8681_s20 + $0xfd0] sm:$0xff] }
 0x24d   : > { %6229 = vmatpush1.bf16.msra.mxu0 %v6228_v59  ;;  %v2283_v38 = vand.u32 2147483647, %v7669_v60  ;;  %v2285_v12 = vand.u32 2147483647, %v7671_v24  ;;  %v6238_v56 = vpack.c.bf16 %v2284_v3, %v2276_v9  ;;  %v7672_v44 = vld [vmem:[%s8681_s20 + $0x828] sm:$0xff]  ;;  %v6302_v31 = vpack.c.bf16 %v2286_v49, %v2278_v13  ;;  %v7674_v59 = vld [vmem:[%s8681_s20 + $0x838] sm:$0xff] }
 0x24e   : > { %6293 = vmatpush1.bf16.msra.mxu1 %v6292_v7  ;;  %6231 = vmatprep.subr.bf16.mxu0 %v6230_v46  ;;  %v2040_v62 = vand.u32 2147483647, %v7672_v44  ;;  %v7673_v47 = vld [vmem:[%s8681_s20 + $0x868] sm:$0xff]  ;;  %v2042_v29 = vand.u32 2147483647, %v7674_v59  ;;  %v7675_v6 = vld [vmem:[%s8681_s20 + $0x878] sm:$0xff] }
 0x24f   : > { %6295 = vmatprep.subr.bf16.mxu1 %v6294_v54  ;;  %v2048_v28 = vand.u32 2147483647, %v7673_v47  ;;  %v2050_v55 = vand.u32 2147483647, %v7675_v6  ;;  %v6240_v41 = vpack.c.bf16 %v2283_v38, %v2275_v35  ;;  %v6304_v7 = vpack.c.bf16 %v2285_v12, %v2277_v61  ;;  %v7676_v46 = vld [vmem:[%s8681_s20 + $0x820] sm:$0xff]  ;;  %v7678_v19 = vld [vmem:[%s8681_s20 + $0x830] sm:$0xff] }
 0x250   : > { %v2039_v0 = vand.u32 2147483647, %v7676_v46  ;;  %v7677_v43 = vld [vmem:[%s8681_s20 + $0x860] sm:$0xff]  ;;  %v2041_v54 = vand.u32 2147483647, %v7678_v19  ;;  %v7679_v17 = vld [vmem:[%s8681_s20 + $0x870] sm:$0xff] }
 0x251   : > { %6233 = vmatpush1.bf16.msra.mxu0 %v6232_v2  ;;  %v2047_v14 = vand.u32 2147483647, %v7677_v43  ;;  %v6306_v21 = vpack.c.bf16 %v2048_v28, %v2040_v62  ;;  %v2049_v40 = vand.u32 2147483647, %v7679_v17  ;;  %v7680_v1 = vld [vmem:[%s8681_s20 + $0x8a8] sm:$0xff]  ;;  %v6370_v8 = vpack.c.bf16 %v2050_v55, %v2042_v29  ;;  %v7682_v4 = vld [vmem:[%s8681_s20 + $0x8b8] sm:$0xff] }
 0x252   : > { %6297 = vmatpush1.bf16.msra.mxu1 %v6296_v5  ;;  %6235 = vmatprep.subr.bf16.mxu0 %v6234_v10  ;;  %v2056_v2 = vand.u32 2147483647, %v7680_v1  ;;  %v7681_v5 = vld [vmem:[%s8681_s20 + $0x8e8] sm:$0xff]  ;;  %v2058_v22 = vand.u32 2147483647, %v7682_v4  ;;  %v7683_v45 = vld [vmem:[%s8681_s20 + $0x8f8] sm:$0xff] }
 0x253   : > { %6299 = vmatprep.subr.bf16.mxu1 %v6298_v25  ;;  %v2064_v26 = vand.u32 2147483647, %v7681_v5  ;;  %v2066_v33 = vand.u32 2147483647, %v7683_v45  ;;  %v7684_v10 = vld [vmem:[%s8681_s20 + $0x8a0] sm:$0xff]  ;;  %v6308_v9 = vpack.c.bf16 %v2047_v14, %v2039_v0  ;;  %v7686_v23 = vld [vmem:[%s8681_s20 + $0x8b0] sm:$0xff]  ;;  %v6372_v13 = vpack.c.bf16 %v2049_v40, %v2041_v54 }
 0x254   : > { %v2055_v37 = vand.u32 2147483647, %v7684_v10  ;;  %v7685_v42 = vld [vmem:[%s8681_s20 + $0x8e0] sm:$0xff]  ;;  %v2057_v3 = vand.u32 2147483647, %v7686_v23  ;;  %v7687_v25 = vld [vmem:[%s8681_s20 + $0x8f0] sm:$0xff] }
 0x255   : > { %6237 = vmatpush1.bf16.msra.mxu0 %v6236_v34  ;;  %v2063_v50 = vand.u32 2147483647, %v7685_v42  ;;  %v2065_v20 = vand.u32 2147483647, %v7687_v25  ;;  %v6310_v58 = vpack.c.bf16 %v2064_v26, %v2056_v2  ;;  %v7688_v49 = vld [vmem:[%s8681_s20 + $0x928] sm:$0xff]  ;;  %v6374_v38 = vpack.c.bf16 %v2066_v33, %v2058_v22  ;;  %v7690_v34 = vld [vmem:[%s8681_s20 + $0x938] sm:$0xff] }
 0x256   : > { %6301 = vmatpush1.bf16.msra.mxu1 %v6300_v57  ;;  %6239 = vmatprep.subr.bf16.mxu0 %v6238_v56  ;;  %v2072_v16 = vand.u32 2147483647, %v7688_v49  ;;  %v7689_v35 = vld [vmem:[%s8681_s20 + $0x968] sm:$0xff]  ;;  %v2074_v27 = vand.u32 2147483647, %v7690_v34  ;;  %v7691_v61 = vld [vmem:[%s8681_s20 + $0x978] sm:$0xff] }
 0x257   : > { %6303 = vmatprep.subr.bf16.mxu1 %v6302_v31  ;;  %v2080_v60 = vand.u32 2147483647, %v7689_v35  ;;  %v2082_v24 = vand.u32 2147483647, %v7691_v61  ;;  %v10707_v12 = vld [vmem:[#allocation2 + $0x10] sm:$0xff]  ;;  %v6312_v57 = vpack.c.bf16 %v2063_v50, %v2055_v37  ;;  %v6376_v56 = vpack.c.bf16 %v2065_v20, %v2057_v3  ;;  %v7693_v44 = vld [vmem:[%s8681_s20 + $0x920] sm:$0xff] }
 0x258   : > { %v2071_v62 = vand.u32 2147483647, %v7693_v44  ;;  %v7694_v47 = vld [vmem:[%s8681_s20 + $0x960] sm:$0xff]  ;;  %v7695_v31 = vld [vmem:[%s8681_s20 + $0x930] sm:$0xff]  ;;  %v7698_v46 = vld [vmem:[%s8681_s20 + $0x9e8] sm:$0xff] }
 0x259   : > { %6241 = vmatpush1.bf16.msra.mxu0 %v6240_v41  ;;  %v2079_v28 = vand.u32 2147483647, %v7694_v47  ;;  %v2073_v59 = vand.u32 2147483647, %v7695_v31  ;;  %v6314_v29 = vpack.c.bf16 %v2080_v60, %v2072_v16  ;;  %v7696_v6 = vld [vmem:[%s8681_s20 + $0x970] sm:$0xff]  ;;  %v7697_v41 = vld [vmem:[%s8681_s20 + $0x9a8] sm:$0xff]  ;;  %v6378_v43 = vpack.c.bf16 %v2082_v24, %v2074_v27 }
 0x25a   : > { %6305 = vmatpush1.bf16.msra.mxu1 %v6304_v7  ;;  %6307 = vmatprep.subr.bf16.mxu0 %v6306_v21  ;;  %v2081_v55 = vand.u32 2147483647, %v7696_v6  ;;  %v2088_v7 = vand.u32 2147483647, %v7697_v41  ;;  %v2096_v0 = vand.u32 2147483647, %v7698_v46 }
 0x25b   : > { %6371 = vmatprep.subr.bf16.mxu1 %v6370_v8  ;;  %v7699_v14 = vld [vmem:[%s8681_s20 + $0x9b8] sm:$0xff]  ;;  %v7701_v17 = vld [vmem:[%s8681_s20 + $0x9a0] sm:$0xff]  ;;  %v7703_v5 = vld [vmem:[%s8681_s20 + $0x9b0] sm:$0xff]  ;;  %v6316_v22 = vpack.c.bf16 %v2079_v28, %v2071_v62 }
 0x25c   : > { %2356 = vmatmul.mubr.f32.vlgmr.msra.gmra.mrb[12].mxu0 %v10707_v12  ;;  %v2090_v19 = vand.u32 2147483647, %v7699_v14  ;;  %v7700_v54 = vld [vmem:[%s8681_s20 + $0x9f8] sm:$0xff]  ;;  %v2087_v40 = vand.u32 2147483647, %v7701_v17  ;;  %v7702_v1 = vld [vmem:[%s8681_s20 + $0x9e0] sm:$0xff]  ;;  %v6380_v42 = vpack.c.bf16 %v2081_v55, %v2073_v59  ;;  %v6318_v50 = vpack.c.bf16 %v2096_v0, %v2088_v7 }
 0x25d   : > { %2427 = vmatmul.mubr.f32.vlgmr.msra.gmra.mrb[12].mxu1 %v10707_v12  ;;  %6309 = vmatpush1.bf16.msra.mxu0 %v6308_v9  ;;  %v2098_v21 = vand.u32 2147483647, %v7700_v54  ;;  %v2095_v2 = vand.u32 2147483647, %v7702_v1  ;;  %v2089_v26 = vand.u32 2147483647, %v7703_v5 }
 0x25e   : > { %6373 = vmatpush1.bf16.msra.mxu1 %v6372_v13  ;;  %6311 = vmatprep.subr.bf16.mxu0 %v6310_v58  ;;  %v7704_v8 = vld [vmem:[%s8681_s20 + $0x9f0] sm:$0xff]  ;;  %v7705_v45 = vld [vmem:[%s8681_s20 + $0xa28] sm:$0xff]  ;;  %v7707_v9 = vld [vmem:[%s8681_s20 + $0xa38] sm:$0xff] }
 0x25f   : > { %6375 = vmatprep.subr.bf16.mxu1 %v6374_v38  ;;  %2497 = vmatprep.mubr.f32.mxu0 %v10562_v11  ;;  %v2097_v4 = vand.u32 2147483647, %v7704_v8  ;;  %v2104_v33 = vand.u32 2147483647, %v7705_v45  ;;  %v7706_v10 = vld [vmem:[%s8681_s20 + $0xa68] sm:$0xff]  ;;  %v7708_v3 = vld [vmem:[%s8681_s20 + $0xa78] sm:$0xff]  ;;  %v6320_v16 = vpack.c.bf16 %v2095_v2, %v2087_v40 }
 0x260   : > { %2568 = vmatprep.mubr.f32.mxu1 %v10562_v11  ;;  %v2112_v37 = vand.u32 2147483647, %v7706_v10  ;;  %v2106_v23 = vand.u32 2147483647, %v7707_v9  ;;  %v2114_v25 = vand.u32 2147483647, %v7708_v3  ;;  %v6382_v11 = vpack.c.bf16 %v2098_v21, %v2090_v19 }
 0x261   : > { %6313 = vmatpush1.bf16.msra.mxu0 %v6312_v57  ;;  %v7709_v20 = vld [vmem:[%s8681_s20 + $0xa20] sm:$0xff]  ;;  %v6384_v35 = vpack.c.bf16 %v2097_v4, %v2089_v26  ;;  %v7711_v60 = vld [vmem:[%s8681_s20 + $0xa30] sm:$0xff]  ;;  %v7713_v24 = vld [vmem:[%s8681_s20 + $0xaa8] sm:$0xff] }
 0x262   : > { %6377 = vmatpush1.bf16.msra.mxu1 %v6376_v56  ;;  %6315 = vmatprep.subr.bf16.mxu0 %v6314_v29  ;;  %v2103_v13 = vand.u32 2147483647, %v7709_v20  ;;  %v7710_v58 = vld [vmem:[%s8681_s20 + $0xa60] sm:$0xff]  ;;  %v2105_v38 = vand.u32 2147483647, %v7711_v60  ;;  %v7712_v34 = vld [vmem:[%s8681_s20 + $0xa70] sm:$0xff]  ;;  %v6322_v61 = vpack.c.bf16 %v2112_v37, %v2104_v33  ;;  %v6386_v28 = vpack.c.bf16 %v2114_v25, %v2106_v23 }
 0x263   : > { %6379 = vmatprep.subr.bf16.mxu1 %v6378_v43  ;;  %v2111_v49 = vand.u32 2147483647, %v7710_v58  ;;  %v2113_v27 = vand.u32 2147483647, %v7712_v34  ;;  %v2120_v57 = vand.u32 2147483647, %v7713_v24 }
 0x264   : > { %v7714_v56 = vld [vmem:[%s8681_s20 + $0xae8] sm:$0xff]  ;;  %v7715_v62 = vld [vmem:[%s8681_s20 + $0xab8] sm:$0xff]  ;;  %v7717_v29 = vld [vmem:[%s8681_s20 + $0xaa0] sm:$0xff] }
 0x265   : > { %6317 = vmatpush1.bf16.msra.mxu0 %v6316_v22  ;;  %v2128_v44 = vand.u32 2147483647, %v7714_v56  ;;  %v2122_v47 = vand.u32 2147483647, %v7715_v62  ;;  %v7716_v31 = vld [vmem:[%s8681_s20 + $0xaf8] sm:$0xff]  ;;  %v7718_v55 = vld [vmem:[%s8681_s20 + $0xae0] sm:$0xff]  ;;  %v6324_v7 = vpack.c.bf16 %v2111_v49, %v2103_v13  ;;  %v6388_v21 = vpack.c.bf16 %v2113_v27, %v2105_v38 }
 0x266   : > { %6381 = vmatpush1.bf16.msra.mxu1 %v6380_v42  ;;  %6319 = vmatprep.subr.bf16.mxu0 %v6318_v50  ;;  %v2130_v59 = vand.u32 2147483647, %v7716_v31  ;;  %v2119_v6 = vand.u32 2147483647, %v7717_v29  ;;  %v2127_v41 = vand.u32 2147483647, %v7718_v55 }
 0x267   : > { %6383 = vmatprep.subr.bf16.mxu1 %v6382_v11  ;;  %v7719_v46 = vld [vmem:[%s8681_s20 + $0xab0] sm:$0xff]  ;;  %v7721_v19 = vld [vmem:[%s8681_s20 + $0xb28] sm:$0xff]  ;;  %v7723_v1 = vld [vmem:[%s8681_s20 + $0xb38] sm:$0xff]  ;;  %v6326_v8 = vpack.c.bf16 %v2128_v44, %v2120_v57 }
 0x268   : > { %v2121_v0 = vand.u32 2147483647, %v7719_v46  ;;  %v7720_v43 = vld [vmem:[%s8681_s20 + $0xaf0] sm:$0xff]  ;;  %v2136_v54 = vand.u32 2147483647, %v7721_v19  ;;  %v7722_v17 = vld [vmem:[%s8681_s20 + $0xb68] sm:$0xff]  ;;  %v6390_v42 = vpack.c.bf16 %v2130_v59, %v2122_v47  ;;  %v6328_v20 = vpack.c.bf16 %v2127_v41, %v2119_v6 }
 0x269   : > { %v2129_v14 = vand.u32 2147483647, %v7720_v43  ;;  %v2144_v40 = vand.u32 2147483647, %v7722_v17  ;;  %v2138_v2 = vand.u32 2147483647, %v7723_v1  ;;  %6321 = vmatpush1.bf16.msra.mxu0 %v6320_v16 }
 0x26a   : > { %v7724_v5 = vld [vmem:[%s8681_s20 + $0xb78] sm:$0xff]  ;;  %v7725_v4 = vld [vmem:[%s8681_s20 + $0xb20] sm:$0xff]  ;;  %v7727_v10 = vld [vmem:[%s8681_s20 + $0xb30] sm:$0xff]  ;;  %6385 = vmatpush1.bf16.msra.mxu1 %v6384_v35  ;;  %6323 = vmatprep.subr.bf16.mxu0 %v6322_v61 }
 0x26b   : > { %v2146_v26 = vand.u32 2147483647, %v7724_v5  ;;  %v2135_v22 = vand.u32 2147483647, %v7725_v4  ;;  %v7726_v45 = vld [vmem:[%s8681_s20 + $0xb60] sm:$0xff]  ;;  %v7728_v50 = vld [vmem:[%s8681_s20 + $0xb70] sm:$0xff]  ;;  %6387 = vmatprep.subr.bf16.mxu1 %v6386_v28  ;;  %v6392_v38 = vpack.c.bf16 %v2129_v14, %v2121_v0  ;;  %v6330_v44 = vpack.c.bf16 %v2144_v40, %v2136_v54 }
 0x26c   : > { %v2143_v33 = vand.u32 2147483647, %v7726_v45  ;;  %v2137_v37 = vand.u32 2147483647, %v7727_v10  ;;  %v2145_v9 = vand.u32 2147483647, %v7728_v50 }
 0x26d   : > { %v7729_v23 = vld [vmem:[%s8681_s20 + $0xba8] sm:$0xff]  ;;  %v7731_v13 = vld [vmem:[%s8681_s20 + $0xbb8] sm:$0xff]  ;;  %v7733_v35 = vld [vmem:[%s8681_s20 + $0xba0] sm:$0xff]  ;;  %6325 = vmatpush1.bf16.msra.mxu0 %v6324_v7  ;;  %v6394_v62 = vpack.c.bf16 %v2146_v26, %v2138_v2 }
 0x26e   : > { %v2152_v3 = vand.u32 2147483647, %v7729_v23  ;;  %v7730_v25 = vld [vmem:[%s8681_s20 + $0xbe8] sm:$0xff]  ;;  %v2154_v58 = vand.u32 2147483647, %v7731_v13  ;;  %v7732_v49 = vld [vmem:[%s8681_s20 + $0xbf8] sm:$0xff]  ;;  %6389 = vmatpush1.bf16.msra.mxu1 %v6388_v21  ;;  %6327 = vmatprep.subr.bf16.mxu0 %v6326_v8  ;;  %v6332_v29 = vpack.c.bf16 %v2143_v33, %v2135_v22  ;;  %v6396_v6 = vpack.c.bf16 %v2145_v9, %v2137_v37 }
 0x26f   : > { %v2160_v11 = vand.u32 2147483647, %v7730_v25  ;;  %v2162_v16 = vand.u32 2147483647, %v7732_v49  ;;  %v2151_v60 = vand.u32 2147483647, %v7733_v35  ;;  %6391 = vmatprep.subr.bf16.mxu1 %v6390_v42 }
 0x270   : > { %v7734_v34 = vld [vmem:[%s8681_s20 + $0xbe0] sm:$0xff]  ;;  %v7735_v61 = vld [vmem:[%s8681_s20 + $0xbb0] sm:$0xff]  ;;  %v7737_v47 = vld [vmem:[%s8681_s20 + $0xc28] sm:$0xff]  ;;  %v1255_v43 = vpop.f32.mrb[6].mxu0  ;;  %v1326_v2 = vpop.f32.mrb[6].mxu1 }
 0x271   : > { %v2159_v27 = vand.u32 2147483647, %v7734_v34  ;;  %v2153_v24 = vand.u32 2147483647, %v7735_v61  ;;  %v7736_v57 = vld [vmem:[%s8681_s20 + $0xbf0] sm:$0xff]  ;;  %v7738_v31 = vld [vmem:[%s8681_s20 + $0xc68] sm:$0xff]  ;;  %v6334_v7 = vpack.c.bf16 %v2160_v11, %v2152_v3  ;;  %v6398_v14 = vpack.c.bf16 %v2162_v16, %v2154_v58  ;;  %6329 = vmatpush1.bf16.msra.mxu0 %v6328_v20 }
 0x272   : > { %v2161_v56 = vand.u32 2147483647, %v7736_v57  ;;  %v2168_v28 = vand.u32 2147483647, %v7737_v47  ;;  %v2176_v59 = vand.u32 2147483647, %v7738_v31  ;;  %6393 = vmatpush1.bf16.msra.mxu1 %v6392_v38  ;;  %6331 = vmatprep.subr.bf16.mxu0 %v6330_v44 }
 0x273   : > { %v7739_v55 = vld [vmem:[%s8681_s20 + $0xc38] sm:$0xff]  ;;  %v7741_v19 = vld [vmem:[%s8681_s20 + $0xc20] sm:$0xff]  ;;  %v1344_v1 = vrot.slane %v1255_v43, 1  ;;  %v1257_v21 = vpop.f32.mrb[7].mxu0  ;;  %v6336_v5 = vpack.c.bf16 %v2159_v27, %v2151_v60  ;;  %v7743_v8 = vld [vmem:[%s8681_s20 + $0xc30] sm:$0xff]  ;;  %v1346_v22 = vrot.slane %v1326_v2, 1  ;;  %6395 = vmatprep.subr.bf16.mxu1 %v6394_v62 }
 0x274   : > { %v2170_v41 = vand.u32 2147483647, %v7739_v55  ;;  %v7740_v46 = vld [vmem:[%s8681_s20 + $0xc78] sm:$0xff]  ;;  %v2167_v54 = vand.u32 2147483647, %v7741_v19  ;;  %v7742_v17 = vld [vmem:[%s8681_s20 + $0xc60] sm:$0xff]  ;;  %v6400_v26 = vpack.c.bf16 %v2161_v56, %v2153_v24  ;;  %v6338_v10 = vpack.c.bf16 %v2176_v59, %v2168_v28 }
 0x275   : > { %v2178_v0 = vand.u32 2147483647, %v7740_v46  ;;  %v2175_v40 = vand.u32 2147483647, %v7742_v17  ;;  %v2169_v4 = vand.u32 2147483647, %v7743_v8  ;;  %v1360_v50 = vsub.f32 %v10446_v15, %v1344_v1  ;;  %6333 = vmatpush1.bf16.msra.mxu0 %v6332_v29 }
 0x276   : > { %v1345_v45 = vrot.slane %v1257_v21, 1  ;;  %v1328_v33 = vpop.f32.mrb[7].mxu1  ;;  %v7744_v37 = vld [vmem:[%s8681_s20 + $0xc70] sm:$0xff]  ;;  %v1429_v9 = vadd.f32 %v1344_v1, %v10446_v15  ;;  %v1362_v25 = vsub.f32 %v10451_v53, %v1346_v22  ;;  %v1431_v11 = vadd.f32 %v1346_v22, %v10451_v53  ;;  %v7745_v15 = vld [vmem:[%s8681_s20 + $0xca8] sm:$0xff]  ;;  %v7747_v53 = vld [vmem:[%s8681_s20 + $0xcb8] sm:$0xff]  ;;  %6397 = vmatpush1.bf16.msra.mxu1 %v6396_v6  ;;  %6335 = vmatprep.subr.bf16.mxu0 %v6334_v7 }
 0x277   : > { %v2177_v42 = vand.u32 2147483647, %v7744_v37  ;;  %v1347_v23 = vrot.slane %v1328_v33, 1  ;;  %v6402_v3 = vpack.c.bf16 %v2178_v0, %v2170_v41  ;;  %v2184_v16 = vand.u32 2147483647, %v7745_v15  ;;  %v7746_v35 = vld [vmem:[%s8681_s20 + $0xce8] sm:$0xff]  ;;  %6399 = vmatprep.subr.bf16.mxu1 %v6398_v14 }
 0x278   : > { %v1361_v20 = vsub.f32 %v10453_v51, %v1345_v45  ;;  %v1430_v13 = vadd.f32 %v1345_v45, %v10453_v51  ;;  %v2192_v60 = vand.u32 2147483647, %v7746_v35  ;;  %v2186_v27 = vand.u32 2147483647, %v7747_v53  ;;  %v7748_v61 = vld [vmem:[%s8681_s20 + $0xcf8] sm:$0xff]  ;;  %v7750_v44 = vld [vmem:[%s8681_s20 + $0xce0] sm:$0xff] }
 0x279   : > { %v1363_v58 = vsub.f32 %v10457_v32, %v1347_v23  ;;  %v1432_v49 = vadd.f32 %v1347_v23, %v10457_v32  ;;  %v2194_v51 = vand.u32 2147483647, %v7748_v61  ;;  %v7749_v32 = vld [vmem:[%s8681_s20 + $0xca0] sm:$0xff]  ;;  %v2191_v62 = vand.u32 2147483647, %v7750_v44  ;;  %v7751_v31 = vld [vmem:[%s8681_s20 + $0xcb0] sm:$0xff]  ;;  %6337 = vmatpush1.bf16.msra.mxu0 %v6336_v5 }
 0x27a   : > { %v1374_v38 = vcombine.low %v1360_v50, %v1361_v20  ;;  %v1443_v34 = vcombine.low %v1429_v9, %v1430_v13  ;;  %v2183_v56 = vand.u32 2147483647, %v7749_v32  ;;  %v2185_v59 = vand.u32 2147483647, %v7751_v31  ;;  %v7752_v29 = vld [vmem:[%s8681_s20 + $0xcf0] sm:$0xff]  ;;  %v7753_v19 = vld [vmem:[%s8681_s20 + $0xd28] sm:$0xff]  ;;  %6401 = vmatpush1.bf16.msra.mxu1 %v6400_v26  ;;  %6339 = vmatprep.subr.bf16.mxu0 %v6338_v10 }
 0x27b   : > { %v1375_v24 = vcombine.low %v1362_v25, %v1363_v58  ;;  %v1444_v57 = vcombine.low %v1431_v11, %v1432_v49  ;;  %v2193_v55 = vand.u32 2147483647, %v7752_v29  ;;  %v6340_v46 = vpack.c.bf16 %v2175_v40, %v2167_v54  ;;  %v7754_v1 = vld [vmem:[%s8681_s20 + $0xd68] sm:$0xff]  ;;  %6403 = vmatprep.subr.bf16.mxu1 %v6402_v3  ;;  %v7755_v40 = vld [vmem:[%s8681_s20 + $0xd38] sm:$0xff]  ;;  %v7757_v45 = vld [vmem:[%s8681_s20 + $0xd20] sm:$0xff] }
 0x27c   : > { %v1396_v47 = vrot.slane %v1374_v38, %v10599_v39  ;;  %v1465_v28 = vrot.slane %v1443_v34, %v10599_v39  ;;  %v6404_v0 = vpack.c.bf16 %v2177_v42, %v2169_v4  ;;  %v6342_v43 = vpack.c.bf16 %v2192_v60, %v2184_v16  ;;  %v7756_v4 = vld [vmem:[%s8681_s20 + $0xd78] sm:$0xff]  ;;  %v7758_v9 = vld [vmem:[%s8681_s20 + $0xd60] sm:$0xff]  ;;  %v7759_v3 = vld [vmem:[%s8681_s20 + $0xd30] sm:$0xff] }
 0x27d   : > { %v1403_v41 = vrot.slane %v1375_v24, %v10599_v39  ;;  %v1472_v6 = vrot.slane %v1444_v57, %v10599_v39  ;;  %v6406_v7 = vpack.c.bf16 %v2194_v51, %v2186_v27  ;;  %v2200_v17 = vand.u32 2147483647, %v7753_v19  ;;  %6341 = vmatpush1.bf16.msra.mxu0 %v6340_v46  ;;  %v7760_v36 = vld [vmem:[%s8681_s20 + $0xd70] sm:$0xff]  ;;  %v7762_v11 = vld [vmem:[%s8681_s20 + $0xde8] sm:$0xff]  ;;  %v7763_v58 = vld [vmem:[%s8681_s20 + $0xdb8] sm:$0xff] }
 0x27e   : > { %v2208_v14 = vand.u32 2147483647, %v7754_v1  ;;  %v6344_v8 = vpack.c.bf16 %v2191_v62, %v2183_v56  ;;  %v6408_v54 = vpack.c.bf16 %v2193_v55, %v2185_v59  ;;  %v2202_v5 = vand.u32 2147483647, %v7755_v40  ;;  %6405 = vmatpush1.bf16.msra.mxu1 %v6404_v0  ;;  %6343 = vmatprep.subr.bf16.mxu0 %v6342_v43  ;;  %v7764_v15 = vld [vmem:[%s8681_s20 + $0xdf8] sm:$0xff]  ;;  %v7765_v35 = vld [vmem:[%s8681_s20 + $0xda0] sm:$0xff] }
 0x27f   : > { %v1405_v2 = vcombine.low %v1396_v47, %v1403_v41  ;;  %v1474_v21 = vcombine.low %v1465_v28, %v1472_v6  ;;  %v2210_v22 = vand.u32 2147483647, %v7756_v4  ;;  %v2199_v33 = vand.u32 2147483647, %v7757_v45  ;;  %6407 = vmatprep.subr.bf16.mxu1 %v6406_v7  ;;  %v7766_v38 = vld [vmem:[%s8681_s20 + $0xde0] sm:$0xff]  ;;  %v7767_v27 = vld [vmem:[%s8681_s20 + $0xdb0] sm:$0xff] }
 0x280   : > { %v1412_v37 = vrot.slane %v1404_v18, %v10599_v39  ;;  %v1481_v26 = vrot.slane %v1473_v48, %v10599_v39  ;;  %v6346_v50 = vpack.c.bf16 %v2208_v14, %v2200_v17  ;;  %v2207_v23 = vand.u32 2147483647, %v7758_v9  ;;  %v7761_v48 = vld [vmem:[%s8681_s20 + $0xda8] sm:$0xff]  ;;  %v7768_v51 = vld [vmem:[%s8681_s20 + $0xdf0] sm:$0xff]  ;;  %v7771_v31 = vld [vmem:[%s8681_s20 + $0xe38] sm:$0xff] }
 0x281   : > { %v1419_v10 = vrot.slane %v1405_v2, %v10599_v39  ;;  %v1488_v42 = vrot.slane %v1474_v21, %v10599_v39  ;;  %v2201_v30 = vand.u32 2147483647, %v7759_v3  ;;  %v2209_v18 = vand.u32 2147483647, %v7760_v36  ;;  %6345 = vmatpush1.bf16.msra.mxu0 %v6344_v8  ;;  %v7769_v56 = vld [vmem:[%s8681_s20 + $0xe28] sm:$0xff]  ;;  %v7772_v29 = vld [vmem:[%s8681_s20 + $0xe78] sm:$0xff] }
 0x282   : > { %v2216_v25 = vand.u32 2147483647, %v7761_v48  ;;  %v2224_v20 = vand.u32 2147483647, %v7762_v11  ;;  %v6410_v13 = vpack.c.bf16 %v2210_v22, %v2202_v5  ;;  %v2218_v49 = vand.u32 2147483647, %v7763_v58  ;;  %6409 = vmatpush1.bf16.msra.mxu1 %v6408_v54  ;;  %6347 = vmatprep.subr.bf16.mxu0 %v6346_v50 }
 0x283   : > { %v1420_v63 = vcombine.low %v1412_v37, %v1419_v10  ;;  %v1489_v52 = vcombine.low %v1481_v26, %v1488_v42  ;;  %v2226_v16 = vand.u32 2147483647, %v7764_v15  ;;  %v2215_v60 = vand.u32 2147483647, %v7765_v35  ;;  %v7770_v62 = vld [vmem:[%s8681_s20 + $0xe68] sm:$0xff]  ;;  %v7773_v46 = vld [vmem:[%s8681_s20 + $0xe20] sm:$0xff] }
 0x284   : > { %v2223_v34 = vand.u32 2147483647, %v7766_v38  ;;  %v6348_v53 = vpack.c.bf16 %v2207_v23, %v2199_v33  ;;  %v2217_v61 = vand.u32 2147483647, %v7767_v27  ;;  %v2225_v24 = vand.u32 2147483647, %v7768_v51  ;;  %6411 = vmatprep.subr.bf16.mxu1 %v6410_v13 }
 0x285   : > { %1423 = vst [vmem:[%s10814_s23] sm:$0xff] %v1420_v63  ;;  %1492 = vst [vmem:[%s10819_s26] sm:$0xff] %v1489_v52  ;;  %v6412_v57 = vpack.c.bf16 %v2209_v18, %v2201_v30  ;;  %v6350_v32 = vpack.c.bf16 %v2224_v20, %v2216_v25  ;;  %v2232_v44 = vand.u32 2147483647, %v7769_v56  ;;  %v2240_v47 = vand.u32 2147483647, %v7770_v62  ;;  %v7774_v43 = vld [vmem:[%s8681_s20 + $0xe60] sm:$0xff]  ;;  %v7775_v19 = vld [vmem:[%s8681_s20 + $0xe30] sm:$0xff] }
 0x286   : > { %v6414_v28 = vpack.c.bf16 %v2226_v16, %v2218_v49  ;;  %v2234_v59 = vand.u32 2147483647, %v7771_v31  ;;  %v2242_v55 = vand.u32 2147483647, %v7772_v29  ;;  %v6352_v41 = vpack.c.bf16 %v2223_v34, %v2215_v60  ;;  %6349 = vmatpush1.bf16.msra.mxu0 %v6348_v53  ;;  %v7776_v14 = vld [vmem:[%s8681_s20 + $0xe70] sm:$0xff]  ;;  %v7777_v21 = vld [vmem:[%s8681_s20 + $0xea8] sm:$0xff] }
 0x287   : > { %v6416_v6 = vpack.c.bf16 %v2225_v24, %v2217_v61  ;;  %v2231_v0 = vand.u32 2147483647, %v7773_v46  ;;  %v2239_v7 = vand.u32 2147483647, %v7774_v43  ;;  %v2233_v17 = vand.u32 2147483647, %v7775_v19  ;;  %6413 = vmatpush1.bf16.msra.mxu1 %v6412_v57  ;;  %6351 = vmatprep.subr.bf16.mxu0 %v6350_v32 }
 0x288   : > { %v6354_v1 = vpack.c.bf16 %v2240_v47, %v2232_v44  ;;  %v2241_v2 = vand.u32 2147483647, %v7776_v14  ;;  %v2248_v8 = vand.u32 2147483647, %v7777_v21  ;;  %v7778_v54 = vld [vmem:[%s8681_s20 + $0xee8] sm:$0xff]  ;;  %6415 = vmatprep.subr.bf16.mxu1 %v6414_v28  ;;  %v6418_v5 = vpack.c.bf16 %v2242_v55, %v2234_v59  ;;  %v7779_v4 = vld [vmem:[%s8681_s20 + $0xeb8] sm:$0xff] }
 0x289   : > { %v2256_v40 = vand.u32 2147483647, %v7778_v54  ;;  %v2250_v22 = vand.u32 2147483647, %v7779_v4  ;;  %v7780_v45 = vld [vmem:[%s8681_s20 + $0xef8] sm:$0xff]  ;;  %v7781_v37 = vld [vmem:[%s8681_s20 + $0xea0] sm:$0xff]  ;;  %v6356_v50 = vpack.c.bf16 %v2239_v7, %v2231_v0 }
 0x28a   : > { %v2258_v33 = vand.u32 2147483647, %v7780_v45  ;;  %v2247_v26 = vand.u32 2147483647, %v7781_v37  ;;  %v7782_v10 = vld [vmem:[%s8681_s20 + $0xee0] sm:$0xff]  ;;  %6353 = vmatpush1.bf16.msra.mxu0 %v6352_v41  ;;  %v7783_v9 = vld [vmem:[%s8681_s20 + $0xeb0] sm:$0xff]  ;;  %v6420_v36 = vpack.c.bf16 %v2241_v2, %v2233_v17 }
 0x28b   : > { %v2255_v42 = vand.u32 2147483647, %v7782_v10  ;;  %v2249_v23 = vand.u32 2147483647, %v7783_v9  ;;  %v7784_v3 = vld [vmem:[%s8681_s20 + $0xef0] sm:$0xff]  ;;  %6417 = vmatpush1.bf16.msra.mxu1 %v6416_v6  ;;  %6355 = vmatprep.subr.bf16.mxu0 %v6354_v1  ;;  %v6358_v18 = vpack.c.bf16 %v2256_v40, %v2248_v8  ;;  %v7785_v63 = vld [vmem:[%s8681_s20 + $0xf28] sm:$0xff] }
 0x28c   : > { %v2257_v30 = vand.u32 2147483647, %v7784_v3  ;;  %v2264_v52 = vand.u32 2147483647, %v7785_v63  ;;  %v7786_v48 = vld [vmem:[%s8681_s20 + $0xf68] sm:$0xff]  ;;  %6419 = vmatprep.subr.bf16.mxu1 %v6418_v5  ;;  %v6422_v11 = vpack.c.bf16 %v2258_v33, %v2250_v22  ;;  %v7787_v20 = vld [vmem:[%s8681_s20 + $0xf38] sm:$0xff] }
 0x28d   : > { %v2272_v25 = vand.u32 2147483647, %v7786_v48  ;;  %v2266_v13 = vand.u32 2147483647, %v7787_v20  ;;  %v7788_v58 = vld [vmem:[%s8681_s20 + $0xf78] sm:$0xff]  ;;  %v6360_v15 = vpack.c.bf16 %v2255_v42, %v2247_v26  ;;  %v7789_v35 = vld [vmem:[%s8681_s20 + $0xf20] sm:$0xff] }
 0x28e   : > { %v2274_v49 = vand.u32 2147483647, %v7788_v58  ;;  %6357 = vmatpush1.bf16.msra.mxu0 %v6356_v50  ;;  %v6424_v16 = vpack.c.bf16 %v2257_v30, %v2249_v23  ;;  %v2263_v60 = vand.u32 2147483647, %v7789_v35  ;;  %v7790_v38 = vld [vmem:[%s8681_s20 + $0xf60] sm:$0xff]  ;;  %v7791_v53 = vld [vmem:[%s8681_s20 + $0xf30] sm:$0xff] }
 0x28f   : > { %v2271_v34 = vand.u32 2147483647, %v7790_v38  ;;  %v2265_v27 = vand.u32 2147483647, %v7791_v53  ;;  %6421 = vmatpush1.bf16.msra.mxu1 %v6420_v36  ;;  %6359 = vmatprep.subr.bf16.mxu0 %v6358_v18  ;;  %v6362_v61 = vpack.c.bf16 %v2272_v25, %v2264_v52  ;;  %v7792_v51 = vld [vmem:[%s8681_s20 + $0xf70] sm:$0xff]  ;;  %v7793_v57 = vld [vmem:[%s8681_s20 + $0xfa8] sm:$0xff] }
 0x290   : > { %v2273_v24 = vand.u32 2147483647, %v7792_v51  ;;  %v2280_v32 = vand.u32 2147483647, %v7793_v57  ;;  %v7794_v56 = vld [vmem:[%s8681_s20 + $0xfe8] sm:$0xff]  ;;  %6423 = vmatprep.subr.bf16.mxu1 %v6422_v11  ;;  %v6426_v62 = vpack.c.bf16 %v2274_v49, %v2266_v13  ;;  %v7795_v47 = vld [vmem:[%s8681_s20 + $0xfb8] sm:$0xff] }
 0x291   : > { %v2288_v44 = vand.u32 2147483647, %v7794_v56  ;;  %v2282_v28 = vand.u32 2147483647, %v7795_v47  ;;  %v7796_v31 = vld [vmem:[%s8681_s20 + $0xff8] sm:$0xff]  ;;  %v6364_v29 = vpack.c.bf16 %v2271_v34, %v2263_v60  ;;  %v7797_v55 = vld [vmem:[%s8681_s20 + $0xfa0] sm:$0xff] }
 0x292   : > { %v2290_v59 = vand.u32 2147483647, %v7796_v31  ;;  %6361 = vmatpush1.bf16.msra.mxu0 %v6360_v15  ;;  %v2279_v41 = vand.u32 2147483647, %v7797_v55  ;;  %v7798_v6 = vld [vmem:[%s8681_s20 + $0xfe0] sm:$0xff]  ;;  %v6428_v0 = vpack.c.bf16 %v2273_v24, %v2265_v27  ;;  %v7799_v7 = vld [vmem:[%s8681_s20 + $0xfb0] sm:$0xff] }
 0x293   : > { %v2287_v46 = vand.u32 2147483647, %v7798_v6  ;;  %6425 = vmatpush1.bf16.msra.mxu1 %v6424_v16  ;;  %6363 = vmatprep.subr.bf16.mxu0 %v6362_v61  ;;  %v6366_v43 = vpack.c.bf16 %v2288_v44, %v2280_v32  ;;  %v2281_v19 = vand.u32 2147483647, %v7799_v7  ;;  %v7800_v17 = vld [vmem:[%s8681_s20 + $0xff0] sm:$0xff]  ;;  %v2738_v2 = vld [vmem:[%s8681_s20 + $0x1008] sm:$0xff] }
 0x294   : > { %v2289_v1 = vand.u32 2147483647, %v7800_v17  ;;  %6427 = vmatprep.subr.bf16.mxu1 %v6426_v62  ;;  %v6430_v14 = vpack.c.bf16 %v2290_v59, %v2282_v28  ;;  %v2746_v21 = vld [vmem:[%s8681_s20 + $0x1048] sm:$0xff]  ;;  %v2740_v8 = vld [vmem:[%s8681_s20 + $0x1018] sm:$0xff]  ;;  %v2737_v22 = vld [vmem:[%s8681_s20 + $0x1000] sm:$0xff] }
 0x295   : > { %v2748_v54 = vld [vmem:[%s8681_s20 + $0x1058] sm:$0xff]  ;;  %v6368_v40 = vpack.c.bf16 %v2287_v46, %v2279_v41  ;;  %v6434_v4 = vpack.c.bf16 %v2746_v21, %v2738_v2  ;;  %v2745_v45 = vld [vmem:[%s8681_s20 + $0x1040] sm:$0xff]  ;;  %v2739_v33 = vld [vmem:[%s8681_s20 + $0x1010] sm:$0xff] }
 0x296   : > { %6365 = vmatpush1.bf16.msra.mxu0 %v6364_v29  ;;  %v6432_v5 = vpack.c.bf16 %v2289_v1, %v2281_v19  ;;  %v6498_v37 = vpack.c.bf16 %v2748_v54, %v2740_v8  ;;  %v2747_v26 = vld [vmem:[%s8681_s20 + $0x1050] sm:$0xff]  ;;  %v2754_v10 = vld [vmem:[%s8681_s20 + $0x1088] sm:$0xff]  ;;  %v2756_v50 = vld [vmem:[%s8681_s20 + $0x1098] sm:$0xff]  ;;  %v6436_v23 = vpack.c.bf16 %v2745_v45, %v2737_v22 }
 0x297   : > { %6429 = vmatpush1.bf16.msra.mxu1 %v6428_v0  ;;  %6367 = vmatprep.subr.bf16.mxu0 %v6366_v43  ;;  %v2762_v42 = vld [vmem:[%s8681_s20 + $0x10c8] sm:$0xff]  ;;  %v2764_v9 = vld [vmem:[%s8681_s20 + $0x10d8] sm:$0xff]  ;;  %v6500_v3 = vpack.c.bf16 %v2747_v26, %v2739_v33  ;;  %v2753_v36 = vld [vmem:[%s8681_s20 + $0x1080] sm:$0xff] }
 0x298   : > { %6431 = vmatprep.subr.bf16.mxu1 %v6430_v14  ;;  %v6438_v30 = vpack.c.bf16 %v2762_v42, %v2754_v10  ;;  %v2761_v18 = vld [vmem:[%s8681_s20 + $0x10c0] sm:$0xff]  ;;  %v2755_v63 = vld [vmem:[%s8681_s20 + $0x1090] sm:$0xff]  ;;  %v6502_v52 = vpack.c.bf16 %v2764_v9, %v2756_v50  ;;  %v2770_v25 = vld [vmem:[%s8681_s20 + $0x1108] sm:$0xff] }
 0x299   : > { %v2763_v48 = vld [vmem:[%s8681_s20 + $0x10d0] sm:$0xff]  ;;  %v2778_v11 = vld [vmem:[%s8681_s20 + $0x1148] sm:$0xff]  ;;  %v2772_v20 = vld [vmem:[%s8681_s20 + $0x1118] sm:$0xff]  ;;  %v6440_v49 = vpack.c.bf16 %v2761_v18, %v2753_v36 }
 0x29a   : > { %6369 = vmatpush1.bf16.msra.mxu0 %v6368_v40  ;;  %v2780_v13 = vld [vmem:[%s8681_s20 + $0x1158] sm:$0xff]  ;;  %v10875_v58 = vld [vmem:[#allocation2 + $0x28] sm:$0xff]  ;;  %v6504_v15 = vpack.c.bf16 %v2763_v48, %v2755_v63  ;;  %v6442_v16 = vpack.c.bf16 %v2778_v11, %v2770_v25  ;;  %v2769_v35 = vld [vmem:[%s8681_s20 + $0x1100] sm:$0xff] }
 0x29b   : > { %6433 = vmatpush1.bf16.msra.mxu1 %v6432_v5  ;;  %6435 = vmatprep.subr.bf16.mxu0 %v6434_v4  ;;  %v2777_v60 = vld [vmem:[%s8681_s20 + $0x1140] sm:$0xff]  ;;  %v2771_v38 = vld [vmem:[%s8681_s20 + $0x1110] sm:$0xff]  ;;  %v6506_v34 = vpack.c.bf16 %v2780_v13, %v2772_v20  ;;  %v2786_v27 = vld [vmem:[%s8681_s20 + $0x1188] sm:$0xff] }
 0x29c   : > { %6499 = vmatprep.subr.bf16.mxu1 %v6498_v37  ;;  %v2779_v53 = vld [vmem:[%s8681_s20 + $0x1150] sm:$0xff]  ;;  %v2794_v61 = vld [vmem:[%s8681_s20 + $0x11c8] sm:$0xff]  ;;  %v2796_v51 = vld [vmem:[%s8681_s20 + $0x11d8] sm:$0xff]  ;;  %v6444_v24 = vpack.c.bf16 %v2777_v60, %v2769_v35 }
 0x29d   : > { %2498 = vmatmul.mubr.f32.vlgmr.msra.gmra.mrb[14].mxu0 %v10707_v12  ;;  %v6508_v57 = vpack.c.bf16 %v2779_v53, %v2771_v38  ;;  %v6446_v32 = vpack.c.bf16 %v2794_v61, %v2786_v27  ;;  %v2785_v56 = vld [vmem:[%s8681_s20 + $0x1180] sm:$0xff]  ;;  %v2787_v62 = vld [vmem:[%s8681_s20 + $0x1190] sm:$0xff]  ;;  %v2802_v31 = vld [vmem:[%s8681_s20 + $0x1208] sm:$0xff] }
 0x29e   : > { %2569 = vmatmul.mubr.f32.vlgmr.msra.gmra.mrb[14].mxu1 %v10707_v12  ;;  %6437 = vmatpush1.bf16.msra.mxu0 %v6436_v23  ;;  %v2788_v12 = vld [vmem:[%s8681_s20 + $0x1198] sm:$0xff]  ;;  %v2793_v44 = vld [vmem:[%s8681_s20 + $0x11c0] sm:$0xff]  ;;  %v2795_v28 = vld [vmem:[%s8681_s20 + $0x11d0] sm:$0xff] }
 0x29f   : > { %6501 = vmatpush1.bf16.msra.mxu1 %v6500_v3  ;;  %6439 = vmatprep.subr.bf16.mxu0 %v6438_v30  ;;  %v6510_v47 = vpack.c.bf16 %v2796_v51, %v2788_v12  ;;  %v2810_v59 = vld [vmem:[%s8681_s20 + $0x1248] sm:$0xff]  ;;  %v2804_v29 = vld [vmem:[%s8681_s20 + $0x1218] sm:$0xff]  ;;  %v6448_v41 = vpack.c.bf16 %v2793_v44, %v2785_v56  ;;  %v6512_v6 = vpack.c.bf16 %v2795_v28, %v2787_v62  ;;  %v2801_v0 = vld [vmem:[%s8681_s20 + $0x1200] sm:$0xff] }
 0x2a0   : > { %6503 = vmatprep.subr.bf16.mxu1 %v6502_v52  ;;  %3059 = vmatprep.mubr.f32.mxu0 %v10875_v58  ;;  %v2812_v55 = vld [vmem:[%s8681_s20 + $0x1258] sm:$0xff]  ;;  %v6450_v46 = vpack.c.bf16 %v2810_v59, %v2802_v31  ;;  %v2809_v43 = vld [vmem:[%s8681_s20 + $0x1240] sm:$0xff]  ;;  %v2803_v7 = vld [vmem:[%s8681_s20 + $0x1210] sm:$0xff] }
 0x2a1   : > { %3130 = vmatprep.mubr.f32.mxu1 %v10875_v58  ;;  %v6514_v19 = vpack.c.bf16 %v2812_v55, %v2804_v29  ;;  %v2811_v17 = vld [vmem:[%s8681_s20 + $0x1250] sm:$0xff]  ;;  %v2818_v1 = vld [vmem:[%s8681_s20 + $0x1288] sm:$0xff]  ;;  %v2820_v2 = vld [vmem:[%s8681_s20 + $0x1298] sm:$0xff]  ;;  %v6452_v8 = vpack.c.bf16 %v2809_v43, %v2801_v0 }
 0x2a2   : > { %6441 = vmatpush1.bf16.msra.mxu0 %v6440_v49  ;;  %v2826_v14 = vld [vmem:[%s8681_s20 + $0x12c8] sm:$0xff]  ;;  %v2828_v21 = vld [vmem:[%s8681_s20 + $0x12d8] sm:$0xff]  ;;  %v6516_v54 = vpack.c.bf16 %v2811_v17, %v2803_v7  ;;  %v2817_v5 = vld [vmem:[%s8681_s20 + $0x1280] sm:$0xff] }
 0x2a3   : > { %6505 = vmatpush1.bf16.msra.mxu1 %v6504_v15  ;;  %6443 = vmatprep.subr.bf16.mxu0 %v6442_v16  ;;  %v6454_v40 = vpack.c.bf16 %v2826_v14, %v2818_v1  ;;  %v2825_v4 = vld [vmem:[%s8681_s20 + $0x12c0] sm:$0xff]  ;;  %v2819_v22 = vld [vmem:[%s8681_s20 + $0x1290] sm:$0xff]  ;;  %v6518_v45 = vpack.c.bf16 %v2828_v21, %v2820_v2  ;;  %v2834_v37 = vld [vmem:[%s8681_s20 + $0x1308] sm:$0xff] }
 0x2a4   : > { %6507 = vmatprep.subr.bf16.mxu1 %v6506_v34  ;;  %v2827_v33 = vld [vmem:[%s8681_s20 + $0x12d0] sm:$0xff]  ;;  %v2842_v26 = vld [vmem:[%s8681_s20 + $0x1348] sm:$0xff]  ;;  %v2836_v10 = vld [vmem:[%s8681_s20 + $0x1318] sm:$0xff]  ;;  %v6456_v50 = vpack.c.bf16 %v2825_v4, %v2817_v5 }
 0x2a5   : > { %v2844_v42 = vld [vmem:[%s8681_s20 + $0x1358] sm:$0xff]  ;;  %v6520_v9 = vpack.c.bf16 %v2827_v33, %v2819_v22  ;;  %v6458_v23 = vpack.c.bf16 %v2842_v26, %v2834_v37  ;;  %v2833_v3 = vld [vmem:[%s8681_s20 + $0x1300] sm:$0xff]  ;;  %v2835_v36 = vld [vmem:[%s8681_s20 + $0x1310] sm:$0xff] }
 0x2a6   : > { %6445 = vmatpush1.bf16.msra.mxu0 %v6444_v24  ;;  %v2841_v30 = vld [vmem:[%s8681_s20 + $0x1340] sm:$0xff]  ;;  %v6522_v63 = vpack.c.bf16 %v2844_v42, %v2836_v10  ;;  %v2843_v52 = vld [vmem:[%s8681_s20 + $0x1350] sm:$0xff]  ;;  %v2850_v48 = vld [vmem:[%s8681_s20 + $0x1388] sm:$0xff] }
 0x2a7   : > { %6509 = vmatpush1.bf16.msra.mxu1 %v6508_v57  ;;  %6447 = vmatprep.subr.bf16.mxu0 %v6446_v32  ;;  %v2858_v25 = vld [vmem:[%s8681_s20 + $0x13c8] sm:$0xff]  ;;  %v2852_v13 = vld [vmem:[%s8681_s20 + $0x1398] sm:$0xff]  ;;  %v6460_v16 = vpack.c.bf16 %v2841_v30, %v2833_v3  ;;  %v6524_v35 = vpack.c.bf16 %v2843_v52, %v2835_v36  ;;  %v10929_v38 = vld [vmem:[%s8681_s20 + $0x1380] sm:$0xff] }
 0x2a8   : > { %6511 = vmatprep.subr.bf16.mxu1 %v6510_v47  ;;  %v2860_v49 = vld [vmem:[%s8681_s20 + $0x13d8] sm:$0xff]  ;;  %v6462_v60 = vpack.c.bf16 %v2858_v25, %v2850_v48  ;;  %v2857_v34 = vld [vmem:[%s8681_s20 + $0x13c0] sm:$0xff]  ;;  %v2851_v53 = vld [vmem:[%s8681_s20 + $0x1390] sm:$0xff] }
 0x2a9   : > { %v6526_v27 = vpack.c.bf16 %v2860_v49, %v2852_v13  ;;  %v10934_v61 = vld [vmem:[%s8681_s20 + $0x13d0] sm:$0xff]  ;;  %v2866_v12 = vld [vmem:[%s8681_s20 + $0x1408] sm:$0xff]  ;;  %v2868_v24 = vld [vmem:[%s8681_s20 + $0x1418] sm:$0xff]  ;;  %v6464_v32 = vpack.c.bf16 %v2857_v34, %v10929_v38 }
 0x2aa   : > { %6449 = vmatpush1.bf16.msra.mxu0 %v6448_v41  ;;  %v2874_v51 = vld [vmem:[%s8681_s20 + $0x1448] sm:$0xff]  ;;  %v2876_v57 = vld [vmem:[%s8681_s20 + $0x1458] sm:$0xff]  ;;  %v6528_v56 = vpack.c.bf16 %v10934_v61, %v2851_v53  ;;  %v2865_v62 = vld [vmem:[%s8681_s20 + $0x1400] sm:$0xff] }
 0x2ab   : > { %6513 = vmatpush1.bf16.msra.mxu1 %v6512_v6  ;;  %6451 = vmatprep.subr.bf16.mxu0 %v6450_v46  ;;  %v6466_v44 = vpack.c.bf16 %v2874_v51, %v2866_v12  ;;  %v2873_v47 = vld [vmem:[%s8681_s20 + $0x1440] sm:$0xff]  ;;  %v2867_v28 = vld [vmem:[%s8681_s20 + $0x1410] sm:$0xff]  ;;  %v6530_v31 = vpack.c.bf16 %v2876_v57, %v2868_v24  ;;  %v2882_v29 = vld [vmem:[%s8681_s20 + $0x1488] sm:$0xff] }
 0x2ac   : > { %6515 = vmatprep.subr.bf16.mxu1 %v6514_v19  ;;  %v2875_v59 = vld [vmem:[%s8681_s20 + $0x1450] sm:$0xff]  ;;  %v2890_v55 = vld [vmem:[%s8681_s20 + $0x14c8] sm:$0xff]  ;;  %v2884_v41 = vld [vmem:[%s8681_s20 + $0x1498] sm:$0xff]  ;;  %v6468_v46 = vpack.c.bf16 %v2873_v47, %v2865_v62 }
 0x2ad   : > { %v2892_v6 = vld [vmem:[%s8681_s20 + $0x14d8] sm:$0xff]  ;;  %v6532_v0 = vpack.c.bf16 %v2875_v59, %v2867_v28  ;;  %v6470_v43 = vpack.c.bf16 %v2890_v55, %v2882_v29  ;;  %v2881_v7 = vld [vmem:[%s8681_s20 + $0x1480] sm:$0xff]  ;;  %v2883_v17 = vld [vmem:[%s8681_s20 + $0x1490] sm:$0xff] }
 0x2ae   : > { %6453 = vmatpush1.bf16.msra.mxu0 %v6452_v8  ;;  %v2889_v19 = vld [vmem:[%s8681_s20 + $0x14c0] sm:$0xff]  ;;  %v6534_v1 = vpack.c.bf16 %v2892_v6, %v2884_v41  ;;  %v2891_v14 = vld [vmem:[%s8681_s20 + $0x14d0] sm:$0xff]  ;;  %v2898_v2 = vld [vmem:[%s8681_s20 + $0x1508] sm:$0xff] }
 0x2af   : > { %6517 = vmatpush1.bf16.msra.mxu1 %v6516_v54  ;;  %6455 = vmatprep.subr.bf16.mxu0 %v6454_v40  ;;  %v10915_v18 = vpop.f32.mrb[8].mxu0  ;;  %v2906_v21 = vld [vmem:[%s8681_s20 + $0x1548] sm:$0xff]  ;;  %v2900_v8 = vld [vmem:[%s8681_s20 + $0x1518] sm:$0xff]  ;;  %v6472_v40 = vpack.c.bf16 %v2889_v19, %v2881_v7  ;;  %v6536_v5 = vpack.c.bf16 %v2891_v14, %v2883_v17  ;;  %v2897_v22 = vld [vmem:[%s8681_s20 + $0x1500] sm:$0xff] }
 0x2b0   : > { %6519 = vmatprep.subr.bf16.mxu1 %v6518_v45  ;;  %v10920_v11 = vpop.f32.mrb[8].mxu1  ;;  %v10922_v20 = vpop.f32.mrb[9].mxu0  ;;  %v2908_v54 = vld [vmem:[%s8681_s20 + $0x1558] sm:$0xff]  ;;  %v6474_v4 = vpack.c.bf16 %v2906_v21, %v2898_v2  ;;  %v2905_v45 = vld [vmem:[%s8681_s20 + $0x1540] sm:$0xff]  ;;  %v2899_v33 = vld [vmem:[%s8681_s20 + $0x1510] sm:$0xff] }
 0x2b1   : > { %v10926_v15 = vpop.f32.mrb[9].mxu1  ;;  %v6538_v37 = vpack.c.bf16 %v2908_v54, %v2900_v8  ;;  %v2907_v26 = vld [vmem:[%s8681_s20 + $0x1550] sm:$0xff]  ;;  %v2914_v10 = vld [vmem:[%s8681_s20 + $0x1588] sm:$0xff]  ;;  %v2913_v36 = vld [vmem:[%s8681_s20 + $0x1580] sm:$0xff] }
 0x2b2   : > { %6457 = vmatpush1.bf16.msra.mxu0 %v6456_v50  ;;  %v2922_v42 = vld [vmem:[%s8681_s20 + $0x15c8] sm:$0xff]  ;;  %v2916_v50 = vld [vmem:[%s8681_s20 + $0x1598] sm:$0xff]  ;;  %v6540_v3 = vpack.c.bf16 %v2907_v26, %v2899_v33  ;;  %v2915_v52 = vld [vmem:[%s8681_s20 + $0x1590] sm:$0xff] }
 0x2b3   : > { %6521 = vmatpush1.bf16.msra.mxu1 %v6520_v9  ;;  %6459 = vmatprep.subr.bf16.mxu0 %v6458_v23  ;;  %v2924_v9 = vld [vmem:[%s8681_s20 + $0x15d8] sm:$0xff]  ;;  %v6476_v23 = vpack.c.bf16 %v2905_v45, %v2897_v22  ;;  %v6478_v30 = vpack.c.bf16 %v2922_v42, %v2914_v10  ;;  %v2923_v25 = vld [vmem:[%s8681_s20 + $0x15d0] sm:$0xff]  ;;  %v2930_v13 = vld [vmem:[%s8681_s20 + $0x1608] sm:$0xff] }
 0x2b4   : > { %6523 = vmatprep.subr.bf16.mxu1 %v6522_v63  ;;  %v2921_v63 = vld [vmem:[%s8681_s20 + $0x15c0] sm:$0xff]  ;;  %v6542_v48 = vpack.c.bf16 %v2924_v9, %v2916_v50  ;;  %v2938_v49 = vld [vmem:[%s8681_s20 + $0x1648] sm:$0xff]  ;;  %v6544_v34 = vpack.c.bf16 %v2923_v25, %v2915_v52  ;;  %v2931_v51 = vld [vmem:[%s8681_s20 + $0x1610] sm:$0xff] }
 0x2b5   : > { %v6482_v53 = vpack.c.bf16 %v2938_v49, %v2930_v13  ;;  %v2937_v12 = vld [vmem:[%s8681_s20 + $0x1640] sm:$0xff]  ;;  %v2939_v57 = vld [vmem:[%s8681_s20 + $0x1650] sm:$0xff]  ;;  %v2956_v62 = vld [vmem:[%s8681_s20 + $0x16d8] sm:$0xff] }
 0x2b6   : > { %6461 = vmatpush1.bf16.msra.mxu0 %v6460_v16  ;;  %v2932_v16 = vld [vmem:[%s8681_s20 + $0x1618] sm:$0xff]  ;;  %v6548_v28 = vpack.c.bf16 %v2939_v57, %v2931_v51  ;;  %v2945_v59 = vld [vmem:[%s8681_s20 + $0x1680] sm:$0xff]  ;;  %v2947_v55 = vld [vmem:[%s8681_s20 + $0x1690] sm:$0xff] }
 0x2b7   : > { %6525 = vmatpush1.bf16.msra.mxu1 %v6524_v35  ;;  %6463 = vmatprep.subr.bf16.mxu0 %v6462_v60  ;;  %v2940_v35 = vld [vmem:[%s8681_s20 + $0x1658] sm:$0xff]  ;;  %v6480_v60 = vpack.c.bf16 %v2921_v63, %v2913_v36  ;;  %v2953_v29 = vld [vmem:[%s8681_s20 + $0x16c0] sm:$0xff]  ;;  %v2955_v6 = vld [vmem:[%s8681_s20 + $0x16d0] sm:$0xff] }
 0x2b8   : > { %6527 = vmatprep.subr.bf16.mxu1 %v6526_v27  ;;  %v2929_v27 = vld [vmem:[%s8681_s20 + $0x1600] sm:$0xff]  ;;  %v6546_v24 = vpack.c.bf16 %v2940_v35, %v2932_v16  ;;  %v2972_v7 = vld [vmem:[%s8681_s20 + $0x1758] sm:$0xff]  ;;  %v6488_v19 = vpack.c.bf16 %v2953_v29, %v2945_v59  ;;  %v6552_v17 = vpack.c.bf16 %v2955_v6, %v2947_v55  ;;  %v2963_v21 = vld [vmem:[%s8681_s20 + $0x1710] sm:$0xff] }
 0x2b9   : > { %v6484_v47 = vpack.c.bf16 %v2937_v12, %v2929_v27  ;;  %v2961_v14 = vld [vmem:[%s8681_s20 + $0x1700] sm:$0xff]  ;;  %v2971_v54 = vld [vmem:[%s8681_s20 + $0x1750] sm:$0xff]  ;;  %v2988_v22 = vld [vmem:[%s8681_s20 + $0x17d8] sm:$0xff] }
 0x2ba   : > { %6465 = vmatpush1.bf16.msra.mxu0 %v6464_v32  ;;  %v2946_v32 = vld [vmem:[%s8681_s20 + $0x1688] sm:$0xff]  ;;  %v2969_v2 = vld [vmem:[%s8681_s20 + $0x1740] sm:$0xff]  ;;  %v6556_v33 = vpack.c.bf16 %v2971_v54, %v2963_v21  ;;  %v2979_v42 = vld [vmem:[%s8681_s20 + $0x1790] sm:$0xff] }
 0x2bb   : > { %6529 = vmatpush1.bf16.msra.mxu1 %v6528_v56  ;;  %6467 = vmatprep.subr.bf16.mxu0 %v6466_v44  ;;  %v2954_v56 = vld [vmem:[%s8681_s20 + $0x16c8] sm:$0xff]  ;;  %v2948_v44 = vld [vmem:[%s8681_s20 + $0x1698] sm:$0xff]  ;;  %v6492_v45 = vpack.c.bf16 %v2969_v2, %v2961_v14  ;;  %v2977_v26 = vld [vmem:[%s8681_s20 + $0x1780] sm:$0xff] }
 0x2bc   : > { %6531 = vmatprep.subr.bf16.mxu1 %v6530_v31  ;;  %v6486_v31 = vpack.c.bf16 %v2954_v56, %v2946_v32  ;;  %v6550_v41 = vpack.c.bf16 %v2956_v62, %v2948_v44  ;;  %v2985_v10 = vld [vmem:[%s8681_s20 + $0x17c0] sm:$0xff]  ;;  %v2987_v9 = vld [vmem:[%s8681_s20 + $0x17d0] sm:$0xff]  ;;  %v2752_v36 = vld [vmem:[%s8681_s20 + $0x1078] sm:$0xff] }
 0x2bd   : > { %v6496_v63 = vpack.c.bf16 %v2985_v10, %v2977_v26  ;;  %v6560_v52 = vpack.c.bf16 %v2987_v9, %v2979_v42  ;;  %v2741_v25 = vld [vmem:[%s8681_s20 + $0x1020] sm:$0xff]  ;;  %v2743_v49 = vld [vmem:[%s8681_s20 + $0x1030] sm:$0xff]  ;;  %v2768_v27 = vld [vmem:[%s8681_s20 + $0x10f8] sm:$0xff] }
 0x2be   : > { %6469 = vmatpush1.bf16.msra.mxu0 %v6468_v46  ;;  %v2962_v46 = vld [vmem:[%s8681_s20 + $0x1708] sm:$0xff]  ;;  %v2749_v13 = vld [vmem:[%s8681_s20 + $0x1060] sm:$0xff]  ;;  %v2751_v35 = vld [vmem:[%s8681_s20 + $0x1070] sm:$0xff] }
 0x2bf   : > { %6533 = vmatpush1.bf16.msra.mxu1 %v6532_v0  ;;  %6471 = vmatprep.subr.bf16.mxu0 %v6470_v43  ;;  %v2970_v0 = vld [vmem:[%s8681_s20 + $0x1748] sm:$0xff]  ;;  %v2964_v43 = vld [vmem:[%s8681_s20 + $0x1718] sm:$0xff]  ;;  %v11014_v12 = vld [vmem:[#allocation2 + $0x20] sm:$0xff]  ;;  %v6564_v51 = vpack.c.bf16 %v2749_v13, %v2741_v25 }
 0x2c0   : > { %6535 = vmatprep.subr.bf16.mxu1 %v6534_v1  ;;  %v6490_v1 = vpack.c.bf16 %v2970_v0, %v2962_v46  ;;  %v6554_v8 = vpack.c.bf16 %v2972_v7, %v2964_v43  ;;  %v2757_v32 = vld [vmem:[%s8681_s20 + $0x10a0] sm:$0xff]  ;;  %v2759_v44 = vld [vmem:[%s8681_s20 + $0x10b0] sm:$0xff]  ;;  %v2776_v59 = vld [vmem:[%s8681_s20 + $0x1138] sm:$0xff] }
 0x2c1   : > { %v2765_v56 = vld [vmem:[%s8681_s20 + $0x10e0] sm:$0xff]  ;;  %v2784_v29 = vld [vmem:[%s8681_s20 + $0x1178] sm:$0xff]  ;;  %v2775_v43 = vld [vmem:[%s8681_s20 + $0x1130] sm:$0xff] }
 0x2c2   : > { %6473 = vmatpush1.bf16.msra.mxu0 %v6472_v40  ;;  %v2978_v40 = vld [vmem:[%s8681_s20 + $0x1788] sm:$0xff]  ;;  %v6568_v55 = vpack.c.bf16 %v2765_v56, %v2757_v32  ;;  %v2773_v46 = vld [vmem:[%s8681_s20 + $0x1120] sm:$0xff]  ;;  %v6634_v7 = vpack.c.bf16 %v2784_v29, %v2776_v59  ;;  %v2792_v14 = vld [vmem:[%s8681_s20 + $0x11b8] sm:$0xff] }
 0x2c3   : > { %6537 = vmatpush1.bf16.msra.mxu1 %v6536_v5  ;;  %6475 = vmatprep.subr.bf16.mxu0 %v6474_v4  ;;  %v2986_v5 = vld [vmem:[%s8681_s20 + $0x17c8] sm:$0xff]  ;;  %v2980_v4 = vld [vmem:[%s8681_s20 + $0x1798] sm:$0xff]  ;;  %v2781_v0 = vld [vmem:[%s8681_s20 + $0x1160] sm:$0xff] }
 0x2c4   : > { %6539 = vmatprep.subr.bf16.mxu1 %v6538_v37  ;;  %v6494_v37 = vpack.c.bf16 %v2986_v5, %v2978_v40  ;;  %v6558_v50 = vpack.c.bf16 %v2988_v22, %v2980_v4  ;;  %v2800_v2 = vld [vmem:[%s8681_s20 + $0x11f8] sm:$0xff]  ;;  %v6572_v21 = vpack.c.bf16 %v2781_v0, %v2773_v46  ;;  %v2789_v40 = vld [vmem:[%s8681_s20 + $0x11a0] sm:$0xff]  ;;  %v2791_v4 = vld [vmem:[%s8681_s20 + $0x11b0] sm:$0xff] }
 0x2c5   : > { %v2797_v5 = vld [vmem:[%s8681_s20 + $0x11e0] sm:$0xff]  ;;  %v6638_v22 = vpack.c.bf16 %v2800_v2, %v2792_v14  ;;  %v2816_v26 = vld [vmem:[%s8681_s20 + $0x1278] sm:$0xff] }
 0x2c6   : > { %6477 = vmatpush1.bf16.msra.mxu0 %v6476_v23  ;;  %v2742_v23 = vld [vmem:[%s8681_s20 + $0x1028] sm:$0xff]  ;;  %v6576_v10 = vpack.c.bf16 %v2797_v5, %v2789_v40  ;;  %v2805_v9 = vld [vmem:[%s8681_s20 + $0x1220] sm:$0xff]  ;;  %v2832_v25 = vld [vmem:[%s8681_s20 + $0x12f8] sm:$0xff] }
 0x2c7   : > { %6541 = vmatpush1.bf16.msra.mxu1 %v6540_v3  ;;  %6479 = vmatprep.subr.bf16.mxu0 %v6478_v30  ;;  %v2750_v3 = vld [vmem:[%s8681_s20 + $0x1068] sm:$0xff]  ;;  %v2744_v30 = vld [vmem:[%s8681_s20 + $0x1038] sm:$0xff]  ;;  %v2853_v2 = vld [vmem:[%s8681_s20 + $0x13a0] sm:$0xff] }
 0x2c8   : > { %6543 = vmatprep.subr.bf16.mxu1 %v6542_v48  ;;  %v6562_v48 = vpack.c.bf16 %v2750_v3, %v2742_v23  ;;  %v6626_v16 = vpack.c.bf16 %v2752_v36, %v2744_v30  ;;  %v2813_v23 = vld [vmem:[%s8681_s20 + $0x1260] sm:$0xff]  ;;  %v2807_v3 = vld [vmem:[%s8681_s20 + $0x1230] sm:$0xff]  ;;  %v2848_v32 = vld [vmem:[%s8681_s20 + $0x1378] sm:$0xff] }
 0x2c9   : > { %v2815_v36 = vld [vmem:[%s8681_s20 + $0x1270] sm:$0xff]  ;;  %v6580_v13 = vpack.c.bf16 %v2813_v23, %v2805_v9  ;;  %v2870_v5 = vld [vmem:[%s8681_s20 + $0x1428] sm:$0xff] }
 0x2ca   : > { %6481 = vmatpush1.bf16.msra.mxu0 %v6480_v60  ;;  %v2758_v60 = vld [vmem:[%s8681_s20 + $0x10a8] sm:$0xff]  ;;  %v2863_v40 = vld [vmem:[%s8681_s20 + $0x13f0] sm:$0xff] }
 0x2cb   : > { %6545 = vmatpush1.bf16.msra.mxu1 %v6544_v34  ;;  %6483 = vmatprep.subr.bf16.mxu0 %v6482_v53  ;;  %v2766_v34 = vld [vmem:[%s8681_s20 + $0x10e8] sm:$0xff]  ;;  %v2760_v53 = vld [vmem:[%s8681_s20 + $0x10b8] sm:$0xff]  ;;  %v2879_v9 = vld [vmem:[%s8681_s20 + $0x1470] sm:$0xff] }
 0x2cc   : > { %6547 = vmatprep.subr.bf16.mxu1 %v6546_v24  ;;  %v6628_v24 = vpack.c.bf16 %v2751_v35, %v2743_v49  ;;  %v6566_v57 = vpack.c.bf16 %v2766_v34, %v2758_v60  ;;  %v6630_v62 = vpack.c.bf16 %v2768_v27, %v2760_v53  ;;  %v6644_v49 = vpack.c.bf16 %v2815_v36, %v2807_v3  ;;  %v2821_v35 = vld [vmem:[%s8681_s20 + $0x12a0] sm:$0xff]  ;;  %v2823_v34 = vld [vmem:[%s8681_s20 + $0x12b0] sm:$0xff]  ;;  %v2886_v23 = vld [vmem:[%s8681_s20 + $0x14a8] sm:$0xff] }
 0x2cd   : > { %v2829_v60 = vld [vmem:[%s8681_s20 + $0x12e0] sm:$0xff]  ;;  %v2831_v27 = vld [vmem:[%s8681_s20 + $0x12f0] sm:$0xff]  ;;  %v2894_v3 = vld [vmem:[%s8681_s20 + $0x14e8] sm:$0xff] }
 0x2ce   : > { %6485 = vmatpush1.bf16.msra.mxu0 %v6484_v47  ;;  %v2767_v47 = vld [vmem:[%s8681_s20 + $0x10f0] sm:$0xff]  ;;  %v6584_v56 = vpack.c.bf16 %v2829_v60, %v2821_v35  ;;  %v2896_v36 = vld [vmem:[%s8681_s20 + $0x14f8] sm:$0xff]  ;;  %v2902_v60 = vld [vmem:[%s8681_s20 + $0x1528] sm:$0xff] }
 0x2cf   : > { %6549 = vmatpush1.bf16.msra.mxu1 %v6548_v28  ;;  %6487 = vmatprep.subr.bf16.mxu0 %v6486_v31  ;;  %v2774_v28 = vld [vmem:[%s8681_s20 + $0x1128] sm:$0xff]  ;;  %v2895_v35 = vld [vmem:[%s8681_s20 + $0x14f0] sm:$0xff] }
 0x2d0   : > { %6551 = vmatprep.subr.bf16.mxu1 %v6550_v41  ;;  %v2782_v31 = vld [vmem:[%s8681_s20 + $0x1168] sm:$0xff]  ;;  %v6632_v41 = vpack.c.bf16 %v2767_v47, %v2759_v44  ;;  %v6648_v44 = vpack.c.bf16 %v2831_v27, %v2823_v34  ;;  %v2837_v47 = vld [vmem:[%s8681_s20 + $0x1320] sm:$0xff]  ;;  %v2912_v27 = vld [vmem:[%s8681_s20 + $0x1578] sm:$0xff] }
 0x2d1   : > { %v6570_v6 = vpack.c.bf16 %v2782_v31, %v2774_v28  ;;  %v2845_v28 = vld [vmem:[%s8681_s20 + $0x1360] sm:$0xff]  ;;  %v2839_v31 = vld [vmem:[%s8681_s20 + $0x1330] sm:$0xff]  ;;  %v2910_v34 = vld [vmem:[%s8681_s20 + $0x1568] sm:$0xff] }
 0x2d2   : > { %6489 = vmatpush1.bf16.msra.mxu0 %v6488_v19  ;;  %v2783_v19 = vld [vmem:[%s8681_s20 + $0x1170] sm:$0xff] }
 0x2d3   : > { %6553 = vmatpush1.bf16.msra.mxu1 %v6552_v17  ;;  %6491 = vmatprep.subr.bf16.mxu0 %v6490_v1  ;;  %v2790_v17 = vld [vmem:[%s8681_s20 + $0x11a8] sm:$0xff] }
 0x2d4   : > { %6555 = vmatprep.subr.bf16.mxu1 %v6554_v8  ;;  %v2798_v1 = vld [vmem:[%s8681_s20 + $0x11e8] sm:$0xff]  ;;  %v6636_v8 = vpack.c.bf16 %v2783_v19, %v2775_v43  ;;  %v2856_v43 = vld [vmem:[%s8681_s20 + $0x13b8] sm:$0xff] }
 0x2d5   : > { %v6574_v54 = vpack.c.bf16 %v2798_v1, %v2790_v17  ;;  %v6588_v17 = vpack.c.bf16 %v2845_v28, %v2837_v47  ;;  %v2911_v47 = vld [vmem:[%s8681_s20 + $0x1570] sm:$0xff]  ;;  %v2918_v28 = vld [vmem:[%s8681_s20 + $0x15a8] sm:$0xff] }
 0x2d6   : > { %6493 = vmatpush1.bf16.msra.mxu0 %v6492_v45  ;;  %v2799_v45 = vld [vmem:[%s8681_s20 + $0x11f0] sm:$0xff] }
 0x2d7   : > { %6557 = vmatpush1.bf16.msra.mxu1 %v6556_v33  ;;  %6495 = vmatprep.subr.bf16.mxu0 %v6494_v37  ;;  %v2806_v33 = vld [vmem:[%s8681_s20 + $0x1228] sm:$0xff]  ;;  %v2808_v37 = vld [vmem:[%s8681_s20 + $0x1238] sm:$0xff]  ;;  %v6640_v42 = vpack.c.bf16 %v2799_v45, %v2791_v4 }
 0x2d8   : > { %6559 = vmatprep.subr.bf16.mxu1 %v6558_v50  ;;  %v6642_v30 = vpack.c.bf16 %v2816_v26, %v2808_v37  ;;  %v2878_v4 = vld [vmem:[%s8681_s20 + $0x1468] sm:$0xff]  ;;  %v2880_v45 = vld [vmem:[%s8681_s20 + $0x1478] sm:$0xff]  ;;  %v2869_v26 = vld [vmem:[%s8681_s20 + $0x1420] sm:$0xff] }
 0x2d9   : > { %v6594_v37 = vpack.c.bf16 %v2878_v4, %v2870_v5 }
 0x2da   : > { %6497 = vmatpush1.bf16.msra.mxu0 %v6496_v63  ;;  %v2822_v63 = vld [vmem:[%s8681_s20 + $0x12a8] sm:$0xff] }
 0x2db   : > { %6561 = vmatpush1.bf16.msra.mxu1 %v6560_v52  ;;  %6563 = vmatprep.subr.bf16.mxu0 %v6562_v48  ;;  %v2830_v52 = vld [vmem:[%s8681_s20 + $0x12e8] sm:$0xff]  ;;  %v2824_v48 = vld [vmem:[%s8681_s20 + $0x12b8] sm:$0xff] }
 0x2dc   : > { %6627 = vmatprep.subr.bf16.mxu1 %v6626_v16  ;;  %v6582_v16 = vpack.c.bf16 %v2830_v52, %v2822_v63  ;;  %v6646_v53 = vpack.c.bf16 %v2832_v25, %v2824_v48  ;;  %v6598_v48 = vpack.c.bf16 %v2894_v3, %v2886_v23  ;;  %v2885_v25 = vld [vmem:[%s8681_s20 + $0x14a0] sm:$0xff] }
 0x2dd   : > { %3060 = vmatmul.mubr.f32.vlgmr.msra.gmra.mrb[16].mxu0 %v11014_v12 }
 0x2de   : > { %3131 = vmatmul.mubr.f32.vlgmr.msra.gmra.mrb[16].mxu1 %v11014_v12  ;;  %6565 = vmatpush1.bf16.msra.mxu0 %v6564_v51  ;;  %v2838_v51 = vld [vmem:[%s8681_s20 + $0x1328] sm:$0xff] }
 0x2df   : > { %6629 = vmatpush1.bf16.msra.mxu1 %v6628_v24  ;;  %6567 = vmatprep.subr.bf16.mxu0 %v6566_v57  ;;  %v2846_v24 = vld [vmem:[%s8681_s20 + $0x1368] sm:$0xff]  ;;  %v2840_v57 = vld [vmem:[%s8681_s20 + $0x1338] sm:$0xff] }
 0x2e0   : > { %6631 = vmatprep.subr.bf16.mxu1 %v6630_v62  ;;  %3201 = vmatprep.mubr.f32.mxu0 %v10875_v58  ;;  %v6586_v62 = vpack.c.bf16 %v2846_v24, %v2838_v51  ;;  %v6650_v29 = vpack.c.bf16 %v2848_v32, %v2840_v57  ;;  %v6602_v57 = vpack.c.bf16 %v2910_v34, %v2902_v60  ;;  %v2901_v32 = vld [vmem:[%s8681_s20 + $0x1520] sm:$0xff] }
 0x2e1   : > { %3272 = vmatprep.mubr.f32.mxu1 %v10875_v58  ;;  %v2814_v58 = vld [vmem:[%s8681_s20 + $0x1268] sm:$0xff] }
 0x2e2   : > { %6569 = vmatpush1.bf16.msra.mxu0 %v6568_v55  ;;  %v6578_v50 = vpack.c.bf16 %v2814_v58, %v2806_v33  ;;  %v2847_v55 = vld [vmem:[%s8681_s20 + $0x1370] sm:$0xff] }
 0x2e3   : > { %6633 = vmatpush1.bf16.msra.mxu1 %v6632_v41  ;;  %6571 = vmatprep.subr.bf16.mxu0 %v6570_v6  ;;  %v2854_v41 = vld [vmem:[%s8681_s20 + $0x13a8] sm:$0xff]  ;;  %v6652_v1 = vpack.c.bf16 %v2847_v55, %v2839_v31  ;;  %v2928_v55 = vld [vmem:[%s8681_s20 + $0x15f8] sm:$0xff] }
 0x2e4   : > { %6635 = vmatprep.subr.bf16.mxu1 %v6634_v7  ;;  %v2862_v6 = vld [vmem:[%s8681_s20 + $0x13e8] sm:$0xff]  ;;  %v2864_v7 = vld [vmem:[%s8681_s20 + $0x13f8] sm:$0xff] }
 0x2e5   : > { %v6590_v14 = vpack.c.bf16 %v2862_v6, %v2854_v41  ;;  %v2926_v31 = vld [vmem:[%s8681_s20 + $0x15e8] sm:$0xff] }
 0x2e6   : > { %6573 = vmatpush1.bf16.msra.mxu0 %v6572_v21  ;;  %v2861_v21 = vld [vmem:[%s8681_s20 + $0x13e0] sm:$0xff] }
 0x2e7   : > { %6637 = vmatpush1.bf16.msra.mxu1 %v6636_v8  ;;  %6575 = vmatprep.subr.bf16.mxu0 %v6574_v54  ;;  %v2855_v8 = vld [vmem:[%s8681_s20 + $0x13b0] sm:$0xff]  ;;  %v6654_v54 = vpack.c.bf16 %v2864_v7, %v2856_v43  ;;  %v6592_v33 = vpack.c.bf16 %v2861_v21, %v2853_v2  ;;  %v6606_v43 = vpack.c.bf16 %v2926_v31, %v2918_v28  ;;  %v2917_v7 = vld [vmem:[%s8681_s20 + $0x15a0] sm:$0xff]  ;;  %v2934_v21 = vld [vmem:[%s8681_s20 + $0x1628] sm:$0xff] }
 0x2e8   : > { %6639 = vmatprep.subr.bf16.mxu1 %v6638_v22  ;;  %v2872_v22 = vld [vmem:[%s8681_s20 + $0x1438] sm:$0xff]  ;;  %v6656_v58 = vpack.c.bf16 %v2863_v40, %v2855_v8  ;;  %v2927_v2 = vld [vmem:[%s8681_s20 + $0x15f0] sm:$0xff]  ;;  %v2942_v8 = vld [vmem:[%s8681_s20 + $0x1668] sm:$0xff] }
 0x2e9   : > { %v2944_v40 = vld [vmem:[%s8681_s20 + $0x1678] sm:$0xff]  ;;  %v2981_v31 = vld [vmem:[%s8681_s20 + $0x17a0] sm:$0xff] }
 0x2ea   : > { %6577 = vmatpush1.bf16.msra.mxu0 %v6576_v10  ;;  %v2877_v10 = vld [vmem:[%s8681_s20 + $0x1460] sm:$0xff] }
 0x2eb   : > { %6641 = vmatpush1.bf16.msra.mxu1 %v6640_v42  ;;  %6579 = vmatprep.subr.bf16.mxu0 %v6578_v50  ;;  %v2871_v42 = vld [vmem:[%s8681_s20 + $0x1430] sm:$0xff]  ;;  %v6658_v50 = vpack.c.bf16 %v2880_v45, %v2872_v22  ;;  %v6596_v63 = vpack.c.bf16 %v2877_v10, %v2869_v26  ;;  %v6610_v22 = vpack.c.bf16 %v2942_v8, %v2934_v21  ;;  %v2933_v45 = vld [vmem:[%s8681_s20 + $0x1620] sm:$0xff]  ;;  %v2950_v10 = vld [vmem:[%s8681_s20 + $0x16a8] sm:$0xff] }
 0x2ec   : > { %6643 = vmatprep.subr.bf16.mxu1 %v6642_v30  ;;  %v2888_v30 = vld [vmem:[%s8681_s20 + $0x14b8] sm:$0xff]  ;;  %v6660_v52 = vpack.c.bf16 %v2879_v9, %v2871_v42  ;;  %v2943_v26 = vld [vmem:[%s8681_s20 + $0x1670] sm:$0xff]  ;;  %v2958_v42 = vld [vmem:[%s8681_s20 + $0x16e8] sm:$0xff] }
 0x2ed   : > { %v2960_v9 = vld [vmem:[%s8681_s20 + $0x16f8] sm:$0xff] }
 0x2ee   : > { %6581 = vmatpush1.bf16.msra.mxu0 %v6580_v13  ;;  %v2893_v13 = vld [vmem:[%s8681_s20 + $0x14e0] sm:$0xff]  ;;  %v7803_v21 = vld [vmem:[%s8681_s20 + $0x1018] sm:$0xff] }
 0x2ef   : > { %6645 = vmatpush1.bf16.msra.mxu1 %v6644_v49  ;;  %6583 = vmatprep.subr.bf16.mxu0 %v6582_v16  ;;  %v11063_v59 = vpop.f32.mrb[10].mxu0  ;;  %v2887_v49 = vld [vmem:[%s8681_s20 + $0x14b0] sm:$0xff]  ;;  %v6662_v16 = vpack.c.bf16 %v2896_v36, %v2888_v30  ;;  %v6600_v51 = vpack.c.bf16 %v2893_v13, %v2885_v25  ;;  %v6614_v30 = vpack.c.bf16 %v2958_v42, %v2950_v10  ;;  %v2949_v36 = vld [vmem:[%s8681_s20 + $0x16a0] sm:$0xff]  ;;  %v2966_v13 = vld [vmem:[%s8681_s20 + $0x1728] sm:$0xff]  ;;  %v3282_v8 = vand.u32 2147483647, %v7803_v21 }
 0x2f0   : > { %6647 = vmatprep.subr.bf16.mxu1 %v6646_v53  ;;  %v11068_v46 = vpop.f32.mrb[10].mxu1  ;;  %v11070_v0 = vpop.f32.mrb[11].mxu0  ;;  %v2904_v53 = vld [vmem:[%s8681_s20 + $0x1538] sm:$0xff]  ;;  %v6664_v24 = vpack.c.bf16 %v2895_v35, %v2887_v49  ;;  %v2959_v25 = vld [vmem:[%s8681_s20 + $0x16f0] sm:$0xff]  ;;  %v2974_v49 = vld [vmem:[%s8681_s20 + $0x1768] sm:$0xff] }
 0x2f1   : > { %v11074_v19 = vpop.f32.mrb[11].mxu1  ;;  %v2976_v35 = vld [vmem:[%s8681_s20 + $0x1778] sm:$0xff]  ;;  %v7808_v42 = vld [vmem:[%s8681_s20 + $0x1050] sm:$0xff] }
 0x2f2   : > { %6585 = vmatpush1.bf16.msra.mxu0 %v6584_v56  ;;  %v2909_v56 = vld [vmem:[%s8681_s20 + $0x1560] sm:$0xff] }
 0x2f3   : > { %6649 = vmatpush1.bf16.msra.mxu1 %v6648_v44  ;;  %6587 = vmatprep.subr.bf16.mxu0 %v6586_v62  ;;  %v2903_v44 = vld [vmem:[%s8681_s20 + $0x1530] sm:$0xff]  ;;  %v6666_v62 = vpack.c.bf16 %v2912_v27, %v2904_v53  ;;  %v6604_v41 = vpack.c.bf16 %v2909_v56, %v2901_v32  ;;  %v6618_v53 = vpack.c.bf16 %v2974_v49, %v2966_v13  ;;  %v2965_v27 = vld [vmem:[%s8681_s20 + $0x1720] sm:$0xff]  ;;  %v2982_v56 = vld [vmem:[%s8681_s20 + $0x17a8] sm:$0xff] }
 0x2f4   : > { %6651 = vmatprep.subr.bf16.mxu1 %v6650_v29  ;;  %v2920_v29 = vld [vmem:[%s8681_s20 + $0x15b8] sm:$0xff]  ;;  %v6668_v6 = vpack.c.bf16 %v2911_v47, %v2903_v44  ;;  %v2975_v32 = vld [vmem:[%s8681_s20 + $0x1770] sm:$0xff]  ;;  %v2990_v44 = vld [vmem:[%s8681_s20 + $0x17e8] sm:$0xff] }
 0x2f5   : > { %v2992_v47 = vld [vmem:[%s8681_s20 + $0x17f8] sm:$0xff]  ;;  %v7813_v13 = vld [vmem:[%s8681_s20 + $0x1080] sm:$0xff] }
 0x2f6   : > { %6589 = vmatpush1.bf16.msra.mxu0 %v6588_v17  ;;  %v2925_v17 = vld [vmem:[%s8681_s20 + $0x15e0] sm:$0xff]  ;;  %v3295_v49 = vand.u32 2147483647, %v7813_v13 }
 0x2f7   : > { %6653 = vmatpush1.bf16.msra.mxu1 %v6652_v1  ;;  %6591 = vmatprep.subr.bf16.mxu0 %v6590_v14  ;;  %v2919_v1 = vld [vmem:[%s8681_s20 + $0x15b0] sm:$0xff]  ;;  %v6670_v14 = vpack.c.bf16 %v2928_v55, %v2920_v29  ;;  %v6608_v5 = vpack.c.bf16 %v2925_v17, %v2917_v7  ;;  %v2989_v29 = vld [vmem:[%s8681_s20 + $0x17e0] sm:$0xff]  ;;  %v7801_v7 = vld [vmem:[%s8681_s20 + $0x1008] sm:$0xff] }
 0x2f8   : > { %6655 = vmatprep.subr.bf16.mxu1 %v6654_v54  ;;  %v2936_v54 = vld [vmem:[%s8681_s20 + $0x1638] sm:$0xff]  ;;  %v6672_v4 = vpack.c.bf16 %v2927_v2, %v2919_v1  ;;  %v3280_v17 = vand.u32 2147483647, %v7801_v7  ;;  %v7802_v1 = vld [vmem:[%s8681_s20 + $0x1048] sm:$0xff] }
 0x2fa   : > { %6593 = vmatpush1.bf16.msra.mxu0 %v6592_v33  ;;  %v2941_v33 = vld [vmem:[%s8681_s20 + $0x1660] sm:$0xff] }
 0x2fb   : > { %6657 = vmatpush1.bf16.msra.mxu1 %v6656_v58  ;;  %6595 = vmatprep.subr.bf16.mxu0 %v6594_v37  ;;  %v2935_v58 = vld [vmem:[%s8681_s20 + $0x1630] sm:$0xff]  ;;  %v6674_v37 = vpack.c.bf16 %v2944_v40, %v2936_v54  ;;  %v6612_v23 = vpack.c.bf16 %v2941_v33, %v2933_v45  ;;  %v7804_v54 = vld [vmem:[%s8681_s20 + $0x1058] sm:$0xff]  ;;  %v7806_v33 = vld [vmem:[%s8681_s20 + $0x1040] sm:$0xff] }
 0x2fc   : > { %6659 = vmatprep.subr.bf16.mxu1 %v6658_v50  ;;  %v2952_v50 = vld [vmem:[%s8681_s20 + $0x16b8] sm:$0xff]  ;;  %v6676_v3 = vpack.c.bf16 %v2943_v26, %v2935_v58  ;;  %v3290_v40 = vand.u32 2147483647, %v7804_v54  ;;  %v3287_v58 = vand.u32 2147483647, %v7806_v33 }
 0x2fe   : > { %6597 = vmatpush1.bf16.msra.mxu0 %v6596_v63  ;;  %v2957_v63 = vld [vmem:[%s8681_s20 + $0x16e0] sm:$0xff] }
 0x2ff   : > { %6661 = vmatpush1.bf16.msra.mxu1 %v6660_v52  ;;  %6599 = vmatprep.subr.bf16.mxu0 %v6598_v48  ;;  %v2951_v52 = vld [vmem:[%s8681_s20 + $0x16b0] sm:$0xff]  ;;  %v6678_v48 = vpack.c.bf16 %v2960_v9, %v2952_v50  ;;  %v6616_v60 = vpack.c.bf16 %v2957_v63, %v2949_v36  ;;  %v3289_v50 = vand.u32 2147483647, %v7808_v42  ;;  %v7809_v9 = vld [vmem:[%s8681_s20 + $0x1088] sm:$0xff]  ;;  %v6754_v36 = vpack.c.bf16 %v3290_v40, %v3282_v8  ;;  %v7811_v63 = vld [vmem:[%s8681_s20 + $0x1098] sm:$0xff] }
 0x300   : > { %6663 = vmatprep.subr.bf16.mxu1 %v6662_v16  ;;  %v2968_v16 = vld [vmem:[%s8681_s20 + $0x1738] sm:$0xff]  ;;  %v6680_v34 = vpack.c.bf16 %v2959_v25, %v2951_v52  ;;  %v3298_v52 = vand.u32 2147483647, %v7811_v63  ;;  %v7824_v8 = vld [vmem:[%s8681_s20 + $0x1150] sm:$0xff]  ;;  %v7825_v40 = vld [vmem:[%s8681_s20 + $0x1188] sm:$0xff] }
 0x301   : > { %v3321_v54 = vand.u32 2147483647, %v7824_v8  ;;  %v7847_v8 = vld [vmem:[%s8681_s20 + $0x12c0] sm:$0xff] }
 0x302   : > { %6601 = vmatpush1.bf16.msra.mxu0 %v6600_v51  ;;  %v2973_v51 = vld [vmem:[%s8681_s20 + $0x1760] sm:$0xff] }
 0x303   : > { %6665 = vmatpush1.bf16.msra.mxu1 %v6664_v24  ;;  %6603 = vmatprep.subr.bf16.mxu0 %v6602_v57  ;;  %v2967_v24 = vld [vmem:[%s8681_s20 + $0x1730] sm:$0xff]  ;;  %v6682_v57 = vpack.c.bf16 %v2976_v35, %v2968_v16  ;;  %v6620_v28 = vpack.c.bf16 %v2973_v51, %v2965_v27  ;;  %v7814_v16 = vld [vmem:[%s8681_s20 + $0x10c0] sm:$0xff] }
 0x304   : > { %6667 = vmatprep.subr.bf16.mxu1 %v6666_v62  ;;  %v2984_v62 = vld [vmem:[%s8681_s20 + $0x17b8] sm:$0xff]  ;;  %v6684_v55 = vpack.c.bf16 %v2975_v32, %v2967_v24  ;;  %v3303_v35 = vand.u32 2147483647, %v7814_v16  ;;  %v7816_v27 = vld [vmem:[%s8681_s20 + $0x10d0] sm:$0xff]  ;;  %v7817_v32 = vld [vmem:[%s8681_s20 + $0x1108] sm:$0xff] }
 0x305   : > { %v6686_v2 = vpack.c.bf16 %v2992_v47, %v2984_v62  ;;  %v3305_v51 = vand.u32 2147483647, %v7816_v27 }
 0x306   : > { %6605 = vmatpush1.bf16.msra.mxu0 %v6604_v41  ;;  %v6622_v41 = vpack.c.bf16 %v2990_v44, %v2982_v56  ;;  %v3312_v56 = vand.u32 2147483647, %v7817_v32  ;;  %v7818_v44 = vld [vmem:[%s8681_s20 + $0x1148] sm:$0xff]  ;;  %v7839_v32 = vld [vmem:[%s8681_s20 + $0x1240] sm:$0xff] }
 0x307   : > { %6669 = vmatpush1.bf16.msra.mxu1 %v6668_v6  ;;  %6607 = vmatprep.subr.bf16.mxu0 %v6606_v43  ;;  %v2983_v6 = vld [vmem:[%s8681_s20 + $0x17b0] sm:$0xff]  ;;  %v3320_v62 = vand.u32 2147483647, %v7818_v44 }
 0x308   : > { %6671 = vmatprep.subr.bf16.mxu1 %v6670_v14  ;;  %v2991_v43 = vld [vmem:[%s8681_s20 + $0x17f0] sm:$0xff]  ;;  %v3288_v14 = vand.u32 2147483647, %v7802_v1 }
 0x309   : > { %v6698_v21 = vpack.c.bf16 %v3320_v62, %v3312_v56  ;;  %v3351_v56 = vand.u32 2147483647, %v7839_v32  ;;  %v7840_v44 = vld [vmem:[%s8681_s20 + $0x1210] sm:$0xff] }
 0x30a   : > { %6609 = vmatpush1.bf16.msra.mxu0 %v6608_v5  ;;  %v6624_v5 = vpack.c.bf16 %v2989_v29, %v2981_v31  ;;  %v6690_v10 = vpack.c.bf16 %v3288_v14, %v3280_v17  ;;  %v7820_v29 = vld [vmem:[%s8681_s20 + $0x1158] sm:$0xff]  ;;  %v7822_v17 = vld [vmem:[%s8681_s20 + $0x1140] sm:$0xff]  ;;  %v7823_v14 = vld [vmem:[%s8681_s20 + $0x1110] sm:$0xff]  ;;  %v3345_v62 = vand.u32 2147483647, %v7840_v44 }
 0x30b   : > { %6673 = vmatpush1.bf16.msra.mxu1 %v6672_v4  ;;  %6611 = vmatprep.subr.bf16.mxu0 %v6610_v22  ;;  %v6688_v4 = vpack.c.bf16 %v2991_v43, %v2983_v6  ;;  %v7805_v22 = vld [vmem:[%s8681_s20 + $0x1000] sm:$0xff]  ;;  %v3319_v1 = vand.u32 2147483647, %v7822_v17 }
 0x30c   : > { %6675 = vmatprep.subr.bf16.mxu1 %v6674_v37  ;;  %v3279_v45 = vand.u32 2147483647, %v7805_v22  ;;  %v7807_v37 = vld [vmem:[%s8681_s20 + $0x1010] sm:$0xff]  ;;  %v7821_v43 = vld [vmem:[%s8681_s20 + $0x1100] sm:$0xff] }
 0x30d   : > { %v3281_v26 = vand.u32 2147483647, %v7807_v37  ;;  %v3311_v7 = vand.u32 2147483647, %v7821_v43  ;;  %v7844_v43 = vld [vmem:[%s8681_s20 + $0x1298] sm:$0xff] }
 0x30e   : > { %6613 = vmatpush1.bf16.msra.mxu0 %v6612_v23  ;;  %v3296_v23 = vand.u32 2147483647, %v7809_v9 }
 0x30f   : > { %6677 = vmatpush1.bf16.msra.mxu1 %v6676_v3  ;;  %6615 = vmatprep.subr.bf16.mxu0 %v6614_v30  ;;  %v7810_v3 = vld [vmem:[%s8681_s20 + $0x10c8] sm:$0xff]  ;;  %v6756_v24 = vpack.c.bf16 %v3289_v50, %v3281_v26  ;;  %v7831_v50 = vld [vmem:[%s8681_s20 + $0x11c0] sm:$0xff] }
 0x310   : > { %6679 = vmatprep.subr.bf16.mxu1 %v6678_v48  ;;  %v3304_v30 = vand.u32 2147483647, %v7810_v3  ;;  %v7812_v48 = vld [vmem:[%s8681_s20 + $0x10d8] sm:$0xff]  ;;  %v11174_v26 = vld [vmem:[#allocation2 + $0x28] sm:$0xff]  ;;  %v3335_v9 = vand.u32 2147483647, %v7831_v50 }
 0x311   : > { %v3306_v25 = vand.u32 2147483647, %v7812_v48  ;;  %v7832_v3 = vld [vmem:[%s8681_s20 + $0x1190] sm:$0xff] }
 0x312   : > { %6617 = vmatpush1.bf16.msra.mxu0 %v6616_v60  ;;  %v6692_v60 = vpack.c.bf16 %v3287_v58, %v3279_v45  ;;  %v7827_v45 = vld [vmem:[%s8681_s20 + $0x1198] sm:$0xff] }
 0x313   : > { %6681 = vmatpush1.bf16.msra.mxu1 %v6680_v34  ;;  %6619 = vmatprep.subr.bf16.mxu0 %v6618_v53  ;;  %v7815_v34 = vld [vmem:[%s8681_s20 + $0x1090] sm:$0xff]  ;;  %v6758_v47 = vpack.c.bf16 %v3306_v25, %v3298_v52  ;;  %v3330_v33 = vand.u32 2147483647, %v7827_v45  ;;  %v7828_v58 = vld [vmem:[%s8681_s20 + $0x11d8] sm:$0xff]  ;;  %v7834_v25 = vld [vmem:[%s8681_s20 + $0x1208] sm:$0xff] }
 0x314   : > { %6683 = vmatprep.subr.bf16.mxu1 %v6682_v57  ;;  %v3297_v53 = vand.u32 2147483647, %v7815_v34  ;;  %v6694_v57 = vpack.c.bf16 %v3304_v30, %v3296_v23  ;;  %v3338_v37 = vand.u32 2147483647, %v7828_v58  ;;  %v6700_v23 = vpack.c.bf16 %v3319_v1, %v3311_v7  ;;  %v7845_v1 = vld [vmem:[%s8681_s20 + $0x12d8] sm:$0xff]  ;;  %v7850_v45 = vld [vmem:[%s8681_s20 + $0x1308] sm:$0xff] }
 0x315   : > { %v3329_v30 = vand.u32 2147483647, %v7832_v3  ;;  %v3344_v13 = vand.u32 2147483647, %v7834_v25  ;;  %v3362_v7 = vand.u32 2147483647, %v7844_v43 }
 0x316   : > { %6621 = vmatpush1.bf16.msra.mxu0 %v6620_v28  ;;  %v7819_v28 = vld [vmem:[%s8681_s20 + $0x1118] sm:$0xff]  ;;  %v6760_v6 = vpack.c.bf16 %v3305_v51, %v3297_v53  ;;  %v7838_v51 = vld [vmem:[%s8681_s20 + $0x1200] sm:$0xff] }
 0x317   : > { %6685 = vmatpush1.bf16.msra.mxu1 %v6684_v55  ;;  %6623 = vmatprep.subr.bf16.mxu0 %v6622_v41  ;;  %v3314_v31 = vand.u32 2147483647, %v7819_v28  ;;  %v3322_v55 = vand.u32 2147483647, %v7820_v29  ;;  %v6696_v41 = vpack.c.bf16 %v3303_v35, %v3295_v49  ;;  %v7835_v49 = vld [vmem:[%s8681_s20 + $0x1248] sm:$0xff]  ;;  %v6766_v35 = vpack.c.bf16 %v3338_v37, %v3330_v33  ;;  %v7837_v53 = vld [vmem:[%s8681_s20 + $0x1258] sm:$0xff] }
 0x318   : > { %6687 = vmatprep.subr.bf16.mxu1 %v6686_v2  ;;  %v3313_v2 = vand.u32 2147483647, %v7823_v14  ;;  %v3352_v16 = vand.u32 2147483647, %v7835_v49  ;;  %v3354_v27 = vand.u32 2147483647, %v7837_v53 }
 0x319   : > { %v6762_v22 = vpack.c.bf16 %v3322_v55, %v3314_v31  ;;  %v7842_v29 = vld [vmem:[%s8681_s20 + $0x1288] sm:$0xff]  ;;  %v3370_v14 = vand.u32 2147483647, %v7845_v1  ;;  %v3376_v33 = vand.u32 2147483647, %v7850_v45  ;;  %v7857_v49 = vld [vmem:[%s8681_s20 + $0x1350] sm:$0xff] }
 0x31a   : > { %6625 = vmatpush1.bf16.msra.mxu0 %v6624_v5  ;;  %v7826_v5 = vld [vmem:[%s8681_s20 + $0x11c8] sm:$0xff]  ;;  %v6764_v52 = vpack.c.bf16 %v3321_v54, %v3313_v2  ;;  %v3360_v55 = vand.u32 2147483647, %v7842_v29  ;;  %v6706_v17 = vpack.c.bf16 %v3352_v16, %v3344_v13  ;;  %v7846_v2 = vld [vmem:[%s8681_s20 + $0x1280] sm:$0xff]  ;;  %v3367_v54 = vand.u32 2147483647, %v7847_v8 }
 0x31b   : > { %6689 = vmatpush1.bf16.msra.mxu1 %v6688_v4  ;;  %6691 = vmatprep.subr.bf16.mxu0 %v6690_v10  ;;  %v3336_v4 = vand.u32 2147483647, %v7826_v5  ;;  %v7830_v10 = vld [vmem:[%s8681_s20 + $0x1180] sm:$0xff]  ;;  %v7851_v37 = vld [vmem:[%s8681_s20 + $0x1348] sm:$0xff]  ;;  %v3385_v16 = vand.u32 2147483647, %v7857_v49 }
 0x31c   : > { %6755 = vmatprep.subr.bf16.mxu1 %v6754_v36  ;;  %v3327_v42 = vand.u32 2147483647, %v7830_v10  ;;  %v7833_v36 = vld [vmem:[%s8681_s20 + $0x11d0] sm:$0xff]  ;;  %v3384_v10 = vand.u32 2147483647, %v7851_v37 }
 0x31d   : > { %3202 = vmatmul.mubr.f32.vlgmr.msra.gmra.mrb[18].mxu0 %v11014_v12  ;;  %v3337_v63 = vand.u32 2147483647, %v7833_v36  ;;  %v3401_v29 = vand.u32 2147483647, %v10934_v61  ;;  %v7866_v61 = vld [vmem:[%s8681_s20 + $0x1418] sm:$0xff] }
 0x31e   : > { %3273 = vmatmul.mubr.f32.vlgmr.msra.gmra.mrb[18].mxu1 %v11014_v12  ;;  %6693 = vmatpush1.bf16.msra.mxu0 %v6692_v60  ;;  %v3328_v12 = vand.u32 2147483647, %v7825_v40  ;;  %v7836_v60 = vld [vmem:[%s8681_s20 + $0x1218] sm:$0xff] }
 0x31f   : > { %6757 = vmatpush1.bf16.msra.mxu1 %v6756_v24  ;;  %6695 = vmatprep.subr.bf16.mxu0 %v6694_v57  ;;  %v3346_v34 = vand.u32 2147483647, %v7836_v60  ;;  %v3343_v24 = vand.u32 2147483647, %v7838_v51  ;;  %v6704_v57 = vpack.c.bf16 %v3335_v9, %v3327_v42  ;;  %v6768_v31 = vpack.c.bf16 %v3337_v63, %v3329_v30  ;;  %v7852_v42 = vld [vmem:[%s8681_s20 + $0x1318] sm:$0xff]  ;;  %v7854_v30 = vld [vmem:[%s8681_s20 + $0x1300] sm:$0xff] }
 0x320   : > { %6759 = vmatprep.subr.bf16.mxu1 %v6758_v47  ;;  %3599 = vmatprep.mubr.f32.mxu0 %v11174_v26  ;;  %v6702_v48 = vpack.c.bf16 %v3336_v4, %v3328_v12  ;;  %v7841_v47 = vld [vmem:[%s8681_s20 + $0x1250] sm:$0xff]  ;;  %v3378_v50 = vand.u32 2147483647, %v7852_v42  ;;  %v7853_v9 = vld [vmem:[%s8681_s20 + $0x1358] sm:$0xff]  ;;  %v3375_v36 = vand.u32 2147483647, %v7854_v30 }
 0x321   : > { %3670 = vmatprep.mubr.f32.mxu1 %v11174_v26  ;;  %v3353_v28 = vand.u32 2147483647, %v7841_v47  ;;  %v6770_v40 = vpack.c.bf16 %v3354_v27, %v3346_v34  ;;  %v7848_v12 = vld [vmem:[%s8681_s20 + $0x1290] sm:$0xff]  ;;  %v6708_v58 = vpack.c.bf16 %v3351_v56, %v3343_v24  ;;  %v7855_v63 = vld [vmem:[%s8681_s20 + $0x1340] sm:$0xff]  ;;  %v7859_v34 = vld [vmem:[%s8681_s20 + $0x13c8] sm:$0xff]  ;;  %v6774_v27 = vpack.c.bf16 %v3370_v14, %v3362_v7 }
 0x322   : > { %6697 = vmatpush1.bf16.msra.mxu0 %v6696_v41  ;;  %v7843_v41 = vld [vmem:[%s8681_s20 + $0x12c8] sm:$0xff]  ;;  %v3361_v5 = vand.u32 2147483647, %v7848_v12  ;;  %v7849_v4 = vld [vmem:[%s8681_s20 + $0x12d0] sm:$0xff]  ;;  %v3400_v53 = vand.u32 2147483647, %v7859_v34 }
 0x323   : > { %6761 = vmatpush1.bf16.msra.mxu1 %v6760_v6  ;;  %6699 = vmatprep.subr.bf16.mxu0 %v6698_v21  ;;  %v3368_v6 = vand.u32 2147483647, %v7843_v41  ;;  %v3359_v21 = vand.u32 2147483647, %v7846_v2  ;;  %v6772_v3 = vpack.c.bf16 %v3353_v28, %v3345_v62  ;;  %v7860_v51 = vld [vmem:[%s8681_s20 + $0x1398] sm:$0xff]  ;;  %v7862_v62 = vld [vmem:[%s8681_s20 + $0x13c0] sm:$0xff]  ;;  %v6714_v41 = vpack.c.bf16 %v3384_v10, %v3376_v33 }
 0x324   : > { %6763 = vmatprep.subr.bf16.mxu1 %v6762_v22  ;;  %v3369_v22 = vand.u32 2147483647, %v7849_v4  ;;  %v3394_v24 = vand.u32 2147483647, %v7860_v51  ;;  %v3391_v56 = vand.u32 2147483647, %v10929_v38 }
 0x325   : > { %v6710_v13 = vpack.c.bf16 %v3368_v6, %v3360_v55  ;;  %v6712_v44 = vpack.c.bf16 %v3367_v54, %v3359_v21  ;;  %v3399_v47 = vand.u32 2147483647, %v7862_v62  ;;  %v7863_v28 = vld [vmem:[%s8681_s20 + $0x1390] sm:$0xff]  ;;  %v7864_v6 = vld [vmem:[%s8681_s20 + $0x1408] sm:$0xff]  ;;  %v3410_v54 = vand.u32 2147483647, %v7866_v61 }
 0x326   : > { %6701 = vmatpush1.bf16.msra.mxu0 %v6700_v23  ;;  %v3386_v23 = vand.u32 2147483647, %v7853_v9  ;;  %v6776_v55 = vpack.c.bf16 %v3369_v22, %v3361_v5  ;;  %v3408_v43 = vand.u32 2147483647, %v7864_v6  ;;  %v7865_v7 = vld [vmem:[%s8681_s20 + $0x1448] sm:$0xff]  ;;  %v7871_v34 = vld [vmem:[%s8681_s20 + $0x1450] sm:$0xff] }
 0x327   : > { %6765 = vmatpush1.bf16.msra.mxu1 %v6764_v52  ;;  %6703 = vmatprep.subr.bf16.mxu0 %v6702_v48  ;;  %v3383_v52 = vand.u32 2147483647, %v7855_v63  ;;  %v7856_v48 = vld [vmem:[%s8681_s20 + $0x1310] sm:$0xff]  ;;  %v6720_v45 = vpack.c.bf16 %v3399_v47, %v3391_v56  ;;  %v7874_v47 = vld [vmem:[%s8681_s20 + $0x1498] sm:$0xff]  ;;  %v7876_v6 = vld [vmem:[%s8681_s20 + $0x1480] sm:$0xff] }
 0x328   : > { %6767 = vmatprep.subr.bf16.mxu1 %v6766_v35  ;;  %v3377_v25 = vand.u32 2147483647, %v7856_v48  ;;  %v7858_v35 = vld [vmem:[%s8681_s20 + $0x1388] sm:$0xff]  ;;  %v6778_v1 = vpack.c.bf16 %v3386_v23, %v3378_v50  ;;  %v7869_v23 = vld [vmem:[%s8681_s20 + $0x1440] sm:$0xff] }
 0x329   : > { %v3392_v60 = vand.u32 2147483647, %v7858_v35  ;;  %v6716_v38 = vpack.c.bf16 %v3383_v52, %v3375_v36  ;;  %v7870_v52 = vld [vmem:[%s8681_s20 + $0x1410] sm:$0xff] }
 0x32a   : > { %6705 = vmatpush1.bf16.msra.mxu0 %v6704_v57  ;;  %v7861_v57 = vld [vmem:[%s8681_s20 + $0x13d8] sm:$0xff]  ;;  %v6780_v14 = vpack.c.bf16 %v3385_v16, %v3377_v25  ;;  %v3409_v48 = vand.u32 2147483647, %v7870_v52  ;;  %v7887_v52 = vld [vmem:[%s8681_s20 + $0x1550] sm:$0xff] }
 0x32b   : > { %6769 = vmatpush1.bf16.msra.mxu1 %v6768_v31  ;;  %6707 = vmatprep.subr.bf16.mxu0 %v6706_v17  ;;  %v3402_v32 = vand.u32 2147483647, %v7861_v57  ;;  %v3393_v31 = vand.u32 2147483647, %v7863_v28  ;;  %v3416_v17 = vand.u32 2147483647, %v7865_v7  ;;  %v6718_v21 = vpack.c.bf16 %v3400_v53, %v3392_v60 }
 0x32c   : > { %6771 = vmatprep.subr.bf16.mxu1 %v6770_v40  ;;  %v7867_v40 = vld [vmem:[%s8681_s20 + $0x1458] sm:$0xff]  ;;  %v3417_v53 = vand.u32 2147483647, %v7871_v34  ;;  %v3426_v28 = vand.u32 2147483647, %v7874_v47  ;;  %v7877_v7 = vld [vmem:[%s8681_s20 + $0x14c0] sm:$0xff] }
 0x32d   : > { %v6782_v8 = vpack.c.bf16 %v3402_v32, %v3394_v24  ;;  %v3418_v12 = vand.u32 2147483647, %v7867_v40  ;;  %v6784_v33 = vpack.c.bf16 %v3401_v29, %v3393_v31  ;;  %v6722_v9 = vpack.c.bf16 %v3416_v17, %v3408_v43  ;;  %v7872_v24 = vld [vmem:[%s8681_s20 + $0x1488] sm:$0xff]  ;;  %v7875_v31 = vld [vmem:[%s8681_s20 + $0x14d8] sm:$0xff] }
 0x32e   : > { %6709 = vmatpush1.bf16.msra.mxu0 %v6708_v58  ;;  %v7868_v58 = vld [vmem:[%s8681_s20 + $0x1400] sm:$0xff]  ;;  %v3424_v57 = vand.u32 2147483647, %v7872_v24  ;;  %v3434_v29 = vand.u32 2147483647, %v7875_v31  ;;  %v7880_v40 = vld [vmem:[%s8681_s20 + $0x1508] sm:$0xff] }
 0x32f   : > { %6773 = vmatpush1.bf16.msra.mxu1 %v6772_v3  ;;  %6711 = vmatprep.subr.bf16.mxu0 %v6710_v13  ;;  %v2357_v2 = vpop.f32.mrb[12].mxu0  ;;  %v3407_v37 = vand.u32 2147483647, %v7868_v58  ;;  %v3415_v3 = vand.u32 2147483647, %v7869_v23  ;;  %v6786_v60 = vpack.c.bf16 %v3418_v12, %v3410_v54  ;;  %v7885_v23 = vld [vmem:[%s8681_s20 + $0x1540] sm:$0xff] }
 0x330   : > { %6775 = vmatprep.subr.bf16.mxu1 %v6774_v27  ;;  %v2584_v5 = vrot.slane %v2357_v2, 1  ;;  %v2428_v4 = vpop.f32.mrb[12].mxu1  ;;  %v2359_v22 = vpop.f32.mrb[13].mxu0  ;;  %v3423_v43 = vand.u32 2147483647, %v7876_v6  ;;  %v7891_v34 = vld [vmem:[%s8681_s20 + $0x15d8] sm:$0xff] }
 0x331   : > { %v2586_v10 = vrot.slane %v2428_v4, 1  ;;  %v2585_v42 = vrot.slane %v2359_v22, 1  ;;  %v2430_v50 = vpop.f32.mrb[13].mxu1  ;;  %v3431_v17 = vand.u32 2147483647, %v7877_v7  ;;  %v6790_v22 = vpack.c.bf16 %v3434_v29, %v3426_v28  ;;  %v7893_v24 = vld [vmem:[%s8681_s20 + $0x15c0] sm:$0xff] }
 0x332   : > { %6713 = vmatpush1.bf16.msra.mxu0 %v6712_v44  ;;  %v2600_v30 = vsub.f32 %v10915_v18, %v2584_v5  ;;  %v2669_v36 = vadd.f32 %v2584_v5, %v10915_v18  ;;  %v2587_v63 = vrot.slane %v2430_v50, 1  ;;  %v6724_v44 = vpack.c.bf16 %v3415_v3, %v3407_v37  ;;  %v7881_v5 = vld [vmem:[%s8681_s20 + $0x1548] sm:$0xff]  ;;  %v7883_v37 = vld [vmem:[%s8681_s20 + $0x1558] sm:$0xff] }
 0x333   : > { %6777 = vmatpush1.bf16.msra.mxu1 %v6776_v55  ;;  %6715 = vmatprep.subr.bf16.mxu0 %v6714_v41  ;;  %v2602_v25 = vsub.f32 %v10920_v11, %v2586_v10  ;;  %v2671_v13 = vadd.f32 %v2586_v10, %v10920_v11  ;;  %v2601_v49 = vsub.f32 %v10922_v20, %v2585_v42  ;;  %v7873_v11 = vld [vmem:[%s8681_s20 + $0x14c8] sm:$0xff]  ;;  %v3440_v12 = vand.u32 2147483647, %v7880_v40 }
 0x334   : > { %v2670_v16 = vadd.f32 %v2585_v42, %v10922_v20  ;;  %6779 = vmatprep.subr.bf16.mxu1 %v6778_v1  ;;  %v2603_v35 = vsub.f32 %v10926_v15, %v2587_v63  ;;  %v2672_v18 = vadd.f32 %v2587_v63, %v10926_v15  ;;  %v3432_v32 = vand.u32 2147483647, %v7873_v11  ;;  %v7896_v31 = vld [vmem:[%s8681_s20 + $0x1608] sm:$0xff] }
 0x335   : > { %v2616_v27 = vcombine.low %v2600_v30, %v2601_v49  ;;  %v6788_v1 = vpack.c.bf16 %v3417_v53, %v3409_v48  ;;  %v3448_v4 = vand.u32 2147483647, %v7881_v5  ;;  %v3450_v10 = vand.u32 2147483647, %v7883_v37  ;;  %v7886_v30 = vld [vmem:[%s8681_s20 + $0x1510] sm:$0xff]  ;;  %v7889_v49 = vld [vmem:[%s8681_s20 + $0x15c8] sm:$0xff] }
 0x336   : > { %v2685_v51 = vcombine.low %v2669_v36, %v2670_v16  ;;  %6717 = vmatpush1.bf16.msra.mxu0 %v6716_v38  ;;  %v2617_v56 = vcombine.low %v2602_v25, %v2603_v35  ;;  %v2686_v20 = vcombine.low %v2671_v13, %v2672_v18  ;;  %v6726_v38 = vpack.c.bf16 %v3432_v32, %v3424_v57  ;;  %v7888_v25 = vld [vmem:[%s8681_s20 + $0x1588] sm:$0xff]  ;;  %v7890_v18 = vld [vmem:[%s8681_s20 + $0x1598] sm:$0xff]  ;;  %v7894_v32 = vld [vmem:[%s8681_s20 + $0x1590] sm:$0xff] }
 0x337   : > { %6781 = vmatpush1.bf16.msra.mxu1 %v6780_v14  ;;  %6719 = vmatprep.subr.bf16.mxu0 %v6718_v21  ;;  %v11233_v15 = vrot.slane %v2616_v27, %v10599_v39  ;;  %v7878_v14 = vld [vmem:[%s8681_s20 + $0x1490] sm:$0xff]  ;;  %v6728_v42 = vpack.c.bf16 %v3431_v17, %v3423_v43  ;;  %v3447_v3 = vand.u32 2147483647, %v7885_v23  ;;  %v3441_v36 = vand.u32 2147483647, %v7886_v30  ;;  %v7892_v27 = vld [vmem:[%s8681_s20 + $0x1580] sm:$0xff] }
 0x338   : > { %v11236_v62 = vrot.slane %v2685_v51, %v10599_v39  ;;  %6783 = vmatprep.subr.bf16.mxu1 %v6782_v8  ;;  %v11241_v55 = vrot.slane %v2617_v56, %v10599_v39  ;;  %v11244_v41 = vrot.slane %v2686_v20, %v10599_v39  ;;  %v3425_v2 = vand.u32 2147483647, %v7878_v14  ;;  %v7879_v21 = vld [vmem:[%s8681_s20 + $0x14d0] sm:$0xff]  ;;  %v7897_v6 = vld [vmem:[%s8681_s20 + $0x1648] sm:$0xff]  ;;  %v7898_v17 = vld [vmem:[%s8681_s20 + $0x1618] sm:$0xff] }
 0x339   : > { %v3433_v8 = vand.u32 2147483647, %v7879_v21  ;;  %v6730_v63 = vpack.c.bf16 %v3448_v4, %v3440_v12  ;;  %v3449_v48 = vand.u32 2147483647, %v7887_v52  ;;  %v3456_v13 = vand.u32 2147483647, %v7888_v25 }
 0x33a   : > { %6721 = vmatpush1.bf16.msra.mxu0 %v6720_v45  ;;  %v2648_v61 = vcombine.low %v11233_v15, %v11241_v55  ;;  %v2717_v54 = vcombine.low %v11236_v62, %v11244_v41  ;;  %v7882_v45 = vld [vmem:[%s8681_s20 + $0x1518] sm:$0xff]  ;;  %v3464_v16 = vand.u32 2147483647, %v7889_v49  ;;  %v3466_v53 = vand.u32 2147483647, %v7891_v34  ;;  %v7895_v20 = vld [vmem:[%s8681_s20 + $0x15d0] sm:$0xff] }
 0x33b   : > { %6785 = vmatpush1.bf16.msra.mxu1 %v6784_v33  ;;  %6723 = vmatprep.subr.bf16.mxu0 %v6722_v9  ;;  %v3442_v58 = vand.u32 2147483647, %v7882_v45  ;;  %v6792_v50 = vpack.c.bf16 %v3433_v8, %v3425_v2  ;;  %v7884_v33 = vld [vmem:[%s8681_s20 + $0x1500] sm:$0xff]  ;;  %v3455_v51 = vand.u32 2147483647, %v7892_v27  ;;  %v6796_v47 = vpack.c.bf16 %v3449_v48, %v3441_v36  ;;  %v7902_v4 = vld [vmem:[%s8681_s20 + $0x1610] sm:$0xff] }
 0x33c   : > { %6787 = vmatprep.subr.bf16.mxu1 %v6786_v60  ;;  %v3439_v9 = vand.u32 2147483647, %v7884_v33  ;;  %v3458_v60 = vand.u32 2147483647, %v7890_v18  ;;  %v3463_v57 = vand.u32 2147483647, %v7893_v24  ;;  %v6734_v28 = vpack.c.bf16 %v3464_v16, %v3456_v13 }
 0x33d   : > { %v6794_v35 = vpack.c.bf16 %v3450_v10, %v3442_v58  ;;  %v3457_v56 = vand.u32 2147483647, %v7894_v32  ;;  %v3472_v29 = vand.u32 2147483647, %v7896_v31  ;;  %v3480_v43 = vand.u32 2147483647, %v7897_v6 }
 0x33e   : > { %6725 = vmatpush1.bf16.msra.mxu0 %v6724_v44  ;;  %v6732_v11 = vpack.c.bf16 %v3447_v3, %v3439_v9  ;;  %v3465_v44 = vand.u32 2147483647, %v7895_v20  ;;  %v6798_v7 = vpack.c.bf16 %v3466_v53, %v3458_v60  ;;  %v6736_v2 = vpack.c.bf16 %v3463_v57, %v3455_v51  ;;  %v7900_v8 = vld [vmem:[%s8681_s20 + $0x1600] sm:$0xff]  ;;  %v7903_v58 = vld [vmem:[%s8681_s20 + $0x1650] sm:$0xff]  ;;  %v7904_v10 = vld [vmem:[%s8681_s20 + $0x1688] sm:$0xff] }
 0x33f   : > { %6789 = vmatpush1.bf16.msra.mxu1 %v6788_v1  ;;  %6727 = vmatprep.subr.bf16.mxu0 %v6726_v38  ;;  %v3474_v1 = vand.u32 2147483647, %v7898_v17  ;;  %v7899_v38 = vld [vmem:[%s8681_s20 + $0x1658] sm:$0xff]  ;;  %v3471_v40 = vand.u32 2147483647, %v7900_v8  ;;  %v7901_v12 = vld [vmem:[%s8681_s20 + $0x1640] sm:$0xff]  ;;  %v6738_v45 = vpack.c.bf16 %v3480_v43, %v3472_v29 }
 0x340   : > { %6791 = vmatprep.subr.bf16.mxu1 %v6790_v22  ;;  %v3482_v14 = vand.u32 2147483647, %v7899_v38  ;;  %v6800_v21 = vpack.c.bf16 %v3465_v44, %v3457_v56  ;;  %v3479_v5 = vand.u32 2147483647, %v7901_v12  ;;  %v3473_v22 = vand.u32 2147483647, %v7902_v4 }
 0x341   : > { %v3481_v37 = vand.u32 2147483647, %v7903_v58  ;;  %v7906_v23 = vld [vmem:[%s8681_s20 + $0x1698] sm:$0xff]  ;;  %v7909_v48 = vld [vmem:[%s8681_s20 + $0x16c0] sm:$0xff]  ;;  %v7910_v49 = vld [vmem:[%s8681_s20 + $0x1690] sm:$0xff] }
 0x342   : > { %6729 = vmatpush1.bf16.msra.mxu0 %v6728_v42  ;;  %v3488_v42 = vand.u32 2147483647, %v7904_v10  ;;  %v6802_v9 = vpack.c.bf16 %v3482_v14, %v3474_v1  ;;  %v3490_v3 = vand.u32 2147483647, %v7906_v23  ;;  %v7907_v30 = vld [vmem:[%s8681_s20 + $0x16d8] sm:$0xff]  ;;  %v6740_v13 = vpack.c.bf16 %v3479_v5, %v3471_v40  ;;  %v7912_v53 = vld [vmem:[%s8681_s20 + $0x1708] sm:$0xff] }
 0x343   : > { %6793 = vmatpush1.bf16.msra.mxu1 %v6792_v50  ;;  %6731 = vmatprep.subr.bf16.mxu0 %v6730_v63  ;;  %v7905_v50 = vld [vmem:[%s8681_s20 + $0x16c8] sm:$0xff]  ;;  %v3498_v36 = vand.u32 2147483647, %v7907_v30  ;;  %v7908_v63 = vld [vmem:[%s8681_s20 + $0x1680] sm:$0xff]  ;;  %v3495_v25 = vand.u32 2147483647, %v7909_v48  ;;  %v6804_v60 = vpack.c.bf16 %v3481_v37, %v3473_v22 }
 0x344   : > { %6795 = vmatprep.subr.bf16.mxu1 %v6794_v35  ;;  %v3496_v33 = vand.u32 2147483647, %v7905_v50  ;;  %v3487_v52 = vand.u32 2147483647, %v7908_v63  ;;  %v3489_v16 = vand.u32 2147483647, %v7910_v49 }
 0x345   : > { %v7911_v35 = vld [vmem:[%s8681_s20 + $0x16d0] sm:$0xff]  ;;  %v3504_v27 = vand.u32 2147483647, %v7912_v53  ;;  %v7913_v51 = vld [vmem:[%s8681_s20 + $0x1748] sm:$0xff]  ;;  %v6806_v57 = vpack.c.bf16 %v3498_v36, %v3490_v3  ;;  %v7915_v56 = vld [vmem:[%s8681_s20 + $0x1758] sm:$0xff] }
 0x346   : > { %6733 = vmatpush1.bf16.msra.mxu0 %v6732_v11  ;;  %v3497_v18 = vand.u32 2147483647, %v7911_v35  ;;  %v6742_v34 = vpack.c.bf16 %v3496_v33, %v3488_v42  ;;  %v3512_v24 = vand.u32 2147483647, %v7913_v51  ;;  %v7914_v11 = vld [vmem:[%s8681_s20 + $0x1718] sm:$0xff]  ;;  %v6744_v44 = vpack.c.bf16 %v3495_v25, %v3487_v52  ;;  %v7917_v29 = vld [vmem:[%s8681_s20 + $0x1740] sm:$0xff] }
 0x347   : > { %6797 = vmatpush1.bf16.msra.mxu1 %v6796_v47  ;;  %6735 = vmatprep.subr.bf16.mxu0 %v6734_v28  ;;  %v3506_v32 = vand.u32 2147483647, %v7914_v11  ;;  %v3514_v20 = vand.u32 2147483647, %v7915_v56  ;;  %v7916_v28 = vld [vmem:[%s8681_s20 + $0x1700] sm:$0xff]  ;;  %v7918_v43 = vld [vmem:[%s8681_s20 + $0x1710] sm:$0xff] }
 0x348   : > { %6799 = vmatprep.subr.bf16.mxu1 %v6798_v7  ;;  %v6808_v47 = vpack.c.bf16 %v3497_v18, %v3489_v16  ;;  %v3503_v31 = vand.u32 2147483647, %v7916_v28  ;;  %v3511_v6 = vand.u32 2147483647, %v7917_v29  ;;  %v3505_v7 = vand.u32 2147483647, %v7918_v43 }
 0x349   : > { %v6746_v17 = vpack.c.bf16 %v3512_v24, %v3504_v27  ;;  %v7919_v1 = vld [vmem:[%s8681_s20 + $0x1750] sm:$0xff]  ;;  %v7920_v14 = vld [vmem:[%s8681_s20 + $0x1788] sm:$0xff]  ;;  %v6810_v40 = vpack.c.bf16 %v3514_v20, %v3506_v32  ;;  %v7922_v12 = vld [vmem:[%s8681_s20 + $0x1798] sm:$0xff] }
 0x34a   : > { %6737 = vmatpush1.bf16.msra.mxu0 %v6736_v2  ;;  %v3513_v38 = vand.u32 2147483647, %v7919_v1  ;;  %v3520_v2 = vand.u32 2147483647, %v7920_v14  ;;  %v3522_v5 = vand.u32 2147483647, %v7922_v12  ;;  %v6748_v42 = vpack.c.bf16 %v3511_v6, %v3503_v31 }
 0x34b   : > { %6801 = vmatpush1.bf16.msra.mxu1 %v6800_v21  ;;  %6739 = vmatprep.subr.bf16.mxu0 %v6738_v45  ;;  %v7921_v21 = vld [vmem:[%s8681_s20 + $0x17c8] sm:$0xff]  ;;  %v7923_v4 = vld [vmem:[%s8681_s20 + $0x17d8] sm:$0xff]  ;;  %v7924_v45 = vld [vmem:[%s8681_s20 + $0x1780] sm:$0xff] }
 0x34c   : > { %6803 = vmatprep.subr.bf16.mxu1 %v6802_v9  ;;  %v3528_v8 = vand.u32 2147483647, %v7921_v21  ;;  %v3530_v22 = vand.u32 2147483647, %v7923_v4  ;;  %v3519_v58 = vand.u32 2147483647, %v7924_v45  ;;  %v6812_v3 = vpack.c.bf16 %v3513_v38, %v3505_v7 }
 0x34d   : > { %v7925_v37 = vld [vmem:[%s8681_s20 + $0x17c0] sm:$0xff]  ;;  %v7926_v50 = vld [vmem:[%s8681_s20 + $0x1790] sm:$0xff]  ;;  %v7928_v36 = vld [vmem:[%s8681_s20 + $0x1028] sm:$0xff] }
 0x34e   : > { %6741 = vmatpush1.bf16.msra.mxu0 %v6740_v13  ;;  %v3527_v10 = vand.u32 2147483647, %v7925_v37  ;;  %v3521_v33 = vand.u32 2147483647, %v7926_v50  ;;  %v7927_v9 = vld [vmem:[%s8681_s20 + $0x17d0] sm:$0xff]  ;;  %v6750_v30 = vpack.c.bf16 %v3528_v8, %v3520_v2  ;;  %v7929_v52 = vld [vmem:[%s8681_s20 + $0x1068] sm:$0xff]  ;;  %v6814_v25 = vpack.c.bf16 %v3530_v22, %v3522_v5 }
 0x34f   : > { %6805 = vmatpush1.bf16.msra.mxu1 %v6804_v60  ;;  %6743 = vmatprep.subr.bf16.mxu0 %v6742_v34  ;;  %v3529_v23 = vand.u32 2147483647, %v7927_v9  ;;  %v3284_v63 = vand.u32 2147483647, %v7928_v36  ;;  %v3292_v48 = vand.u32 2147483647, %v7929_v52 }
 0x350   : > { %6807 = vmatprep.subr.bf16.mxu1 %v6806_v57  ;;  %v7930_v13 = vld [vmem:[%s8681_s20 + $0x1038] sm:$0xff]  ;;  %v6752_v18 = vpack.c.bf16 %v3527_v10, %v3519_v58  ;;  %v7932_v34 = vld [vmem:[%s8681_s20 + $0x1020] sm:$0xff]  ;;  %v7934_v24 = vld [vmem:[%s8681_s20 + $0x1030] sm:$0xff] }
 0x351   : > { %v3286_v49 = vand.u32 2147483647, %v7930_v13  ;;  %v7931_v16 = vld [vmem:[%s8681_s20 + $0x1078] sm:$0xff]  ;;  %v6816_v60 = vpack.c.bf16 %v3529_v23, %v3521_v33  ;;  %v3283_v53 = vand.u32 2147483647, %v7932_v34  ;;  %v7933_v27 = vld [vmem:[%s8681_s20 + $0x1060] sm:$0xff]  ;;  %v6818_v11 = vpack.c.bf16 %v3292_v48, %v3284_v63 }
 0x352   : > { %6745 = vmatpush1.bf16.msra.mxu0 %v6744_v44  ;;  %v3294_v35 = vand.u32 2147483647, %v7931_v16  ;;  %v3291_v51 = vand.u32 2147483647, %v7933_v27  ;;  %v3285_v57 = vand.u32 2147483647, %v7934_v24 }
 0x353   : > { %6809 = vmatpush1.bf16.msra.mxu1 %v6808_v47  ;;  %6747 = vmatprep.subr.bf16.mxu0 %v6746_v17  ;;  %v7935_v32 = vld [vmem:[%s8681_s20 + $0x1070] sm:$0xff]  ;;  %v7936_v20 = vld [vmem:[%s8681_s20 + $0x10a8] sm:$0xff]  ;;  %v7938_v29 = vld [vmem:[%s8681_s20 + $0x10b8] sm:$0xff] }
 0x354   : > { %6811 = vmatprep.subr.bf16.mxu1 %v6810_v40  ;;  %v3293_v56 = vand.u32 2147483647, %v7935_v32  ;;  %v3300_v44 = vand.u32 2147483647, %v7936_v20  ;;  %v7937_v47 = vld [vmem:[%s8681_s20 + $0x10e8] sm:$0xff]  ;;  %v6882_v31 = vpack.c.bf16 %v3294_v35, %v3286_v49  ;;  %v7939_v43 = vld [vmem:[%s8681_s20 + $0x10f8] sm:$0xff]  ;;  %v6820_v2 = vpack.c.bf16 %v3291_v51, %v3283_v53 }
 0x355   : > { %v3308_v28 = vand.u32 2147483647, %v7937_v47  ;;  %v3302_v6 = vand.u32 2147483647, %v7938_v29  ;;  %v3310_v7 = vand.u32 2147483647, %v7939_v43 }
 0x356   : > { %6749 = vmatpush1.bf16.msra.mxu0 %v6748_v42  ;;  %v7940_v17 = vld [vmem:[%s8681_s20 + $0x10a0] sm:$0xff]  ;;  %v7942_v21 = vld [vmem:[%s8681_s20 + $0x10b0] sm:$0xff]  ;;  %v6884_v5 = vpack.c.bf16 %v3293_v56, %v3285_v57  ;;  %v7944_v22 = vld [vmem:[%s8681_s20 + $0x1128] sm:$0xff] }
 0x357   : > { %6813 = vmatpush1.bf16.msra.mxu1 %v6812_v3  ;;  %6751 = vmatprep.subr.bf16.mxu0 %v6750_v30  ;;  %v3299_v1 = vand.u32 2147483647, %v7940_v17  ;;  %v7941_v38 = vld [vmem:[%s8681_s20 + $0x10e0] sm:$0xff]  ;;  %v3301_v8 = vand.u32 2147483647, %v7942_v21  ;;  %v7943_v40 = vld [vmem:[%s8681_s20 + $0x10f0] sm:$0xff]  ;;  %v6822_v4 = vpack.c.bf16 %v3308_v28, %v3300_v44  ;;  %v6886_v10 = vpack.c.bf16 %v3310_v7, %v3302_v6 }
 0x358   : > { %6815 = vmatprep.subr.bf16.mxu1 %v6814_v25  ;;  %v3307_v14 = vand.u32 2147483647, %v7941_v38  ;;  %v3309_v12 = vand.u32 2147483647, %v7943_v40  ;;  %v3316_v45 = vand.u32 2147483647, %v7944_v22 }
 0x359   : > { %v7945_v58 = vld [vmem:[%s8681_s20 + $0x1168] sm:$0xff]  ;;  %v7946_v42 = vld [vmem:[%s8681_s20 + $0x1138] sm:$0xff]  ;;  %v11322_v23 = vld [vmem:[#allocation2 + $0x20] sm:$0xff] }
 0x35a   : > { %6753 = vmatpush1.bf16.msra.mxu0 %v6752_v18  ;;  %v3324_v37 = vand.u32 2147483647, %v7945_v58  ;;  %v3318_v50 = vand.u32 2147483647, %v7946_v42  ;;  %v7947_v33 = vld [vmem:[%s8681_s20 + $0x1178] sm:$0xff]  ;;  %v6824_v3 = vpack.c.bf16 %v3307_v14, %v3299_v1  ;;  %v6888_v30 = vpack.c.bf16 %v3309_v12, %v3301_v8  ;;  %v7949_v36 = vld [vmem:[%s8681_s20 + $0x1120] sm:$0xff] }
 0x35b   : > { %6817 = vmatpush1.bf16.msra.mxu1 %v6816_v60  ;;  %6819 = vmatprep.subr.bf16.mxu0 %v6818_v11  ;;  %v3326_v9 = vand.u32 2147483647, %v7947_v33  ;;  %v3315_v63 = vand.u32 2147483647, %v7949_v36  ;;  %v7950_v52 = vld [vmem:[%s8681_s20 + $0x1160] sm:$0xff]  ;;  %v7951_v25 = vld [vmem:[%s8681_s20 + $0x1130] sm:$0xff] }
 0x35c   : > { %6883 = vmatprep.subr.bf16.mxu1 %v6882_v31  ;;  %v3323_v48 = vand.u32 2147483647, %v7950_v52  ;;  %v3317_v13 = vand.u32 2147483647, %v7951_v25  ;;  %v6826_v49 = vpack.c.bf16 %v3324_v37, %v3316_v45  ;;  %v7952_v16 = vld [vmem:[%s8681_s20 + $0x1170] sm:$0xff]  ;;  %v7953_v18 = vld [vmem:[%s8681_s20 + $0x11a8] sm:$0xff] }
 0x35d   : > { %3600 = vmatmul.mubr.f32.vlgmr.msra.gmra.mrb[20].mxu0 %v11322_v23  ;;  %v3325_v35 = vand.u32 2147483647, %v7952_v16  ;;  %v3332_v60 = vand.u32 2147483647, %v7953_v18  ;;  %v7954_v34 = vld [vmem:[%s8681_s20 + $0x11e8] sm:$0xff]  ;;  %v6890_v27 = vpack.c.bf16 %v3326_v9, %v3318_v50  ;;  %v7955_v51 = vld [vmem:[%s8681_s20 + $0x11b8] sm:$0xff] }
 0x35e   : > { %3671 = vmatmul.mubr.f32.vlgmr.msra.gmra.mrb[20].mxu1 %v11322_v23  ;;  %6821 = vmatpush1.bf16.msra.mxu0 %v6820_v2  ;;  %v3340_v53 = vand.u32 2147483647, %v7954_v34  ;;  %v3334_v24 = vand.u32 2147483647, %v7955_v51  ;;  %v7956_v57 = vld [vmem:[%s8681_s20 + $0x11f8] sm:$0xff]  ;;  %v7957_v32 = vld [vmem:[%s8681_s20 + $0x11a0] sm:$0xff]  ;;  %v6828_v6 = vpack.c.bf16 %v3323_v48, %v3315_v63 }
 0x35f   : > { %6885 = vmatpush1.bf16.msra.mxu1 %v6884_v5  ;;  %6823 = vmatprep.subr.bf16.mxu0 %v6822_v4  ;;  %v3342_v11 = vand.u32 2147483647, %v7956_v57  ;;  %v3331_v56 = vand.u32 2147483647, %v7957_v32  ;;  %v7958_v20 = vld [vmem:[%s8681_s20 + $0x11e0] sm:$0xff]  ;;  %v7959_v47 = vld [vmem:[%s8681_s20 + $0x11b0] sm:$0xff]  ;;  %v6892_v38 = vpack.c.bf16 %v3325_v35, %v3317_v13 }
 0x360   : > { %6887 = vmatprep.subr.bf16.mxu1 %v6886_v10  ;;  %3741 = vmatprep.mubr.f32.mxu0 %v11174_v26  ;;  %v3339_v44 = vand.u32 2147483647, %v7958_v20  ;;  %v3333_v28 = vand.u32 2147483647, %v7959_v47  ;;  %v7960_v31 = vld [vmem:[%s8681_s20 + $0x11f0] sm:$0xff]  ;;  %v7961_v43 = vld [vmem:[%s8681_s20 + $0x1228] sm:$0xff]  ;;  %v6830_v14 = vpack.c.bf16 %v3340_v53, %v3332_v60 }
 0x361   : > { %v3341_v29 = vand.u32 2147483647, %v7960_v31  ;;  %3812 = vmatprep.mubr.f32.mxu1 %v11174_v26  ;;  %v3348_v7 = vand.u32 2147483647, %v7961_v43  ;;  %v7962_v17 = vld [vmem:[%s8681_s20 + $0x1268] sm:$0xff]  ;;  %v7963_v2 = vld [vmem:[%s8681_s20 + $0x1238] sm:$0xff]  ;;  %v6894_v26 = vpack.c.bf16 %v3342_v11, %v3334_v24 }
 0x362   : > { %6825 = vmatpush1.bf16.msra.mxu0 %v6824_v3  ;;  %v3356_v1 = vand.u32 2147483647, %v7962_v17  ;;  %v3350_v21 = vand.u32 2147483647, %v7963_v2  ;;  %v7964_v8 = vld [vmem:[%s8681_s20 + $0x1278] sm:$0xff]  ;;  %v7965_v12 = vld [vmem:[%s8681_s20 + $0x1220] sm:$0xff]  ;;  %v6832_v45 = vpack.c.bf16 %v3339_v44, %v3331_v56 }
 0x363   : > { %6889 = vmatpush1.bf16.msra.mxu1 %v6888_v30  ;;  %6827 = vmatprep.subr.bf16.mxu0 %v6826_v49  ;;  %v3358_v40 = vand.u32 2147483647, %v7964_v8  ;;  %v3347_v5 = vand.u32 2147483647, %v7965_v12  ;;  %v7966_v4 = vld [vmem:[%s8681_s20 + $0x1260] sm:$0xff]  ;;  %v6896_v58 = vpack.c.bf16 %v3341_v29, %v3333_v28  ;;  %v7967_v37 = vld [vmem:[%s8681_s20 + $0x1230] sm:$0xff] }
 0x364   : > { %6891 = vmatprep.subr.bf16.mxu1 %v6890_v27  ;;  %v3355_v22 = vand.u32 2147483647, %v7966_v4  ;;  %v3349_v10 = vand.u32 2147483647, %v7967_v37  ;;  %v7968_v42 = vld [vmem:[%s8681_s20 + $0x1270] sm:$0xff]  ;;  %v6834_v33 = vpack.c.bf16 %v3356_v1, %v3348_v7  ;;  %v7969_v9 = vld [vmem:[%s8681_s20 + $0x12a8] sm:$0xff] }
 0x365   : > { %v3357_v50 = vand.u32 2147483647, %v7968_v42  ;;  %v3364_v3 = vand.u32 2147483647, %v7969_v9  ;;  %v7970_v30 = vld [vmem:[%s8681_s20 + $0x12e8] sm:$0xff]  ;;  %v7971_v63 = vld [vmem:[%s8681_s20 + $0x12b8] sm:$0xff]  ;;  %v6898_v48 = vpack.c.bf16 %v3358_v40, %v3350_v21 }
 0x366   : > { %6829 = vmatpush1.bf16.msra.mxu0 %v6828_v6  ;;  %v3372_v36 = vand.u32 2147483647, %v7970_v30  ;;  %v3366_v52 = vand.u32 2147483647, %v7971_v63  ;;  %v7972_v25 = vld [vmem:[%s8681_s20 + $0x12f8] sm:$0xff]  ;;  %v7973_v49 = vld [vmem:[%s8681_s20 + $0x12a0] sm:$0xff]  ;;  %v6836_v60 = vpack.c.bf16 %v3355_v22, %v3347_v5 }
 0x367   : > { %6893 = vmatpush1.bf16.msra.mxu1 %v6892_v38  ;;  %6831 = vmatprep.subr.bf16.mxu0 %v6830_v14  ;;  %v3374_v13 = vand.u32 2147483647, %v7972_v25  ;;  %v3363_v16 = vand.u32 2147483647, %v7973_v49  ;;  %v7974_v35 = vld [vmem:[%s8681_s20 + $0x12e0] sm:$0xff]  ;;  %v7975_v34 = vld [vmem:[%s8681_s20 + $0x12b0] sm:$0xff]  ;;  %v6900_v11 = vpack.c.bf16 %v3357_v50, %v3349_v10 }
 0x368   : > { %v3371_v18 = vand.u32 2147483647, %v7974_v35  ;;  %6895 = vmatprep.subr.bf16.mxu1 %v6894_v26  ;;  %v3365_v53 = vand.u32 2147483647, %v7975_v34  ;;  %v7976_v27 = vld [vmem:[%s8681_s20 + $0x12f0] sm:$0xff]  ;;  %v7977_v24 = vld [vmem:[%s8681_s20 + $0x1328] sm:$0xff]  ;;  %v6838_v31 = vpack.c.bf16 %v3372_v36, %v3364_v3 }
 0x369   : > { %v3373_v51 = vand.u32 2147483647, %v7976_v27  ;;  %v3380_v57 = vand.u32 2147483647, %v7977_v24  ;;  %v7978_v32 = vld [vmem:[%s8681_s20 + $0x1368] sm:$0xff]  ;;  %v7979_v20 = vld [vmem:[%s8681_s20 + $0x1338] sm:$0xff]  ;;  %v6902_v38 = vpack.c.bf16 %v3374_v13, %v3366_v52 }
 0x36a   : > { %v3388_v56 = vand.u32 2147483647, %v7978_v32  ;;  %v3382_v44 = vand.u32 2147483647, %v7979_v20  ;;  %v7980_v47 = vld [vmem:[%s8681_s20 + $0x1378] sm:$0xff]  ;;  %6833 = vmatpush1.bf16.msra.mxu0 %v6832_v45  ;;  %v7981_v29 = vld [vmem:[%s8681_s20 + $0x1320] sm:$0xff]  ;;  %v6840_v12 = vpack.c.bf16 %v3371_v18, %v3363_v16 }
 0x36b   : > { %v3390_v28 = vand.u32 2147483647, %v7980_v47  ;;  %v3379_v6 = vand.u32 2147483647, %v7981_v29  ;;  %v7982_v43 = vld [vmem:[%s8681_s20 + $0x1360] sm:$0xff]  ;;  %v7983_v17 = vld [vmem:[%s8681_s20 + $0x1330] sm:$0xff]  ;;  %6897 = vmatpush1.bf16.msra.mxu1 %v6896_v58  ;;  %6835 = vmatprep.subr.bf16.mxu0 %v6834_v33  ;;  %v6904_v10 = vpack.c.bf16 %v3373_v51, %v3365_v53 }
 0x36c   : > { %v3387_v7 = vand.u32 2147483647, %v7982_v43  ;;  %v3381_v1 = vand.u32 2147483647, %v7983_v17  ;;  %v7984_v14 = vld [vmem:[%s8681_s20 + $0x1370] sm:$0xff]  ;;  %v7985_v21 = vld [vmem:[%s8681_s20 + $0x13a8] sm:$0xff]  ;;  %6899 = vmatprep.subr.bf16.mxu1 %v6898_v48  ;;  %v6842_v36 = vpack.c.bf16 %v3388_v56, %v3380_v57 }
 0x36d   : > { %v3389_v2 = vand.u32 2147483647, %v7984_v14  ;;  %v3396_v8 = vand.u32 2147483647, %v7985_v21  ;;  %v7986_v40 = vld [vmem:[%s8681_s20 + $0x13e8] sm:$0xff]  ;;  %v7987_v5 = vld [vmem:[%s8681_s20 + $0x13b8] sm:$0xff]  ;;  %v6906_v63 = vpack.c.bf16 %v3390_v28, %v3382_v44 }
 0x36e   : > { %v3404_v26 = vand.u32 2147483647, %v7986_v40  ;;  %v3398_v4 = vand.u32 2147483647, %v7987_v5  ;;  %v7988_v22 = vld [vmem:[%s8681_s20 + $0x13f8] sm:$0xff]  ;;  %v7989_v58 = vld [vmem:[%s8681_s20 + $0x13a0] sm:$0xff]  ;;  %6837 = vmatpush1.bf16.msra.mxu0 %v6836_v60  ;;  %v6844_v49 = vpack.c.bf16 %v3387_v7, %v3379_v6 }
 0x36f   : > { %v3406_v45 = vand.u32 2147483647, %v7988_v22  ;;  %v3395_v37 = vand.u32 2147483647, %v7989_v58  ;;  %v7990_v42 = vld [vmem:[%s8681_s20 + $0x13e0] sm:$0xff]  ;;  %v7991_v33 = vld [vmem:[%s8681_s20 + $0x13b0] sm:$0xff]  ;;  %6901 = vmatpush1.bf16.msra.mxu1 %v6900_v11  ;;  %6839 = vmatprep.subr.bf16.mxu0 %v6838_v31  ;;  %v6908_v16 = vpack.c.bf16 %v3389_v2, %v3381_v1 }
 0x370   : > { %v3403_v50 = vand.u32 2147483647, %v7990_v42  ;;  %v3397_v9 = vand.u32 2147483647, %v7991_v33  ;;  %v7992_v3 = vld [vmem:[%s8681_s20 + $0x13f0] sm:$0xff]  ;;  %v7993_v52 = vld [vmem:[%s8681_s20 + $0x1428] sm:$0xff]  ;;  %6903 = vmatprep.subr.bf16.mxu1 %v6902_v38  ;;  %v6846_v60 = vpack.c.bf16 %v3404_v26, %v3396_v8 }
 0x371   : > { %v3405_v30 = vand.u32 2147483647, %v7992_v3  ;;  %v3412_v48 = vand.u32 2147483647, %v7993_v52  ;;  %v7994_v25 = vld [vmem:[%s8681_s20 + $0x1468] sm:$0xff]  ;;  %v7995_v35 = vld [vmem:[%s8681_s20 + $0x1438] sm:$0xff]  ;;  %v6910_v51 = vpack.c.bf16 %v3406_v45, %v3398_v4 }
 0x372   : > { %v3420_v13 = vand.u32 2147483647, %v7994_v25  ;;  %v3414_v18 = vand.u32 2147483647, %v7995_v35  ;;  %v7996_v34 = vld [vmem:[%s8681_s20 + $0x1478] sm:$0xff]  ;;  %v2499_v27 = vpop.f32.mrb[14].mxu0  ;;  %v6848_v47 = vpack.c.bf16 %v3403_v50, %v3395_v37  ;;  %6841 = vmatpush1.bf16.msra.mxu0 %v6840_v12 }
 0x373   : > { %v3422_v53 = vand.u32 2147483647, %v7996_v34  ;;  %v7997_v24 = vld [vmem:[%s8681_s20 + $0x1420] sm:$0xff]  ;;  %v2588_v20 = vrot.slane %v2499_v27, 1  ;;  %v2570_v44 = vpop.f32.mrb[14].mxu1  ;;  %v2501_v11 = vpop.f32.mrb[15].mxu0  ;;  %v6912_v28 = vpack.c.bf16 %v3405_v30, %v3397_v9  ;;  %6905 = vmatpush1.bf16.msra.mxu1 %v6904_v10  ;;  %6843 = vmatprep.subr.bf16.mxu0 %v6842_v36 }
 0x374   : > { %v3411_v57 = vand.u32 2147483647, %v7997_v24  ;;  %v7998_v32 = vld [vmem:[%s8681_s20 + $0x1460] sm:$0xff]  ;;  %v7999_v31 = vld [vmem:[%s8681_s20 + $0x1430] sm:$0xff]  ;;  %v2590_v6 = vrot.slane %v2570_v44, 1  ;;  %v2589_v43 = vrot.slane %v2501_v11, 1  ;;  %v6850_v17 = vpack.c.bf16 %v3420_v13, %v3412_v48  ;;  %6907 = vmatprep.subr.bf16.mxu1 %v6906_v63 }
 0x375   : > { %v3419_v56 = vand.u32 2147483647, %v7998_v32  ;;  %v3413_v29 = vand.u32 2147483647, %v7999_v31  ;;  %v2572_v7 = vpop.f32.mrb[15].mxu1  ;;  %v8000_v1 = vld [vmem:[%s8681_s20 + $0x1470] sm:$0xff]  ;;  %v2604_v14 = vsub.f32 %v11063_v59, %v2588_v20  ;;  %v2673_v2 = vadd.f32 %v2588_v20, %v11063_v59 }
 0x376   : > { %v3421_v38 = vand.u32 2147483647, %v8000_v1  ;;  %v2591_v21 = vrot.slane %v2572_v7, 1  ;;  %v6914_v8 = vpack.c.bf16 %v3422_v53, %v3414_v18  ;;  %v2606_v40 = vsub.f32 %v11068_v46, %v2590_v6  ;;  %v8001_v59 = vld [vmem:[%s8681_s20 + $0x14a8] sm:$0xff]  ;;  %6845 = vmatpush1.bf16.msra.mxu0 %v6844_v49  ;;  %v8004_v33 = vld [vmem:[%s8681_s20 + $0x14f8] sm:$0xff]  ;;  %v8006_v36 = vld [vmem:[%s8681_s20 + $0x14e0] sm:$0xff] }
 0x377   : > { %v2675_v26 = vadd.f32 %v2590_v6, %v11068_v46  ;;  %v2605_v12 = vsub.f32 %v11070_v0, %v2589_v43  ;;  %v2674_v5 = vadd.f32 %v2589_v43, %v11070_v0  ;;  %v3428_v45 = vand.u32 2147483647, %v8001_v59  ;;  %v8002_v58 = vld [vmem:[%s8681_s20 + $0x14e8] sm:$0xff]  ;;  %v8003_v46 = vld [vmem:[%s8681_s20 + $0x14b8] sm:$0xff]  ;;  %6909 = vmatpush1.bf16.msra.mxu1 %v6908_v16  ;;  %6847 = vmatprep.subr.bf16.mxu0 %v6846_v60  ;;  %v8007_v25 = vld [vmem:[%s8681_s20 + $0x14b0] sm:$0xff] }
 0x378   : > { %v2607_v4 = vsub.f32 %v11074_v19, %v2591_v21  ;;  %v2676_v22 = vadd.f32 %v2591_v21, %v11074_v19  ;;  %v3436_v37 = vand.u32 2147483647, %v8002_v58  ;;  %v3430_v50 = vand.u32 2147483647, %v8003_v46  ;;  %v8005_v19 = vld [vmem:[%s8681_s20 + $0x14a0] sm:$0xff]  ;;  %6911 = vmatprep.subr.bf16.mxu1 %v6910_v51  ;;  %v8008_v49 = vld [vmem:[%s8681_s20 + $0x14f0] sm:$0xff] }
 0x379   : > { %v2618_v10 = vcombine.low %v2604_v14, %v2605_v12  ;;  %v2687_v42 = vcombine.low %v2673_v2, %v2674_v5  ;;  %v3438_v0 = vand.u32 2147483647, %v8004_v33  ;;  %v3427_v30 = vand.u32 2147483647, %v8005_v19  ;;  %v8009_v24 = vld [vmem:[%s8681_s20 + $0x1528] sm:$0xff]  ;;  %v8013_v43 = vld [vmem:[%s8681_s20 + $0x1520] sm:$0xff] }
 0x37a   : > { %v2619_v9 = vcombine.low %v2606_v40, %v2607_v4  ;;  %v2688_v3 = vcombine.low %v2675_v26, %v2676_v22  ;;  %v3435_v63 = vand.u32 2147483647, %v8006_v36  ;;  %v3429_v13 = vand.u32 2147483647, %v8007_v25  ;;  %6849 = vmatpush1.bf16.msra.mxu0 %v6848_v47  ;;  %v8010_v20 = vld [vmem:[%s8681_s20 + $0x1568] sm:$0xff]  ;;  %v8014_v2 = vld [vmem:[%s8681_s20 + $0x1560] sm:$0xff] }
 0x37b   : > { %v2640_v52 = vrot.slane %v2618_v10, %v10599_v39  ;;  %v2709_v48 = vrot.slane %v2687_v42, %v10599_v39  ;;  %v3437_v35 = vand.u32 2147483647, %v8008_v49  ;;  %v6852_v34 = vpack.c.bf16 %v3419_v56, %v3411_v57  ;;  %6913 = vmatpush1.bf16.msra.mxu1 %v6912_v28  ;;  %6851 = vmatprep.subr.bf16.mxu0 %v6850_v17  ;;  %v8011_v56 = vld [vmem:[%s8681_s20 + $0x1538] sm:$0xff]  ;;  %v8016_v55 = vld [vmem:[%s8681_s20 + $0x1570] sm:$0xff]  ;;  %v8018_v26 = vld [vmem:[%s8681_s20 + $0x15e8] sm:$0xff] }
 0x37c   : > { %v2647_v18 = vrot.slane %v2619_v9, %v10599_v39  ;;  %v2716_v16 = vrot.slane %v2688_v3, %v10599_v39  ;;  %v6916_v53 = vpack.c.bf16 %v3421_v38, %v3413_v29  ;;  %v6854_v27 = vpack.c.bf16 %v3436_v37, %v3428_v45  ;;  %6915 = vmatprep.subr.bf16.mxu1 %v6914_v8  ;;  %v8012_v29 = vld [vmem:[%s8681_s20 + $0x1578] sm:$0xff]  ;;  %v8015_v8 = vld [vmem:[%s8681_s20 + $0x1530] sm:$0xff]  ;;  %v2575_v5 = vld [vmem:[%s10814_s23] sm:$0xff] }
 0x37d   : > { %v6918_v60 = vpack.c.bf16 %v3438_v0, %v3430_v50  ;;  %v3444_v32 = vand.u32 2147483647, %v8009_v24  ;;  %v3452_v51 = vand.u32 2147483647, %v8010_v20  ;;  %v6856_v31 = vpack.c.bf16 %v3435_v63, %v3427_v30  ;;  %v2668_v4 = vld [vmem:[%s10819_s26] sm:$0xff]  ;;  %v8021_v46 = vld [vmem:[%s8681_s20 + $0x15a0] sm:$0xff] }
 0x37e   : > { %v2649_v44 = vcombine.low %v2640_v52, %v2647_v18  ;;  %v2718_v11 = vcombine.low %v2709_v48, %v2716_v16  ;;  %v6920_v57 = vpack.c.bf16 %v3437_v35, %v3429_v13  ;;  %v3446_v47 = vand.u32 2147483647, %v8011_v56  ;;  %6853 = vmatpush1.bf16.msra.mxu0 %v6852_v34  ;;  %v8019_v59 = vld [vmem:[%s8681_s20 + $0x15b8] sm:$0xff]  ;;  %v8022_v33 = vld [vmem:[%s8681_s20 + $0x15e0] sm:$0xff]  ;;  %v8023_v3 = vld [vmem:[%s8681_s20 + $0x15b0] sm:$0xff] }
 0x37f   : > { %v3454_v6 = vand.u32 2147483647, %v8012_v29  ;;  %v3443_v7 = vand.u32 2147483647, %v8013_v43  ;;  %v2656_v1 = vrot.slane %v2648_v61, %v10599_v39  ;;  %v2725_v28 = vrot.slane %v2717_v54, %v10599_v39  ;;  %6917 = vmatpush1.bf16.msra.mxu1 %v6916_v53  ;;  %6855 = vmatprep.subr.bf16.mxu0 %v6854_v27  ;;  %v8017_v54 = vld [vmem:[%s8681_s20 + $0x15a8] sm:$0xff]  ;;  %v8020_v58 = vld [vmem:[%s8681_s20 + $0x15f8] sm:$0xff] }
 0x380   : > { %v2663_v17 = vrot.slane %v2649_v44, %v10599_v39  ;;  %v2732_v38 = vrot.slane %v2718_v11, %v10599_v39  ;;  %v6858_v14 = vpack.c.bf16 %v3452_v51, %v3444_v32  ;;  %v3451_v21 = vand.u32 2147483647, %v8014_v2  ;;  %6919 = vmatprep.subr.bf16.mxu1 %v6918_v60  ;;  %v8024_v30 = vld [vmem:[%s8681_s20 + $0x15f0] sm:$0xff]  ;;  %v8025_v48 = vld [vmem:[%s8681_s20 + $0x1628] sm:$0xff]  ;;  %v8027_v18 = vld [vmem:[%s8681_s20 + $0x1638] sm:$0xff] }
 0x381   : > { %v3445_v15 = vand.u32 2147483647, %v8015_v8  ;;  %v3453_v61 = vand.u32 2147483647, %v8016_v55  ;;  %v3460_v40 = vand.u32 2147483647, %v8017_v54  ;;  %v6922_v22 = vpack.c.bf16 %v3454_v6, %v3446_v47 }
 0x382   : > { %v2664_v62 = vcombine.low %v2656_v1, %v2663_v17  ;;  %v2733_v41 = vcombine.low %v2725_v28, %v2732_v38  ;;  %v3468_v12 = vand.u32 2147483647, %v8018_v26  ;;  %v3462_v45 = vand.u32 2147483647, %v8019_v59  ;;  %6857 = vmatpush1.bf16.msra.mxu0 %v6856_v31  ;;  %v8026_v13 = vld [vmem:[%s8681_s20 + $0x1668] sm:$0xff]  ;;  %v8028_v34 = vld [vmem:[%s8681_s20 + $0x1678] sm:$0xff] }
 0x383   : > { %v3470_v37 = vand.u32 2147483647, %v8020_v58  ;;  %v3459_v50 = vand.u32 2147483647, %v8021_v46  ;;  %v3467_v0 = vand.u32 2147483647, %v8022_v33  ;;  %v6860_v9 = vpack.c.bf16 %v3451_v21, %v3443_v7  ;;  %6921 = vmatpush1.bf16.msra.mxu1 %v6920_v57  ;;  %6859 = vmatprep.subr.bf16.mxu0 %v6858_v14 }
 0x384   : > { %v2666_v10 = vadd.f32 %v2664_v62, %v2575_v5  ;;  %v2735_v42 = vadd.f32 %v2733_v41, %v2668_v4  ;;  %v3461_v19 = vand.u32 2147483647, %v8023_v3  ;;  %v3469_v36 = vand.u32 2147483647, %v8024_v30  ;;  %6923 = vmatprep.subr.bf16.mxu1 %v6922_v22  ;;  %v8029_v24 = vld [vmem:[%s8681_s20 + $0x1620] sm:$0xff]  ;;  %v8031_v44 = vld [vmem:[%s8681_s20 + $0x1630] sm:$0xff] }
 0x385   : > { %v6924_v63 = vpack.c.bf16 %v3453_v61, %v3445_v15  ;;  %v6862_v52 = vpack.c.bf16 %v3468_v12, %v3460_v40  ;;  %v3476_v25 = vand.u32 2147483647, %v8025_v48  ;;  %v3484_v49 = vand.u32 2147483647, %v8026_v13  ;;  %v8030_v20 = vld [vmem:[%s8681_s20 + $0x1660] sm:$0xff]  ;;  %v8032_v57 = vld [vmem:[%s8681_s20 + $0x1670] sm:$0xff] }
 0x386   : > { %2667 = vst [vmem:[%s10814_s23] sm:$0xff] %v2666_v10  ;;  %2736 = vst [vmem:[%s10819_s26] sm:$0xff] %v2735_v42  ;;  %v6926_v35 = vpack.c.bf16 %v3470_v37, %v3462_v45  ;;  %v3478_v16 = vand.u32 2147483647, %v8027_v18  ;;  %v3486_v53 = vand.u32 2147483647, %v8028_v34  ;;  %v6864_v27 = vpack.c.bf16 %v3467_v0, %v3459_v50  ;;  %6861 = vmatpush1.bf16.msra.mxu0 %v6860_v9  ;;  %v8033_v47 = vld [vmem:[%s8681_s20 + $0x16a8] sm:$0xff]  ;;  %v8035_v1 = vld [vmem:[%s8681_s20 + $0x16b8] sm:$0xff] }
 0x387   : > { %v6928_v60 = vpack.c.bf16 %v3469_v36, %v3461_v19  ;;  %v3475_v32 = vand.u32 2147483647, %v8029_v24  ;;  %v3483_v51 = vand.u32 2147483647, %v8030_v20  ;;  %v3477_v11 = vand.u32 2147483647, %v8031_v44  ;;  %6925 = vmatpush1.bf16.msra.mxu1 %v6924_v63  ;;  %6863 = vmatprep.subr.bf16.mxu0 %v6862_v52 }
 0x388   : > { %v6866_v31 = vpack.c.bf16 %v3484_v49, %v3476_v25  ;;  %v3485_v56 = vand.u32 2147483647, %v8032_v57  ;;  %v3492_v29 = vand.u32 2147483647, %v8033_v47  ;;  %v8034_v6 = vld [vmem:[%s8681_s20 + $0x16e8] sm:$0xff]  ;;  %6927 = vmatprep.subr.bf16.mxu1 %v6926_v35  ;;  %v6930_v7 = vpack.c.bf16 %v3486_v53, %v3478_v16  ;;  %v8036_v17 = vld [vmem:[%s8681_s20 + $0x16f8] sm:$0xff] }
 0x389   : > { %v3500_v43 = vand.u32 2147483647, %v8034_v6  ;;  %v3494_v28 = vand.u32 2147483647, %v8035_v1  ;;  %v3502_v38 = vand.u32 2147483647, %v8036_v17  ;;  %v6868_v15 = vpack.c.bf16 %v3483_v51, %v3475_v32 }
 0x38a   : > { %v8037_v14 = vld [vmem:[%s8681_s20 + $0x16a0] sm:$0xff]  ;;  %6865 = vmatpush1.bf16.msra.mxu0 %v6864_v27  ;;  %v8039_v55 = vld [vmem:[%s8681_s20 + $0x16b0] sm:$0xff]  ;;  %v6932_v54 = vpack.c.bf16 %v3485_v56, %v3477_v11  ;;  %v8041_v26 = vld [vmem:[%s8681_s20 + $0x1728] sm:$0xff] }
 0x38b   : > { %v3491_v2 = vand.u32 2147483647, %v8037_v14  ;;  %v8038_v21 = vld [vmem:[%s8681_s20 + $0x16e0] sm:$0xff]  ;;  %v3493_v61 = vand.u32 2147483647, %v8039_v55  ;;  %v8040_v62 = vld [vmem:[%s8681_s20 + $0x16f0] sm:$0xff]  ;;  %6929 = vmatpush1.bf16.msra.mxu1 %v6928_v60  ;;  %6867 = vmatprep.subr.bf16.mxu0 %v6866_v31  ;;  %v6870_v40 = vpack.c.bf16 %v3500_v43, %v3492_v29  ;;  %v6934_v22 = vpack.c.bf16 %v3502_v38, %v3494_v28 }
 0x38c   : > { %v3499_v8 = vand.u32 2147483647, %v8038_v21  ;;  %v3501_v41 = vand.u32 2147483647, %v8040_v62  ;;  %v3508_v12 = vand.u32 2147483647, %v8041_v26  ;;  %6931 = vmatprep.subr.bf16.mxu1 %v6930_v7 }
 0x38d   : > { %v8042_v5 = vld [vmem:[%s8681_s20 + $0x1768] sm:$0xff]  ;;  %v8043_v59 = vld [vmem:[%s8681_s20 + $0x1738] sm:$0xff]  ;;  %v8045_v46 = vld [vmem:[%s8681_s20 + $0x1720] sm:$0xff] }
 0x38e   : > { %v3516_v4 = vand.u32 2147483647, %v8042_v5  ;;  %v3510_v45 = vand.u32 2147483647, %v8043_v59  ;;  %v8044_v58 = vld [vmem:[%s8681_s20 + $0x1778] sm:$0xff]  ;;  %v6872_v10 = vpack.c.bf16 %v3499_v8, %v3491_v2  ;;  %6869 = vmatpush1.bf16.msra.mxu0 %v6868_v15  ;;  %v6936_v42 = vpack.c.bf16 %v3501_v41, %v3493_v61  ;;  %v8046_v33 = vld [vmem:[%s8681_s20 + $0x1760] sm:$0xff] }
 0x38f   : > { %v3518_v37 = vand.u32 2147483647, %v8044_v58  ;;  %v3507_v50 = vand.u32 2147483647, %v8045_v46  ;;  %v3515_v0 = vand.u32 2147483647, %v8046_v33  ;;  %6933 = vmatpush1.bf16.msra.mxu1 %v6932_v54  ;;  %6871 = vmatprep.subr.bf16.mxu0 %v6870_v40 }
 0x390   : > { %v8047_v9 = vld [vmem:[%s8681_s20 + $0x1730] sm:$0xff]  ;;  %v6874_v19 = vpack.c.bf16 %v3516_v4, %v3508_v12  ;;  %v8049_v63 = vld [vmem:[%s8681_s20 + $0x17a8] sm:$0xff]  ;;  %6935 = vmatprep.subr.bf16.mxu1 %v6934_v22  ;;  %v8051_v49 = vld [vmem:[%s8681_s20 + $0x17b8] sm:$0xff] }
 0x391   : > { %v3509_v3 = vand.u32 2147483647, %v8047_v9  ;;  %v8048_v30 = vld [vmem:[%s8681_s20 + $0x1770] sm:$0xff]  ;;  %v3524_v52 = vand.u32 2147483647, %v8049_v63  ;;  %v8050_v48 = vld [vmem:[%s8681_s20 + $0x17e8] sm:$0xff]  ;;  %v6938_v13 = vpack.c.bf16 %v3518_v37, %v3510_v45  ;;  %v6876_v34 = vpack.c.bf16 %v3515_v0, %v3507_v50 }
 0x392   : > { %v3517_v36 = vand.u32 2147483647, %v8048_v30  ;;  %v3532_v25 = vand.u32 2147483647, %v8050_v48  ;;  %v3526_v35 = vand.u32 2147483647, %v8051_v49  ;;  %6873 = vmatpush1.bf16.msra.mxu0 %v6872_v10 }
 0x393   : > { %v8052_v18 = vld [vmem:[%s8681_s20 + $0x17f8] sm:$0xff]  ;;  %v8053_v53 = vld [vmem:[%s8681_s20 + $0x17a0] sm:$0xff]  ;;  %6937 = vmatpush1.bf16.msra.mxu1 %v6936_v42  ;;  %6875 = vmatprep.subr.bf16.mxu0 %v6874_v19  ;;  %v8055_v51 = vld [vmem:[%s8681_s20 + $0x17b0] sm:$0xff] }
 0x394   : > { %v3534_v16 = vand.u32 2147483647, %v8052_v18  ;;  %v3523_v27 = vand.u32 2147483647, %v8053_v53  ;;  %v8054_v60 = vld [vmem:[%s8681_s20 + $0x17e0] sm:$0xff]  ;;  %v6940_v32 = vpack.c.bf16 %v3517_v36, %v3509_v3  ;;  %v6878_v20 = vpack.c.bf16 %v3532_v25, %v3524_v52  ;;  %v8056_v11 = vld [vmem:[%s8681_s20 + $0x17f0] sm:$0xff]  ;;  %6939 = vmatprep.subr.bf16.mxu1 %v6938_v13 }
 0x395   : > { %v3531_v24 = vand.u32 2147483647, %v8054_v60  ;;  %v3525_v44 = vand.u32 2147483647, %v8055_v51  ;;  %v3533_v31 = vand.u32 2147483647, %v8056_v11 }
 0x396   : > { %v6942_v57 = vpack.c.bf16 %v3534_v16, %v3526_v35  ;;  %v3982_v56 = vld [vmem:[%s8681_s20 + $0x1808] sm:$0xff]  ;;  %v3984_v29 = vld [vmem:[%s8681_s20 + $0x1818] sm:$0xff]  ;;  %6877 = vmatpush1.bf16.msra.mxu0 %v6876_v34  ;;  %v3981_v28 = vld [vmem:[%s8681_s20 + $0x1800] sm:$0xff] }
 0x397   : > { %v3990_v47 = vld [vmem:[%s8681_s20 + $0x1848] sm:$0xff]  ;;  %v3992_v6 = vld [vmem:[%s8681_s20 + $0x1858] sm:$0xff]  ;;  %v6880_v43 = vpack.c.bf16 %v3531_v24, %v3523_v27  ;;  %6941 = vmatpush1.bf16.msra.mxu1 %v6940_v32  ;;  %6879 = vmatprep.subr.bf16.mxu0 %v6878_v20  ;;  %v6944_v7 = vpack.c.bf16 %v3533_v31, %v3525_v44  ;;  %v3989_v17 = vld [vmem:[%s8681_s20 + $0x1840] sm:$0xff] }
 0x398   : > { %v6946_v1 = vpack.c.bf16 %v3990_v47, %v3982_v56  ;;  %v3983_v38 = vld [vmem:[%s8681_s20 + $0x1810] sm:$0xff]  ;;  %6943 = vmatprep.subr.bf16.mxu1 %v6942_v57  ;;  %v7010_v14 = vpack.c.bf16 %v3992_v6, %v3984_v29  ;;  %v3998_v21 = vld [vmem:[%s8681_s20 + $0x1888] sm:$0xff]  ;;  %v4000_v15 = vld [vmem:[%s8681_s20 + $0x1898] sm:$0xff]  ;;  %v6948_v61 = vpack.c.bf16 %v3989_v17, %v3981_v28 }
 0x399   : > { %v3991_v2 = vld [vmem:[%s8681_s20 + $0x1850] sm:$0xff]  ;;  %v4006_v8 = vld [vmem:[%s8681_s20 + $0x18c8] sm:$0xff]  ;;  %v4008_v55 = vld [vmem:[%s8681_s20 + $0x18d8] sm:$0xff] }
 0x39a   : > { %6881 = vmatpush1.bf16.msra.mxu0 %v6880_v43  ;;  %v7012_v62 = vpack.c.bf16 %v3991_v2, %v3983_v38  ;;  %v6950_v41 = vpack.c.bf16 %v4006_v8, %v3998_v21  ;;  %v3997_v54 = vld [vmem:[%s8681_s20 + $0x1880] sm:$0xff]  ;;  %v3999_v26 = vld [vmem:[%s8681_s20 + $0x1890] sm:$0xff]  ;;  %v7014_v12 = vpack.c.bf16 %v4008_v55, %v4000_v15  ;;  %v4014_v4 = vld [vmem:[%s8681_s20 + $0x1908] sm:$0xff] }
 0x39b   : > { %6945 = vmatpush1.bf16.msra.mxu1 %v6944_v7  ;;  %6947 = vmatprep.subr.bf16.mxu0 %v6946_v1  ;;  %v4005_v40 = vld [vmem:[%s8681_s20 + $0x18c0] sm:$0xff]  ;;  %v4007_v5 = vld [vmem:[%s8681_s20 + $0x18d0] sm:$0xff]  ;;  %v4022_v22 = vld [vmem:[%s8681_s20 + $0x1948] sm:$0xff] }
 0x39c   : > { %7011 = vmatprep.subr.bf16.mxu1 %v7010_v14  ;;  %v4016_v59 = vld [vmem:[%s8681_s20 + $0x1918] sm:$0xff]  ;;  %v6952_v37 = vpack.c.bf16 %v4005_v40, %v3997_v54  ;;  %v7016_v10 = vpack.c.bf16 %v4007_v5, %v3999_v26  ;;  %v6954_v42 = vpack.c.bf16 %v4022_v22, %v4014_v4  ;;  %v4013_v46 = vld [vmem:[%s8681_s20 + $0x1900] sm:$0xff]  ;;  %v4015_v33 = vld [vmem:[%s8681_s20 + $0x1910] sm:$0xff] }
 0x39d   : > { %3742 = vmatmul.mubr.f32.vlgmr.msra.gmra.mrb[22].mxu0 %v11322_v23  ;;  %v4024_v45 = vld [vmem:[%s8681_s20 + $0x1958] sm:$0xff]  ;;  %v4021_v50 = vld [vmem:[%s8681_s20 + $0x1940] sm:$0xff]  ;;  %v4023_v9 = vld [vmem:[%s8681_s20 + $0x1950] sm:$0xff] }
 0x39e   : > { %v11483_v58 = vld [vmem:[#allocation2 + $0x38] sm:$0xff]  ;;  %3813 = vmatmul.mubr.f32.vlgmr.msra.gmra.mrb[22].mxu1 %v11322_v23  ;;  %6949 = vmatpush1.bf16.msra.mxu0 %v6948_v61  ;;  %v7018_v0 = vpack.c.bf16 %v4024_v45, %v4016_v59  ;;  %v4030_v3 = vld [vmem:[%s8681_s20 + $0x1988] sm:$0xff]  ;;  %v6956_v36 = vpack.c.bf16 %v4021_v50, %v4013_v46  ;;  %v7020_v63 = vpack.c.bf16 %v4023_v9, %v4015_v33  ;;  %v4029_v48 = vld [vmem:[%s8681_s20 + $0x1980] sm:$0xff] }
 0x39f   : > { %7013 = vmatpush1.bf16.msra.mxu1 %v7012_v62  ;;  %6951 = vmatprep.subr.bf16.mxu0 %v6950_v41  ;;  %v4038_v19 = vld [vmem:[%s8681_s20 + $0x19c8] sm:$0xff]  ;;  %v4032_v23 = vld [vmem:[%s8681_s20 + $0x1998] sm:$0xff]  ;;  %v4037_v25 = vld [vmem:[%s8681_s20 + $0x19c0] sm:$0xff] }
 0x3a0   : > { %7015 = vmatprep.subr.bf16.mxu1 %v7014_v12  ;;  %4303 = vmatprep.mubr.f32.mxu0 %v11483_v58  ;;  %v4040_v30 = vld [vmem:[%s8681_s20 + $0x19d8] sm:$0xff]  ;;  %v6958_v52 = vpack.c.bf16 %v4038_v19, %v4030_v3  ;;  %v4031_v13 = vld [vmem:[%s8681_s20 + $0x1990] sm:$0xff]  ;;  %v4046_v18 = vld [vmem:[%s8681_s20 + $0x1a08] sm:$0xff]  ;;  %v6960_v27 = vpack.c.bf16 %v4037_v25, %v4029_v48 }
 0x3a1   : > { %4374 = vmatprep.mubr.f32.mxu1 %v11483_v58  ;;  %v7022_v49 = vpack.c.bf16 %v4040_v30, %v4032_v23  ;;  %v4039_v35 = vld [vmem:[%s8681_s20 + $0x19d0] sm:$0xff]  ;;  %v4054_v16 = vld [vmem:[%s8681_s20 + $0x1a48] sm:$0xff]  ;;  %v4048_v34 = vld [vmem:[%s8681_s20 + $0x1a18] sm:$0xff] }
 0x3a2   : > { %6953 = vmatpush1.bf16.msra.mxu0 %v6952_v37  ;;  %v4056_v53 = vld [vmem:[%s8681_s20 + $0x1a58] sm:$0xff]  ;;  %v7024_v60 = vpack.c.bf16 %v4039_v35, %v4031_v13  ;;  %v6962_v24 = vpack.c.bf16 %v4054_v16, %v4046_v18  ;;  %v4045_v32 = vld [vmem:[%s8681_s20 + $0x1a00] sm:$0xff]  ;;  %v4047_v51 = vld [vmem:[%s8681_s20 + $0x1a10] sm:$0xff] }
 0x3a3   : > { %7017 = vmatpush1.bf16.msra.mxu1 %v7016_v10  ;;  %6955 = vmatprep.subr.bf16.mxu0 %v6954_v42  ;;  %v4053_v20 = vld [vmem:[%s8681_s20 + $0x1a40] sm:$0xff]  ;;  %v7026_v44 = vpack.c.bf16 %v4056_v53, %v4048_v34  ;;  %v4055_v11 = vld [vmem:[%s8681_s20 + $0x1a50] sm:$0xff]  ;;  %v4062_v31 = vld [vmem:[%s8681_s20 + $0x1a88] sm:$0xff] }
 0x3a4   : > { %7019 = vmatprep.subr.bf16.mxu1 %v7018_v0  ;;  %v4070_v57 = vld [vmem:[%s8681_s20 + $0x1ac8] sm:$0xff]  ;;  %v4064_v56 = vld [vmem:[%s8681_s20 + $0x1a98] sm:$0xff]  ;;  %v6964_v29 = vpack.c.bf16 %v4053_v20, %v4045_v32  ;;  %v7028_v6 = vpack.c.bf16 %v4055_v11, %v4047_v51  ;;  %v4061_v7 = vld [vmem:[%s8681_s20 + $0x1a80] sm:$0xff] }
 0x3a5   : > { %v4072_v47 = vld [vmem:[%s8681_s20 + $0x1ad8] sm:$0xff]  ;;  %v6966_v43 = vpack.c.bf16 %v4070_v57, %v4062_v31  ;;  %v4069_v1 = vld [vmem:[%s8681_s20 + $0x1ac0] sm:$0xff]  ;;  %v4063_v28 = vld [vmem:[%s8681_s20 + $0x1a90] sm:$0xff] }
 0x3a6   : > { %6957 = vmatpush1.bf16.msra.mxu0 %v6956_v36  ;;  %v7030_v17 = vpack.c.bf16 %v4072_v47, %v4064_v56  ;;  %v4071_v38 = vld [vmem:[%s8681_s20 + $0x1ad0] sm:$0xff]  ;;  %v4078_v14 = vld [vmem:[%s8681_s20 + $0x1b08] sm:$0xff]  ;;  %v4080_v21 = vld [vmem:[%s8681_s20 + $0x1b18] sm:$0xff]  ;;  %v6968_v15 = vpack.c.bf16 %v4069_v1, %v4061_v7 }
 0x3a7   : > { %7021 = vmatpush1.bf16.msra.mxu1 %v7020_v63  ;;  %6959 = vmatprep.subr.bf16.mxu0 %v6958_v52  ;;  %v4086_v2 = vld [vmem:[%s8681_s20 + $0x1b48] sm:$0xff]  ;;  %v4088_v8 = vld [vmem:[%s8681_s20 + $0x1b58] sm:$0xff]  ;;  %v7032_v55 = vpack.c.bf16 %v4071_v38, %v4063_v28  ;;  %v4077_v62 = vld [vmem:[%s8681_s20 + $0x1b00] sm:$0xff] }
 0x3a8   : > { %7023 = vmatprep.subr.bf16.mxu1 %v7022_v49  ;;  %v6970_v61 = vpack.c.bf16 %v4086_v2, %v4078_v14  ;;  %v4085_v41 = vld [vmem:[%s8681_s20 + $0x1b40] sm:$0xff]  ;;  %v4079_v54 = vld [vmem:[%s8681_s20 + $0x1b10] sm:$0xff]  ;;  %v7034_v26 = vpack.c.bf16 %v4088_v8, %v4080_v21  ;;  %v4094_v5 = vld [vmem:[%s8681_s20 + $0x1b88] sm:$0xff] }
 0x3a9   : > { %v4087_v12 = vld [vmem:[%s8681_s20 + $0x1b50] sm:$0xff]  ;;  %v4102_v4 = vld [vmem:[%s8681_s20 + $0x1bc8] sm:$0xff]  ;;  %v4096_v45 = vld [vmem:[%s8681_s20 + $0x1b98] sm:$0xff]  ;;  %v6972_v42 = vpack.c.bf16 %v4085_v41, %v4077_v62 }
 0x3aa   : > { %6961 = vmatpush1.bf16.msra.mxu0 %v6960_v27  ;;  %v4104_v37 = vld [vmem:[%s8681_s20 + $0x1bd8] sm:$0xff]  ;;  %v7036_v46 = vpack.c.bf16 %v4087_v12, %v4079_v54  ;;  %v6974_v50 = vpack.c.bf16 %v4102_v4, %v4094_v5  ;;  %v11537_v33 = vld [vmem:[%s8681_s20 + $0x1b80] sm:$0xff]  ;;  %v4095_v9 = vld [vmem:[%s8681_s20 + $0x1b90] sm:$0xff] }
 0x3ab   : > { %7025 = vmatpush1.bf16.msra.mxu1 %v7024_v60  ;;  %6963 = vmatprep.subr.bf16.mxu0 %v6962_v24  ;;  %v4101_v0 = vld [vmem:[%s8681_s20 + $0x1bc0] sm:$0xff]  ;;  %v7038_v3 = vpack.c.bf16 %v4104_v37, %v4096_v45  ;;  %v11542_v19 = vld [vmem:[%s8681_s20 + $0x1bd0] sm:$0xff]  ;;  %v4110_v23 = vld [vmem:[%s8681_s20 + $0x1c08] sm:$0xff] }
 0x3ac   : > { %7027 = vmatprep.subr.bf16.mxu1 %v7026_v44  ;;  %v4118_v30 = vld [vmem:[%s8681_s20 + $0x1c48] sm:$0xff]  ;;  %v4112_v36 = vld [vmem:[%s8681_s20 + $0x1c18] sm:$0xff]  ;;  %v6976_v52 = vpack.c.bf16 %v4101_v0, %v11537_v33  ;;  %v7040_v48 = vpack.c.bf16 %v11542_v19, %v4095_v9  ;;  %v4109_v13 = vld [vmem:[%s8681_s20 + $0x1c00] sm:$0xff] }
 0x3ad   : > { %v4120_v63 = vld [vmem:[%s8681_s20 + $0x1c58] sm:$0xff]  ;;  %v6978_v25 = vpack.c.bf16 %v4118_v30, %v4110_v23  ;;  %v4117_v49 = vld [vmem:[%s8681_s20 + $0x1c40] sm:$0xff]  ;;  %v4111_v35 = vld [vmem:[%s8681_s20 + $0x1c10] sm:$0xff] }
 0x3ae   : > { %6965 = vmatpush1.bf16.msra.mxu0 %v6964_v29  ;;  %v7042_v18 = vpack.c.bf16 %v4120_v63, %v4112_v36  ;;  %v4119_v16 = vld [vmem:[%s8681_s20 + $0x1c50] sm:$0xff]  ;;  %v4126_v34 = vld [vmem:[%s8681_s20 + $0x1c88] sm:$0xff]  ;;  %v4128_v27 = vld [vmem:[%s8681_s20 + $0x1c98] sm:$0xff]  ;;  %v6980_v24 = vpack.c.bf16 %v4117_v49, %v4109_v13 }
 0x3af   : > { %7029 = vmatpush1.bf16.msra.mxu1 %v7028_v6  ;;  %6967 = vmatprep.subr.bf16.mxu0 %v6966_v43  ;;  %v4134_v53 = vld [vmem:[%s8681_s20 + $0x1cc8] sm:$0xff]  ;;  %v4136_v60 = vld [vmem:[%s8681_s20 + $0x1cd8] sm:$0xff]  ;;  %v7044_v32 = vpack.c.bf16 %v4119_v16, %v4111_v35  ;;  %v4125_v51 = vld [vmem:[%s8681_s20 + $0x1c80] sm:$0xff] }
 0x3b0   : > { %v11523_v40 = vpop.f32.mrb[16].mxu0  ;;  %7031 = vmatprep.subr.bf16.mxu1 %v7030_v17  ;;  %v6982_v20 = vpack.c.bf16 %v4134_v53, %v4126_v34  ;;  %v4133_v44 = vld [vmem:[%s8681_s20 + $0x1cc0] sm:$0xff]  ;;  %v4127_v11 = vld [vmem:[%s8681_s20 + $0x1c90] sm:$0xff]  ;;  %v7046_v31 = vpack.c.bf16 %v4136_v60, %v4128_v27  ;;  %v4142_v56 = vld [vmem:[%s8681_s20 + $0x1d08] sm:$0xff] }
 0x3b1   : > { %v11528_v22 = vpop.f32.mrb[16].mxu1  ;;  %v11530_v59 = vpop.f32.mrb[17].mxu0  ;;  %v4135_v57 = vld [vmem:[%s8681_s20 + $0x1cd0] sm:$0xff]  ;;  %v4150_v47 = vld [vmem:[%s8681_s20 + $0x1d48] sm:$0xff]  ;;  %v4144_v29 = vld [vmem:[%s8681_s20 + $0x1d18] sm:$0xff]  ;;  %v6984_v43 = vpack.c.bf16 %v4133_v44, %v4125_v51 }
 0x3b2   : > { %v11534_v10 = vpop.f32.mrb[17].mxu1  ;;  %6969 = vmatpush1.bf16.msra.mxu0 %v6968_v15  ;;  %v4152_v6 = vld [vmem:[%s8681_s20 + $0x1d58] sm:$0xff]  ;;  %v7048_v7 = vpack.c.bf16 %v4135_v57, %v4127_v11  ;;  %v6986_v1 = vpack.c.bf16 %v4150_v47, %v4142_v56  ;;  %v4141_v28 = vld [vmem:[%s8681_s20 + $0x1d00] sm:$0xff]  ;;  %v4143_v38 = vld [vmem:[%s8681_s20 + $0x1d10] sm:$0xff] }
 0x3b3   : > { %7033 = vmatpush1.bf16.msra.mxu1 %v7032_v55  ;;  %6971 = vmatprep.subr.bf16.mxu0 %v6970_v61  ;;  %v4149_v17 = vld [vmem:[%s8681_s20 + $0x1d40] sm:$0xff]  ;;  %v7050_v14 = vpack.c.bf16 %v4152_v6, %v4144_v29  ;;  %v4151_v2 = vld [vmem:[%s8681_s20 + $0x1d50] sm:$0xff]  ;;  %v4158_v21 = vld [vmem:[%s8681_s20 + $0x1d88] sm:$0xff] }
 0x3b4   : > { %7035 = vmatprep.subr.bf16.mxu1 %v7034_v26  ;;  %v4166_v8 = vld [vmem:[%s8681_s20 + $0x1dc8] sm:$0xff]  ;;  %v4160_v15 = vld [vmem:[%s8681_s20 + $0x1d98] sm:$0xff]  ;;  %v6988_v61 = vpack.c.bf16 %v4149_v17, %v4141_v28  ;;  %v7052_v62 = vpack.c.bf16 %v4151_v2, %v4143_v38  ;;  %v4157_v54 = vld [vmem:[%s8681_s20 + $0x1d80] sm:$0xff] }
 0x3b5   : > { %v4168_v55 = vld [vmem:[%s8681_s20 + $0x1dd8] sm:$0xff]  ;;  %v6990_v41 = vpack.c.bf16 %v4166_v8, %v4158_v21  ;;  %v4165_v26 = vld [vmem:[%s8681_s20 + $0x1dc0] sm:$0xff]  ;;  %v4159_v12 = vld [vmem:[%s8681_s20 + $0x1d90] sm:$0xff] }
 0x3b6   : > { %6973 = vmatpush1.bf16.msra.mxu0 %v6972_v42  ;;  %v7054_v5 = vpack.c.bf16 %v4168_v55, %v4160_v15  ;;  %v4167_v4 = vld [vmem:[%s8681_s20 + $0x1dd0] sm:$0xff]  ;;  %v4174_v45 = vld [vmem:[%s8681_s20 + $0x1e08] sm:$0xff]  ;;  %v4176_v42 = vld [vmem:[%s8681_s20 + $0x1e18] sm:$0xff] }
 0x3b7   : > { %7037 = vmatpush1.bf16.msra.mxu1 %v7036_v46  ;;  %6975 = vmatprep.subr.bf16.mxu0 %v6974_v50  ;;  %v4182_v37 = vld [vmem:[%s8681_s20 + $0x1e48] sm:$0xff]  ;;  %v4184_v46 = vld [vmem:[%s8681_s20 + $0x1e58] sm:$0xff]  ;;  %v6992_v50 = vpack.c.bf16 %v4165_v26, %v4157_v54  ;;  %v7056_v0 = vpack.c.bf16 %v4167_v4, %v4159_v12  ;;  %v4181_v23 = vld [vmem:[%s8681_s20 + $0x1e40] sm:$0xff] }
 0x3b8   : > { %7039 = vmatprep.subr.bf16.mxu1 %v7038_v3  ;;  %v6994_v9 = vpack.c.bf16 %v4182_v37, %v4174_v45  ;;  %v4173_v3 = vld [vmem:[%s8681_s20 + $0x1e00] sm:$0xff]  ;;  %v4175_v30 = vld [vmem:[%s8681_s20 + $0x1e10] sm:$0xff]  ;;  %v7058_v36 = vpack.c.bf16 %v4184_v46, %v4176_v42  ;;  %v4200_v13 = vld [vmem:[%s8681_s20 + $0x1ed8] sm:$0xff] }
 0x3b9   : > { %v4183_v63 = vld [vmem:[%s8681_s20 + $0x1e50] sm:$0xff]  ;;  %v6996_v49 = vpack.c.bf16 %v4181_v23, %v4173_v3  ;;  %v4189_v16 = vld [vmem:[%s8681_s20 + $0x1e80] sm:$0xff]  ;;  %v4216_v51 = vld [vmem:[%s8681_s20 + $0x1f58] sm:$0xff] }
 0x3ba   : > { %6977 = vmatpush1.bf16.msra.mxu0 %v6976_v52  ;;  %v4190_v52 = vld [vmem:[%s8681_s20 + $0x1e88] sm:$0xff]  ;;  %v7060_v35 = vpack.c.bf16 %v4183_v63, %v4175_v30  ;;  %v4197_v34 = vld [vmem:[%s8681_s20 + $0x1ec0] sm:$0xff]  ;;  %v4191_v53 = vld [vmem:[%s8681_s20 + $0x1e90] sm:$0xff] }
 0x3bb   : > { %7041 = vmatpush1.bf16.msra.mxu1 %v7040_v48  ;;  %6979 = vmatprep.subr.bf16.mxu0 %v6978_v25  ;;  %v4198_v48 = vld [vmem:[%s8681_s20 + $0x1ec8] sm:$0xff]  ;;  %v4192_v25 = vld [vmem:[%s8681_s20 + $0x1e98] sm:$0xff]  ;;  %v4199_v60 = vld [vmem:[%s8681_s20 + $0x1ed0] sm:$0xff]  ;;  %v7000_v44 = vpack.c.bf16 %v4197_v34, %v4189_v16 }
 0x3bc   : > { %7043 = vmatprep.subr.bf16.mxu1 %v7042_v18  ;;  %v6998_v18 = vpack.c.bf16 %v4198_v48, %v4190_v52  ;;  %v7062_v27 = vpack.c.bf16 %v4200_v13, %v4192_v25  ;;  %v7064_v11 = vpack.c.bf16 %v4199_v60, %v4191_v53  ;;  %v4205_v57 = vld [vmem:[%s8681_s20 + $0x1f00] sm:$0xff]  ;;  %v4207_v47 = vld [vmem:[%s8681_s20 + $0x1f10] sm:$0xff]  ;;  %v4232_v28 = vld [vmem:[%s8681_s20 + $0x1fd8] sm:$0xff] }
 0x3bd   : > { %v4213_v56 = vld [vmem:[%s8681_s20 + $0x1f40] sm:$0xff]  ;;  %v4215_v6 = vld [vmem:[%s8681_s20 + $0x1f50] sm:$0xff]  ;;  %v3996_v54 = vld [vmem:[%s8681_s20 + $0x1878] sm:$0xff] }
 0x3be   : > { %6981 = vmatpush1.bf16.msra.mxu0 %v6980_v24  ;;  %v4206_v24 = vld [vmem:[%s8681_s20 + $0x1f08] sm:$0xff]  ;;  %v7004_v17 = vpack.c.bf16 %v4213_v56, %v4205_v57  ;;  %v7068_v38 = vpack.c.bf16 %v4215_v6, %v4207_v47  ;;  %v4221_v2 = vld [vmem:[%s8681_s20 + $0x1f80] sm:$0xff]  ;;  %v4223_v8 = vld [vmem:[%s8681_s20 + $0x1f90] sm:$0xff] }
 0x3bf   : > { %7045 = vmatpush1.bf16.msra.mxu1 %v7044_v32  ;;  %6983 = vmatprep.subr.bf16.mxu0 %v6982_v20  ;;  %v4214_v32 = vld [vmem:[%s8681_s20 + $0x1f48] sm:$0xff]  ;;  %v4208_v20 = vld [vmem:[%s8681_s20 + $0x1f18] sm:$0xff]  ;;  %v4229_v21 = vld [vmem:[%s8681_s20 + $0x1fc0] sm:$0xff] }
 0x3c0   : > { %7047 = vmatprep.subr.bf16.mxu1 %v7046_v31  ;;  %v7002_v31 = vpack.c.bf16 %v4214_v32, %v4206_v24  ;;  %v7066_v29 = vpack.c.bf16 %v4216_v51, %v4208_v20  ;;  %v4231_v55 = vld [vmem:[%s8681_s20 + $0x1fd0] sm:$0xff]  ;;  %v7008_v26 = vpack.c.bf16 %v4229_v21, %v4221_v2  ;;  %v3985_v4 = vld [vmem:[%s8681_s20 + $0x1820] sm:$0xff]  ;;  %v4012_v3 = vld [vmem:[%s8681_s20 + $0x18f8] sm:$0xff] }
 0x3c1   : > { %v7072_v12 = vpack.c.bf16 %v4231_v55, %v4223_v8  ;;  %v3993_v45 = vld [vmem:[%s8681_s20 + $0x1860] sm:$0xff]  ;;  %v3987_v37 = vld [vmem:[%s8681_s20 + $0x1830] sm:$0xff]  ;;  %v4020_v16 = vld [vmem:[%s8681_s20 + $0x1938] sm:$0xff] }
 0x3c2   : > { %6985 = vmatpush1.bf16.msra.mxu0 %v6984_v43  ;;  %v4222_v43 = vld [vmem:[%s8681_s20 + $0x1f88] sm:$0xff]  ;;  %v3995_v46 = vld [vmem:[%s8681_s20 + $0x1870] sm:$0xff]  ;;  %v7076_v30 = vpack.c.bf16 %v3993_v45, %v3985_v4  ;;  %v4001_v52 = vld [vmem:[%s8681_s20 + $0x18a0] sm:$0xff] }
 0x3c3   : > { %7049 = vmatpush1.bf16.msra.mxu1 %v7048_v7  ;;  %6987 = vmatprep.subr.bf16.mxu0 %v6986_v1  ;;  %v4230_v7 = vld [vmem:[%s8681_s20 + $0x1fc8] sm:$0xff]  ;;  %v4224_v1 = vld [vmem:[%s8681_s20 + $0x1f98] sm:$0xff]  ;;  %v11622_v23 = vld [vmem:[#allocation2 + $0x30] sm:$0xff] }
 0x3c4   : > { %7051 = vmatprep.subr.bf16.mxu1 %v7050_v14  ;;  %v7006_v14 = vpack.c.bf16 %v4230_v7, %v4222_v43  ;;  %v7070_v15 = vpack.c.bf16 %v4232_v28, %v4224_v1  ;;  %v4009_v48 = vld [vmem:[%s8681_s20 + $0x18e0] sm:$0xff]  ;;  %v4003_v25 = vld [vmem:[%s8681_s20 + $0x18b0] sm:$0xff]  ;;  %v4028_v34 = vld [vmem:[%s8681_s20 + $0x1978] sm:$0xff] }
 0x3c5   : > { %v7080_v53 = vpack.c.bf16 %v4009_v48, %v4001_v52  ;;  %v4017_v24 = vld [vmem:[%s8681_s20 + $0x1920] sm:$0xff]  ;;  %v4019_v20 = vld [vmem:[%s8681_s20 + $0x1930] sm:$0xff]  ;;  %v7146_v51 = vpack.c.bf16 %v4028_v34, %v4020_v16  ;;  %v4036_v57 = vld [vmem:[%s8681_s20 + $0x19b8] sm:$0xff] }
 0x3c6   : > { %6989 = vmatpush1.bf16.msra.mxu0 %v6988_v61  ;;  %v3986_v61 = vld [vmem:[%s8681_s20 + $0x1828] sm:$0xff]  ;;  %v4025_v32 = vld [vmem:[%s8681_s20 + $0x1960] sm:$0xff]  ;;  %v4044_v56 = vld [vmem:[%s8681_s20 + $0x19f8] sm:$0xff] }
 0x3c7   : > { %7053 = vmatpush1.bf16.msra.mxu1 %v7052_v62  ;;  %6991 = vmatprep.subr.bf16.mxu0 %v6990_v41  ;;  %v3994_v62 = vld [vmem:[%s8681_s20 + $0x1868] sm:$0xff]  ;;  %v3988_v41 = vld [vmem:[%s8681_s20 + $0x1838] sm:$0xff]  ;;  %v7084_v47 = vpack.c.bf16 %v4025_v32, %v4017_v24  ;;  %v4033_v43 = vld [vmem:[%s8681_s20 + $0x19a0] sm:$0xff]  ;;  %v7150_v28 = vpack.c.bf16 %v4044_v56, %v4036_v57 }
 0x3c8   : > { %7055 = vmatprep.subr.bf16.mxu1 %v7054_v5  ;;  %v7074_v5 = vpack.c.bf16 %v3994_v62, %v3986_v61  ;;  %v7138_v42 = vpack.c.bf16 %v3996_v54, %v3988_v41  ;;  %v4041_v7 = vld [vmem:[%s8681_s20 + $0x19e0] sm:$0xff]  ;;  %v4035_v1 = vld [vmem:[%s8681_s20 + $0x19b0] sm:$0xff]  ;;  %v4060_v2 = vld [vmem:[%s8681_s20 + $0x1a78] sm:$0xff] }
 0x3c9   : > { %v7088_v21 = vpack.c.bf16 %v4041_v7, %v4033_v43  ;;  %v4049_v55 = vld [vmem:[%s8681_s20 + $0x1a20] sm:$0xff]  ;;  %v4051_v62 = vld [vmem:[%s8681_s20 + $0x1a30] sm:$0xff]  ;;  %v4076_v4 = vld [vmem:[%s8681_s20 + $0x1af8] sm:$0xff] }
 0x3ca   : > { %6993 = vmatpush1.bf16.msra.mxu0 %v6992_v50  ;;  %v4002_v50 = vld [vmem:[%s8681_s20 + $0x18a8] sm:$0xff]  ;;  %v4057_v61 = vld [vmem:[%s8681_s20 + $0x1a60] sm:$0xff]  ;;  %v4059_v54 = vld [vmem:[%s8681_s20 + $0x1a70] sm:$0xff] }
 0x3cb   : > { %7057 = vmatpush1.bf16.msra.mxu1 %v7056_v0  ;;  %6995 = vmatprep.subr.bf16.mxu0 %v6994_v9  ;;  %v4010_v0 = vld [vmem:[%s8681_s20 + $0x18e8] sm:$0xff]  ;;  %v4004_v9 = vld [vmem:[%s8681_s20 + $0x18b8] sm:$0xff]  ;;  %v7092_v45 = vpack.c.bf16 %v4057_v61, %v4049_v55  ;;  %v4097_v56 = vld [vmem:[%s8681_s20 + $0x1ba0] sm:$0xff] }
 0x3cc   : > { %7059 = vmatprep.subr.bf16.mxu1 %v7058_v36  ;;  %v7140_v36 = vpack.c.bf16 %v3995_v46, %v3987_v37  ;;  %v7078_v63 = vpack.c.bf16 %v4010_v0, %v4002_v50  ;;  %v7142_v13 = vpack.c.bf16 %v4012_v3, %v4004_v9  ;;  %v7156_v37 = vpack.c.bf16 %v4059_v54, %v4051_v62  ;;  %v4065_v46 = vld [vmem:[%s8681_s20 + $0x1aa0] sm:$0xff]  ;;  %v4067_v0 = vld [vmem:[%s8681_s20 + $0x1ab0] sm:$0xff]  ;;  %v4092_v52 = vld [vmem:[%s8681_s20 + $0x1b78] sm:$0xff] }
 0x3cd   : > { %v4073_v50 = vld [vmem:[%s8681_s20 + $0x1ae0] sm:$0xff]  ;;  %v4075_v3 = vld [vmem:[%s8681_s20 + $0x1af0] sm:$0xff]  ;;  %v4114_v7 = vld [vmem:[%s8681_s20 + $0x1c28] sm:$0xff] }
 0x3ce   : > { %6997 = vmatpush1.bf16.msra.mxu0 %v6996_v49  ;;  %v4011_v49 = vld [vmem:[%s8681_s20 + $0x18f0] sm:$0xff]  ;;  %v7096_v48 = vpack.c.bf16 %v4073_v50, %v4065_v46  ;;  %v4130_v61 = vld [vmem:[%s8681_s20 + $0x1ca8] sm:$0xff]  ;;  %v4140_v54 = vld [vmem:[%s8681_s20 + $0x1cf8] sm:$0xff] }
 0x3cf   : > { %7061 = vmatpush1.bf16.msra.mxu1 %v7060_v35  ;;  %6999 = vmatprep.subr.bf16.mxu0 %v6998_v18  ;;  %v4018_v35 = vld [vmem:[%s8681_s20 + $0x1928] sm:$0xff]  ;;  %v4107_v43 = vld [vmem:[%s8681_s20 + $0x1bf0] sm:$0xff] }
 0x3d0   : > { %7063 = vmatprep.subr.bf16.mxu1 %v7062_v27  ;;  %v4026_v18 = vld [vmem:[%s8681_s20 + $0x1968] sm:$0xff]  ;;  %v7144_v27 = vpack.c.bf16 %v4011_v49, %v4003_v25  ;;  %v7160_v25 = vpack.c.bf16 %v4075_v3, %v4067_v0  ;;  %v4081_v49 = vld [vmem:[%s8681_s20 + $0x1b20] sm:$0xff]  ;;  %v4123_v55 = vld [vmem:[%s8681_s20 + $0x1c70] sm:$0xff] }
 0x3d1   : > { %v7082_v60 = vpack.c.bf16 %v4026_v18, %v4018_v35  ;;  %v4089_v35 = vld [vmem:[%s8681_s20 + $0x1b60] sm:$0xff]  ;;  %v4083_v18 = vld [vmem:[%s8681_s20 + $0x1b30] sm:$0xff]  ;;  %v4138_v62 = vld [vmem:[%s8681_s20 + $0x1ce8] sm:$0xff] }
 0x3d2   : > { %7001 = vmatpush1.bf16.msra.mxu0 %v7000_v44  ;;  %v4027_v44 = vld [vmem:[%s8681_s20 + $0x1970] sm:$0xff]  ;;  %v4146_v50 = vld [vmem:[%s8681_s20 + $0x1d28] sm:$0xff]  ;;  %v4156_v3 = vld [vmem:[%s8681_s20 + $0x1d78] sm:$0xff] }
 0x3d3   : > { %7065 = vmatpush1.bf16.msra.mxu1 %v7064_v11  ;;  %7003 = vmatprep.subr.bf16.mxu0 %v7002_v31  ;;  %v4034_v11 = vld [vmem:[%s8681_s20 + $0x19a8] sm:$0xff]  ;;  %v4139_v46 = vld [vmem:[%s8681_s20 + $0x1cf0] sm:$0xff] }
 0x3d4   : > { %7067 = vmatprep.subr.bf16.mxu1 %v7066_v29  ;;  %v4042_v31 = vld [vmem:[%s8681_s20 + $0x19e8] sm:$0xff]  ;;  %v7148_v29 = vpack.c.bf16 %v4027_v44, %v4019_v20  ;;  %v4100_v20 = vld [vmem:[%s8681_s20 + $0x1bb8] sm:$0xff] }
 0x3d5   : > { %v7086_v6 = vpack.c.bf16 %v4042_v31, %v4034_v11  ;;  %v7100_v11 = vpack.c.bf16 %v4089_v35, %v4081_v49  ;;  %v4154_v0 = vld [vmem:[%s8681_s20 + $0x1d68] sm:$0xff]  ;;  %v4155_v49 = vld [vmem:[%s8681_s20 + $0x1d70] sm:$0xff] }
 0x3d6   : > { %7005 = vmatpush1.bf16.msra.mxu0 %v7004_v17  ;;  %v4043_v17 = vld [vmem:[%s8681_s20 + $0x19f0] sm:$0xff]  ;;  %v4162_v35 = vld [vmem:[%s8681_s20 + $0x1da8] sm:$0xff] }
 0x3d7   : > { %7069 = vmatpush1.bf16.msra.mxu1 %v7068_v38  ;;  %7007 = vmatprep.subr.bf16.mxu0 %v7006_v14  ;;  %v4050_v38 = vld [vmem:[%s8681_s20 + $0x1a28] sm:$0xff]  ;;  %v4052_v14 = vld [vmem:[%s8681_s20 + $0x1a38] sm:$0xff]  ;;  %v7152_v8 = vpack.c.bf16 %v4043_v17, %v4035_v1 }
 0x3d8   : > { %7071 = vmatprep.subr.bf16.mxu1 %v7070_v15  ;;  %v7154_v41 = vpack.c.bf16 %v4060_v2, %v4052_v14  ;;  %v4122_v1 = vld [vmem:[%s8681_s20 + $0x1c68] sm:$0xff]  ;;  %v4124_v17 = vld [vmem:[%s8681_s20 + $0x1c78] sm:$0xff]  ;;  %v4113_v2 = vld [vmem:[%s8681_s20 + $0x1c20] sm:$0xff] }
 0x3d9   : > { %v7106_v14 = vpack.c.bf16 %v4122_v1, %v4114_v7 }
 0x3da   : > { %7009 = vmatpush1.bf16.msra.mxu0 %v7008_v26  ;;  %v4066_v26 = vld [vmem:[%s8681_s20 + $0x1aa8] sm:$0xff] }
 0x3db   : > { %7073 = vmatpush1.bf16.msra.mxu1 %v7072_v12  ;;  %7075 = vmatprep.subr.bf16.mxu0 %v7074_v5  ;;  %v4074_v12 = vld [vmem:[%s8681_s20 + $0x1ae8] sm:$0xff]  ;;  %v4068_v5 = vld [vmem:[%s8681_s20 + $0x1ab8] sm:$0xff] }
 0x3dc   : > { %7139 = vmatprep.subr.bf16.mxu1 %v7138_v42  ;;  %v7094_v42 = vpack.c.bf16 %v4074_v12, %v4066_v26  ;;  %v7158_v9 = vpack.c.bf16 %v4076_v4, %v4068_v5  ;;  %v7110_v5 = vpack.c.bf16 %v4138_v62, %v4130_v61  ;;  %v4129_v4 = vld [vmem:[%s8681_s20 + $0x1ca0] sm:$0xff] }
 0x3dd   : > { %4304 = vmatmul.mubr.f32.vlgmr.msra.gmra.mrb[24].mxu0 %v11622_v23 }
 0x3de   : > { %4375 = vmatmul.mubr.f32.vlgmr.msra.gmra.mrb[24].mxu1 %v11622_v23  ;;  %7077 = vmatpush1.bf16.msra.mxu0 %v7076_v30  ;;  %v4082_v30 = vld [vmem:[%s8681_s20 + $0x1b28] sm:$0xff] }
 0x3df   : > { %7141 = vmatpush1.bf16.msra.mxu1 %v7140_v36  ;;  %7079 = vmatprep.subr.bf16.mxu0 %v7078_v63  ;;  %v4090_v36 = vld [vmem:[%s8681_s20 + $0x1b68] sm:$0xff]  ;;  %v4084_v63 = vld [vmem:[%s8681_s20 + $0x1b38] sm:$0xff] }
 0x3e0   : > { %7143 = vmatprep.subr.bf16.mxu1 %v7142_v13  ;;  %4445 = vmatprep.mubr.f32.mxu0 %v11483_v58  ;;  %v7098_v13 = vpack.c.bf16 %v4090_v36, %v4082_v30  ;;  %v7162_v34 = vpack.c.bf16 %v4092_v52, %v4084_v63  ;;  %v7114_v63 = vpack.c.bf16 %v4154_v0, %v4146_v50  ;;  %v4145_v52 = vld [vmem:[%s8681_s20 + $0x1d20] sm:$0xff] }
 0x3e1   : > { %4516 = vmatprep.mubr.f32.mxu1 %v11483_v58  ;;  %v4058_v58 = vld [vmem:[%s8681_s20 + $0x1a68] sm:$0xff] }
 0x3e2   : > { %7081 = vmatpush1.bf16.msra.mxu0 %v7080_v53  ;;  %v7090_v15 = vpack.c.bf16 %v4058_v58, %v4050_v38  ;;  %v4091_v53 = vld [vmem:[%s8681_s20 + $0x1b70] sm:$0xff] }
 0x3e3   : > { %7145 = vmatpush1.bf16.msra.mxu1 %v7144_v27  ;;  %7083 = vmatprep.subr.bf16.mxu0 %v7082_v60  ;;  %v4098_v27 = vld [vmem:[%s8681_s20 + $0x1ba8] sm:$0xff]  ;;  %v7164_v31 = vpack.c.bf16 %v4091_v53, %v4083_v18  ;;  %v4172_v53 = vld [vmem:[%s8681_s20 + $0x1df8] sm:$0xff] }
 0x3e4   : > { %7147 = vmatprep.subr.bf16.mxu1 %v7146_v51  ;;  %v4106_v60 = vld [vmem:[%s8681_s20 + $0x1be8] sm:$0xff]  ;;  %v4108_v51 = vld [vmem:[%s8681_s20 + $0x1bf8] sm:$0xff] }
 0x3e5   : > { %v7102_v57 = vpack.c.bf16 %v4106_v60, %v4098_v27  ;;  %v4170_v18 = vld [vmem:[%s8681_s20 + $0x1de8] sm:$0xff] }
 0x3e6   : > { %7085 = vmatpush1.bf16.msra.mxu0 %v7084_v47  ;;  %v4105_v47 = vld [vmem:[%s8681_s20 + $0x1be0] sm:$0xff] }
 0x3e7   : > { %7149 = vmatpush1.bf16.msra.mxu1 %v7148_v29  ;;  %7087 = vmatprep.subr.bf16.mxu0 %v7086_v6  ;;  %v4099_v29 = vld [vmem:[%s8681_s20 + $0x1bb0] sm:$0xff]  ;;  %v7166_v6 = vpack.c.bf16 %v4108_v51, %v4100_v20  ;;  %v7104_v38 = vpack.c.bf16 %v4105_v47, %v4097_v56  ;;  %v7118_v20 = vpack.c.bf16 %v4170_v18, %v4162_v35  ;;  %v4161_v51 = vld [vmem:[%s8681_s20 + $0x1da0] sm:$0xff]  ;;  %v4178_v47 = vld [vmem:[%s8681_s20 + $0x1e28] sm:$0xff] }
 0x3e8   : > { %7151 = vmatprep.subr.bf16.mxu1 %v7150_v28  ;;  %v4116_v28 = vld [vmem:[%s8681_s20 + $0x1c38] sm:$0xff]  ;;  %v7168_v58 = vpack.c.bf16 %v4107_v43, %v4099_v29  ;;  %v4171_v56 = vld [vmem:[%s8681_s20 + $0x1df0] sm:$0xff]  ;;  %v4186_v29 = vld [vmem:[%s8681_s20 + $0x1e68] sm:$0xff] }
 0x3e9   : > { %v4188_v43 = vld [vmem:[%s8681_s20 + $0x1e78] sm:$0xff]  ;;  %v4225_v18 = vld [vmem:[%s8681_s20 + $0x1fa0] sm:$0xff] }
 0x3ea   : > { %7089 = vmatpush1.bf16.msra.mxu0 %v7088_v21  ;;  %v4121_v21 = vld [vmem:[%s8681_s20 + $0x1c60] sm:$0xff] }
 0x3eb   : > { %7153 = vmatpush1.bf16.msra.mxu1 %v7152_v8  ;;  %7091 = vmatprep.subr.bf16.mxu0 %v7090_v15  ;;  %v4115_v8 = vld [vmem:[%s8681_s20 + $0x1c30] sm:$0xff]  ;;  %v7170_v15 = vpack.c.bf16 %v4124_v17, %v4116_v28  ;;  %v7108_v26 = vpack.c.bf16 %v4121_v21, %v4113_v2  ;;  %v7122_v28 = vpack.c.bf16 %v4186_v29, %v4178_v47  ;;  %v4177_v17 = vld [vmem:[%s8681_s20 + $0x1e20] sm:$0xff]  ;;  %v4194_v21 = vld [vmem:[%s8681_s20 + $0x1ea8] sm:$0xff] }
 0x3ec   : > { %7155 = vmatprep.subr.bf16.mxu1 %v7154_v41  ;;  %v4132_v41 = vld [vmem:[%s8681_s20 + $0x1cb8] sm:$0xff]  ;;  %v7172_v12 = vpack.c.bf16 %v4123_v55, %v4115_v8  ;;  %v4187_v2 = vld [vmem:[%s8681_s20 + $0x1e70] sm:$0xff]  ;;  %v4202_v8 = vld [vmem:[%s8681_s20 + $0x1ee8] sm:$0xff] }
 0x3ed   : > { %v4204_v55 = vld [vmem:[%s8681_s20 + $0x1ef8] sm:$0xff] }
 0x3ee   : > { %7093 = vmatpush1.bf16.msra.mxu0 %v7092_v45  ;;  %v4137_v45 = vld [vmem:[%s8681_s20 + $0x1ce0] sm:$0xff]  ;;  %v8059_v47 = vld [vmem:[%s8681_s20 + $0x1818] sm:$0xff] }
 0x3ef   : > { %7157 = vmatpush1.bf16.msra.mxu1 %v7156_v37  ;;  %7095 = vmatprep.subr.bf16.mxu0 %v7094_v42  ;;  %v4131_v37 = vld [vmem:[%s8681_s20 + $0x1cb0] sm:$0xff]  ;;  %v7174_v42 = vpack.c.bf16 %v4140_v54, %v4132_v41  ;;  %v7112_v30 = vpack.c.bf16 %v4137_v45, %v4129_v4  ;;  %v7126_v41 = vpack.c.bf16 %v4202_v8, %v4194_v21  ;;  %v4193_v54 = vld [vmem:[%s8681_s20 + $0x1ea0] sm:$0xff]  ;;  %v4210_v45 = vld [vmem:[%s8681_s20 + $0x1f28] sm:$0xff]  ;;  %v4526_v29 = vand.u32 2147483647, %v8059_v47 }
 0x3f0   : > { %v11671_v16 = vpop.f32.mrb[18].mxu0  ;;  %7159 = vmatprep.subr.bf16.mxu1 %v7158_v9  ;;  %v4148_v9 = vld [vmem:[%s8681_s20 + $0x1d38] sm:$0xff]  ;;  %v7176_v36 = vpack.c.bf16 %v4139_v46, %v4131_v37  ;;  %v4203_v4 = vld [vmem:[%s8681_s20 + $0x1ef0] sm:$0xff]  ;;  %v4218_v37 = vld [vmem:[%s8681_s20 + $0x1f68] sm:$0xff] }
 0x3f1   : > { %v11676_v24 = vpop.f32.mrb[18].mxu1  ;;  %v11678_v32 = vpop.f32.mrb[19].mxu0  ;;  %v4220_v46 = vld [vmem:[%s8681_s20 + $0x1f78] sm:$0xff]  ;;  %v8064_v8 = vld [vmem:[%s8681_s20 + $0x1850] sm:$0xff] }
 0x3f2   : > { %v11682_v44 = vpop.f32.mrb[19].mxu1  ;;  %7097 = vmatpush1.bf16.msra.mxu0 %v7096_v48  ;;  %v4153_v48 = vld [vmem:[%s8681_s20 + $0x1d60] sm:$0xff] }
 0x3f3   : > { %7161 = vmatpush1.bf16.msra.mxu1 %v7160_v25  ;;  %7099 = vmatprep.subr.bf16.mxu0 %v7098_v13  ;;  %v4147_v25 = vld [vmem:[%s8681_s20 + $0x1d30] sm:$0xff]  ;;  %v7178_v13 = vpack.c.bf16 %v4156_v3, %v4148_v9  ;;  %v7116_v27 = vpack.c.bf16 %v4153_v48, %v4145_v52  ;;  %v7130_v9 = vpack.c.bf16 %v4218_v37, %v4210_v45  ;;  %v4209_v3 = vld [vmem:[%s8681_s20 + $0x1f20] sm:$0xff]  ;;  %v4226_v48 = vld [vmem:[%s8681_s20 + $0x1fa8] sm:$0xff] }
 0x3f4   : > { %7163 = vmatprep.subr.bf16.mxu1 %v7162_v34  ;;  %v4164_v34 = vld [vmem:[%s8681_s20 + $0x1db8] sm:$0xff]  ;;  %v7180_v60 = vpack.c.bf16 %v4155_v49, %v4147_v25  ;;  %v4219_v52 = vld [vmem:[%s8681_s20 + $0x1f70] sm:$0xff]  ;;  %v4234_v25 = vld [vmem:[%s8681_s20 + $0x1fe8] sm:$0xff] }
 0x3f5   : > { %v4236_v49 = vld [vmem:[%s8681_s20 + $0x1ff8] sm:$0xff]  ;;  %v8069_v45 = vld [vmem:[%s8681_s20 + $0x1880] sm:$0xff] }
 0x3f6   : > { %7101 = vmatpush1.bf16.msra.mxu0 %v7100_v11  ;;  %v4169_v11 = vld [vmem:[%s8681_s20 + $0x1de0] sm:$0xff]  ;;  %v4539_v37 = vand.u32 2147483647, %v8069_v45 }
 0x3f7   : > { %7165 = vmatpush1.bf16.msra.mxu1 %v7164_v31  ;;  %7103 = vmatprep.subr.bf16.mxu0 %v7102_v57  ;;  %v4163_v31 = vld [vmem:[%s8681_s20 + $0x1db0] sm:$0xff]  ;;  %v7182_v57 = vpack.c.bf16 %v4172_v53, %v4164_v34  ;;  %v7120_v7 = vpack.c.bf16 %v4169_v11, %v4161_v51  ;;  %v4233_v34 = vld [vmem:[%s8681_s20 + $0x1fe0] sm:$0xff]  ;;  %v8057_v51 = vld [vmem:[%s8681_s20 + $0x1808] sm:$0xff] }
 0x3f8   : > { %7167 = vmatprep.subr.bf16.mxu1 %v7166_v6  ;;  %v4180_v6 = vld [vmem:[%s8681_s20 + $0x1e38] sm:$0xff]  ;;  %v7184_v1 = vpack.c.bf16 %v4171_v56, %v4163_v31  ;;  %v4524_v11 = vand.u32 2147483647, %v8057_v51  ;;  %v8058_v31 = vld [vmem:[%s8681_s20 + $0x1848] sm:$0xff] }
 0x3fa   : > { %7105 = vmatpush1.bf16.msra.mxu0 %v7104_v38  ;;  %v4185_v38 = vld [vmem:[%s8681_s20 + $0x1e60] sm:$0xff] }
 0x3fb   : > { %7169 = vmatpush1.bf16.msra.mxu1 %v7168_v58  ;;  %7107 = vmatprep.subr.bf16.mxu0 %v7106_v14  ;;  %v4179_v58 = vld [vmem:[%s8681_s20 + $0x1e30] sm:$0xff]  ;;  %v7186_v14 = vpack.c.bf16 %v4188_v43, %v4180_v6  ;;  %v7124_v61 = vpack.c.bf16 %v4185_v38, %v4177_v17  ;;  %v8060_v6 = vld [vmem:[%s8681_s20 + $0x1858] sm:$0xff]  ;;  %v8062_v38 = vld [vmem:[%s8681_s20 + $0x1840] sm:$0xff] }
 0x3fc   : > { %7171 = vmatprep.subr.bf16.mxu1 %v7170_v15  ;;  %v4196_v15 = vld [vmem:[%s8681_s20 + $0x1eb8] sm:$0xff]  ;;  %v7188_v62 = vpack.c.bf16 %v4187_v2, %v4179_v58  ;;  %v4534_v43 = vand.u32 2147483647, %v8060_v6  ;;  %v4531_v58 = vand.u32 2147483647, %v8062_v38 }
 0x3fe   : > { %7109 = vmatpush1.bf16.msra.mxu0 %v7108_v26  ;;  %v4201_v26 = vld [vmem:[%s8681_s20 + $0x1ee0] sm:$0xff] }
 0x3ff   : > { %7173 = vmatpush1.bf16.msra.mxu1 %v7172_v12  ;;  %7111 = vmatprep.subr.bf16.mxu0 %v7110_v5  ;;  %v4195_v12 = vld [vmem:[%s8681_s20 + $0x1eb0] sm:$0xff]  ;;  %v7190_v5 = vpack.c.bf16 %v4204_v55, %v4196_v15  ;;  %v7128_v50 = vpack.c.bf16 %v4201_v26, %v4193_v54  ;;  %v4533_v15 = vand.u32 2147483647, %v8064_v8  ;;  %v8065_v55 = vld [vmem:[%s8681_s20 + $0x1888] sm:$0xff]  ;;  %v7266_v54 = vpack.c.bf16 %v4534_v43, %v4526_v29  ;;  %v8067_v26 = vld [vmem:[%s8681_s20 + $0x1898] sm:$0xff] }
 0x400   : > { %7175 = vmatprep.subr.bf16.mxu1 %v7174_v42  ;;  %v4212_v42 = vld [vmem:[%s8681_s20 + $0x1f38] sm:$0xff]  ;;  %v7192_v0 = vpack.c.bf16 %v4203_v4, %v4195_v12  ;;  %v4542_v12 = vand.u32 2147483647, %v8067_v26  ;;  %v8080_v29 = vld [vmem:[%s8681_s20 + $0x1950] sm:$0xff]  ;;  %v8081_v43 = vld [vmem:[%s8681_s20 + $0x1988] sm:$0xff] }
 0x401   : > { %v4565_v6 = vand.u32 2147483647, %v8080_v29  ;;  %v8103_v29 = vld [vmem:[%s8681_s20 + $0x1ac0] sm:$0xff] }
 0x402   : > { %7113 = vmatpush1.bf16.msra.mxu0 %v7112_v30  ;;  %v4217_v30 = vld [vmem:[%s8681_s20 + $0x1f60] sm:$0xff] }
 0x403   : > { %7177 = vmatpush1.bf16.msra.mxu1 %v7176_v36  ;;  %7115 = vmatprep.subr.bf16.mxu0 %v7114_v63  ;;  %v4211_v36 = vld [vmem:[%s8681_s20 + $0x1f30] sm:$0xff]  ;;  %v7194_v63 = vpack.c.bf16 %v4220_v46, %v4212_v42  ;;  %v7132_v35 = vpack.c.bf16 %v4217_v30, %v4209_v3  ;;  %v8070_v42 = vld [vmem:[%s8681_s20 + $0x18c0] sm:$0xff] }
 0x404   : > { %7179 = vmatprep.subr.bf16.mxu1 %v7178_v13  ;;  %v4228_v13 = vld [vmem:[%s8681_s20 + $0x1fb8] sm:$0xff]  ;;  %v7196_v53 = vpack.c.bf16 %v4219_v52, %v4211_v36  ;;  %v4547_v46 = vand.u32 2147483647, %v8070_v42  ;;  %v8072_v3 = vld [vmem:[%s8681_s20 + $0x18d0] sm:$0xff]  ;;  %v8073_v52 = vld [vmem:[%s8681_s20 + $0x1908] sm:$0xff] }
 0x405   : > { %v7198_v56 = vpack.c.bf16 %v4236_v49, %v4228_v13  ;;  %v4549_v30 = vand.u32 2147483647, %v8072_v3 }
 0x406   : > { %7117 = vmatpush1.bf16.msra.mxu0 %v7116_v27  ;;  %v7134_v27 = vpack.c.bf16 %v4234_v25, %v4226_v48  ;;  %v4556_v48 = vand.u32 2147483647, %v8073_v52  ;;  %v8074_v25 = vld [vmem:[%s8681_s20 + $0x1948] sm:$0xff]  ;;  %v8095_v52 = vld [vmem:[%s8681_s20 + $0x1a40] sm:$0xff] }
 0x407   : > { %7181 = vmatpush1.bf16.msra.mxu1 %v7180_v60  ;;  %7119 = vmatprep.subr.bf16.mxu0 %v7118_v20  ;;  %v4227_v60 = vld [vmem:[%s8681_s20 + $0x1fb0] sm:$0xff]  ;;  %v4564_v13 = vand.u32 2147483647, %v8074_v25 }
 0x408   : > { %7183 = vmatprep.subr.bf16.mxu1 %v7182_v57  ;;  %v4235_v20 = vld [vmem:[%s8681_s20 + $0x1ff0] sm:$0xff]  ;;  %v4532_v57 = vand.u32 2147483647, %v8058_v31 }
 0x409   : > { %v7210_v47 = vpack.c.bf16 %v4564_v13, %v4556_v48  ;;  %v4595_v48 = vand.u32 2147483647, %v8095_v52  ;;  %v8096_v25 = vld [vmem:[%s8681_s20 + $0x1a10] sm:$0xff] }
 0x40a   : > { %7121 = vmatpush1.bf16.msra.mxu0 %v7120_v7  ;;  %v7136_v7 = vpack.c.bf16 %v4233_v34, %v4225_v18  ;;  %v7202_v21 = vpack.c.bf16 %v4532_v57, %v4524_v11  ;;  %v8076_v34 = vld [vmem:[%s8681_s20 + $0x1958] sm:$0xff]  ;;  %v8078_v11 = vld [vmem:[%s8681_s20 + $0x1940] sm:$0xff]  ;;  %v8079_v57 = vld [vmem:[%s8681_s20 + $0x1910] sm:$0xff]  ;;  %v4589_v13 = vand.u32 2147483647, %v8096_v25 }
 0x40b   : > { %7185 = vmatpush1.bf16.msra.mxu1 %v7184_v1  ;;  %7123 = vmatprep.subr.bf16.mxu0 %v7122_v28  ;;  %v7200_v1 = vpack.c.bf16 %v4235_v20, %v4227_v60  ;;  %v8061_v28 = vld [vmem:[%s8681_s20 + $0x1800] sm:$0xff]  ;;  %v4563_v31 = vand.u32 2147483647, %v8078_v11 }
 0x40c   : > { %7187 = vmatprep.subr.bf16.mxu1 %v7186_v14  ;;  %v4523_v17 = vand.u32 2147483647, %v8061_v28  ;;  %v8063_v14 = vld [vmem:[%s8681_s20 + $0x1810] sm:$0xff]  ;;  %v8077_v20 = vld [vmem:[%s8681_s20 + $0x1900] sm:$0xff] }
 0x40d   : > { %v4525_v2 = vand.u32 2147483647, %v8063_v14  ;;  %v4555_v51 = vand.u32 2147483647, %v8077_v20  ;;  %v8100_v20 = vld [vmem:[%s8681_s20 + $0x1a98] sm:$0xff] }
 0x40e   : > { %7125 = vmatpush1.bf16.msra.mxu0 %v7124_v61  ;;  %v4540_v61 = vand.u32 2147483647, %v8065_v55 }
 0x40f   : > { %7189 = vmatpush1.bf16.msra.mxu1 %v7188_v62  ;;  %7127 = vmatprep.subr.bf16.mxu0 %v7126_v41  ;;  %v8066_v62 = vld [vmem:[%s8681_s20 + $0x18c8] sm:$0xff]  ;;  %v7268_v36 = vpack.c.bf16 %v4533_v15, %v4525_v2  ;;  %v11782_v2 = vld [vmem:[#allocation2 + $0x38] sm:$0xff]  ;;  %v8087_v15 = vld [vmem:[%s8681_s20 + $0x19c0] sm:$0xff] }
 0x410   : > { %7191 = vmatprep.subr.bf16.mxu1 %v7190_v5  ;;  %v4548_v41 = vand.u32 2147483647, %v8066_v62  ;;  %v8068_v5 = vld [vmem:[%s8681_s20 + $0x18d8] sm:$0xff]  ;;  %v4579_v55 = vand.u32 2147483647, %v8087_v15  ;;  %v8088_v62 = vld [vmem:[%s8681_s20 + $0x1990] sm:$0xff] }
 0x411   : > { %v4550_v4 = vand.u32 2147483647, %v8068_v5 }
 0x412   : > { %7129 = vmatpush1.bf16.msra.mxu0 %v7128_v50  ;;  %v7204_v50 = vpack.c.bf16 %v4531_v58, %v4523_v17  ;;  %v8083_v17 = vld [vmem:[%s8681_s20 + $0x1998] sm:$0xff] }
 0x413   : > { %7193 = vmatpush1.bf16.msra.mxu1 %v7192_v0  ;;  %7131 = vmatprep.subr.bf16.mxu0 %v7130_v9  ;;  %v8071_v0 = vld [vmem:[%s8681_s20 + $0x1890] sm:$0xff]  ;;  %v7270_v49 = vpack.c.bf16 %v4550_v4, %v4542_v12  ;;  %v4574_v38 = vand.u32 2147483647, %v8083_v17  ;;  %v8084_v58 = vld [vmem:[%s8681_s20 + $0x19d8] sm:$0xff]  ;;  %v8090_v4 = vld [vmem:[%s8681_s20 + $0x1a08] sm:$0xff] }
 0x414   : > { %7195 = vmatprep.subr.bf16.mxu1 %v7194_v63  ;;  %v4541_v9 = vand.u32 2147483647, %v8071_v0  ;;  %v7206_v63 = vpack.c.bf16 %v4548_v41, %v4540_v61  ;;  %v4582_v14 = vand.u32 2147483647, %v8084_v58  ;;  %v7212_v61 = vpack.c.bf16 %v4563_v31, %v4555_v51  ;;  %v8101_v31 = vld [vmem:[%s8681_s20 + $0x1ad8] sm:$0xff]  ;;  %v8106_v17 = vld [vmem:[%s8681_s20 + $0x1b08] sm:$0xff] }
 0x415   : > { %v4573_v41 = vand.u32 2147483647, %v8088_v62  ;;  %v4588_v45 = vand.u32 2147483647, %v8090_v4  ;;  %v4606_v51 = vand.u32 2147483647, %v8100_v20 }
 0x416   : > { %7133 = vmatpush1.bf16.msra.mxu0 %v7132_v35  ;;  %v8075_v35 = vld [vmem:[%s8681_s20 + $0x1918] sm:$0xff]  ;;  %v7272_v60 = vpack.c.bf16 %v4549_v30, %v4541_v9  ;;  %v8094_v30 = vld [vmem:[%s8681_s20 + $0x1a00] sm:$0xff] }
 0x417   : > { %7197 = vmatpush1.bf16.msra.mxu1 %v7196_v53  ;;  %7135 = vmatprep.subr.bf16.mxu0 %v7134_v27  ;;  %v4558_v18 = vand.u32 2147483647, %v8075_v35  ;;  %v4566_v53 = vand.u32 2147483647, %v8076_v34  ;;  %v7208_v27 = vpack.c.bf16 %v4547_v46, %v4539_v37  ;;  %v8091_v37 = vld [vmem:[%s8681_s20 + $0x1a48] sm:$0xff]  ;;  %v7278_v46 = vpack.c.bf16 %v4582_v14, %v4574_v38  ;;  %v8093_v9 = vld [vmem:[%s8681_s20 + $0x1a58] sm:$0xff] }
 0x418   : > { %7199 = vmatprep.subr.bf16.mxu1 %v7198_v56  ;;  %v4557_v56 = vand.u32 2147483647, %v8079_v57  ;;  %v4596_v42 = vand.u32 2147483647, %v8091_v37  ;;  %v4598_v3 = vand.u32 2147483647, %v8093_v9 }
 0x419   : > { %v7274_v28 = vpack.c.bf16 %v4566_v53, %v4558_v18  ;;  %v8098_v34 = vld [vmem:[%s8681_s20 + $0x1a88] sm:$0xff]  ;;  %v4614_v57 = vand.u32 2147483647, %v8101_v31  ;;  %v4620_v38 = vand.u32 2147483647, %v8106_v17  ;;  %v8113_v37 = vld [vmem:[%s8681_s20 + $0x1b50] sm:$0xff] }
 0x41a   : > { %7137 = vmatpush1.bf16.msra.mxu0 %v7136_v7  ;;  %v8082_v7 = vld [vmem:[%s8681_s20 + $0x19c8] sm:$0xff]  ;;  %v7276_v12 = vpack.c.bf16 %v4565_v6, %v4557_v56  ;;  %v4604_v53 = vand.u32 2147483647, %v8098_v34  ;;  %v7218_v11 = vpack.c.bf16 %v4596_v42, %v4588_v45  ;;  %v8102_v56 = vld [vmem:[%s8681_s20 + $0x1a80] sm:$0xff]  ;;  %v4611_v6 = vand.u32 2147483647, %v8103_v29 }
 0x41b   : > { %7201 = vmatpush1.bf16.msra.mxu1 %v7200_v1  ;;  %7203 = vmatprep.subr.bf16.mxu0 %v7202_v21  ;;  %v4580_v1 = vand.u32 2147483647, %v8082_v7  ;;  %v8086_v21 = vld [vmem:[%s8681_s20 + $0x1980] sm:$0xff]  ;;  %v8107_v14 = vld [vmem:[%s8681_s20 + $0x1b48] sm:$0xff]  ;;  %v4629_v42 = vand.u32 2147483647, %v8113_v37 }
 0x41c   : > { %7267 = vmatprep.subr.bf16.mxu1 %v7266_v54  ;;  %v4571_v8 = vand.u32 2147483647, %v8086_v21  ;;  %v8089_v54 = vld [vmem:[%s8681_s20 + $0x19d0] sm:$0xff]  ;;  %v4628_v21 = vand.u32 2147483647, %v8107_v14 }
 0x41d   : > { %4446 = vmatmul.mubr.f32.vlgmr.msra.gmra.mrb[26].mxu0 %v11622_v23  ;;  %v4581_v26 = vand.u32 2147483647, %v8089_v54  ;;  %v4645_v34 = vand.u32 2147483647, %v11542_v19  ;;  %v8122_v19 = vld [vmem:[%s8681_s20 + $0x1c18] sm:$0xff] }
 0x41e   : > { %4517 = vmatmul.mubr.f32.vlgmr.msra.gmra.mrb[26].mxu1 %v11622_v23  ;;  %7205 = vmatpush1.bf16.msra.mxu0 %v7204_v50  ;;  %v4572_v23 = vand.u32 2147483647, %v8081_v43  ;;  %v8092_v50 = vld [vmem:[%s8681_s20 + $0x1a18] sm:$0xff] }
 0x41f   : > { %7269 = vmatpush1.bf16.msra.mxu1 %v7268_v36  ;;  %7207 = vmatprep.subr.bf16.mxu0 %v7206_v63  ;;  %v4590_v0 = vand.u32 2147483647, %v8092_v50  ;;  %v4587_v36 = vand.u32 2147483647, %v8094_v30  ;;  %v7216_v63 = vpack.c.bf16 %v4579_v55, %v4571_v8  ;;  %v7280_v18 = vpack.c.bf16 %v4581_v26, %v4573_v41  ;;  %v8108_v8 = vld [vmem:[%s8681_s20 + $0x1b18] sm:$0xff]  ;;  %v8110_v41 = vld [vmem:[%s8681_s20 + $0x1b00] sm:$0xff] }
 0x420   : > { %7271 = vmatprep.subr.bf16.mxu1 %v7270_v49  ;;  %4843 = vmatprep.mubr.f32.mxu0 %v11782_v2  ;;  %v7214_v5 = vpack.c.bf16 %v4580_v1, %v4572_v23  ;;  %v8097_v49 = vld [vmem:[%s8681_s20 + $0x1a50] sm:$0xff]  ;;  %v4622_v15 = vand.u32 2147483647, %v8108_v8  ;;  %v8109_v55 = vld [vmem:[%s8681_s20 + $0x1b58] sm:$0xff]  ;;  %v4619_v54 = vand.u32 2147483647, %v8110_v41 }
 0x421   : > { %4914 = vmatprep.mubr.f32.mxu1 %v11782_v2  ;;  %v4597_v35 = vand.u32 2147483647, %v8097_v49  ;;  %v7282_v43 = vpack.c.bf16 %v4598_v3, %v4590_v0  ;;  %v8104_v23 = vld [vmem:[%s8681_s20 + $0x1a90] sm:$0xff]  ;;  %v7220_v58 = vpack.c.bf16 %v4595_v48, %v4587_v36  ;;  %v8111_v26 = vld [vmem:[%s8681_s20 + $0x1b40] sm:$0xff]  ;;  %v8115_v0 = vld [vmem:[%s8681_s20 + $0x1bc8] sm:$0xff]  ;;  %v7286_v3 = vpack.c.bf16 %v4614_v57, %v4606_v51 }
 0x422   : > { %7209 = vmatpush1.bf16.msra.mxu0 %v7208_v27  ;;  %v8099_v27 = vld [vmem:[%s8681_s20 + $0x1ac8] sm:$0xff]  ;;  %v4605_v7 = vand.u32 2147483647, %v8104_v23  ;;  %v8105_v1 = vld [vmem:[%s8681_s20 + $0x1ad0] sm:$0xff]  ;;  %v4644_v9 = vand.u32 2147483647, %v8115_v0 }
 0x423   : > { %7273 = vmatpush1.bf16.msra.mxu1 %v7272_v60  ;;  %7211 = vmatprep.subr.bf16.mxu0 %v7210_v47  ;;  %v4612_v60 = vand.u32 2147483647, %v8099_v27  ;;  %v4603_v47 = vand.u32 2147483647, %v8102_v56  ;;  %v7284_v62 = vpack.c.bf16 %v4597_v35, %v4589_v13  ;;  %v8116_v30 = vld [vmem:[%s8681_s20 + $0x1b98] sm:$0xff]  ;;  %v8118_v13 = vld [vmem:[%s8681_s20 + $0x1bc0] sm:$0xff]  ;;  %v7226_v27 = vpack.c.bf16 %v4628_v21, %v4620_v38 }
 0x424   : > { %7275 = vmatprep.subr.bf16.mxu1 %v7274_v28  ;;  %v4613_v28 = vand.u32 2147483647, %v8105_v1  ;;  %v4638_v36 = vand.u32 2147483647, %v8116_v30  ;;  %v4635_v48 = vand.u32 2147483647, %v11537_v33 }
 0x425   : > { %v7222_v45 = vpack.c.bf16 %v4612_v60, %v4604_v53  ;;  %v7224_v25 = vpack.c.bf16 %v4611_v6, %v4603_v47  ;;  %v4643_v49 = vand.u32 2147483647, %v8118_v13  ;;  %v8119_v35 = vld [vmem:[%s8681_s20 + $0x1b90] sm:$0xff]  ;;  %v8120_v60 = vld [vmem:[%s8681_s20 + $0x1c08] sm:$0xff]  ;;  %v4654_v6 = vand.u32 2147483647, %v8122_v19 }
 0x426   : > { %7213 = vmatpush1.bf16.msra.mxu0 %v7212_v61  ;;  %v4630_v61 = vand.u32 2147483647, %v8109_v55  ;;  %v7288_v53 = vpack.c.bf16 %v4613_v28, %v4605_v7  ;;  %v4652_v20 = vand.u32 2147483647, %v8120_v60  ;;  %v8121_v51 = vld [vmem:[%s8681_s20 + $0x1c48] sm:$0xff]  ;;  %v8127_v0 = vld [vmem:[%s8681_s20 + $0x1c50] sm:$0xff] }
 0x427   : > { %7277 = vmatpush1.bf16.msra.mxu1 %v7276_v12  ;;  %7215 = vmatprep.subr.bf16.mxu0 %v7214_v5  ;;  %v4627_v12 = vand.u32 2147483647, %v8111_v26  ;;  %v8112_v5 = vld [vmem:[%s8681_s20 + $0x1b10] sm:$0xff]  ;;  %v7232_v17 = vpack.c.bf16 %v4643_v49, %v4635_v48  ;;  %v8130_v49 = vld [vmem:[%s8681_s20 + $0x1c98] sm:$0xff]  ;;  %v8132_v60 = vld [vmem:[%s8681_s20 + $0x1c80] sm:$0xff] }
 0x428   : > { %7279 = vmatprep.subr.bf16.mxu1 %v7278_v46  ;;  %v4621_v4 = vand.u32 2147483647, %v8112_v5  ;;  %v8114_v46 = vld [vmem:[%s8681_s20 + $0x1b88] sm:$0xff]  ;;  %v7290_v31 = vpack.c.bf16 %v4630_v61, %v4622_v15  ;;  %v8125_v61 = vld [vmem:[%s8681_s20 + $0x1c40] sm:$0xff] }
 0x429   : > { %v4636_v50 = vand.u32 2147483647, %v8114_v46  ;;  %v7228_v33 = vpack.c.bf16 %v4627_v12, %v4619_v54  ;;  %v8126_v12 = vld [vmem:[%s8681_s20 + $0x1c10] sm:$0xff] }
 0x42a   : > { %7217 = vmatpush1.bf16.msra.mxu0 %v7216_v63  ;;  %v8117_v63 = vld [vmem:[%s8681_s20 + $0x1bd8] sm:$0xff]  ;;  %v7292_v57 = vpack.c.bf16 %v4629_v42, %v4621_v4  ;;  %v4653_v5 = vand.u32 2147483647, %v8126_v12  ;;  %v8143_v12 = vld [vmem:[%s8681_s20 + $0x1d50] sm:$0xff] }
 0x42b   : > { %7281 = vmatpush1.bf16.msra.mxu1 %v7280_v18  ;;  %7219 = vmatprep.subr.bf16.mxu0 %v7218_v11  ;;  %v4646_v52 = vand.u32 2147483647, %v8117_v63  ;;  %v4637_v18 = vand.u32 2147483647, %v8119_v35  ;;  %v4660_v11 = vand.u32 2147483647, %v8121_v51  ;;  %v7230_v47 = vpack.c.bf16 %v4644_v9, %v4636_v50 }
 0x42c   : > { %7283 = vmatprep.subr.bf16.mxu1 %v7282_v43  ;;  %v8123_v43 = vld [vmem:[%s8681_s20 + $0x1c58] sm:$0xff]  ;;  %v4661_v9 = vand.u32 2147483647, %v8127_v0  ;;  %v4670_v35 = vand.u32 2147483647, %v8130_v49  ;;  %v8133_v51 = vld [vmem:[%s8681_s20 + $0x1cc0] sm:$0xff] }
 0x42d   : > { %v7294_v29 = vpack.c.bf16 %v4646_v52, %v4638_v36  ;;  %v4662_v23 = vand.u32 2147483647, %v8123_v43  ;;  %v7296_v38 = vpack.c.bf16 %v4645_v34, %v4637_v18  ;;  %v7234_v55 = vpack.c.bf16 %v4660_v11, %v4652_v20  ;;  %v8128_v36 = vld [vmem:[%s8681_s20 + $0x1c88] sm:$0xff]  ;;  %v8131_v18 = vld [vmem:[%s8681_s20 + $0x1cd8] sm:$0xff] }
 0x42e   : > { %7221 = vmatpush1.bf16.msra.mxu0 %v7220_v58  ;;  %v8124_v58 = vld [vmem:[%s8681_s20 + $0x1c00] sm:$0xff]  ;;  %v4668_v63 = vand.u32 2147483647, %v8128_v36  ;;  %v4678_v34 = vand.u32 2147483647, %v8131_v18  ;;  %v8136_v43 = vld [vmem:[%s8681_s20 + $0x1d08] sm:$0xff] }
 0x42f   : > { %7285 = vmatpush1.bf16.msra.mxu1 %v7284_v62  ;;  %7223 = vmatprep.subr.bf16.mxu0 %v7222_v45  ;;  %v4651_v14 = vand.u32 2147483647, %v8124_v58  ;;  %v4659_v62 = vand.u32 2147483647, %v8125_v61  ;;  %v7298_v50 = vpack.c.bf16 %v4662_v23, %v4654_v6  ;;  %v4667_v20 = vand.u32 2147483647, %v8132_v60 }
 0x430   : > { %v3601_v56 = vpop.f32.mrb[20].mxu0  ;;  %7287 = vmatprep.subr.bf16.mxu1 %v7286_v3  ;;  %v4675_v11 = vand.u32 2147483647, %v8133_v51  ;;  %v4684_v23 = vand.u32 2147483647, %v8136_v43  ;;  %v8141_v61 = vld [vmem:[%s8681_s20 + $0x1d40] sm:$0xff] }
 0x431   : > { %v3828_v7 = vrot.slane %v3601_v56, 1  ;;  %v3672_v1 = vpop.f32.mrb[20].mxu1  ;;  %v3603_v28 = vpop.f32.mrb[21].mxu0  ;;  %v8147_v0 = vld [vmem:[%s8681_s20 + $0x1dd8] sm:$0xff]  ;;  %v8149_v36 = vld [vmem:[%s8681_s20 + $0x1dc0] sm:$0xff]  ;;  %v8152_v18 = vld [vmem:[%s8681_s20 + $0x1e08] sm:$0xff] }
 0x432   : > { %v3830_v21 = vrot.slane %v3672_v1, 1  ;;  %v3829_v8 = vrot.slane %v3603_v28, 1  ;;  %v3674_v15 = vpop.f32.mrb[21].mxu1  ;;  %7225 = vmatpush1.bf16.msra.mxu0 %v7224_v25  ;;  %v7236_v25 = vpack.c.bf16 %v4659_v62, %v4651_v14  ;;  %v7302_v28 = vpack.c.bf16 %v4678_v34, %v4670_v35  ;;  %v8139_v14 = vld [vmem:[%s8681_s20 + $0x1d58] sm:$0xff]  ;;  %v8153_v60 = vld [vmem:[%s8681_s20 + $0x1e48] sm:$0xff] }
 0x433   : > { %v3844_v41 = vsub.f32 %v11523_v40, %v3828_v7  ;;  %v3913_v54 = vadd.f32 %v3828_v7, %v11523_v40  ;;  %v3831_v26 = vrot.slane %v3674_v15, 1  ;;  %7289 = vmatpush1.bf16.msra.mxu1 %v7288_v53  ;;  %7227 = vmatprep.subr.bf16.mxu0 %v7226_v27  ;;  %v8137_v7 = vld [vmem:[%s8681_s20 + $0x1d48] sm:$0xff]  ;;  %v4691_v62 = vand.u32 2147483647, %v8141_v61  ;;  %v8162_v61 = vld [vmem:[%s8681_s20 + $0x1e98] sm:$0xff] }
 0x434   : > { %v3846_v4 = vsub.f32 %v11528_v22, %v3830_v21  ;;  %v3915_v45 = vadd.f32 %v3830_v21, %v11528_v22  ;;  %v3845_v37 = vsub.f32 %v11530_v59, %v3829_v8  ;;  %v3914_v42 = vadd.f32 %v3829_v8, %v11530_v59  ;;  %7291 = vmatprep.subr.bf16.mxu1 %v7290_v31  ;;  %v8129_v22 = vld [vmem:[%s8681_s20 + $0x1cc8] sm:$0xff] }
 0x435   : > { %v3847_v46 = vsub.f32 %v11534_v10, %v3831_v26  ;;  %v3916_v40 = vadd.f32 %v3831_v26, %v11534_v10  ;;  %v4676_v52 = vand.u32 2147483647, %v8129_v22  ;;  %v7300_v31 = vpack.c.bf16 %v4661_v9, %v4653_v5 }
 0x436   : > { %v3860_v3 = vcombine.low %v3844_v41, %v3845_v37  ;;  %v3929_v30 = vcombine.low %v3913_v54, %v3914_v42  ;;  %7229 = vmatpush1.bf16.msra.mxu0 %v7228_v33  ;;  %v4692_v1 = vand.u32 2147483647, %v8137_v7  ;;  %v4694_v21 = vand.u32 2147483647, %v8139_v14  ;;  %v8142_v41 = vld [vmem:[%s8681_s20 + $0x1d10] sm:$0xff]  ;;  %v8145_v37 = vld [vmem:[%s8681_s20 + $0x1dc8] sm:$0xff] }
 0x437   : > { %v3861_v48 = vcombine.low %v3846_v4, %v3847_v46  ;;  %v3930_v59 = vcombine.low %v3915_v45, %v3916_v40  ;;  %7293 = vmatpush1.bf16.msra.mxu1 %v7292_v57  ;;  %7231 = vmatprep.subr.bf16.mxu0 %v7230_v47  ;;  %v7238_v33 = vpack.c.bf16 %v4676_v52, %v4668_v63  ;;  %v8134_v57 = vld [vmem:[%s8681_s20 + $0x1c90] sm:$0xff]  ;;  %v4685_v54 = vand.u32 2147483647, %v8142_v41  ;;  %v8144_v4 = vld [vmem:[%s8681_s20 + $0x1d88] sm:$0xff]  ;;  %v8146_v40 = vld [vmem:[%s8681_s20 + $0x1d98] sm:$0xff] }
 0x438   : > { %v11841_v10 = vrot.slane %v3860_v3, %v10599_v39  ;;  %v11844_v13 = vrot.slane %v3929_v30, %v10599_v39  ;;  %7295 = vmatprep.subr.bf16.mxu1 %v7294_v29  ;;  %v4669_v56 = vand.u32 2147483647, %v8134_v57  ;;  %v8135_v47 = vld [vmem:[%s8681_s20 + $0x1cd0] sm:$0xff]  ;;  %v7240_v8 = vpack.c.bf16 %v4675_v11, %v4667_v20  ;;  %v8148_v3 = vld [vmem:[%s8681_s20 + $0x1d80] sm:$0xff]  ;;  %v8154_v11 = vld [vmem:[%s8681_s20 + $0x1e18] sm:$0xff] }
 0x439   : > { %v11849_v53 = vrot.slane %v3861_v48, %v10599_v39  ;;  %v11852_v27 = vrot.slane %v3930_v59, %v10599_v39  ;;  %v4677_v29 = vand.u32 2147483647, %v8135_v47  ;;  %v7242_v26 = vpack.c.bf16 %v4692_v1, %v4684_v23  ;;  %v8150_v52 = vld [vmem:[%s8681_s20 + $0x1d90] sm:$0xff]  ;;  %v8157_v23 = vld [vmem:[%s8681_s20 + $0x1e40] sm:$0xff]  ;;  %v8163_v41 = vld [vmem:[%s8681_s20 + $0x1ed8] sm:$0xff] }
 0x43a   : > { %7233 = vmatpush1.bf16.msra.mxu0 %v7232_v17  ;;  %v8138_v17 = vld [vmem:[%s8681_s20 + $0x1d18] sm:$0xff]  ;;  %v4693_v5 = vand.u32 2147483647, %v8143_v12  ;;  %v4700_v45 = vand.u32 2147483647, %v8144_v4  ;;  %v8151_v59 = vld [vmem:[%s8681_s20 + $0x1dd0] sm:$0xff] }
 0x43b   : > { %v3892_v19 = vcombine.low %v11841_v10, %v11849_v53  ;;  %v3961_v6 = vcombine.low %v11844_v13, %v11852_v27  ;;  %7297 = vmatpush1.bf16.msra.mxu1 %v7296_v38  ;;  %7235 = vmatprep.subr.bf16.mxu0 %v7234_v55  ;;  %v4686_v58 = vand.u32 2147483647, %v8138_v17  ;;  %v7304_v15 = vpack.c.bf16 %v4677_v29, %v4669_v56  ;;  %v8140_v38 = vld [vmem:[%s8681_s20 + $0x1d00] sm:$0xff]  ;;  %v8158_v1 = vld [vmem:[%s8681_s20 + $0x1e10] sm:$0xff] }
 0x43c   : > { %7299 = vmatprep.subr.bf16.mxu1 %v7298_v50  ;;  %v4683_v55 = vand.u32 2147483647, %v8140_v38  ;;  %v4708_v42 = vand.u32 2147483647, %v8145_v37  ;;  %v4702_v50 = vand.u32 2147483647, %v8146_v40  ;;  %v7308_v49 = vpack.c.bf16 %v4693_v5, %v4685_v54 }
 0x43d   : > { %v7306_v46 = vpack.c.bf16 %v4694_v21, %v4686_v58  ;;  %v4710_v9 = vand.u32 2147483647, %v8147_v0  ;;  %v4699_v30 = vand.u32 2147483647, %v8148_v3  ;;  %v4707_v63 = vand.u32 2147483647, %v8149_v36 }
 0x43e   : > { %7237 = vmatpush1.bf16.msra.mxu0 %v7236_v25  ;;  %v7244_v22 = vpack.c.bf16 %v4691_v62, %v4683_v55  ;;  %v4701_v48 = vand.u32 2147483647, %v8150_v52  ;;  %v4709_v25 = vand.u32 2147483647, %v8151_v59  ;;  %v7246_v35 = vpack.c.bf16 %v4708_v42, %v4700_v45  ;;  %v8156_v29 = vld [vmem:[%s8681_s20 + $0x1e00] sm:$0xff]  ;;  %v8159_v58 = vld [vmem:[%s8681_s20 + $0x1e50] sm:$0xff] }
 0x43f   : > { %7301 = vmatpush1.bf16.msra.mxu1 %v7300_v31  ;;  %7239 = vmatprep.subr.bf16.mxu0 %v7238_v33  ;;  %v4716_v34 = vand.u32 2147483647, %v8152_v18  ;;  %v4724_v20 = vand.u32 2147483647, %v8153_v60  ;;  %v7310_v51 = vpack.c.bf16 %v4710_v9, %v4702_v50  ;;  %v4718_v31 = vand.u32 2147483647, %v8154_v11 }
 0x440   : > { %7303 = vmatprep.subr.bf16.mxu1 %v7302_v28  ;;  %v8155_v33 = vld [vmem:[%s8681_s20 + $0x1e58] sm:$0xff]  ;;  %v7248_v56 = vpack.c.bf16 %v4707_v63, %v4699_v30  ;;  %v7312_v47 = vpack.c.bf16 %v4709_v25, %v4701_v48  ;;  %v4715_v43 = vand.u32 2147483647, %v8156_v29  ;;  %v4723_v7 = vand.u32 2147483647, %v8157_v23  ;;  %v8160_v21 = vld [vmem:[%s8681_s20 + $0x1e88] sm:$0xff] }
 0x441   : > { %v4726_v57 = vand.u32 2147483647, %v8155_v33  ;;  %v4717_v28 = vand.u32 2147483647, %v8158_v1  ;;  %v7250_v17 = vpack.c.bf16 %v4724_v20, %v4716_v34  ;;  %v4725_v14 = vand.u32 2147483647, %v8159_v58 }
 0x442   : > { %7241 = vmatpush1.bf16.msra.mxu0 %v7240_v8  ;;  %v4732_v8 = vand.u32 2147483647, %v8160_v21  ;;  %v4734_v62 = vand.u32 2147483647, %v8162_v61  ;;  %v4742_v54 = vand.u32 2147483647, %v8163_v41  ;;  %v7252_v45 = vpack.c.bf16 %v4723_v7, %v4715_v43 }
 0x443   : > { %7305 = vmatpush1.bf16.msra.mxu1 %v7304_v15  ;;  %7243 = vmatprep.subr.bf16.mxu0 %v7242_v26  ;;  %v8161_v15 = vld [vmem:[%s8681_s20 + $0x1ec8] sm:$0xff]  ;;  %v7314_v55 = vpack.c.bf16 %v4726_v57, %v4718_v31  ;;  %v8164_v26 = vld [vmem:[%s8681_s20 + $0x1e80] sm:$0xff]  ;;  %v8166_v37 = vld [vmem:[%s8681_s20 + $0x1e90] sm:$0xff]  ;;  %v7316_v50 = vpack.c.bf16 %v4725_v14, %v4717_v28 }
 0x444   : > { %7307 = vmatprep.subr.bf16.mxu1 %v7306_v46  ;;  %v4740_v38 = vand.u32 2147483647, %v8161_v15  ;;  %v4731_v12 = vand.u32 2147483647, %v8164_v26  ;;  %v8165_v5 = vld [vmem:[%s8681_s20 + $0x1ec0] sm:$0xff]  ;;  %v8167_v46 = vld [vmem:[%s8681_s20 + $0x1ed0] sm:$0xff]  ;;  %v7318_v63 = vpack.c.bf16 %v4742_v54, %v4734_v62 }
 0x445   : > { %v4739_v4 = vand.u32 2147483647, %v8165_v5  ;;  %v4733_v42 = vand.u32 2147483647, %v8166_v37  ;;  %v4741_v40 = vand.u32 2147483647, %v8167_v46 }
 0x446   : > { %7245 = vmatpush1.bf16.msra.mxu0 %v7244_v22  ;;  %v7254_v0 = vpack.c.bf16 %v4740_v38, %v4732_v8  ;;  %v8168_v9 = vld [vmem:[%s8681_s20 + $0x1f08] sm:$0xff]  ;;  %v8170_v22 = vld [vmem:[%s8681_s20 + $0x1f18] sm:$0xff]  ;;  %v8173_v34 = vld [vmem:[%s8681_s20 + $0x1f40] sm:$0xff] }
 0x447   : > { %7309 = vmatpush1.bf16.msra.mxu1 %v7308_v49  ;;  %7247 = vmatprep.subr.bf16.mxu0 %v7246_v35  ;;  %v4748_v3 = vand.u32 2147483647, %v8168_v9  ;;  %v8169_v30 = vld [vmem:[%s8681_s20 + $0x1f48] sm:$0xff]  ;;  %v4750_v52 = vand.u32 2147483647, %v8170_v22  ;;  %v8171_v48 = vld [vmem:[%s8681_s20 + $0x1f58] sm:$0xff]  ;;  %v7256_v25 = vpack.c.bf16 %v4739_v4, %v4731_v12  ;;  %v7320_v49 = vpack.c.bf16 %v4741_v40, %v4733_v42 }
 0x448   : > { %7311 = vmatprep.subr.bf16.mxu1 %v7310_v51  ;;  %v4756_v36 = vand.u32 2147483647, %v8169_v30  ;;  %v4758_v59 = vand.u32 2147483647, %v8171_v48  ;;  %v8172_v35 = vld [vmem:[%s8681_s20 + $0x1f00] sm:$0xff]  ;;  %v8174_v20 = vld [vmem:[%s8681_s20 + $0x1f10] sm:$0xff] }
 0x449   : > { %v4747_v18 = vand.u32 2147483647, %v8172_v35  ;;  %v4755_v60 = vand.u32 2147483647, %v8173_v34  ;;  %v4749_v51 = vand.u32 2147483647, %v8174_v20 }
 0x44a   : > { %7249 = vmatpush1.bf16.msra.mxu0 %v7248_v56  ;;  %v7258_v11 = vpack.c.bf16 %v4756_v36, %v4748_v3  ;;  %v8175_v31 = vld [vmem:[%s8681_s20 + $0x1f50] sm:$0xff]  ;;  %v8176_v57 = vld [vmem:[%s8681_s20 + $0x1f88] sm:$0xff]  ;;  %v7322_v43 = vpack.c.bf16 %v4758_v59, %v4750_v52  ;;  %v8178_v23 = vld [vmem:[%s8681_s20 + $0x1f98] sm:$0xff] }
 0x44b   : > { %7313 = vmatpush1.bf16.msra.mxu1 %v7312_v47  ;;  %7251 = vmatprep.subr.bf16.mxu0 %v7250_v17  ;;  %v4757_v33 = vand.u32 2147483647, %v8175_v31  ;;  %v4764_v56 = vand.u32 2147483647, %v8176_v57  ;;  %v8177_v47 = vld [vmem:[%s8681_s20 + $0x1fc8] sm:$0xff]  ;;  %v8179_v1 = vld [vmem:[%s8681_s20 + $0x1fd8] sm:$0xff]  ;;  %v7260_v8 = vpack.c.bf16 %v4755_v60, %v4747_v18 }
 0x44c   : > { %7315 = vmatprep.subr.bf16.mxu1 %v7314_v55  ;;  %v4772_v29 = vand.u32 2147483647, %v8177_v47  ;;  %v4766_v7 = vand.u32 2147483647, %v8178_v23  ;;  %v4774_v28 = vand.u32 2147483647, %v8179_v1 }
 0x44d   : > { %v8180_v17 = vld [vmem:[%s8681_s20 + $0x1f80] sm:$0xff]  ;;  %v8182_v15 = vld [vmem:[%s8681_s20 + $0x1f90] sm:$0xff]  ;;  %v7324_v62 = vpack.c.bf16 %v4757_v33, %v4749_v51  ;;  %v8184_v54 = vld [vmem:[%s8681_s20 + $0x1828] sm:$0xff] }
 0x44e   : > { %7253 = vmatpush1.bf16.msra.mxu0 %v7252_v45  ;;  %v4763_v58 = vand.u32 2147483647, %v8180_v17  ;;  %v8181_v14 = vld [vmem:[%s8681_s20 + $0x1fc0] sm:$0xff]  ;;  %v4765_v38 = vand.u32 2147483647, %v8182_v15  ;;  %v8183_v55 = vld [vmem:[%s8681_s20 + $0x1fd0] sm:$0xff]  ;;  %v7262_v41 = vpack.c.bf16 %v4772_v29, %v4764_v56  ;;  %v7326_v4 = vpack.c.bf16 %v4774_v28, %v4766_v7 }
 0x44f   : > { %7317 = vmatpush1.bf16.msra.mxu1 %v7316_v50  ;;  %7255 = vmatprep.subr.bf16.mxu0 %v7254_v0  ;;  %v4771_v21 = vand.u32 2147483647, %v8181_v14  ;;  %v4773_v61 = vand.u32 2147483647, %v8183_v55  ;;  %v4528_v26 = vand.u32 2147483647, %v8184_v54 }
 0x450   : > { %7319 = vmatprep.subr.bf16.mxu1 %v7318_v63  ;;  %v8185_v12 = vld [vmem:[%s8681_s20 + $0x1868] sm:$0xff]  ;;  %v8186_v45 = vld [vmem:[%s8681_s20 + $0x1838] sm:$0xff]  ;;  %v8188_v0 = vld [vmem:[%s8681_s20 + $0x1820] sm:$0xff] }
 0x451   : > { %v4536_v5 = vand.u32 2147483647, %v8185_v12  ;;  %v4530_v37 = vand.u32 2147483647, %v8186_v45  ;;  %v8187_v42 = vld [vmem:[%s8681_s20 + $0x1878] sm:$0xff]  ;;  %v7264_v40 = vpack.c.bf16 %v4771_v21, %v4763_v58  ;;  %v7328_v50 = vpack.c.bf16 %v4773_v61, %v4765_v38  ;;  %v8189_v3 = vld [vmem:[%s8681_s20 + $0x1860] sm:$0xff] }
 0x452   : > { %7257 = vmatpush1.bf16.msra.mxu0 %v7256_v25  ;;  %v4538_v46 = vand.u32 2147483647, %v8187_v42  ;;  %v4527_v9 = vand.u32 2147483647, %v8188_v0  ;;  %v4535_v30 = vand.u32 2147483647, %v8189_v3 }
 0x453   : > { %7321 = vmatpush1.bf16.msra.mxu1 %v7320_v49  ;;  %7259 = vmatprep.subr.bf16.mxu0 %v7258_v11  ;;  %v8190_v36 = vld [vmem:[%s8681_s20 + $0x1830] sm:$0xff]  ;;  %v7330_v22 = vpack.c.bf16 %v4536_v5, %v4528_v26  ;;  %v8192_v59 = vld [vmem:[%s8681_s20 + $0x18a8] sm:$0xff]  ;;  %v8194_v34 = vld [vmem:[%s8681_s20 + $0x18b8] sm:$0xff] }
 0x454   : > { %7323 = vmatprep.subr.bf16.mxu1 %v7322_v43  ;;  %v4529_v63 = vand.u32 2147483647, %v8190_v36  ;;  %v8191_v52 = vld [vmem:[%s8681_s20 + $0x1870] sm:$0xff]  ;;  %v4544_v25 = vand.u32 2147483647, %v8192_v59  ;;  %v8193_v49 = vld [vmem:[%s8681_s20 + $0x18e8] sm:$0xff]  ;;  %v7394_v18 = vpack.c.bf16 %v4538_v46, %v4530_v37  ;;  %v7332_v56 = vpack.c.bf16 %v4535_v30, %v4527_v9 }
 0x455   : > { %v4537_v48 = vand.u32 2147483647, %v8191_v52  ;;  %v4552_v35 = vand.u32 2147483647, %v8193_v49  ;;  %v4546_v60 = vand.u32 2147483647, %v8194_v34 }
 0x456   : > { %7261 = vmatpush1.bf16.msra.mxu0 %v7260_v8  ;;  %v8195_v20 = vld [vmem:[%s8681_s20 + $0x18f8] sm:$0xff]  ;;  %v8196_v11 = vld [vmem:[%s8681_s20 + $0x18a0] sm:$0xff]  ;;  %v8198_v47 = vld [vmem:[%s8681_s20 + $0x18b0] sm:$0xff] }
 0x457   : > { %7325 = vmatpush1.bf16.msra.mxu1 %v7324_v62  ;;  %7263 = vmatprep.subr.bf16.mxu0 %v7262_v41  ;;  %v4554_v51 = vand.u32 2147483647, %v8195_v20  ;;  %v4543_v31 = vand.u32 2147483647, %v8196_v11  ;;  %v8197_v33 = vld [vmem:[%s8681_s20 + $0x18e0] sm:$0xff]  ;;  %v8199_v43 = vld [vmem:[%s8681_s20 + $0x18f0] sm:$0xff]  ;;  %v7396_v7 = vpack.c.bf16 %v4537_v48, %v4529_v63  ;;  %v7334_v1 = vpack.c.bf16 %v4552_v35, %v4544_v25 }
 0x458   : > { %7327 = vmatprep.subr.bf16.mxu1 %v7326_v4  ;;  %v4551_v57 = vand.u32 2147483647, %v8197_v33  ;;  %v4545_v29 = vand.u32 2147483647, %v8198_v47  ;;  %v4553_v23 = vand.u32 2147483647, %v8199_v43 }
 0x459   : > { %v8200_v28 = vld [vmem:[%s8681_s20 + $0x1928] sm:$0xff]  ;;  %v7398_v21 = vpack.c.bf16 %v4554_v51, %v4546_v60  ;;  %v8202_v8 = vld [vmem:[%s8681_s20 + $0x1938] sm:$0xff]  ;;  %v11930_v61 = vld [vmem:[#allocation2 + $0x30] sm:$0xff] }
 0x45a   : > { %7265 = vmatpush1.bf16.msra.mxu0 %v7264_v40  ;;  %v4560_v17 = vand.u32 2147483647, %v8200_v28  ;;  %v8201_v58 = vld [vmem:[%s8681_s20 + $0x1968] sm:$0xff]  ;;  %v4562_v15 = vand.u32 2147483647, %v8202_v8  ;;  %v8203_v38 = vld [vmem:[%s8681_s20 + $0x1978] sm:$0xff]  ;;  %v7336_v62 = vpack.c.bf16 %v4551_v57, %v4543_v31  ;;  %v7400_v41 = vpack.c.bf16 %v4553_v23, %v4545_v29 }
 0x45b   : > { %7329 = vmatpush1.bf16.msra.mxu1 %v7328_v50  ;;  %7331 = vmatprep.subr.bf16.mxu0 %v7330_v22  ;;  %v4568_v14 = vand.u32 2147483647, %v8201_v58  ;;  %v4570_v55 = vand.u32 2147483647, %v8203_v38  ;;  %v8205_v54 = vld [vmem:[%s8681_s20 + $0x1920] sm:$0xff]  ;;  %v8207_v4 = vld [vmem:[%s8681_s20 + $0x1930] sm:$0xff] }
 0x45c   : > { %7395 = vmatprep.subr.bf16.mxu1 %v7394_v18  ;;  %v4559_v26 = vand.u32 2147483647, %v8205_v54  ;;  %v8206_v12 = vld [vmem:[%s8681_s20 + $0x1960] sm:$0xff]  ;;  %v4561_v45 = vand.u32 2147483647, %v8207_v4  ;;  %v8208_v42 = vld [vmem:[%s8681_s20 + $0x1970] sm:$0xff] }
 0x45d   : > { %4844 = vmatmul.mubr.f32.vlgmr.msra.gmra.mrb[28].mxu0 %v11930_v61  ;;  %v4567_v5 = vand.u32 2147483647, %v8206_v12  ;;  %v7338_v37 = vpack.c.bf16 %v4568_v14, %v4560_v17  ;;  %v4569_v46 = vand.u32 2147483647, %v8208_v42  ;;  %v8209_v40 = vld [vmem:[%s8681_s20 + $0x19a8] sm:$0xff]  ;;  %v7402_v3 = vpack.c.bf16 %v4570_v55, %v4562_v15  ;;  %v8211_v30 = vld [vmem:[%s8681_s20 + $0x19b8] sm:$0xff] }
 0x45e   : > { %4915 = vmatmul.mubr.f32.vlgmr.msra.gmra.mrb[28].mxu1 %v11930_v61  ;;  %7333 = vmatpush1.bf16.msra.mxu0 %v7332_v56  ;;  %v4576_v50 = vand.u32 2147483647, %v8209_v40  ;;  %v8210_v0 = vld [vmem:[%s8681_s20 + $0x19e8] sm:$0xff]  ;;  %v4578_v36 = vand.u32 2147483647, %v8211_v30  ;;  %v8212_v63 = vld [vmem:[%s8681_s20 + $0x19f8] sm:$0xff] }
 0x45f   : > { %7397 = vmatpush1.bf16.msra.mxu1 %v7396_v7  ;;  %7335 = vmatprep.subr.bf16.mxu0 %v7334_v1  ;;  %v4584_v9 = vand.u32 2147483647, %v8210_v0  ;;  %v4586_v22 = vand.u32 2147483647, %v8212_v63  ;;  %v8213_v52 = vld [vmem:[%s8681_s20 + $0x19a0] sm:$0xff]  ;;  %v8215_v49 = vld [vmem:[%s8681_s20 + $0x19b0] sm:$0xff]  ;;  %v7340_v60 = vpack.c.bf16 %v4567_v5, %v4559_v26  ;;  %v7404_v33 = vpack.c.bf16 %v4569_v46, %v4561_v45 }
 0x460   : > { %7399 = vmatprep.subr.bf16.mxu1 %v7398_v21  ;;  %v4575_v48 = vand.u32 2147483647, %v8213_v52  ;;  %4985 = vmatprep.mubr.f32.mxu0 %v11782_v2  ;;  %v8214_v59 = vld [vmem:[%s8681_s20 + $0x19e0] sm:$0xff]  ;;  %v4577_v35 = vand.u32 2147483647, %v8215_v49  ;;  %v8216_v18 = vld [vmem:[%s8681_s20 + $0x19f0] sm:$0xff] }
 0x461   : > { %v4583_v25 = vand.u32 2147483647, %v8214_v59  ;;  %v4585_v34 = vand.u32 2147483647, %v8216_v18  ;;  %5056 = vmatprep.mubr.f32.mxu1 %v11782_v2  ;;  %v8217_v20 = vld [vmem:[%s8681_s20 + $0x1a28] sm:$0xff]  ;;  %v7342_v57 = vpack.c.bf16 %v4584_v9, %v4576_v50  ;;  %v8219_v56 = vld [vmem:[%s8681_s20 + $0x1a38] sm:$0xff]  ;;  %v7406_v2 = vpack.c.bf16 %v4586_v22, %v4578_v36 }
 0x462   : > { %7337 = vmatpush1.bf16.msra.mxu0 %v7336_v62  ;;  %v4592_v51 = vand.u32 2147483647, %v8217_v20  ;;  %v8218_v11 = vld [vmem:[%s8681_s20 + $0x1a68] sm:$0xff]  ;;  %v4594_v47 = vand.u32 2147483647, %v8219_v56  ;;  %v8220_v29 = vld [vmem:[%s8681_s20 + $0x1a78] sm:$0xff] }
 0x463   : > { %v4600_v31 = vand.u32 2147483647, %v8218_v11  ;;  %7401 = vmatpush1.bf16.msra.mxu1 %v7400_v41  ;;  %7339 = vmatprep.subr.bf16.mxu0 %v7338_v37  ;;  %v4602_v43 = vand.u32 2147483647, %v8220_v29  ;;  %v8221_v23 = vld [vmem:[%s8681_s20 + $0x1a20] sm:$0xff]  ;;  %v7344_v17 = vpack.c.bf16 %v4583_v25, %v4575_v48  ;;  %v7408_v58 = vpack.c.bf16 %v4585_v34, %v4577_v35  ;;  %v8223_v14 = vld [vmem:[%s8681_s20 + $0x1a30] sm:$0xff] }
 0x464   : > { %7403 = vmatprep.subr.bf16.mxu1 %v7402_v3  ;;  %v4591_v7 = vand.u32 2147483647, %v8221_v23  ;;  %v8222_v1 = vld [vmem:[%s8681_s20 + $0x1a60] sm:$0xff]  ;;  %v4593_v21 = vand.u32 2147483647, %v8223_v14  ;;  %v8224_v8 = vld [vmem:[%s8681_s20 + $0x1a70] sm:$0xff] }
 0x465   : > { %v4599_v28 = vand.u32 2147483647, %v8222_v1  ;;  %v4601_v15 = vand.u32 2147483647, %v8224_v8  ;;  %v7346_v38 = vpack.c.bf16 %v4600_v31, %v4592_v51  ;;  %v8225_v55 = vld [vmem:[%s8681_s20 + $0x1aa8] sm:$0xff]  ;;  %v8227_v26 = vld [vmem:[%s8681_s20 + $0x1ab8] sm:$0xff]  ;;  %v7410_v5 = vpack.c.bf16 %v4602_v43, %v4594_v47 }
 0x466   : > { %7341 = vmatpush1.bf16.msra.mxu0 %v7340_v60  ;;  %v4608_v62 = vand.u32 2147483647, %v8225_v55  ;;  %v8226_v41 = vld [vmem:[%s8681_s20 + $0x1ae8] sm:$0xff]  ;;  %v4610_v12 = vand.u32 2147483647, %v8227_v26  ;;  %v8228_v4 = vld [vmem:[%s8681_s20 + $0x1af8] sm:$0xff] }
 0x467   : > { %v4616_v54 = vand.u32 2147483647, %v8226_v41  ;;  %7405 = vmatpush1.bf16.msra.mxu1 %v7404_v33  ;;  %7343 = vmatprep.subr.bf16.mxu0 %v7342_v57  ;;  %v4618_v45 = vand.u32 2147483647, %v8228_v4  ;;  %v8229_v37 = vld [vmem:[%s8681_s20 + $0x1aa0] sm:$0xff]  ;;  %v7348_v50 = vpack.c.bf16 %v4599_v28, %v4591_v7  ;;  %v8231_v0 = vld [vmem:[%s8681_s20 + $0x1ab0] sm:$0xff]  ;;  %v7412_v22 = vpack.c.bf16 %v4601_v15, %v4593_v21 }
 0x468   : > { %v4607_v42 = vand.u32 2147483647, %v8229_v37  ;;  %v8230_v46 = vld [vmem:[%s8681_s20 + $0x1ae0] sm:$0xff]  ;;  %7407 = vmatprep.subr.bf16.mxu1 %v7406_v2  ;;  %v4609_v9 = vand.u32 2147483647, %v8231_v0  ;;  %v8232_v3 = vld [vmem:[%s8681_s20 + $0x1af0] sm:$0xff] }
 0x469   : > { %v4615_v40 = vand.u32 2147483647, %v8230_v46  ;;  %v4617_v30 = vand.u32 2147483647, %v8232_v3  ;;  %v8233_v36 = vld [vmem:[%s8681_s20 + $0x1b28] sm:$0xff]  ;;  %v8235_v59 = vld [vmem:[%s8681_s20 + $0x1b38] sm:$0xff]  ;;  %v7350_v18 = vpack.c.bf16 %v4616_v54, %v4608_v62  ;;  %v7414_v33 = vpack.c.bf16 %v4618_v45, %v4610_v12 }
 0x46a   : > { %v4624_v63 = vand.u32 2147483647, %v8233_v36  ;;  %v8234_v52 = vld [vmem:[%s8681_s20 + $0x1b68] sm:$0xff]  ;;  %v4626_v25 = vand.u32 2147483647, %v8235_v59  ;;  %v8236_v49 = vld [vmem:[%s8681_s20 + $0x1b78] sm:$0xff]  ;;  %7345 = vmatpush1.bf16.msra.mxu0 %v7344_v17 }
 0x46b   : > { %v4632_v48 = vand.u32 2147483647, %v8234_v52  ;;  %v4634_v35 = vand.u32 2147483647, %v8236_v49  ;;  %v8237_v34 = vld [vmem:[%s8681_s20 + $0x1b20] sm:$0xff]  ;;  %v8239_v11 = vld [vmem:[%s8681_s20 + $0x1b30] sm:$0xff]  ;;  %7409 = vmatpush1.bf16.msra.mxu1 %v7408_v58  ;;  %7347 = vmatprep.subr.bf16.mxu0 %v7346_v38  ;;  %v7352_v23 = vpack.c.bf16 %v4615_v40, %v4607_v42  ;;  %v7416_v21 = vpack.c.bf16 %v4617_v30, %v4609_v9 }
 0x46c   : > { %v4623_v60 = vand.u32 2147483647, %v8237_v34  ;;  %v8238_v20 = vld [vmem:[%s8681_s20 + $0x1b60] sm:$0xff]  ;;  %v4625_v31 = vand.u32 2147483647, %v8239_v11  ;;  %v8240_v57 = vld [vmem:[%s8681_s20 + $0x1b70] sm:$0xff]  ;;  %7411 = vmatprep.subr.bf16.mxu1 %v7410_v5 }
 0x46d   : > { %v4631_v51 = vand.u32 2147483647, %v8238_v20  ;;  %v4633_v56 = vand.u32 2147483647, %v8240_v57  ;;  %v8241_v47 = vld [vmem:[%s8681_s20 + $0x1ba8] sm:$0xff]  ;;  %v8243_v7 = vld [vmem:[%s8681_s20 + $0x1bb8] sm:$0xff]  ;;  %v7354_v54 = vpack.c.bf16 %v4632_v48, %v4624_v63  ;;  %v7418_v26 = vpack.c.bf16 %v4634_v35, %v4626_v25 }
 0x46e   : > { %v4640_v29 = vand.u32 2147483647, %v8241_v47  ;;  %v8242_v43 = vld [vmem:[%s8681_s20 + $0x1be8] sm:$0xff]  ;;  %v4642_v1 = vand.u32 2147483647, %v8243_v7  ;;  %v8244_v28 = vld [vmem:[%s8681_s20 + $0x1bf8] sm:$0xff]  ;;  %7349 = vmatpush1.bf16.msra.mxu0 %v7348_v50 }
 0x46f   : > { %v4648_v2 = vand.u32 2147483647, %v8242_v43  ;;  %v4650_v17 = vand.u32 2147483647, %v8244_v28  ;;  %v8245_v58 = vld [vmem:[%s8681_s20 + $0x1ba0] sm:$0xff]  ;;  %v8247_v38 = vld [vmem:[%s8681_s20 + $0x1bb0] sm:$0xff]  ;;  %7413 = vmatpush1.bf16.msra.mxu1 %v7412_v22  ;;  %7351 = vmatprep.subr.bf16.mxu0 %v7350_v18  ;;  %v7356_v37 = vpack.c.bf16 %v4631_v51, %v4623_v60  ;;  %v7420_v42 = vpack.c.bf16 %v4633_v56, %v4625_v31 }
 0x470   : > { %v4639_v14 = vand.u32 2147483647, %v8245_v58  ;;  %v8246_v8 = vld [vmem:[%s8681_s20 + $0x1be0] sm:$0xff]  ;;  %v4641_v55 = vand.u32 2147483647, %v8247_v38  ;;  %v8248_v62 = vld [vmem:[%s8681_s20 + $0x1bf0] sm:$0xff]  ;;  %7415 = vmatprep.subr.bf16.mxu1 %v7414_v33 }
 0x471   : > { %v4647_v15 = vand.u32 2147483647, %v8246_v8  ;;  %v4649_v41 = vand.u32 2147483647, %v8248_v62  ;;  %v8249_v12 = vld [vmem:[%s8681_s20 + $0x1c28] sm:$0xff]  ;;  %v8251_v46 = vld [vmem:[%s8681_s20 + $0x1c38] sm:$0xff]  ;;  %v7358_v50 = vpack.c.bf16 %v4648_v2, %v4640_v29  ;;  %v7422_v30 = vpack.c.bf16 %v4650_v17, %v4642_v1 }
 0x472   : > { %v4656_v5 = vand.u32 2147483647, %v8249_v12  ;;  %v8250_v4 = vld [vmem:[%s8681_s20 + $0x1c68] sm:$0xff]  ;;  %v4658_v40 = vand.u32 2147483647, %v8251_v46  ;;  %v8252_v0 = vld [vmem:[%s8681_s20 + $0x1c78] sm:$0xff]  ;;  %7353 = vmatpush1.bf16.msra.mxu0 %v7352_v23 }
 0x473   : > { %v4664_v45 = vand.u32 2147483647, %v8250_v4  ;;  %v4666_v9 = vand.u32 2147483647, %v8252_v0  ;;  %v3743_v3 = vpop.f32.mrb[22].mxu0  ;;  %v8253_v36 = vld [vmem:[%s8681_s20 + $0x1c20] sm:$0xff]  ;;  %v7360_v49 = vpack.c.bf16 %v4647_v15, %v4639_v14  ;;  %v7424_v35 = vpack.c.bf16 %v4649_v41, %v4641_v55  ;;  %7417 = vmatpush1.bf16.msra.mxu1 %v7416_v21  ;;  %7355 = vmatprep.subr.bf16.mxu0 %v7354_v54 }
 0x474   : > { %v4655_v63 = vand.u32 2147483647, %v8253_v36  ;;  %v8254_v52 = vld [vmem:[%s8681_s20 + $0x1c60] sm:$0xff]  ;;  %v3832_v59 = vrot.slane %v3743_v3, 1  ;;  %v3814_v25 = vpop.f32.mrb[22].mxu1  ;;  %v3745_v22 = vpop.f32.mrb[23].mxu0  ;;  %7419 = vmatprep.subr.bf16.mxu1 %v7418_v26 }
 0x475   : > { %v4663_v48 = vand.u32 2147483647, %v8254_v52  ;;  %v8255_v18 = vld [vmem:[%s8681_s20 + $0x1c30] sm:$0xff]  ;;  %v3834_v60 = vrot.slane %v3814_v25, 1  ;;  %v3833_v20 = vrot.slane %v3745_v22, 1  ;;  %v3816_v51 = vpop.f32.mrb[23].mxu1  ;;  %v7362_v11 = vpack.c.bf16 %v4664_v45, %v4656_v5 }
 0x476   : > { %v4657_v34 = vand.u32 2147483647, %v8255_v18  ;;  %v8256_v31 = vld [vmem:[%s8681_s20 + $0x1c70] sm:$0xff]  ;;  %v3848_v57 = vsub.f32 %v11671_v16, %v3832_v59  ;;  %v3917_v56 = vadd.f32 %v3832_v59, %v11671_v16  ;;  %v3835_v47 = vrot.slane %v3816_v51, 1  ;;  %v8257_v16 = vld [vmem:[%s8681_s20 + $0x1ca8] sm:$0xff]  ;;  %7357 = vmatpush1.bf16.msra.mxu0 %v7356_v37  ;;  %v8260_v38 = vld [vmem:[%s8681_s20 + $0x1cf8] sm:$0xff] }
 0x477   : > { %v4665_v33 = vand.u32 2147483647, %v8256_v31  ;;  %v7426_v29 = vpack.c.bf16 %v4666_v9, %v4658_v40  ;;  %v3850_v43 = vsub.f32 %v11676_v24, %v3834_v60  ;;  %v3919_v2 = vadd.f32 %v3834_v60, %v11676_v24  ;;  %v8258_v58 = vld [vmem:[%s8681_s20 + $0x1ce8] sm:$0xff]  ;;  %v8259_v24 = vld [vmem:[%s8681_s20 + $0x1cb8] sm:$0xff]  ;;  %7421 = vmatpush1.bf16.msra.mxu1 %v7420_v42  ;;  %7359 = vmatprep.subr.bf16.mxu0 %v7358_v50  ;;  %v8262_v54 = vld [vmem:[%s8681_s20 + $0x1ce0] sm:$0xff] }
 0x478   : > { %v3849_v23 = vsub.f32 %v11678_v32, %v3833_v20  ;;  %v3918_v7 = vadd.f32 %v3833_v20, %v11678_v32  ;;  %v3851_v1 = vsub.f32 %v11682_v44, %v3835_v47  ;;  %v3920_v28 = vadd.f32 %v3835_v47, %v11682_v44  ;;  %v8261_v44 = vld [vmem:[%s8681_s20 + $0x1ca0] sm:$0xff]  ;;  %7423 = vmatprep.subr.bf16.mxu1 %v7422_v30  ;;  %v8263_v4 = vld [vmem:[%s8681_s20 + $0x1cb0] sm:$0xff]  ;;  %v8265_v36 = vld [vmem:[%s8681_s20 + $0x1d28] sm:$0xff] }
 0x479   : > { %v4672_v17 = vand.u32 2147483647, %v8257_v16  ;;  %v4680_v14 = vand.u32 2147483647, %v8258_v58  ;;  %v4674_v15 = vand.u32 2147483647, %v8259_v24  ;;  %v7364_v0 = vpack.c.bf16 %v4663_v48, %v4655_v63 }
 0x47a   : > { %v3862_v21 = vcombine.low %v3848_v57, %v3849_v23  ;;  %v3931_v8 = vcombine.low %v3917_v56, %v3918_v7  ;;  %v4682_v32 = vand.u32 2147483647, %v8260_v38  ;;  %v3863_v55 = vcombine.low %v3850_v43, %v3851_v1  ;;  %v8264_v37 = vld [vmem:[%s8681_s20 + $0x1cf0] sm:$0xff]  ;;  %7361 = vmatpush1.bf16.msra.mxu0 %v7360_v49  ;;  %v8266_v59 = vld [vmem:[%s8681_s20 + $0x1d68] sm:$0xff]  ;;  %v8267_v48 = vld [vmem:[%s8681_s20 + $0x1d38] sm:$0xff] }
 0x47b   : > { %v3932_v62 = vcombine.low %v3919_v2, %v3920_v28  ;;  %v4671_v41 = vand.u32 2147483647, %v8261_v44  ;;  %v4679_v26 = vand.u32 2147483647, %v8262_v54  ;;  %v4673_v45 = vand.u32 2147483647, %v8263_v4  ;;  %7425 = vmatpush1.bf16.msra.mxu1 %v7424_v35  ;;  %7363 = vmatprep.subr.bf16.mxu0 %v7362_v11 }
 0x47c   : > { %v3884_v12 = vrot.slane %v3862_v21, %v10599_v39  ;;  %v3953_v5 = vrot.slane %v3931_v8, %v10599_v39  ;;  %v4681_v46 = vand.u32 2147483647, %v8264_v37  ;;  %v3891_v40 = vrot.slane %v3863_v55, %v10599_v39  ;;  %7427 = vmatprep.subr.bf16.mxu1 %v7426_v29  ;;  %v8269_v20 = vld [vmem:[%s8681_s20 + $0x1d20] sm:$0xff]  ;;  %v8271_v53 = vld [vmem:[%s8681_s20 + $0x1d30] sm:$0xff]  ;;  %v8273_v29 = vld [vmem:[%s8681_s20 + $0x1da8] sm:$0xff] }
 0x47d   : > { %v3960_v42 = vrot.slane %v3932_v62, %v10599_v39  ;;  %v7428_v9 = vpack.c.bf16 %v4665_v33, %v4657_v34  ;;  %v7366_v3 = vpack.c.bf16 %v4680_v14, %v4672_v17  ;;  %v7430_v50 = vpack.c.bf16 %v4682_v32, %v4674_v15  ;;  %v8268_v34 = vld [vmem:[%s8681_s20 + $0x1d78] sm:$0xff]  ;;  %v8270_v56 = vld [vmem:[%s8681_s20 + $0x1d60] sm:$0xff]  ;;  %v8272_v47 = vld [vmem:[%s8681_s20 + $0x1d70] sm:$0xff] }
 0x47e   : > { %v4688_v52 = vand.u32 2147483647, %v8265_v36  ;;  %v4696_v30 = vand.u32 2147483647, %v8266_v59  ;;  %v3893_v25 = vcombine.low %v3884_v12, %v3891_v40  ;;  %v7368_v18 = vpack.c.bf16 %v4679_v26, %v4671_v41  ;;  %7365 = vmatpush1.bf16.msra.mxu0 %v7364_v0  ;;  %v8274_v2 = vld [vmem:[%s8681_s20 + $0x1de8] sm:$0xff]  ;;  %v8275_v1 = vld [vmem:[%s8681_s20 + $0x1db8] sm:$0xff] }
 0x47f   : > { %v3962_v22 = vcombine.low %v3953_v5, %v3960_v42  ;;  %v7432_v63 = vpack.c.bf16 %v4681_v46, %v4673_v45  ;;  %v4690_v49 = vand.u32 2147483647, %v8267_v48  ;;  %v4698_v60 = vand.u32 2147483647, %v8268_v34  ;;  %7429 = vmatpush1.bf16.msra.mxu1 %v7428_v9  ;;  %7367 = vmatprep.subr.bf16.mxu0 %v7366_v3  ;;  %v8276_v16 = vld [vmem:[%s8681_s20 + $0x1df8] sm:$0xff]  ;;  %v8277_v58 = vld [vmem:[%s8681_s20 + $0x1da0] sm:$0xff] }
 0x480   : > { %v4687_v51 = vand.u32 2147483647, %v8269_v20  ;;  %v12017_v31 = vrot.slane %v3892_v19, %v10599_v39  ;;  %v12023_v35 = vrot.slane %v3961_v6, %v10599_v39  ;;  %v12026_v11 = vrot.slane %v3893_v25, %v10599_v39  ;;  %7431 = vmatprep.subr.bf16.mxu1 %v7430_v50  ;;  %v8278_v21 = vld [vmem:[%s8681_s20 + $0x1de0] sm:$0xff]  ;;  %v8279_v15 = vld [vmem:[%s8681_s20 + $0x1db0] sm:$0xff]  ;;  %v8281_v41 = vld [vmem:[%s8681_s20 + $0x1e28] sm:$0xff] }
 0x481   : > { %v12029_v33 = vrot.slane %v3962_v22, %v10599_v39  ;;  %v7370_v57 = vpack.c.bf16 %v4696_v30, %v4688_v52  ;;  %v4695_v10 = vand.u32 2147483647, %v8270_v56  ;;  %v4689_v19 = vand.u32 2147483647, %v8271_v53  ;;  %v8280_v32 = vld [vmem:[%s8681_s20 + $0x1df0] sm:$0xff]  ;;  %v8282_v26 = vld [vmem:[%s8681_s20 + $0x1e68] sm:$0xff] }
 0x482   : > { %v4697_v13 = vand.u32 2147483647, %v8272_v47  ;;  %v3908_v27 = vcombine.low %v12017_v31, %v12026_v11  ;;  %v4704_v43 = vand.u32 2147483647, %v8273_v29  ;;  %v4712_v23 = vand.u32 2147483647, %v8274_v2  ;;  %7369 = vmatpush1.bf16.msra.mxu0 %v7368_v18 }
 0x483   : > { %v3977_v6 = vcombine.low %v12023_v35, %v12029_v33  ;;  %v7434_v7 = vpack.c.bf16 %v4698_v60, %v4690_v49  ;;  %v4706_v28 = vand.u32 2147483647, %v8275_v1  ;;  %v4714_v17 = vand.u32 2147483647, %v8276_v16  ;;  %7433 = vmatpush1.bf16.msra.mxu1 %v7432_v63  ;;  %7371 = vmatprep.subr.bf16.mxu0 %v7370_v57  ;;  %v8283_v4 = vld [vmem:[%s8681_s20 + $0x1e38] sm:$0xff]  ;;  %v8285_v0 = vld [vmem:[%s8681_s20 + $0x1e20] sm:$0xff] }
 0x484   : > { %v4703_v14 = vand.u32 2147483647, %v8277_v58  ;;  %v4711_v8 = vand.u32 2147483647, %v8278_v21  ;;  %v7372_v24 = vpack.c.bf16 %v4695_v10, %v4687_v51  ;;  %v4705_v38 = vand.u32 2147483647, %v8279_v15 }
 0x485   : > { %v4713_v55 = vand.u32 2147483647, %v8280_v32  ;;  %v7436_v62 = vpack.c.bf16 %v4697_v13, %v4689_v19  ;;  %v7374_v44 = vpack.c.bf16 %v4712_v23, %v4704_v43  ;;  %v4720_v54 = vand.u32 2147483647, %v8281_v41  ;;  %7435 = vmatprep.subr.bf16.mxu1 %v7434_v7  ;;  %v8284_v37 = vld [vmem:[%s8681_s20 + $0x1e78] sm:$0xff]  ;;  %v8286_v3 = vld [vmem:[%s8681_s20 + $0x1e60] sm:$0xff] }
 0x486   : > { %v4728_v12 = vand.u32 2147483647, %v8282_v26  ;;  %v7438_v5 = vpack.c.bf16 %v4714_v17, %v4706_v28  ;;  %v4722_v45 = vand.u32 2147483647, %v8283_v4  ;;  %v4730_v46 = vand.u32 2147483647, %v8284_v37  ;;  %7373 = vmatpush1.bf16.msra.mxu0 %v7372_v24 }
 0x487   : > { %v7376_v40 = vpack.c.bf16 %v4711_v8, %v4703_v14  ;;  %v7440_v42 = vpack.c.bf16 %v4713_v55, %v4705_v38  ;;  %v4719_v9 = vand.u32 2147483647, %v8285_v0  ;;  %v4727_v50 = vand.u32 2147483647, %v8286_v3  ;;  %v8287_v36 = vld [vmem:[%s8681_s20 + $0x1e30] sm:$0xff]  ;;  %7437 = vmatpush1.bf16.msra.mxu1 %v7436_v62  ;;  %7375 = vmatprep.subr.bf16.mxu0 %v7374_v44  ;;  %v8289_v22 = vld [vmem:[%s8681_s20 + $0x1ea8] sm:$0xff] }
 0x488   : > { %v4721_v52 = vand.u32 2147483647, %v8287_v36  ;;  %v7378_v59 = vpack.c.bf16 %v4728_v12, %v4720_v54  ;;  %v8288_v30 = vld [vmem:[%s8681_s20 + $0x1e70] sm:$0xff]  ;;  %v4736_v18 = vand.u32 2147483647, %v8289_v22  ;;  %v8290_v63 = vld [vmem:[%s8681_s20 + $0x1ee8] sm:$0xff]  ;;  %7439 = vmatprep.subr.bf16.mxu1 %v7438_v5  ;;  %v7442_v49 = vpack.c.bf16 %v4730_v46, %v4722_v45 }
 0x489   : > { %v4729_v25 = vand.u32 2147483647, %v8288_v30  ;;  %v4744_v48 = vand.u32 2147483647, %v8290_v63  ;;  %v8291_v34 = vld [vmem:[%s8681_s20 + $0x1eb8] sm:$0xff]  ;;  %v8293_v57 = vld [vmem:[%s8681_s20 + $0x1ea0] sm:$0xff]  ;;  %v7380_v19 = vpack.c.bf16 %v4727_v50, %v4719_v9 }
 0x48a   : > { %v4738_v60 = vand.u32 2147483647, %v8291_v34  ;;  %v8292_v20 = vld [vmem:[%s8681_s20 + $0x1ef8] sm:$0xff]  ;;  %v4735_v56 = vand.u32 2147483647, %v8293_v57  ;;  %v8294_v10 = vld [vmem:[%s8681_s20 + $0x1ee0] sm:$0xff]  ;;  %7377 = vmatpush1.bf16.msra.mxu0 %v7376_v40 }
 0x48b   : > { %v4746_v51 = vand.u32 2147483647, %v8292_v20  ;;  %v4743_v53 = vand.u32 2147483647, %v8294_v10  ;;  %v8295_v47 = vld [vmem:[%s8681_s20 + $0x1eb0] sm:$0xff]  ;;  %7441 = vmatpush1.bf16.msra.mxu1 %v7440_v42  ;;  %7379 = vmatprep.subr.bf16.mxu0 %v7378_v59  ;;  %v7444_v2 = vpack.c.bf16 %v4729_v25, %v4721_v52  ;;  %v7382_v23 = vpack.c.bf16 %v4744_v48, %v4736_v18  ;;  %v8297_v7 = vld [vmem:[%s8681_s20 + $0x1f28] sm:$0xff] }
 0x48c   : > { %v4737_v13 = vand.u32 2147483647, %v8295_v47  ;;  %v8296_v29 = vld [vmem:[%s8681_s20 + $0x1ef0] sm:$0xff]  ;;  %v4752_v1 = vand.u32 2147483647, %v8297_v7  ;;  %v8298_v28 = vld [vmem:[%s8681_s20 + $0x1f68] sm:$0xff]  ;;  %7443 = vmatprep.subr.bf16.mxu1 %v7442_v49 }
 0x48d   : > { %v4745_v43 = vand.u32 2147483647, %v8296_v29  ;;  %v4760_v16 = vand.u32 2147483647, %v8298_v28  ;;  %v7446_v17 = vpack.c.bf16 %v4746_v51, %v4738_v60  ;;  %v8299_v58 = vld [vmem:[%s8681_s20 + $0x1f38] sm:$0xff]  ;;  %v7384_v24 = vpack.c.bf16 %v4743_v53, %v4735_v56  ;;  %v8301_v38 = vld [vmem:[%s8681_s20 + $0x1f20] sm:$0xff] }
 0x48e   : > { %v4754_v14 = vand.u32 2147483647, %v8299_v58  ;;  %v8300_v21 = vld [vmem:[%s8681_s20 + $0x1f78] sm:$0xff]  ;;  %7381 = vmatpush1.bf16.msra.mxu0 %v7380_v19  ;;  %v4751_v32 = vand.u32 2147483647, %v8301_v38  ;;  %v8302_v55 = vld [vmem:[%s8681_s20 + $0x1f60] sm:$0xff] }
 0x48f   : > { %v4762_v8 = vand.u32 2147483647, %v8300_v21  ;;  %v7448_v15 = vpack.c.bf16 %v4745_v43, %v4737_v13  ;;  %v4759_v62 = vand.u32 2147483647, %v8302_v55  ;;  %v8303_v44 = vld [vmem:[%s8681_s20 + $0x1f30] sm:$0xff]  ;;  %7445 = vmatpush1.bf16.msra.mxu1 %v7444_v2  ;;  %7383 = vmatprep.subr.bf16.mxu0 %v7382_v23  ;;  %v7386_v54 = vpack.c.bf16 %v4760_v16, %v4752_v1  ;;  %v8305_v5 = vld [vmem:[%s8681_s20 + $0x1fa8] sm:$0xff] }
 0x490   : > { %v4753_v41 = vand.u32 2147483647, %v8303_v44  ;;  %v8304_v26 = vld [vmem:[%s8681_s20 + $0x1f70] sm:$0xff]  ;;  %v4768_v4 = vand.u32 2147483647, %v8305_v5  ;;  %v8306_v45 = vld [vmem:[%s8681_s20 + $0x1fe8] sm:$0xff]  ;;  %7447 = vmatprep.subr.bf16.mxu1 %v7446_v17 }
 0x491   : > { %v4761_v12 = vand.u32 2147483647, %v8304_v26  ;;  %v4776_v37 = vand.u32 2147483647, %v8306_v45  ;;  %v7450_v46 = vpack.c.bf16 %v4762_v8, %v4754_v14  ;;  %v8307_v40 = vld [vmem:[%s8681_s20 + $0x1fb8] sm:$0xff]  ;;  %v7388_v3 = vpack.c.bf16 %v4759_v62, %v4751_v32  ;;  %v8309_v50 = vld [vmem:[%s8681_s20 + $0x1fa0] sm:$0xff] }
 0x492   : > { %v4770_v42 = vand.u32 2147483647, %v8307_v40  ;;  %v8308_v0 = vld [vmem:[%s8681_s20 + $0x1ff8] sm:$0xff]  ;;  %7385 = vmatpush1.bf16.msra.mxu0 %v7384_v24  ;;  %v4767_v36 = vand.u32 2147483647, %v8309_v50  ;;  %v8310_v52 = vld [vmem:[%s8681_s20 + $0x1fe0] sm:$0xff] }
 0x493   : > { %v4778_v9 = vand.u32 2147483647, %v8308_v0  ;;  %v4775_v59 = vand.u32 2147483647, %v8310_v52  ;;  %7449 = vmatpush1.bf16.msra.mxu1 %v7448_v15  ;;  %7387 = vmatprep.subr.bf16.mxu0 %v7386_v54  ;;  %v7452_v30 = vpack.c.bf16 %v4761_v12, %v4753_v41  ;;  %v7390_v25 = vpack.c.bf16 %v4776_v37, %v4768_v4  ;;  %v8311_v22 = vld [vmem:[%s8681_s20 + $0x1fb0] sm:$0xff] }
 0x494   : > { %v4769_v18 = vand.u32 2147483647, %v8311_v22  ;;  %v8312_v63 = vld [vmem:[%s8681_s20 + $0x1ff0] sm:$0xff]  ;;  %7451 = vmatprep.subr.bf16.mxu1 %v7450_v46  ;;  %s8377_s20 = scalar_lea.vmem %s8376_s30, 256 }
 0x495   : > { %v4777_v48 = vand.u32 2147483647, %v8312_v63  ;;  %v7454_v49 = vpack.c.bf16 %v4778_v9, %v4770_v42  ;;  %v7392_v34 = vpack.c.bf16 %v4775_v59, %v4767_v36  ;;  %p8379_p9 = scmp.lt.s32.totalorder %s8377_s20, %s8371_s9 }
 0x496   : > { %7389 = vmatpush1.bf16.msra.mxu0 %v7388_v3 }
 0x497   : > { %7453 = vmatpush1.bf16.msra.mxu1 %v7452_v30  ;;  %7391 = vmatprep.subr.bf16.mxu0 %v7390_v25  ;;  %v7456_v60 = vpack.c.bf16 %v4777_v48, %v4769_v18  ;;  %p8380_p3 = por %p8379_p9, %p8378_p0 }
 0x498   : > { %7455 = vmatprep.subr.bf16.mxu1 %v7454_v49 }
 0x499   : > { %p8381_p7 = pnand %p8380_p3, %p8374_p1 }
 0x49a   : > { %7393 = vmatpush1.bf16.msra.mxu0 %v7392_v34 }
 0x49b   : > { %7457 = vmatpush1.bf16.msra.mxu1 %v7456_v60 }
 0x49d   : > { %4986 = vmatmul.mubr.f32.vlgmr.msra.gmra.mrb[30].mxu0 %v11930_v61 }
 0x49e   : > { %5057 = vmatmul.mubr.f32.vlgmr.msra.gmra.mrb[30].mxu1 %v11930_v61 }
 0x4b0   : > { %v4305_v20 = vpop.f32.mrb[24].mxu0 }
 0x4b1   : > { %v4376_v51 = vpop.f32.mrb[24].mxu1  ;;  %v4307_v57 = vpop.f32.mrb[25].mxu0 }
 0x4b2   : > { %v4378_v56 = vpop.f32.mrb[25].mxu1 }
 0x4f0   : > { %v4447_v10 = vpop.f32.mrb[26].mxu0 }
 0x4f1   : > { %v4518_v53 = vpop.f32.mrb[26].mxu1  ;;  %v4449_v19 = vpop.f32.mrb[27].mxu0 }
 0x4f2   : > { %v4520_v47 = vpop.f32.mrb[27].mxu1 }
 0x530   : > { %v4845_v13 = vpop.f32.mrb[28].mxu0 }
 0x531   : > { %v5072_v29 = vrot.slane %v4845_v13, 1  ;;  %v4916_v43 = vpop.f32.mrb[28].mxu1  ;;  %v4847_v2 = vpop.f32.mrb[29].mxu0  ;;  %v3912_v13 = vld [vmem:[%s10819_s26] sm:$0xff] }
 0x532   : > { %v5074_v23 = vrot.slane %v4916_v43, 1  ;;  %v5073_v7 = vrot.slane %v4847_v2, 1  ;;  %v4918_v1 = vpop.f32.mrb[29].mxu1  ;;  %v3979_v43 = vadd.f32 %v3977_v6, %v3912_v13 }
 0x533   : > { %v5088_v28 = vsub.f32 %v4305_v20, %v5072_v29  ;;  %v5157_v16 = vadd.f32 %v5072_v29, %v4305_v20  ;;  %v5075_v17 = vrot.slane %v4918_v1, 1 }
 0x534   : > { %v5090_v58 = vsub.f32 %v4376_v51, %v5074_v23  ;;  %v5159_v61 = vadd.f32 %v5074_v23, %v4376_v51  ;;  %v5089_v14 = vsub.f32 %v4307_v57, %v5073_v7  ;;  %v5158_v21 = vadd.f32 %v5073_v7, %v4307_v57 }
 0x535   : > { %v5091_v8 = vsub.f32 %v4378_v56, %v5075_v17  ;;  %v5160_v24 = vadd.f32 %v5075_v17, %v4378_v56 }
 0x536   : > { %v5104_v15 = vcombine.low %v5088_v28, %v5089_v14  ;;  %v5173_v38 = vcombine.low %v5157_v16, %v5158_v21 }
 0x537   : > { %v5105_v32 = vcombine.low %v5090_v58, %v5091_v8  ;;  %v5174_v55 = vcombine.low %v5159_v61, %v5160_v24 }
 0x538   : > { %v5114_v62 = vrot.slane %v5104_v15, %v10599_v39  ;;  %v5183_v44 = vrot.slane %v5173_v38, %v10599_v39 }
 0x539   : > { %v5121_v41 = vrot.slane %v5105_v32, %v10599_v39  ;;  %v5190_v54 = vrot.slane %v5174_v55, %v10599_v39 }
 0x53b   : > { %v5136_v26 = vcombine.low %v5114_v62, %v5121_v41  ;;  %v5205_v12 = vcombine.low %v5183_v44, %v5190_v54 }
 0x53d   : > { %v5144_v56 = vrot.slane %v5136_v26, %v10599_v39 }
 0x570   : > { %v4987_v5 = vpop.f32.mrb[30].mxu0 }
 0x571   : > { %v5076_v4 = vrot.slane %v4987_v5, 1  ;;  %v5058_v45 = vpop.f32.mrb[30].mxu1  ;;  %v4989_v37 = vpop.f32.mrb[31].mxu0 }
 0x572   : > { %v5078_v46 = vrot.slane %v5058_v45, 1  ;;  %v5077_v40 = vrot.slane %v4989_v37, 1  ;;  %v5060_v42 = vpop.f32.mrb[31].mxu1 }
 0x573   : > { %v5092_v0 = vsub.f32 %v4447_v10, %v5076_v4  ;;  %v5161_v9 = vadd.f32 %v5076_v4, %v4447_v10  ;;  %v5079_v3 = vrot.slane %v5060_v42, 1  ;;  %v5213_v10 = vrot.slane %v5205_v12, %v10599_v39 }
 0x574   : > { %v5094_v50 = vsub.f32 %v4518_v53, %v5078_v46  ;;  %v5163_v36 = vadd.f32 %v5078_v46, %v4518_v53  ;;  %v5093_v52 = vsub.f32 %v4449_v19, %v5077_v40  ;;  %v5162_v59 = vadd.f32 %v5077_v40, %v4449_v19 }
 0x575   : > { %v5095_v30 = vsub.f32 %v4520_v47, %v5079_v3  ;;  %v5164_v25 = vadd.f32 %v5079_v3, %v4520_v47  ;;  %v3819_v47 = vld [vmem:[%s10814_s23] sm:$0xff] }
 0x576   : > { %v5106_v22 = vcombine.low %v5092_v0, %v5093_v52  ;;  %v5175_v18 = vcombine.low %v5161_v9, %v5162_v59  ;;  %v3910_v29 = vadd.f32 %v3908_v27, %v3819_v47 }
 0x577   : > { %v5107_v63 = vcombine.low %v5094_v50, %v5095_v30  ;;  %v5176_v48 = vcombine.low %v5163_v36, %v5164_v25 }
 0x578   : > { %v5128_v49 = vrot.slane %v5106_v22, %v10599_v39  ;;  %v5197_v34 = vrot.slane %v5175_v18, %v10599_v39 }
 0x579   : > { %v5135_v60 = vrot.slane %v5107_v63, %v10599_v39  ;;  %v5204_v20 = vrot.slane %v5176_v48, %v10599_v39 }
 0x57b   : > { %v5137_v51 = vcombine.low %v5128_v49, %v5135_v60  ;;  %v5206_v57 = vcombine.low %v5197_v34, %v5204_v20 }
 0x57d   : > { %v5151_v53 = vrot.slane %v5137_v51, %v10599_v39  ;;  %v5220_v19 = vrot.slane %v5206_v57, %v10599_v39 }
 0x57f   : > { %v5152_v2 = vcombine.low %v5144_v56, %v5151_v53  ;;  %v5221_v23 = vcombine.low %v5213_v10, %v5220_v19 }
 0x581   : > { %v5154_v39 = vadd.f32 %v5152_v2, %v3910_v29  ;;  %v5223_v31 = vadd.f32 %v5221_v23, %v3979_v43 }
 0x583   : > { %5155 = vst [vmem:[%s10814_s23] sm:$0xff] %v5154_v39  ;;  %5224 = vst [vmem:[%s10819_s26] sm:$0xff] %v5223_v31 }
 0x584   : > { %8384 = shalt.err (!%p8381_p7)
}
 0x585   : > { %s8385_s21 = scalar_lea.hbm %s12106_s15, 128  ;;  %s8389_s29 = scalar_lea.hbm %s12188_s2, 256 }
 0x586   : > { %p8386_p13 = scmp.ne.s32.totalorder %s12106_s15, %s8385_s21  ;;  %p8390_p12 = scmp.lt.u32.totalorder %s12106_s15, %s12188_s2 }
 0x587   : > { %p8391_p4 = scmp.lt.u32.totalorder %s8389_s29, %s8385_s21  ;;  %p8393_p5 = scmp.lt.u32.totalorder %s8385_s21, %s12106_s15 }
 0x588   : > { %p8387_p2 = pnand %p8386_p13, %p12853_p10 }
 0x589   : > { %p8392_p8 = por %p8391_p4, %p8390_p12 }
 0x58a   : > { %p8388_p6 = pneg %p8387_p2 }
 0x58b   : > { %p8394_p11 = por %p8393_p5, %p8392_p8 }
 0x58d   : > { %p8395_p1 = pnand %p8394_p11, %p8388_p6 }
 0x58f   : > { %8398 = shalt.err (!%p8395_p1)
}
 0x590   : > { %7464 = dma.vmem_to_hbm [thread:$0]  (%p12853_p10), %s12108_s18, 128, %s12106_s15, %s5226_s7  }
 0x591   : > { %s5231_s11 = scalar_lea.sflag [#allocation9], %s8677_s8  ;;  %s8399_s19 = scalar_lea.vmem %s12115_s22, 128 }
 0x592   : > { %p8400_p0 = scmp.ne.s32.totalorder %s12115_s22, %s8399_s19  ;;  %s8498_s9 = smov [#allocation8]  }
 0x593   : > { %s8403_s10 = sshll.u32 %s8498_s9, 4  ;;  %s8404_s10 = int_to_ptr.vmem [resolvable:$false] %s8403_s10 }
 0x594   : > { %p8401_p9 = pnand %p8400_p0, %p12853_p10  ;;  %s8405_s30 = scalar_lea.vmem %s8404_s10, 256 }
 0x595   : > { %p8406_p7 = scmp.lt.s32.totalorder %s12115_s22, %s8404_s10  ;;  %p8407_p13 = scmp.lt.s32.totalorder %s8405_s30, %s8399_s19 }
 0x596   : > { %p8402_p3 = pneg %p8401_p9 }
 0x597   : > { %p8408_p2 = por %p8407_p13, %p8406_p7 }
 0x599   : > { %p8409_p6 = pnand %p8408_p2, %p8402_p3 }
 0x59b   : > { %8412 = shalt.err (!%p8409_p6)
}
 0x59c   : > { %s8413_s8 = scalar_lea.hbm %s12113_s27, 128  ;;  %s8417_s7 = scalar_lea.hbm %s12189_s3, 256 }
 0x59d   : > { %p8414_p12 = scmp.ne.s32.totalorder %s12113_s27, %s8413_s8  ;;  %p8418_p5 = scmp.lt.u32.totalorder %s12113_s27, %s12189_s3 }
 0x59e   : > { %p8419_p11 = scmp.lt.u32.totalorder %s8417_s7, %s8413_s8  ;;  %p8421_p0 = scmp.lt.u32.totalorder %s8413_s8, %s12113_s27 }
 0x59f   : > { %p8415_p4 = pnand %p8414_p12, %p12853_p10 }
 0x5a0   : > { %p8420_p1 = por %p8419_p11, %p8418_p5 }
 0x5a1   : > { %p8416_p8 = pneg %p8415_p4 }
 0x5a2   : > { %p8422_p9 = por %p8421_p0, %p8420_p1 }
 0x5a4   : > { %p8423_p3 = pnand %p8422_p9, %p8416_p8 }
 0x5a6   : > { %8426 = shalt.err (!%p8423_p3)
}
 0x5a7   : > { %7465 = dma.vmem_to_hbm [thread:$0]  (%p12853_p10), %s12115_s22, 128, %s12113_s27, %s5231_s11  }
 0x5a8 PF: > { %s5271_s23 = sand.u32 1, %s8469_s12   ;;  %p12854_p7 = scmp.ne.s32.totalorder %s12359_s25, 0 }
 0x5a9   : > { %p12855_p13 = scmp.ge.s32.totalorder %s8489_s17, 2  ;;  %s5272_s26 = scalar_lea.sflag [#allocation4], %s5271_s23 }
 0x5ab   : > { %p7477_p2 = pnand %p12855_p13, %p12854_p7 }
 0x5ad   : > { %8460 = dma.done.wait (!%p7477_p2), %s5272_s26, 128  }
 0x5ae   : > { %8462 = vsyncadd (!%p7477_p2), %s5272_s26, 4294967168  ;;  %s5281_s29 = scalar_lea.sflag [#allocation9], %s5271_s23 }
 0x5af   : > { %8464 = dma.done.wait (!%p7477_p2), %s5281_s29, 128  }
 0x5b0   : > { %8466 = vsyncadd (!%p7477_p2), %s5281_s29, 4294967168  ;;  %s24_s17 = sadd.s32 1, %s8489_s17   ;;  %s12856_s12 = smov %s8473_s13 }
 0x5b1   : > { %p21_p6 = scmp.ge.s32.totalorder %s24_s17, 4   ;;  %s12857_s13 = smov %s8477_s14 }
 0x5b2   : > { %s12858_s14 = smov %s8638_s28  ;;  %s12859_s15 = smov %s8485_s16 }
 0x5b3   : > { %s12860_s16 = smov %s12862_s4  ;;  %23 = sbr.rel (!%p21_p6) target bundleno = 9 (0x9), region = 100 }
 0x5ba   :  { %5286 = vsyncpa [#allocation3], 1 }
 0x5bb   :  { %5288 = vsyncpa [#allocation3 + $0x1], 1 }
 0x5bc   :  { %5289 = vsyncpa [#allocation6], 1 }
 0x5bd   :  { %5291 = vsyncpa [#allocation6 + $0x1], 1 }
 0x5be   :  { %5292 = vsyncpa [#allocation4], 1 }
 0x5bf   :  { %5294 = vsyncpa [#allocation4 + $0x1], 1 }
 0x5c0   :  { %5295 = vsyncpa [#allocation9], 1 }
 0x5c1   :  { %5297 = vsyncpa [#allocation9 + $0x1], 1 }

</bundles_post_ra>
